<compile_context>
chip_gen: v7x
topology: tpu7x:2x2x1
jax: 0.10.0
libtpu: 0.0.40
codegen_flags: <defaults>
</compile_context>

<pallas_src>
import math
import functools

import jax
import jax.numpy as jnp
from jax.experimental import pallas as pl
from jax.experimental.pallas import tpu as pltpu

_EPS_LN = 1e-5


# ---------------------------------------------------------------------------
# small in-kernel helpers
# ---------------------------------------------------------------------------
def _mm(x, w):
    """bf16 x bf16 MXU matmul with f32 accumulation (astype is a no-op for bf16 inputs)."""
    return jnp.dot(x.astype(jnp.bfloat16), w.astype(jnp.bfloat16),
                   preferred_element_type=jnp.float32)


def _ln(x, g, b, eps=_EPS_LN):
    """LayerNorm over the last dim, f32 math."""
    x = x.astype(jnp.float32)
    mu = jnp.mean(x, axis=-1, keepdims=True)
    var = jnp.mean((x - mu) ** 2, axis=-1, keepdims=True)
    return (x - mu) * jax.lax.rsqrt(var + eps) * g + b


def _full_spec(a):
    """Whole-array block (block dims equal the array dims)."""
    nd = a.ndim
    return pl.BlockSpec(a.shape, lambda *_: (0,) * nd)


def _branch_weight_spec(w):
    """Branch-stacked weight: leading dim indexed by the branch grid axis, rest whole."""
    nd = w.ndim
    return pl.BlockSpec((None,) + tuple(w.shape[1:]),
                        lambda b, r: (r,) + (0,) * (nd - 1))


def _decoder_compiler_params(Lq, D, S, dff, weights):
    """Raise the scoped VMEM limit only when the per-step working set needs it."""
    sem = ("parallel", "parallel")
    w_bytes = sum(int(w.size) // int(w.shape[0]) * w.dtype.itemsize for w in weights)
    # double-buffered streamed blocks (bf16) + rough f32 in-kernel temporaries
    est = 2 * (S * D * 2 + 4 * Lq * D * 2 + w_bytes)
    est += 4 * (S * 2 * D + 2 * Lq * S + Lq * dff + 6 * Lq * D)
    if est <= 28 * 2 ** 20:
        return pltpu.CompilerParams(dimension_semantics=sem)
    cap = 100 * 2 ** 20
    try:
        cap = min(cap, int(pltpu.get_tpu_info().vmem_capacity_bytes) * 7 // 8)
    except Exception:  # pragma: no cover - info query is best-effort
        pass
    return pltpu.CompilerParams(dimension_semantics=sem,
                                vmem_limit_bytes=int(min(est * 2, cap)))


# ---------------------------------------------------------------------------
# fused decoder-layer kernel (self-attn + cross-attn + FFN + all LayerNorms)
# grid = (batch, branch); weights are stacked along a leading branch dim.
# ---------------------------------------------------------------------------
def _decoder_layer_kernel(*refs, nhead, has_mem_bias, has_tgt_mask):
    it = iter(refs)
    tgt_ref = next(it)                                   # (Lq, D)  bf16
    pos_ref = next(it)                                   # (Lq, D)  bf16
    mem_ref = next(it)                                   # (S,  D)  bf16
    membias_ref = next(it) if has_mem_bias else None     # (1, S)   f32
    tmask_ref = next(it) if has_tgt_mask else None       # (Lq, Lq) f32
    (sa_wqk, sa_bqk, sa_wv, sa_bv, sa_wo, sa_bo, n1g, n1b,
     ca_wq, ca_bq, ca_wkv, ca_bkv, ca_wo, ca_bo, n2g, n2b,
     fw1, fb1, fw2, fb2, n3g, n3b, fng, fnb,
     o_ref, onorm_ref) = tuple(it)

    x_bf = tgt_ref[...]
    pos_f = pos_ref[...].astype(jnp.float32)
    mem_bf = mem_ref[...]
    x = x_bf.astype(jnp.float32)

    D = x.shape[-1]
    Dh = D // nhead
    scale = 1.0 / math.sqrt(Dh)

    sa_bias = tmask_ref[...] if has_tgt_mask else None      # broadcasts over heads
    ca_bias = membias_ref[...] if has_mem_bias else None    # (1, S) broadcasts over (H, Lq, S)

    def heads(t_bf):
        # (L, D) bf16 -> (nhead, L, Dh) bf16  (single reshape + major-dim transpose)
        L = t_bf.shape[0]
        return jnp.swapaxes(t_bf.reshape(L, nhead, Dh), 0, 1)

    def attend(q_bf, k_bf, v_bf, wo, bo, bias):
        # all heads batched: scores (H, Lq, Lk), PV (H, Lq, Dh)
        qh, kh, vh = heads(q_bf), heads(k_bf), heads(v_bf)
        s = jax.lax.dot_general(qh, kh, (((2,), (2,)), ((0,), (0,))),
                                preferred_element_type=jnp.float32) * scale
        if bias is not None:
            s = s + bias
        s = s - jnp.max(s, axis=-1, keepdims=True)
        p = jnp.exp(s)
        p = p * pl.reciprocal(jnp.sum(p, axis=-1, keepdims=True), approx=True)
        o = jax.lax.dot_general(p.astype(jnp.bfloat16), vh, (((2,), (1,)), ((0,), (0,))),
                                preferred_element_type=jnp.float32)          # (H, Lq, Dh)
        o = jnp.swapaxes(o, 0, 1).reshape(q_bf.shape[0], D)                  # (Lq, D) f32
        return _mm(o, wo[...]) + bo[...]

    # ---- self attention : q = k = tgt + pos, v = tgt (fused Q/K projection) ----
    q_in = (x + pos_f).astype(jnp.bfloat16)
    qk = (_mm(q_in, sa_wqk[...]) + sa_bqk[...]).astype(jnp.bfloat16)          # (Lq, 2D)
    v = (_mm(x_bf, sa_wv[...]) + sa_bv[...]).astype(jnp.bfloat16)             # (Lq, D)
    sa = attend(qk[:, :D], qk[:, D:], v, sa_wo, sa_bo, sa_bias)
    x = _ln(x + sa, n1g[...], n1b[...])

    # ---- cross attention over memory (fused K/V projection) ----
    # TODO(synk): upstream uses MSDeformAttn; dense attention over flattened memory instead.
    q = (_mm((x + pos_f).astype(jnp.bfloat16), ca_wq[...]) + ca_bq[...]).astype(jnp.bfloat16)
    kv = (_mm(mem_bf, ca_wkv[...]) + ca_bkv[...]).astype(jnp.bfloat16)        # (S, 2D)
    ca = attend(q, kv[:, :D], kv[:, D:], ca_wo, ca_bo, ca_bias)
    x = _ln(x + ca, n2g[...], n2b[...])

    # ---- FFN ----
    h = jnp.maximum(_mm(x, fw1[...]) + fb1[...], 0.0)
    ffn = _mm(h, fw2[...]) + fb2[...]
    x = _ln(x + ffn, n3g[...], n3b[...])

    o_ref[...] = x.astype(o_ref.dtype)
    # decoder-level output norm (TransformerDecoder.norm / sub_norm / hoi_norm) fused here
    onorm_ref[...] = _ln(x, fng[...], fnb[...]).astype(onorm_ref.dtype)


def decoder_layer_forward(lp, final_norm, tgt, query_pos, memory, mem_bias, tgt_bias, nhead):
    """Fused decoder layer(s).

    tgt / query_pos: (R, B, Lq, D) bf16, R = number of fused branches (weights stacked along
    the leading dim).  memory: (B, S, D) bf16.  Returns (new_tgt, normed_new_tgt), both
    (R, B, Lq, D) bf16.
    """
    R, B, Lq, D = tgt.shape
    S = memory.shape[1]

    inputs = [tgt, query_pos, memory]
    in_specs = [
        pl.BlockSpec((None, None, Lq, D), lambda b, r: (r, b, 0, 0)),
        pl.BlockSpec((None, None, Lq, D), lambda b, r: (r, b, 0, 0)),
        # memory block index depends only on b -> stays resident across the branch axis
        pl.BlockSpec((None, S, D), lambda b, r: (b, 0, 0)),
    ]
    has_mem_bias = mem_bias is not None
    has_tgt_mask = tgt_bias is not None
    if has_mem_bias:
        inputs.append(mem_bias.reshape(B, 1, S))
        in_specs.append(pl.BlockSpec((None, 1, S), lambda b, r: (b, 0, 0)))
    if has_tgt_mask:
        inputs.append(tgt_bias)
        in_specs.append(pl.BlockSpec((Lq, Lq), lambda b, r: (0, 0)))

    weights = [
        lp["sa_wqk"], lp["sa_bqk"], lp["sa_wv"], lp["sa_bv"], lp["sa_wo"], lp["sa_bo"],
        lp["n1_g"], lp["n1_b"],
        lp["ca_wq"], lp["ca_bq"], lp["ca_wkv"], lp["ca_bkv"], lp["ca_wo"], lp["ca_bo"],
        lp["n2_g"], lp["n2_b"],
        lp["ffn_w1"], lp["ffn_b1"], lp["ffn_w2"], lp["ffn_b2"],
        lp["n3_g"], lp["n3_b"],
        final_norm["g"], final_norm["b"],
    ]
    inputs += weights
    in_specs += [_branch_weight_spec(w) for w in weights]

    dff = lp["ffn_w1"].shape[-1]
    out, out_normed = pl.pallas_call(
        functools.partial(_decoder_layer_kernel, nhead=nhead,
                          has_mem_bias=has_mem_bias, has_tgt_mask=has_tgt_mask),
        out_shape=(jax.ShapeDtypeStruct((R, B, Lq, D), jnp.bfloat16),
                   jax.ShapeDtypeStruct((R, B, Lq, D), jnp.bfloat16)),
        grid=(B, R),  # branch innermost so the (S, D) memory block is DMA'd once per batch
        in_specs=in_specs,
        out_specs=(pl.BlockSpec((None, None, Lq, D), lambda b, r: (r, b, 0, 0)),
                   pl.BlockSpec((None, None, Lq, D), lambda b, r: (r, b, 0, 0))),
        compiler_params=_decoder_compiler_params(Lq, D, S, dff, weights),
    )(*inputs)
    return out, out_normed


# ---------------------------------------------------------------------------
# fused "position fusion" kernel: ref_point_head MLP + sub_ref_point_head MLP +
# Fuser.pair_fusion in one pallas_call over the shared (B*Lq, D) rows.
# ---------------------------------------------------------------------------
def _pos_fusion_kernel(sine_ref, cont_ref,
                       rw0, rb0, rw1, rb1,           # ref_point_head (query_pos for branch 0)
                       srw0, srb0, srw1, srb1,       # sub_ref_point_head
                       ws1, bs1, wo1, bo1, cng, cnb,
                       ws2, bs2, wo2, bo2, sng, snb, ong, onb,
                       pos_ref):
    sine = sine_ref[0]            # (M, E) bf16
    ssine = sine_ref[1]
    out = cont_ref[0]             # (M, D) bf16  -> Fuser "sub_content"
    sout = cont_ref[1]            # (M, D) bf16  -> Fuser "obj_content"

    # 2-layer MLP heads (ReLU in between)
    qp = _mm(jnp.maximum(_mm(sine, rw0[...]) + rb0[...], 0.0), rw1[...]) + rb1[...]
    sqp = _mm(jnp.maximum(_mm(ssine, srw0[...]) + srb0[...], 0.0), srw1[...]) + srb1[...]

    # Fuser.pair_fusion
    cross = jnp.maximum(
        _ln(_mm(out, ws1[...]) + bs1[...] + _mm(sout, wo1[...]) + bo1[...], cng[...], cnb[...]),
        0.0)
    pos_ref[0] = _ln(_mm(cross, ws2[...]) + bs2[...] + qp, sng[...], snb[...]).astype(pos_ref.dtype)
    pos_ref[1] = _ln(_mm(cross, wo2[...]) + bo2[...] + sqp, ong[...], onb[...]).astype(pos_ref.dtype)


def pos_fusion_forward(rph, srph, fp, sine, sub_sine, content_pair):
    """sine/sub_sine: (B, Lq, E) f32 sine embeddings; content_pair: (2, B, Lq, D) bf16.
    Returns fused positions (2, B, Lq, D) bf16 (branch 0 = object layer, 1 = subject layer)."""
    B, Lq, E = sine.shape
    D = content_pair.shape[-1]
    M = B * Lq
    sine2 = jnp.stack([sine, sub_sine]).reshape(2, M, E).astype(jnp.bfloat16)
    cont2 = content_pair.reshape(2, M, D)
    args = [sine2, cont2,
            rph[0]["w"], rph[0]["b"], rph[1]["w"], rph[1]["b"],
            srph[0]["w"], srph[0]["b"], srph[1]["w"], srph[1]["b"],
            fp["sub_w1"]["w"], fp["sub_w1"]["b"], fp["obj_w1"]["w"], fp["obj_w1"]["b"],
            fp["cross_norm"]["g"], fp["cross_norm"]["b"],
            fp["sub_w2"]["w"], fp["sub_w2"]["b"], fp["obj_w2"]["w"], fp["obj_w2"]["b"],
            fp["sub_norm"]["g"], fp["sub_norm"]["b"], fp["obj_norm"]["g"], fp["obj_norm"]["b"]]
    pos2 = pl.pallas_call(
        _pos_fusion_kernel,
        out_shape=jax.ShapeDtypeStruct((2, M, D), jnp.bfloat16),
        grid=(1,),
        in_specs=[_full_spec(a) for a in args],
        out_specs=pl.BlockSpec((2, M, D), lambda i: (0, 0, 0)),
    )(*args)
    return pos2.reshape(2, B, Lq, D)


# ---------------------------------------------------------------------------
# fused Fuser.ternary_fusion kernel
# ---------------------------------------------------------------------------
def _ternary_fusion_kernel(sc_ref, oc_ref, spat_ref,
                           ws3, bs3, wo3, bo3, cn2g, cn2b,
                           spw1, spb1, spng, spnb, spw2, spb2,
                           cw, cb, cn3g, cn3b, out_ref):
    sc = sc_ref[...]
    oc = oc_ref[...]
    spat = spat_ref[...].astype(jnp.float32)
    cross = jnp.maximum(
        _ln(_mm(sc, ws3[...]) + bs3[...] + _mm(oc, wo3[...]) + bo3[...], cn2g[...], cn2b[...]),
        0.0)
    hsp = jnp.maximum(_ln(_mm(spat, spw1[...]) + spb1[...], spng[...], spnb[...]), 0.0)
    cross_pos = _mm(hsp, spw2[...]) + spb2[...]
    out_ref[...] = _ln(_mm(cross, cw[...]) + cb[...] + cross_pos,
                       cn3g[...], cn3b[...]).astype(out_ref.dtype)


def fuser_ternary_fusion(fp, obj_content, obj_position, sub_content, sub_position):
    shp = obj_content.shape
    D = shp[-1]
    spat = jnp.concatenate(
        [sub_position, obj_position, compute_spatial_feature(sub_position, obj_position)],
        axis=-1)                                        # (..., 16)
    sc = sub_content.reshape(-1, D)
    oc = obj_content.reshape(-1, D)
    sp16 = spat.reshape(-1, 16)
    M = sc.shape[0]
    args = [sc, oc, sp16,
            fp["sub_w3"]["w"], fp["sub_w3"]["b"], fp["obj_w3"]["w"], fp["obj_w3"]["b"],
            fp["cross_norm2"]["g"], fp["cross_norm2"]["b"],
            fp["spa_w1"]["w"], fp["spa_w1"]["b"], fp["spa_norm"]["g"], fp["spa_norm"]["b"],
            fp["spa_w2"]["w"], fp["spa_w2"]["b"],
            fp["cross_w"]["w"], fp["cross_w"]["b"],
            fp["cross_norm3"]["g"], fp["cross_norm3"]["b"]]
    out = pl.pallas_call(
        _ternary_fusion_kernel,
        out_shape=jax.ShapeDtypeStruct((M, D), jnp.bfloat16),
        grid=(1,),
        in_specs=[_full_spec(a) for a in args],
        out_specs=pl.BlockSpec((M, D), lambda i: (0, 0)),
    )(*args)
    return out.reshape(shp)


# ---------------------------------------------------------------------------
# tiny heads / elementwise glue (plain JAX; 4-wide outputs are not worth a kernel)
# ---------------------------------------------------------------------------
def mlp_jax(layers, x):
    x = x.astype(jnp.float32)
    for i, lp in enumerate(layers):
        x = x @ lp["w"].astype(jnp.float32) + lp["b"]
        if i < len(layers) - 1:
            x = jax.nn.relu(x)
    return x


def inverse_sigmoid(x, eps=1e-3):
    x = jnp.clip(x, 0.0, 1.0)
    x1 = jnp.clip(x, eps, None)
    x2 = jnp.clip(1.0 - x, eps, None)
    return jnp.log(x1 / x2)


def gen_sineembed_for_position(pos, num_pos_feats):
    """pos: (..., 4) in [0,1] -> (..., 4*num_pos_feats), order (y, x, w, h)."""
    scale = 2.0 * math.pi
    dim_t = jnp.arange(num_pos_feats, dtype=jnp.float32)
    dim_t = 10000.0 ** (2.0 * jnp.floor(dim_t / 2.0) / num_pos_feats)

    def embed(coord):
        e = coord * scale
        p = e[..., None] / dim_t
        return jnp.stack((jnp.sin(p[..., 0::2]), jnp.cos(p[..., 1::2])), axis=-1).reshape(
            *p.shape[:-1], -1)

    pos_x = embed(pos[..., 0])
    pos_y = embed(pos[..., 1])
    pos_w = embed(pos[..., 2])
    pos_h = embed(pos[..., 3])
    return jnp.concatenate([pos_y, pos_x, pos_w, pos_h], axis=-1)


def box_cxcywh_to_xyxy(b):
    cx, cy, w, h = jnp.split(b, 4, axis=-1)
    return jnp.concatenate([cx - 0.5 * w, cy - 0.5 * h, cx + 0.5 * w, cy + 0.5 * h], axis=-1)


def box_xyxy_to_cxcywh(b):
    x0, y0, x1, y1 = jnp.split(b, 4, axis=-1)
    return jnp.concatenate([(x0 + x1) / 2, (y0 + y1) / 2, x1 - x0, y1 - y0], axis=-1)


def box_union(b1, b2):
    # TODO(synk): exact upstream box_union not provided; enclosing box of the two cxcywh boxes.
    a, c = box_cxcywh_to_xyxy(b1), box_cxcywh_to_xyxy(b2)
    lt = jnp.minimum(a[..., :2], c[..., :2])
    rb = jnp.maximum(a[..., 2:], c[..., 2:])
    return box_xyxy_to_cxcywh(jnp.concatenate([lt, rb], axis=-1))


def compute_spatial_feature(sub, obj, eps=1e-6):
    # TODO(synk): exact upstream compute_spatial_feature not provided; 8-dim relative geometry.
    scx, scy, sw, sh = jnp.split(sub, 4, axis=-1)
    ocx, ocy, ow, oh = jnp.split(obj, 4, axis=-1)
    dx = (ocx - scx) / (sw + eps)
    dy = (ocy - scy) / (sh + eps)
    dw = jnp.log(ow / (sw + eps) + eps)
    dh = jnp.log(oh / (sh + eps) + eps)
    return jnp.concatenate(
        [dx, dy, dw, dh, sw * sh, ow * oh, jnp.abs(ocx - scx), jnp.abs(ocy - scy)], axis=-1)


# ---------------------------------------------------------------------------
# full TransformerDecoder forward
# ---------------------------------------------------------------------------
def transformer_decoder_forward(params, tgt, sub_tgt, hoi, memory, tgt_mask,
                                memory_key_padding_mask, refpoints, sub_refpoints,
                                level_start_index, spatial_shapes, valid_ratios,
                                *, nhead, d_model):
    # level_start_index / spatial_shapes are only consumed by MSDeformAttn (see TODO above).
    del level_start_index, spatial_shapes

    B = tgt.shape[1]
    # batch-first internally, obj/sub branches stacked along a leading axis; bf16 streaming.
    pair_out = jnp.stack([jnp.swapaxes(tgt, 0, 1),
                          jnp.swapaxes(sub_tgt, 0, 1)]).astype(jnp.bfloat16)   # (2,B,Lq,D)
    hoi_out = jnp.swapaxes(hoi, 0, 1)[None].astype(jnp.bfloat16)               # (1,B,Lq,D)
    memory_bf = jnp.swapaxes(memory, 0, 1).astype(jnp.bfloat16)                # (B,S,D)
    reference_points = jax.nn.sigmoid(jnp.swapaxes(refpoints, 0, 1))           # (B,Lq,4)
    sub_reference_points = jax.nn.sigmoid(jnp.swapaxes(sub_refpoints, 0, 1))

    mem_bias = None
    if memory_key_padding_mask is not None:                  # (B, S) bool, True = pad
        mem_bias = jnp.where(memory_key_padding_mask, -1e9, 0.0).astype(jnp.float32)
    tgt_bias = None
    if tgt_mask is not None:                                 # (Lq, Lq) bool or additive
        if tgt_mask.dtype == jnp.bool_:
            tgt_bias = jnp.where(tgt_mask, -1e9, 0.0).astype(jnp.float32)
        else:
            tgt_bias = tgt_mask.astype(jnp.float32)

    vr2 = jnp.concatenate([valid_ratios, valid_ratios], axis=-1)   # (B, nlvl, 4)
    vr_l0 = vr2[:, 0, :][:, None, :]                               # (B, 1, 4) level-0 slice
    num_pos_feats = d_model // 2
    num_layers = len(params["layers"])

    # branch-stacked decoder weights (index 0 = object branch, 1 = subject branch)
    pair_layers = [
        {k: jnp.stack([params["layers"][i][k], params["sub_layers"][i][k]])
         for k in params["layers"][i]}
        for i in range(num_layers)]
    hoi_layers = [{k: v[None] for k, v in params["hoi_layers"][i].items()}
                  for i in range(num_layers)]
    pair_norm = {"g": jnp.stack([params["norm"]["g"], params["sub_norm"]["g"]]),
                 "b": jnp.stack([params["norm"]["b"], params["sub_norm"]["b"]])}
    hoi_norm = {"g": params["hoi_norm"]["g"][None], "b": params["hoi_norm"]["b"][None]}

    ref_points = [reference_points]
    sub_ref_points = [sub_reference_points]
    intermediate, sub_intermediate, hoi_intermediate = [], [], []

    for layer_id in range(num_layers):
        fp = params["fusers"][layer_id]

        sine = gen_sineembed_for_position(reference_points * vr_l0, num_pos_feats)
        sub_sine = gen_sineembed_for_position(sub_reference_points * vr_l0, num_pos_feats)
        fused_pos_pair = pos_fusion_forward(
            params["ref_point_head"], params["sub_ref_point_head"], fp,
            sine, sub_sine, pair_out)                                       # (2,B,Lq,D) bf16

        # object + subject decoder layers fused into one pallas_call (branch grid axis)
        pair_out, pair_normed = decoder_layer_forward(
            pair_layers[layer_id], pair_norm, pair_out, fused_pos_pair,
            memory_bf, mem_bias, tgt_bias, nhead)

        new_reference_points = jax.nn.sigmoid(
            mlp_jax(params["bbox_embed"][layer_id], pair_out[0])
            + inverse_sigmoid(reference_points))
        sub_new_reference_points = jax.nn.sigmoid(
            mlp_jax(params["sub_bbox_embed"][layer_id], pair_out[1])
            + inverse_sigmoid(sub_reference_points))

        # hoi reference points would only feed MSDeformAttn's sampling grid (TODO above).
        _hoi_reference_points = box_union(new_reference_points, sub_new_reference_points)

        hoi_fused_pos = fuser_ternary_fusion(
            fp, pair_out[0], new_reference_points, pair_out[1], sub_new_reference_points)
        hoi_out, hoi_normed = decoder_layer_forward(
            hoi_layers[layer_id], hoi_norm, hoi_out, hoi_fused_pos[None],
            memory_bf, mem_bias, tgt_bias, nhead)

        reference_points = jax.lax.stop_gradient(new_reference_points)
        sub_reference_points = jax.lax.stop_gradient(sub_new_reference_points)

        ref_points.append(new_reference_points)
        sub_ref_points.append(sub_new_reference_points)
        intermediate.append(pair_normed[0].astype(jnp.float32))
        sub_intermediate.append(pair_normed[1].astype(jnp.float32))
        hoi_intermediate.append(hoi_normed[0].astype(jnp.float32))

    # already batch-first == the transposed outputs of the PyTorch module
    return [sub_intermediate, sub_ref_points, intermediate, ref_points, hoi_intermediate]


# ---------------------------------------------------------------------------
# deterministic parameter construction (shapes follow the module's __init__)
# ---------------------------------------------------------------------------
class KeyGen:
    def __init__(self, seed=0):
        self.key = jax.random.PRNGKey(seed)

    def __call__(self):
        self.key, sub = jax.random.split(self.key)
        return sub


def _w(kg, din, dout, scale=0.05):
    # matmul weights stored as bf16 (native MXU operand dtype); accumulation stays f32 in-kernel
    return (jax.random.normal(kg(), (din, dout), jnp.float32) * scale).astype(jnp.bfloat16)


def lin_p(kg, din, dout):
    return {"w": _w(kg, din, dout), "b": jnp.zeros((1, dout), jnp.float32)}


def ln_p(d):
    return {"g": jnp.ones((1, d), jnp.float32), "b": jnp.zeros((1, d), jnp.float32)}


def decoder_layer_p(kg, d, dff):
    z = lambda n: jnp.zeros((1, n), jnp.float32)
    p = {
        # self-attention: fused Q/K projection, separate V, output projection
        "sa_wqk": _w(kg, d, 2 * d), "sa_bqk": z(2 * d),
        "sa_wv": _w(kg, d, d), "sa_bv": z(d),
        "sa_wo": _w(kg, d, d), "sa_bo": z(d),
        # cross-attention: Q projection, fused K/V projection, output projection
        "ca_wq": _w(kg, d, d), "ca_bq": z(d),
        "ca_wkv": _w(kg, d, 2 * d), "ca_bkv": z(2 * d),
        "ca_wo": _w(kg, d, d), "ca_bo": z(d),
        # FFN
        "ffn_w1": _w(kg, d, dff), "ffn_b1": z(dff),
        "ffn_w2": _w(kg, dff, d), "ffn_b2": z(d),
    }
    for name in ("n1", "n2", "n3"):
        ln = ln_p(d)
        p[name + "_g"] = ln["g"]
        p[name + "_b"] = ln["b"]
    return p


def fuser_p(kg, d):
    return {
        "sub_w1": lin_p(kg, d, d), "obj_w1": lin_p(kg, d, d), "cross_norm": ln_p(d),
        "sub_w2": lin_p(kg, d, d), "obj_w2": lin_p(kg, d, d),
        "sub_norm": ln_p(d), "obj_norm": ln_p(d),
        "sub_w3": lin_p(kg, d, d), "obj_w3": lin_p(kg, d, d), "cross_norm2": ln_p(d),
        "spa_w1": lin_p(kg, 16, 64), "spa_norm": ln_p(64), "spa_w2": lin_p(kg, 64, d),
        "cross_w": lin_p(kg, d, d), "cross_norm3": ln_p(d),
    }


def mlp_p(kg, din, dh, dout, nlayers):
    dims = [din] + [dh] * (nlayers - 1) + [dout]
    return [lin_p(kg, dims[i], dims[i + 1]) for i in range(nlayers)]


def build_params(kg, d_model, dff, num_layers, query_dim=4):
    # independent parameter sets per layer and per branch (object / sub / hoi), matching the
    # upstream module after DeformableTransformer._reset_parameters re-initializes every clone.
    return {
        "layers": [decoder_layer_p(kg, d_model, dff) for _ in range(num_layers)],
        "sub_layers": [decoder_layer_p(kg, d_model, dff) for _ in range(num_layers)],
        "hoi_layers": [decoder_layer_p(kg, d_model, dff) for _ in range(num_layers)],
        "fusers": [fuser_p(kg, d_model) for _ in range(num_layers)],
        "norm": ln_p(d_model), "sub_norm": ln_p(d_model), "hoi_norm": ln_p(d_model),
        "ref_point_head": mlp_p(kg, query_dim // 2 * d_model, d_model, d_model, 2),
        "sub_ref_point_head": mlp_p(kg, query_dim // 2 * d_model, d_model, d_model, 2),
        "bbox_embed": [mlp_p(kg, d_model, d_model, 4, 3) for _ in range(num_layers)],
        "sub_bbox_embed": [mlp_p(kg, d_model, d_model, 4, 3) for _ in range(num_layers)],
    }


# ---------------------------------------------------------------------------
if __name__ == "__main__":
    d_model, nhead, dff, num_layers = 32, 4, 64, 2
    num_queries, batch = 8, 2
    spatial_shapes = jnp.array([[4, 4], [2, 2]], jnp.int32)         # 2 feature levels
    level_start_index = jnp.array([0, 16], jnp.int32)
    S = 20                                                          # 4*4 + 2*2

    kg = KeyGen(0)
    params = build_params(kg, d_model, dff, num_layers)

    key = jax.random.PRNGKey(0)
    ks = jax.random.split(key, 8)
    tgt = jax.random.normal(ks[0], (num_queries, batch, d_model), jnp.float32) * 0.5
    sub_tgt = jax.random.normal(ks[1], (num_queries, batch, d_model), jnp.float32) * 0.5
    hoi = jax.random.normal(ks[2], (num_queries, batch, d_model), jnp.float32) * 0.5
    memory = jax.random.normal(ks[3], (S, batch, d_model), jnp.float32) * 0.5
    refpoints = jax.random.normal(ks[4], (num_queries, batch, 4), jnp.float32)
    sub_refpoints = jax.random.normal(ks[5], (num_queries, batch, 4), jnp.float32)
    valid_ratios = jnp.ones((batch, 2, 2), jnp.float32)
    memory_key_padding_mask = None                                  # no padding (fast path)
    tgt_mask = None

    fwd = jax.jit(functools.partial(transformer_decoder_forward, nhead=nhead, d_model=d_model))
    outs = fwd(params, tgt, sub_tgt, hoi, memory, tgt_mask, memory_key_padding_mask,
               refpoints, sub_refpoints, level_start_index, spatial_shapes, valid_ratios)
    jax.block_until_ready(outs)

    # sanity on output structure / shapes
    assert len(outs) == 5
    assert outs[2][0].shape == (batch, num_queries, d_model)        # intermediate (batch-first)
    assert outs[3][0].shape == (batch, num_queries, 4)              # ref points (batch-first)
    assert len(outs[3]) == num_layers + 1
    for o in outs:
        for a in o:
            assert bool(jnp.all(jnp.isfinite(a.astype(jnp.float32))))
    print("KERNEL_OK")
</pallas_src>

<mosaic_0001>
module attributes {stable_mosaic.version = 11 : i64} {
  func.func @_pos_fusion_kernel(%arg0: i32, %arg1: memref<2x16x64xbf16, #tpu.memory_space<vmem>>, %arg2: memref<2x16x32xbf16, #tpu.memory_space<vmem>>, %arg3: memref<64x32xbf16, #tpu.memory_space<vmem>>, %arg4: memref<1x32xf32, #tpu.memory_space<vmem>>, %arg5: memref<32x32xbf16, #tpu.memory_space<vmem>>, %arg6: memref<1x32xf32, #tpu.memory_space<vmem>>, %arg7: memref<64x32xbf16, #tpu.memory_space<vmem>>, %arg8: memref<1x32xf32, #tpu.memory_space<vmem>>, %arg9: memref<32x32xbf16, #tpu.memory_space<vmem>>, %arg10: memref<1x32xf32, #tpu.memory_space<vmem>>, %arg11: memref<32x32xbf16, #tpu.memory_space<vmem>>, %arg12: memref<1x32xf32, #tpu.memory_space<vmem>>, %arg13: memref<32x32xbf16, #tpu.memory_space<vmem>>, %arg14: memref<1x32xf32, #tpu.memory_space<vmem>>, %arg15: memref<1x32xf32, #tpu.memory_space<vmem>>, %arg16: memref<1x32xf32, #tpu.memory_space<vmem>>, %arg17: memref<32x32xbf16, #tpu.memory_space<vmem>>, %arg18: memref<1x32xf32, #tpu.memory_space<vmem>>, %arg19: memref<32x32xbf16, #tpu.memory_space<vmem>>, %arg20: memref<1x32xf32, #tpu.memory_space<vmem>>, %arg21: memref<1x32xf32, #tpu.memory_space<vmem>>, %arg22: memref<1x32xf32, #tpu.memory_space<vmem>>, %arg23: memref<1x32xf32, #tpu.memory_space<vmem>>, %arg24: memref<1x32xf32, #tpu.memory_space<vmem>>, %arg25: memref<2x16x32xbf16, #tpu.memory_space<vmem>>) attributes {dimension_semantics = [#tpu.dimension_semantics<arbitrary>], iteration_bounds = array<i64: 1>, scalar_prefetch = 0 : i64, scratch_operands = 0 : i64, tpu.core_type = #tpu.core_type<tc>, window_params = [{pipeline_mode = #tpu.pipeline_mode<synchronous>, transform_indices = @transform_0, window_bounds = array<i64: 2, 16, 64>}, {pipeline_mode = #tpu.pipeline_mode<synchronous>, transform_indices = @transform_1, window_bounds = array<i64: 2, 16, 32>}, {pipeline_mode = #tpu.pipeline_mode<synchronous>, transform_indices = @transform_2, window_bounds = array<i64: 64, 32>}, {pipeline_mode = #tpu.pipeline_mode<synchronous>, transform_indices = @transform_3, window_bounds = array<i64: 1, 32>}, {pipeline_mode = #tpu.pipeline_mode<synchronous>, transform_indices = @transform_4, window_bounds = array<i64: 32, 32>}, {pipeline_mode = #tpu.pipeline_mode<synchronous>, transform_indices = @transform_5, window_bounds = array<i64: 1, 32>}, {pipeline_mode = #tpu.pipeline_mode<synchronous>, transform_indices = @transform_6, window_bounds = array<i64: 64, 32>}, {pipeline_mode = #tpu.pipeline_mode<synchronous>, transform_indices = @transform_7, window_bounds = array<i64: 1, 32>}, {pipeline_mode = #tpu.pipeline_mode<synchronous>, transform_indices = @transform_8, window_bounds = array<i64: 32, 32>}, {pipeline_mode = #tpu.pipeline_mode<synchronous>, transform_indices = @transform_9, window_bounds = array<i64: 1, 32>}, {pipeline_mode = #tpu.pipeline_mode<synchronous>, transform_indices = @transform_10, window_bounds = array<i64: 32, 32>}, {pipeline_mode = #tpu.pipeline_mode<synchronous>, transform_indices = @transform_11, window_bounds = array<i64: 1, 32>}, {pipeline_mode = #tpu.pipeline_mode<synchronous>, transform_indices = @transform_12, window_bounds = array<i64: 32, 32>}, {pipeline_mode = #tpu.pipeline_mode<synchronous>, transform_indices = @transform_13, window_bounds = array<i64: 1, 32>}, {pipeline_mode = #tpu.pipeline_mode<synchronous>, transform_indices = @transform_14, window_bounds = array<i64: 1, 32>}, {pipeline_mode = #tpu.pipeline_mode<synchronous>, transform_indices = @transform_15, window_bounds = array<i64: 1, 32>}, {pipeline_mode = #tpu.pipeline_mode<synchronous>, transform_indices = @transform_16, window_bounds = array<i64: 32, 32>}, {pipeline_mode = #tpu.pipeline_mode<synchronous>, transform_indices = @transform_17, window_bounds = array<i64: 1, 32>}, {pipeline_mode = #tpu.pipeline_mode<synchronous>, transform_indices = @transform_18, window_bounds = array<i64: 32, 32>}, {pipeline_mode = #tpu.pipeline_mode<synchronous>, transform_indices = @transform_19, window_bounds = array<i64: 1, 32>}, {pipeline_mode = #tpu.pipeline_mode<synchronous>, transform_indices = @transform_20, window_bounds = array<i64: 1, 32>}, {pipeline_mode = #tpu.pipeline_mode<synchronous>, transform_indices = @transform_21, window_bounds = array<i64: 1, 32>}, {pipeline_mode = #tpu.pipeline_mode<synchronous>, transform_indices = @transform_22, window_bounds = array<i64: 1, 32>}, {pipeline_mode = #tpu.pipeline_mode<synchronous>, transform_indices = @transform_23, window_bounds = array<i64: 1, 32>}, {pipeline_mode = #tpu.pipeline_mode<synchronous>, transform_indices = @transform_24, window_bounds = array<i64: 2, 16, 32>}]} {
    %c0 = arith.constant 0 : index
    %c0_0 = arith.constant 0 : index
    %c0_1 = arith.constant 0 : index
    %0 = vector.load %arg1[%c0, %c0_0, %c0_1] : memref<2x16x64xbf16, #tpu.memory_space<vmem>>, vector<1x16x64xbf16>
    %1 = vector.shape_cast %0 : vector<1x16x64xbf16> to vector<16x64xbf16>
    %c1 = arith.constant 1 : index
    %c0_2 = arith.constant 0 : index
    %c0_3 = arith.constant 0 : index
    %2 = vector.load %arg1[%c1, %c0_2, %c0_3] : memref<2x16x64xbf16, #tpu.memory_space<vmem>>, vector<1x16x64xbf16>
    %3 = vector.shape_cast %2 : vector<1x16x64xbf16> to vector<16x64xbf16>
    %c0_4 = arith.constant 0 : index
    %c0_5 = arith.constant 0 : index
    %c0_6 = arith.constant 0 : index
    %4 = vector.load %arg2[%c0_4, %c0_5, %c0_6] : memref<2x16x32xbf16, #tpu.memory_space<vmem>>, vector<1x16x32xbf16>
    %5 = vector.shape_cast %4 : vector<1x16x32xbf16> to vector<16x32xbf16>
    %c1_7 = arith.constant 1 : index
    %c0_8 = arith.constant 0 : index
    %c0_9 = arith.constant 0 : index
    %6 = vector.load %arg2[%c1_7, %c0_8, %c0_9] : memref<2x16x32xbf16, #tpu.memory_space<vmem>>, vector<1x16x32xbf16>
    %7 = vector.shape_cast %6 : vector<1x16x32xbf16> to vector<16x32xbf16>
    %c0_10 = arith.constant 0 : index
    %c0_11 = arith.constant 0 : index
    %8 = vector.load %arg3[%c0_10, %c0_11] : memref<64x32xbf16, #tpu.memory_space<vmem>>, vector<64x32xbf16>
    %cst = arith.constant dense<0.000000e+00> : vector<16x32xf32>
    %9 = tpu.matmul %1, %8, %cst {dimension_numbers = #tpu.dot_dimension_numbers<[1], [0], [0], [1], [0, 0, 1, 1], [], []>} : vector<16x64xbf16>, vector<64x32xbf16>, vector<16x32xf32> -> vector<16x32xf32>
    %c0_12 = arith.constant 0 : index
    %c0_13 = arith.constant 0 : index
    %10 = vector.load %arg4[%c0_12, %c0_13] : memref<1x32xf32, #tpu.memory_space<vmem>>, vector<1x32xf32>
    %11 = vector.broadcast %10 : vector<1x32xf32> to vector<16x32xf32>
    %12 = arith.addf %9, %11 : vector<16x32xf32>
    %cst_14 = arith.constant 0.000000e+00 : f32
    %13 = vector.broadcast %cst_14 : f32 to vector<16x32xf32>
    %14 = arith.maximumf %12, %13 : vector<16x32xf32>
    %c0_15 = arith.constant 0 : index
    %c0_16 = arith.constant 0 : index
    %15 = vector.load %arg5[%c0_15, %c0_16] : memref<32x32xbf16, #tpu.memory_space<vmem>>, vector<32x32xbf16>
    %16 = arith.truncf %14 : vector<16x32xf32> to vector<16x32xbf16>
    %cst_17 = arith.constant dense<0.000000e+00> : vector<16x32xf32>
    %17 = tpu.matmul %16, %15, %cst_17 {dimension_numbers = #tpu.dot_dimension_numbers<[1], [0], [0], [1], [0, 0, 1, 1], [], []>} : vector<16x32xbf16>, vector<32x32xbf16>, vector<16x32xf32> -> vector<16x32xf32>
    %c0_18 = arith.constant 0 : index
    %c0_19 = arith.constant 0 : index
    %18 = vector.load %arg6[%c0_18, %c0_19] : memref<1x32xf32, #tpu.memory_space<vmem>>, vector<1x32xf32>
    %19 = vector.broadcast %18 : vector<1x32xf32> to vector<16x32xf32>
    %20 = arith.addf %17, %19 : vector<16x32xf32>
    %c0_20 = arith.constant 0 : index
    %c0_21 = arith.constant 0 : index
    %21 = vector.load %arg7[%c0_20, %c0_21] : memref<64x32xbf16, #tpu.memory_space<vmem>>, vector<64x32xbf16>
    %cst_22 = arith.constant dense<0.000000e+00> : vector<16x32xf32>
    %22 = tpu.matmul %3, %21, %cst_22 {dimension_numbers = #tpu.dot_dimension_numbers<[1], [0], [0], [1], [0, 0, 1, 1], [], []>} : vector<16x64xbf16>, vector<64x32xbf16>, vector<16x32xf32> -> vector<16x32xf32>
    %c0_23 = arith.constant 0 : index
    %c0_24 = arith.constant 0 : index
    %23 = vector.load %arg8[%c0_23, %c0_24] : memref<1x32xf32, #tpu.memory_space<vmem>>, vector<1x32xf32>
    %24 = vector.broadcast %23 : vector<1x32xf32> to vector<16x32xf32>
    %25 = arith.addf %22, %24 : vector<16x32xf32>
    %cst_25 = arith.constant 0.000000e+00 : f32
    %26 = vector.broadcast %cst_25 : f32 to vector<16x32xf32>
    %27 = arith.maximumf %25, %26 : vector<16x32xf32>
    %c0_26 = arith.constant 0 : index
    %c0_27 = arith.constant 0 : index
    %28 = vector.load %arg9[%c0_26, %c0_27] : memref<32x32xbf16, #tpu.memory_space<vmem>>, vector<32x32xbf16>
    %29 = arith.truncf %27 : vector<16x32xf32> to vector<16x32xbf16>
    %cst_28 = arith.constant dense<0.000000e+00> : vector<16x32xf32>
    %30 = tpu.matmul %29, %28, %cst_28 {dimension_numbers = #tpu.dot_dimension_numbers<[1], [0], [0], [1], [0, 0, 1, 1], [], []>} : vector<16x32xbf16>, vector<32x32xbf16>, vector<16x32xf32> -> vector<16x32xf32>
    %c0_29 = arith.constant 0 : index
    %c0_30 = arith.constant 0 : index
    %31 = vector.load %arg10[%c0_29, %c0_30] : memref<1x32xf32, #tpu.memory_space<vmem>>, vector<1x32xf32>
    %32 = vector.broadcast %31 : vector<1x32xf32> to vector<16x32xf32>
    %33 = arith.addf %30, %32 : vector<16x32xf32>
    %c0_31 = arith.constant 0 : index
    %c0_32 = arith.constant 0 : index
    %34 = vector.load %arg11[%c0_31, %c0_32] : memref<32x32xbf16, #tpu.memory_space<vmem>>, vector<32x32xbf16>
    %cst_33 = arith.constant dense<0.000000e+00> : vector<16x32xf32>
    %35 = tpu.matmul %5, %34, %cst_33 {dimension_numbers = #tpu.dot_dimension_numbers<[1], [0], [0], [1], [0, 0, 1, 1], [], []>} : vector<16x32xbf16>, vector<32x32xbf16>, vector<16x32xf32> -> vector<16x32xf32>
    %c0_34 = arith.constant 0 : index
    %c0_35 = arith.constant 0 : index
    %36 = vector.load %arg12[%c0_34, %c0_35] : memref<1x32xf32, #tpu.memory_space<vmem>>, vector<1x32xf32>
    %37 = vector.broadcast %36 : vector<1x32xf32> to vector<16x32xf32>
    %38 = arith.addf %35, %37 : vector<16x32xf32>
    %c0_36 = arith.constant 0 : index
    %c0_37 = arith.constant 0 : index
    %39 = vector.load %arg13[%c0_36, %c0_37] : memref<32x32xbf16, #tpu.memory_space<vmem>>, vector<32x32xbf16>
    %cst_38 = arith.constant dense<0.000000e+00> : vector<16x32xf32>
    %40 = tpu.matmul %7, %39, %cst_38 {dimension_numbers = #tpu.dot_dimension_numbers<[1], [0], [0], [1], [0, 0, 1, 1], [], []>} : vector<16x32xbf16>, vector<32x32xbf16>, vector<16x32xf32> -> vector<16x32xf32>
    %41 = arith.addf %38, %40 : vector<16x32xf32>
    %c0_39 = arith.constant 0 : index
    %c0_40 = arith.constant 0 : index
    %42 = vector.load %arg14[%c0_39, %c0_40] : memref<1x32xf32, #tpu.memory_space<vmem>>, vector<1x32xf32>
    %43 = vector.broadcast %42 : vector<1x32xf32> to vector<16x32xf32>
    %44 = arith.addf %41, %43 : vector<16x32xf32>
    %c0_41 = arith.constant 0 : index
    %c0_42 = arith.constant 0 : index
    %45 = vector.load %arg15[%c0_41, %c0_42] : memref<1x32xf32, #tpu.memory_space<vmem>>, vector<1x32xf32>
    %c0_43 = arith.constant 0 : index
    %c0_44 = arith.constant 0 : index
    %46 = vector.load %arg16[%c0_43, %c0_44] : memref<1x32xf32, #tpu.memory_space<vmem>>, vector<1x32xf32>
    %cst_45 = arith.constant dense<0.000000e+00> : vector<16xf32>
    %47 = vector.multi_reduction <add>, %44, %cst_45 [1] : vector<16x32xf32> to vector<16xf32>
    %48 = vector.shape_cast %47 : vector<16xf32> to vector<16x1xf32>
    %cst_46 = arith.constant 3.200000e+01 : f32
    %49 = vector.broadcast %cst_46 : f32 to vector<16x1xf32>
    %50 = arith.divf %48, %49 : vector<16x1xf32>
    %51 = vector.broadcast %50 : vector<16x1xf32> to vector<16x32xf32>
    %52 = arith.subf %44, %51 : vector<16x32xf32>
    %53 = arith.mulf %52, %52 : vector<16x32xf32>
    %cst_47 = arith.constant dense<0.000000e+00> : vector<16xf32>
    %54 = vector.multi_reduction <add>, %53, %cst_47 [1] : vector<16x32xf32> to vector<16xf32>
    %55 = vector.shape_cast %54 : vector<16xf32> to vector<16x1xf32>
    %cst_48 = arith.constant 3.200000e+01 : f32
    %56 = vector.broadcast %cst_48 : f32 to vector<16x1xf32>
    %57 = arith.divf %55, %56 : vector<16x1xf32>
    %58 = vector.broadcast %50 : vector<16x1xf32> to vector<16x32xf32>
    %59 = arith.subf %44, %58 : vector<16x32xf32>
    %cst_49 = arith.constant 9.99999974E-6 : f32
    %60 = vector.broadcast %cst_49 : f32 to vector<16x1xf32>
    %61 = arith.addf %57, %60 : vector<16x1xf32>
    %62 = math.rsqrt %61 : vector<16x1xf32>
    %63 = vector.broadcast %62 : vector<16x1xf32> to vector<16x32xf32>
    %64 = arith.mulf %59, %63 : vector<16x32xf32>
    %65 = vector.broadcast %45 : vector<1x32xf32> to vector<16x32xf32>
    %66 = arith.mulf %64, %65 : vector<16x32xf32>
    %67 = vector.broadcast %46 : vector<1x32xf32> to vector<16x32xf32>
    %68 = arith.addf %66, %67 : vector<16x32xf32>
    %cst_50 = arith.constant 0.000000e+00 : f32
    %69 = vector.broadcast %cst_50 : f32 to vector<16x32xf32>
    %70 = arith.maximumf %68, %69 : vector<16x32xf32>
    %c0_51 = arith.constant 0 : index
    %c0_52 = arith.constant 0 : index
    %71 = vector.load %arg17[%c0_51, %c0_52] : memref<32x32xbf16, #tpu.memory_space<vmem>>, vector<32x32xbf16>
    %72 = arith.truncf %70 : vector<16x32xf32> to vector<16x32xbf16>
    %cst_53 = arith.constant dense<0.000000e+00> : vector<16x32xf32>
    %73 = tpu.matmul %72, %71, %cst_53 {dimension_numbers = #tpu.dot_dimension_numbers<[1], [0], [0], [1], [0, 0, 1, 1], [], []>} : vector<16x32xbf16>, vector<32x32xbf16>, vector<16x32xf32> -> vector<16x32xf32>
    %c0_54 = arith.constant 0 : index
    %c0_55 = arith.constant 0 : index
    %74 = vector.load %arg18[%c0_54, %c0_55] : memref<1x32xf32, #tpu.memory_space<vmem>>, vector<1x32xf32>
    %75 = vector.broadcast %74 : vector<1x32xf32> to vector<16x32xf32>
    %76 = arith.addf %73, %75 : vector<16x32xf32>
    %77 = arith.addf %76, %20 : vector<16x32xf32>
    %c0_56 = arith.constant 0 : index
    %c0_57 = arith.constant 0 : index
    %78 = vector.load %arg21[%c0_56, %c0_57] : memref<1x32xf32, #tpu.memory_space<vmem>>, vector<1x32xf32>
    %c0_58 = arith.constant 0 : index
    %c0_59 = arith.constant 0 : index
    %79 = vector.load %arg22[%c0_58, %c0_59] : memref<1x32xf32, #tpu.memory_space<vmem>>, vector<1x32xf32>
    %cst_60 = arith.constant dense<0.000000e+00> : vector<16xf32>
    %80 = vector.multi_reduction <add>, %77, %cst_60 [1] : vector<16x32xf32> to vector<16xf32>
    %81 = vector.shape_cast %80 : vector<16xf32> to vector<16x1xf32>
    %cst_61 = arith.constant 3.200000e+01 : f32
    %82 = vector.broadcast %cst_61 : f32 to vector<16x1xf32>
    %83 = arith.divf %81, %82 : vector<16x1xf32>
    %84 = vector.broadcast %83 : vector<16x1xf32> to vector<16x32xf32>
    %85 = arith.subf %77, %84 : vector<16x32xf32>
    %86 = arith.mulf %85, %85 : vector<16x32xf32>
    %cst_62 = arith.constant dense<0.000000e+00> : vector<16xf32>
    %87 = vector.multi_reduction <add>, %86, %cst_62 [1] : vector<16x32xf32> to vector<16xf32>
    %88 = vector.shape_cast %87 : vector<16xf32> to vector<16x1xf32>
    %cst_63 = arith.constant 3.200000e+01 : f32
    %89 = vector.broadcast %cst_63 : f32 to vector<16x1xf32>
    %90 = arith.divf %88, %89 : vector<16x1xf32>
    %91 = vector.broadcast %83 : vector<16x1xf32> to vector<16x32xf32>
    %92 = arith.subf %77, %91 : vector<16x32xf32>
    %cst_64 = arith.constant 9.99999974E-6 : f32
    %93 = vector.broadcast %cst_64 : f32 to vector<16x1xf32>
    %94 = arith.addf %90, %93 : vector<16x1xf32>
    %95 = math.rsqrt %94 : vector<16x1xf32>
    %96 = vector.broadcast %95 : vector<16x1xf32> to vector<16x32xf32>
    %97 = arith.mulf %92, %96 : vector<16x32xf32>
    %98 = vector.broadcast %78 : vector<1x32xf32> to vector<16x32xf32>
    %99 = arith.mulf %97, %98 : vector<16x32xf32>
    %100 = vector.broadcast %79 : vector<1x32xf32> to vector<16x32xf32>
    %101 = arith.addf %99, %100 : vector<16x32xf32>
    %102 = arith.truncf %101 : vector<16x32xf32> to vector<16x32xbf16>
    %c0_65 = arith.constant 0 : index
    %c0_66 = arith.constant 0 : index
    %c0_67 = arith.constant 0 : index
    %103 = vector.load %arg25[%c0_65, %c0_66, %c0_67] : memref<2x16x32xbf16, #tpu.memory_space<vmem>>, vector<1x16x32xbf16>
    %104 = vector.shape_cast %103 : vector<1x16x32xbf16> to vector<16x32xbf16>
    %105 = vector.shape_cast %102 : vector<16x32xbf16> to vector<1x16x32xbf16>
    tpu.vector_store %arg25[%c0_65, %c0_66, %c0_67], %105 {strides = array<i32>} : memref<2x16x32xbf16, #tpu.memory_space<vmem>>, vector<1x16x32xbf16>,
    %c0_68 = arith.constant 0 : index
    %c0_69 = arith.constant 0 : index
    %106 = vector.load %arg19[%c0_68, %c0_69] : memref<32x32xbf16, #tpu.memory_space<vmem>>, vector<32x32xbf16>
    %107 = arith.truncf %70 : vector<16x32xf32> to vector<16x32xbf16>
    %cst_70 = arith.constant dense<0.000000e+00> : vector<16x32xf32>
    %108 = tpu.matmul %107, %106, %cst_70 {dimension_numbers = #tpu.dot_dimension_numbers<[1], [0], [0], [1], [0, 0, 1, 1], [], []>} : vector<16x32xbf16>, vector<32x32xbf16>, vector<16x32xf32> -> vector<16x32xf32>
    %c0_71 = arith.constant 0 : index
    %c0_72 = arith.constant 0 : index
    %109 = vector.load %arg20[%c0_71, %c0_72] : memref<1x32xf32, #tpu.memory_space<vmem>>, vector<1x32xf32>
    %110 = vector.broadcast %109 : vector<1x32xf32> to vector<16x32xf32>
    %111 = arith.addf %108, %110 : vector<16x32xf32>
    %112 = arith.addf %111, %33 : vector<16x32xf32>
    %c0_73 = arith.constant 0 : index
    %c0_74 = arith.constant 0 : index
    %113 = vector.load %arg23[%c0_73, %c0_74] : memref<1x32xf32, #tpu.memory_space<vmem>>, vector<1x32xf32>
    %c0_75 = arith.constant 0 : index
    %c0_76 = arith.constant 0 : index
    %114 = vector.load %arg24[%c0_75, %c0_76] : memref<1x32xf32, #tpu.memory_space<vmem>>, vector<1x32xf32>
    %cst_77 = arith.constant dense<0.000000e+00> : vector<16xf32>
    %115 = vector.multi_reduction <add>, %112, %cst_77 [1] : vector<16x32xf32> to vector<16xf32>
    %116 = vector.shape_cast %115 : vector<16xf32> to vector<16x1xf32>
    %cst_78 = arith.constant 3.200000e+01 : f32
    %117 = vector.broadcast %cst_78 : f32 to vector<16x1xf32>
    %118 = arith.divf %116, %117 : vector<16x1xf32>
    %119 = vector.broadcast %118 : vector<16x1xf32> to vector<16x32xf32>
    %120 = arith.subf %112, %119 : vector<16x32xf32>
    %121 = arith.mulf %120, %120 : vector<16x32xf32>
    %cst_79 = arith.constant dense<0.000000e+00> : vector<16xf32>
    %122 = vector.multi_reduction <add>, %121, %cst_79 [1] : vector<16x32xf32> to vector<16xf32>
    %123 = vector.shape_cast %122 : vector<16xf32> to vector<16x1xf32>
    %cst_80 = arith.constant 3.200000e+01 : f32
    %124 = vector.broadcast %cst_80 : f32 to vector<16x1xf32>
    %125 = arith.divf %123, %124 : vector<16x1xf32>
    %126 = vector.broadcast %118 : vector<16x1xf32> to vector<16x32xf32>
    %127 = arith.subf %112, %126 : vector<16x32xf32>
    %cst_81 = arith.constant 9.99999974E-6 : f32
    %128 = vector.broadcast %cst_81 : f32 to vector<16x1xf32>
    %129 = arith.addf %125, %128 : vector<16x1xf32>
    %130 = math.rsqrt %129 : vector<16x1xf32>
    %131 = vector.broadcast %130 : vector<16x1xf32> to vector<16x32xf32>
    %132 = arith.mulf %127, %131 : vector<16x32xf32>
    %133 = vector.broadcast %113 : vector<1x32xf32> to vector<16x32xf32>
    %134 = arith.mulf %132, %133 : vector<16x32xf32>
    %135 = vector.broadcast %114 : vector<1x32xf32> to vector<16x32xf32>
    %136 = arith.addf %134, %135 : vector<16x32xf32>
    %137 = arith.truncf %136 : vector<16x32xf32> to vector<16x32xbf16>
    %c1_82 = arith.constant 1 : index
    %c0_83 = arith.constant 0 : index
    %c0_84 = arith.constant 0 : index
    %138 = vector.load %arg25[%c1_82, %c0_83, %c0_84] : memref<2x16x32xbf16, #tpu.memory_space<vmem>>, vector<1x16x32xbf16>
    %139 = vector.shape_cast %138 : vector<1x16x32xbf16> to vector<16x32xbf16>
    %140 = vector.shape_cast %137 : vector<16x32xbf16> to vector<1x16x32xbf16>
    tpu.vector_store %arg25[%c1_82, %c0_83, %c0_84], %140 {strides = array<i32>} : memref<2x16x32xbf16, #tpu.memory_space<vmem>>, vector<1x16x32xbf16>,
    return
  }
  func.func @transform_0(%arg0: i32) -> (i32, i32, i32) {
    %c0_i32 = arith.constant 0 : i32
    %c0_i32_0 = arith.constant 0 : i32
    %c0_i32_1 = arith.constant 0 : i32
    %c0_i32_2 = arith.constant 0 : i32
    return %c0_i32, %c0_i32_0, %c0_i32_1 : i32, i32, i32
  }
  func.func @transform_1(%arg0: i32) -> (i32, i32, i32) {
    %c0_i32 = arith.constant 0 : i32
    %c0_i32_0 = arith.constant 0 : i32
    %c0_i32_1 = arith.constant 0 : i32
    %c0_i32_2 = arith.constant 0 : i32
    return %c0_i32, %c0_i32_0, %c0_i32_1 : i32, i32, i32
  }
  func.func @transform_2(%arg0: i32) -> (i32, i32) {
    %c0_i32 = arith.constant 0 : i32
    %c0_i32_0 = arith.constant 0 : i32
    %c0_i32_1 = arith.constant 0 : i32
    return %c0_i32, %c0_i32_0 : i32, i32
  }
  func.func @transform_3(%arg0: i32) -> (i32, i32) {
    %c0_i32 = arith.constant 0 : i32
    %c0_i32_0 = arith.constant 0 : i32
    %c0_i32_1 = arith.constant 0 : i32
    return %c0_i32, %c0_i32_0 : i32, i32
  }
  func.func @transform_4(%arg0: i32) -> (i32, i32) {
    %c0_i32 = arith.constant 0 : i32
    %c0_i32_0 = arith.constant 0 : i32
    %c0_i32_1 = arith.constant 0 : i32
    return %c0_i32, %c0_i32_0 : i32, i32
  }
  func.func @transform_5(%arg0: i32) -> (i32, i32) {
    %c0_i32 = arith.constant 0 : i32
    %c0_i32_0 = arith.constant 0 : i32
    %c0_i32_1 = arith.constant 0 : i32
    return %c0_i32, %c0_i32_0 : i32, i32
  }
  func.func @transform_6(%arg0: i32) -> (i32, i32) {
    %c0_i32 = arith.constant 0 : i32
    %c0_i32_0 = arith.constant 0 : i32
    %c0_i32_1 = arith.constant 0 : i32
    return %c0_i32, %c0_i32_0 : i32, i32
  }
  func.func @transform_7(%arg0: i32) -> (i32, i32) {
    %c0_i32 = arith.constant 0 : i32
    %c0_i32_0 = arith.constant 0 : i32
    %c0_i32_1 = arith.constant 0 : i32
    return %c0_i32, %c0_i32_0 : i32, i32
  }
  func.func @transform_8(%arg0: i32) -> (i32, i32) {
    %c0_i32 = arith.constant 0 : i32
    %c0_i32_0 = arith.constant 0 : i32
    %c0_i32_1 = arith.constant 0 : i32
    return %c0_i32, %c0_i32_0 : i32, i32
  }
  func.func @transform_9(%arg0: i32) -> (i32, i32) {
    %c0_i32 = arith.constant 0 : i32
    %c0_i32_0 = arith.constant 0 : i32
    %c0_i32_1 = arith.constant 0 : i32
    return %c0_i32, %c0_i32_0 : i32, i32
  }
  func.func @transform_10(%arg0: i32) -> (i32, i32) {
    %c0_i32 = arith.constant 0 : i32
    %c0_i32_0 = arith.constant 0 : i32
    %c0_i32_1 = arith.constant 0 : i32
    return %c0_i32, %c0_i32_0 : i32, i32
  }
  func.func @transform_11(%arg0: i32) -> (i32, i32) {
    %c0_i32 = arith.constant 0 : i32
    %c0_i32_0 = arith.constant 0 : i32
    %c0_i32_1 = arith.constant 0 : i32
    return %c0_i32, %c0_i32_0 : i32, i32
  }
  func.func @transform_12(%arg0: i32) -> (i32, i32) {
    %c0_i32 = arith.constant 0 : i32
    %c0_i32_0 = arith.constant 0 : i32
    %c0_i32_1 = arith.constant 0 : i32
    return %c0_i32, %c0_i32_0 : i32, i32
  }
  func.func @transform_13(%arg0: i32) -> (i32, i32) {
    %c0_i32 = arith.constant 0 : i32
    %c0_i32_0 = arith.constant 0 : i32
    %c0_i32_1 = arith.constant 0 : i32
    return %c0_i32, %c0_i32_0 : i32, i32
  }
  func.func @transform_14(%arg0: i32) -> (i32, i32) {
    %c0_i32 = arith.constant 0 : i32
    %c0_i32_0 = arith.constant 0 : i32
    %c0_i32_1 = arith.constant 0 : i32
    return %c0_i32, %c0_i32_0 : i32, i32
  }
  func.func @transform_15(%arg0: i32) -> (i32, i32) {
    %c0_i32 = arith.constant 0 : i32
    %c0_i32_0 = arith.constant 0 : i32
    %c0_i32_1 = arith.constant 0 : i32
    return %c0_i32, %c0_i32_0 : i32, i32
  }
  func.func @transform_16(%arg0: i32) -> (i32, i32) {
    %c0_i32 = arith.constant 0 : i32
    %c0_i32_0 = arith.constant 0 : i32
    %c0_i32_1 = arith.constant 0 : i32
    return %c0_i32, %c0_i32_0 : i32, i32
  }
  func.func @transform_17(%arg0: i32) -> (i32, i32) {
    %c0_i32 = arith.constant 0 : i32
    %c0_i32_0 = arith.constant 0 : i32
    %c0_i32_1 = arith.constant 0 : i32
    return %c0_i32, %c0_i32_0 : i32, i32
  }
  func.func @transform_18(%arg0: i32) -> (i32, i32) {
    %c0_i32 = arith.constant 0 : i32
    %c0_i32_0 = arith.constant 0 : i32
    %c0_i32_1 = arith.constant 0 : i32
    return %c0_i32, %c0_i32_0 : i32, i32
  }
  func.func @transform_19(%arg0: i32) -> (i32, i32) {
    %c0_i32 = arith.constant 0 : i32
    %c0_i32_0 = arith.constant 0 : i32
    %c0_i32_1 = arith.constant 0 : i32
    return %c0_i32, %c0_i32_0 : i32, i32
  }
  func.func @transform_20(%arg0: i32) -> (i32, i32) {
    %c0_i32 = arith.constant 0 : i32
    %c0_i32_0 = arith.constant 0 : i32
    %c0_i32_1 = arith.constant 0 : i32
    return %c0_i32, %c0_i32_0 : i32, i32
  }
  func.func @transform_21(%arg0: i32) -> (i32, i32) {
    %c0_i32 = arith.constant 0 : i32
    %c0_i32_0 = arith.constant 0 : i32
    %c0_i32_1 = arith.constant 0 : i32
    return %c0_i32, %c0_i32_0 : i32, i32
  }
  func.func @transform_22(%arg0: i32) -> (i32, i32) {
    %c0_i32 = arith.constant 0 : i32
    %c0_i32_0 = arith.constant 0 : i32
    %c0_i32_1 = arith.constant 0 : i32
    return %c0_i32, %c0_i32_0 : i32, i32
  }
  func.func @transform_23(%arg0: i32) -> (i32, i32) {
    %c0_i32 = arith.constant 0 : i32
    %c0_i32_0 = arith.constant 0 : i32
    %c0_i32_1 = arith.constant 0 : i32
    return %c0_i32, %c0_i32_0 : i32, i32
  }
  func.func @transform_24(%arg0: i32) -> (i32, i32, i32) {
    %c0_i32 = arith.constant 0 : i32
    %c0_i32_0 = arith.constant 0 : i32
    %c0_i32_1 = arith.constant 0 : i32
    %c0_i32_2 = arith.constant 0 : i32
    return %c0_i32, %c0_i32_0, %c0_i32_1 : i32, i32, i32
  }
}

module attributes {stable_mosaic.version = 11 : i64} {
  func.func @_decoder_layer_kernel(%arg0: i32, %arg1: i32, %arg2: memref<1x1x8x32xbf16, #tpu.memory_space<vmem>>, %arg3: memref<1x1x8x32xbf16, #tpu.memory_space<vmem>>, %arg4: memref<1x20x32xbf16, #tpu.memory_space<vmem>>, %arg5: memref<1x32x64xbf16, #tpu.memory_space<vmem>>, %arg6: memref<1x1x64xf32, #tpu.memory_space<vmem>>, %arg7: memref<1x32x32xbf16, #tpu.memory_space<vmem>>, %arg8: memref<1x1x32xf32, #tpu.memory_space<vmem>>, %arg9: memref<1x32x32xbf16, #tpu.memory_space<vmem>>, %arg10: memref<1x1x32xf32, #tpu.memory_space<vmem>>, %arg11: memref<1x1x32xf32, #tpu.memory_space<vmem>>, %arg12: memref<1x1x32xf32, #tpu.memory_space<vmem>>, %arg13: memref<1x32x32xbf16, #tpu.memory_space<vmem>>, %arg14: memref<1x1x32xf32, #tpu.memory_space<vmem>>, %arg15: memref<1x32x64xbf16, #tpu.memory_space<vmem>>, %arg16: memref<1x1x64xf32, #tpu.memory_space<vmem>>, %arg17: memref<1x32x32xbf16, #tpu.memory_space<vmem>>, %arg18: memref<1x1x32xf32, #tpu.memory_space<vmem>>, %arg19: memref<1x1x32xf32, #tpu.memory_space<vmem>>, %arg20: memref<1x1x32xf32, #tpu.memory_space<vmem>>, %arg21: memref<1x32x64xbf16, #tpu.memory_space<vmem>>, %arg22: memref<1x1x64xf32, #tpu.memory_space<vmem>>, %arg23: memref<1x64x32xbf16, #tpu.memory_space<vmem>>, %arg24: memref<1x1x32xf32, #tpu.memory_space<vmem>>, %arg25: memref<1x1x32xf32, #tpu.memory_space<vmem>>, %arg26: memref<1x1x32xf32, #tpu.memory_space<vmem>>, %arg27: memref<1x1x32xf32, #tpu.memory_space<vmem>>, %arg28: memref<1x1x32xf32, #tpu.memory_space<vmem>>, %arg29: memref<1x1x8x32xbf16, #tpu.memory_space<vmem>>, %arg30: memref<1x1x8x32xbf16, #tpu.memory_space<vmem>>) attributes {dimension_semantics = [#tpu.dimension_semantics<parallel>, #tpu.dimension_semantics<parallel>], iteration_bounds = array<i64: 2, 2>, scalar_prefetch = 0 : i64, scratch_operands = 0 : i64, tpu.core_type = #tpu.core_type<tc>, window_params = [{transform_indices = @transform_0, window_bounds = array<i64: 1, 1, 8, 32>}, {transform_indices = @transform_1, window_bounds = array<i64: 1, 1, 8, 32>}, {transform_indices = @transform_2, window_bounds = array<i64: 1, 20, 32>}, {transform_indices = @transform_3, window_bounds = array<i64: 1, 32, 64>}, {transform_indices = @transform_4, window_bounds = array<i64: 1, 1, 64>}, {transform_indices = @transform_5, window_bounds = array<i64: 1, 32, 32>}, {transform_indices = @transform_6, window_bounds = array<i64: 1, 1, 32>}, {transform_indices = @transform_7, window_bounds = array<i64: 1, 32, 32>}, {transform_indices = @transform_8, window_bounds = array<i64: 1, 1, 32>}, {transform_indices = @transform_9, window_bounds = array<i64: 1, 1, 32>}, {transform_indices = @transform_10, window_bounds = array<i64: 1, 1, 32>}, {transform_indices = @transform_11, window_bounds = array<i64: 1, 32, 32>}, {transform_indices = @transform_12, window_bounds = array<i64: 1, 1, 32>}, {transform_indices = @transform_13, window_bounds = array<i64: 1, 32, 64>}, {transform_indices = @transform_14, window_bounds = array<i64: 1, 1, 64>}, {transform_indices = @transform_15, window_bounds = array<i64: 1, 32, 32>}, {transform_indices = @transform_16, window_bounds = array<i64: 1, 1, 32>}, {transform_indices = @transform_17, window_bounds = array<i64: 1, 1, 32>}, {transform_indices = @transform_18, window_bounds = array<i64: 1, 1, 32>}, {transform_indices = @transform_19, window_bounds = array<i64: 1, 32, 64>}, {transform_indices = @transform_20, window_bounds = array<i64: 1, 1, 64>}, {transform_indices = @transform_21, window_bounds = array<i64: 1, 64, 32>}, {transform_indices = @transform_22, window_bounds = array<i64: 1, 1, 32>}, {transform_indices = @transform_23, window_bounds = array<i64: 1, 1, 32>}, {transform_indices = @transform_24, window_bounds = array<i64: 1, 1, 32>}, {transform_indices = @transform_25, window_bounds = array<i64: 1, 1, 32>}, {transform_indices = @transform_26, window_bounds = array<i64: 1, 1, 32>}, {transform_indices = @transform_27, window_bounds = array<i64: 1, 1, 8, 32>}, {transform_indices = @transform_28, window_bounds = array<i64: 1, 1, 8, 32>}]} {
    %c0 = arith.constant 0 : index
    %c0_0 = arith.constant 0 : index
    %c0_1 = arith.constant 0 : index
    %c0_2 = arith.constant 0 : index
    %0 = vector.load %arg2[%c0, %c0_0, %c0_1, %c0_2] : memref<1x1x8x32xbf16, #tpu.memory_space<vmem>>, vector<1x1x8x32xbf16>
    %1 = vector.shape_cast %0 : vector<1x1x8x32xbf16> to vector<8x32xbf16>
    %c0_3 = arith.constant 0 : index
    %c0_4 = arith.constant 0 : index
    %c0_5 = arith.constant 0 : index
    %c0_6 = arith.constant 0 : index
    %2 = vector.load %arg3[%c0_3, %c0_4, %c0_5, %c0_6] : memref<1x1x8x32xbf16, #tpu.memory_space<vmem>>, vector<1x1x8x32xbf16>
    %3 = vector.shape_cast %2 : vector<1x1x8x32xbf16> to vector<8x32xbf16>
    %4 = arith.extf %3 : vector<8x32xbf16> to vector<8x32xf32>
    %c0_7 = arith.constant 0 : index
    %c0_8 = arith.constant 0 : index
    %c0_9 = arith.constant 0 : index
    %5 = vector.load %arg4[%c0_7, %c0_8, %c0_9] : memref<1x20x32xbf16, #tpu.memory_space<vmem>>, vector<1x20x32xbf16>
    %6 = vector.shape_cast %5 : vector<1x20x32xbf16> to vector<20x32xbf16>
    %7 = arith.extf %1 : vector<8x32xbf16> to vector<8x32xf32>
    %8 = arith.addf %7, %4 : vector<8x32xf32>
    %9 = arith.truncf %8 : vector<8x32xf32> to vector<8x32xbf16>
    %c0_10 = arith.constant 0 : index
    %c0_11 = arith.constant 0 : index
    %c0_12 = arith.constant 0 : index
    %10 = vector.load %arg5[%c0_10, %c0_11, %c0_12] : memref<1x32x64xbf16, #tpu.memory_space<vmem>>, vector<1x32x64xbf16>
    %11 = vector.shape_cast %10 : vector<1x32x64xbf16> to vector<32x64xbf16>
    %cst = arith.constant dense<0.000000e+00> : vector<8x64xf32>
    %12 = tpu.matmul %9, %11, %cst {dimension_numbers = #tpu.dot_dimension_numbers<[1], [0], [0], [1], [0, 0, 1, 1], [], []>} : vector<8x32xbf16>, vector<32x64xbf16>, vector<8x64xf32> -> vector<8x64xf32>
    %c0_13 = arith.constant 0 : index
    %c0_14 = arith.constant 0 : index
    %c0_15 = arith.constant 0 : index
    %13 = vector.load %arg6[%c0_13, %c0_14, %c0_15] : memref<1x1x64xf32, #tpu.memory_space<vmem>>, vector<1x1x64xf32>
    %14 = vector.shape_cast %13 : vector<1x1x64xf32> to vector<1x64xf32>
    %15 = vector.broadcast %14 : vector<1x64xf32> to vector<8x64xf32>
    %16 = arith.addf %12, %15 : vector<8x64xf32>
    %17 = arith.truncf %16 : vector<8x64xf32> to vector<8x64xbf16>
    %c0_16 = arith.constant 0 : index
    %c0_17 = arith.constant 0 : index
    %c0_18 = arith.constant 0 : index
    %18 = vector.load %arg7[%c0_16, %c0_17, %c0_18] : memref<1x32x32xbf16, #tpu.memory_space<vmem>>, vector<1x32x32xbf16>
    %19 = vector.shape_cast %18 : vector<1x32x32xbf16> to vector<32x32xbf16>
    %cst_19 = arith.constant dense<0.000000e+00> : vector<8x32xf32>
    %20 = tpu.matmul %1, %19, %cst_19 {dimension_numbers = #tpu.dot_dimension_numbers<[1], [0], [0], [1], [0, 0, 1, 1], [], []>} : vector<8x32xbf16>, vector<32x32xbf16>, vector<8x32xf32> -> vector<8x32xf32>
    %c0_20 = arith.constant 0 : index
    %c0_21 = arith.constant 0 : index
    %c0_22 = arith.constant 0 : index
    %21 = vector.load %arg8[%c0_20, %c0_21, %c0_22] : memref<1x1x32xf32, #tpu.memory_space<vmem>>, vector<1x1x32xf32>
    %22 = vector.shape_cast %21 : vector<1x1x32xf32> to vector<1x32xf32>
    %23 = vector.broadcast %22 : vector<1x32xf32> to vector<8x32xf32>
    %24 = arith.addf %20, %23 : vector<8x32xf32>
    %25 = arith.truncf %24 : vector<8x32xf32> to vector<8x32xbf16>
    %26 = vector.extract_strided_slice %17 {offsets = [0, 0], sizes = [8, 32], strides = [1, 1]} : vector<8x64xbf16> to vector<8x32xbf16>
    %27 = vector.extract_strided_slice %17 {offsets = [0, 32], sizes = [8, 32], strides = [1, 1]} : vector<8x64xbf16> to vector<8x32xbf16>
    %28 = vector.shape_cast %26 : vector<8x32xbf16> to vector<8x4x8xbf16>
    %29 = tpu.transpose %28, [1, 0, 2] : vector<8x4x8xbf16> -> vector<4x8x8xbf16>
    %30 = vector.shape_cast %27 : vector<8x32xbf16> to vector<8x4x8xbf16>
    %31 = tpu.transpose %30, [1, 0, 2] : vector<8x4x8xbf16> -> vector<4x8x8xbf16>
    %32 = vector.shape_cast %25 : vector<8x32xbf16> to vector<8x4x8xbf16>
    %33 = tpu.transpose %32, [1, 0, 2] : vector<8x4x8xbf16> -> vector<4x8x8xbf16>
    %cst_23 = arith.constant dense<0.000000e+00> : vector<4x8x8xf32>
    %34 = tpu.matmul %29, %31, %cst_23 {dimension_numbers = #tpu.dot_dimension_numbers<[2], [2], [1], [1], [0, 0, 0, 1, 1, 1], [0], [0]>} : vector<4x8x8xbf16>, vector<4x8x8xbf16>, vector<4x8x8xf32> -> vector<4x8x8xf32>
    %cst_24 = arith.constant 0.353553385 : f32
    %35 = vector.broadcast %cst_24 : f32 to vector<4x8x8xf32>
    %36 = arith.mulf %34, %35 : vector<4x8x8xf32>
    %cst_25 = arith.constant dense<0xFF800000> : vector<4x8xf32>
    %37 = vector.multi_reduction <maximumf>, %36, %cst_25 [2] : vector<4x8x8xf32> to vector<4x8xf32>
    %38 = vector.shape_cast %37 : vector<4x8xf32> to vector<4x8x1xf32>
    %39 = vector.broadcast %38 : vector<4x8x1xf32> to vector<4x8x8xf32>
    %40 = arith.subf %36, %39 : vector<4x8x8xf32>
    %41 = math.exp %40 : vector<4x8x8xf32>
    %cst_26 = arith.constant dense<0.000000e+00> : vector<4x8xf32>
    %42 = vector.multi_reduction <add>, %41, %cst_26 [2] : vector<4x8x8xf32> to vector<4x8xf32>
    %43 = vector.shape_cast %42 : vector<4x8xf32> to vector<4x8x1xf32>
    %44 = tpu.reciprocal %43 {approx = true} : vector<4x8x1xf32> -> vector<4x8x1xf32>
    %45 = vector.broadcast %44 : vector<4x8x1xf32> to vector<4x8x8xf32>
    %46 = arith.mulf %41, %45 : vector<4x8x8xf32>
    %47 = arith.truncf %46 : vector<4x8x8xf32> to vector<4x8x8xbf16>
    %cst_27 = arith.constant dense<0.000000e+00> : vector<4x8x8xf32>
    %48 = tpu.matmul %47, %33, %cst_27 {dimension_numbers = #tpu.dot_dimension_numbers<[2], [1], [1], [2], [0, 0, 0, 1, 1, 2], [0], [0]>} : vector<4x8x8xbf16>, vector<4x8x8xbf16>, vector<4x8x8xf32> -> vector<4x8x8xf32>
    %49 = tpu.transpose %48, [1, 0, 2] : vector<4x8x8xf32> -> vector<8x4x8xf32>
    %50 = vector.shape_cast %49 : vector<8x4x8xf32> to vector<8x32xf32>
    %c0_28 = arith.constant 0 : index
    %c0_29 = arith.constant 0 : index
    %c0_30 = arith.constant 0 : index
    %51 = vector.load %arg9[%c0_28, %c0_29, %c0_30] : memref<1x32x32xbf16, #tpu.memory_space<vmem>>, vector<1x32x32xbf16>
    %52 = vector.shape_cast %51 : vector<1x32x32xbf16> to vector<32x32xbf16>
    %53 = arith.truncf %50 : vector<8x32xf32> to vector<8x32xbf16>
    %cst_31 = arith.constant dense<0.000000e+00> : vector<8x32xf32>
    %54 = tpu.matmul %53, %52, %cst_31 {dimension_numbers = #tpu.dot_dimension_numbers<[1], [0], [0], [1], [0, 0, 1, 1], [], []>} : vector<8x32xbf16>, vector<32x32xbf16>, vector<8x32xf32> -> vector<8x32xf32>
    %c0_32 = arith.constant 0 : index
    %c0_33 = arith.constant 0 : index
    %c0_34 = arith.constant 0 : index
    %55 = vector.load %arg10[%c0_32, %c0_33, %c0_34] : memref<1x1x32xf32, #tpu.memory_space<vmem>>, vector<1x1x32xf32>
    %56 = vector.shape_cast %55 : vector<1x1x32xf32> to vector<1x32xf32>
    %57 = vector.broadcast %56 : vector<1x32xf32> to vector<8x32xf32>
    %58 = arith.addf %54, %57 : vector<8x32xf32>
    %59 = arith.addf %7, %58 : vector<8x32xf32>
    %c0_35 = arith.constant 0 : index
    %c0_36 = arith.constant 0 : index
    %c0_37 = arith.constant 0 : index
    %60 = vector.load %arg11[%c0_35, %c0_36, %c0_37] : memref<1x1x32xf32, #tpu.memory_space<vmem>>, vector<1x1x32xf32>
    %61 = vector.shape_cast %60 : vector<1x1x32xf32> to vector<1x32xf32>
    %c0_38 = arith.constant 0 : index
    %c0_39 = arith.constant 0 : index
    %c0_40 = arith.constant 0 : index
    %62 = vector.load %arg12[%c0_38, %c0_39, %c0_40] : memref<1x1x32xf32, #tpu.memory_space<vmem>>, vector<1x1x32xf32>
    %63 = vector.shape_cast %62 : vector<1x1x32xf32> to vector<1x32xf32>
    %cst_41 = arith.constant dense<0.000000e+00> : vector<8xf32>
    %64 = vector.multi_reduction <add>, %59, %cst_41 [1] : vector<8x32xf32> to vector<8xf32>
    %65 = vector.shape_cast %64 : vector<8xf32> to vector<8x1xf32>
    %cst_42 = arith.constant 3.200000e+01 : f32
    %66 = vector.broadcast %cst_42 : f32 to vector<8x1xf32>
    %67 = arith.divf %65, %66 : vector<8x1xf32>
    %68 = vector.broadcast %67 : vector<8x1xf32> to vector<8x32xf32>
    %69 = arith.subf %59, %68 : vector<8x32xf32>
    %70 = arith.mulf %69, %69 : vector<8x32xf32>
    %cst_43 = arith.constant dense<0.000000e+00> : vector<8xf32>
    %71 = vector.multi_reduction <add>, %70, %cst_43 [1] : vector<8x32xf32> to vector<8xf32>
    %72 = vector.shape_cast %71 : vector<8xf32> to vector<8x1xf32>
    %cst_44 = arith.constant 3.200000e+01 : f32
    %73 = vector.broadcast %cst_44 : f32 to vector<8x1xf32>
    %74 = arith.divf %72, %73 : vector<8x1xf32>
    %75 = vector.broadcast %67 : vector<8x1xf32> to vector<8x32xf32>
    %76 = arith.subf %59, %75 : vector<8x32xf32>
    %cst_45 = arith.constant 9.99999974E-6 : f32
    %77 = vector.broadcast %cst_45 : f32 to vector<8x1xf32>
    %78 = arith.addf %74, %77 : vector<8x1xf32>
    %79 = math.rsqrt %78 : vector<8x1xf32>
    %80 = vector.broadcast %79 : vector<8x1xf32> to vector<8x32xf32>
    %81 = arith.mulf %76, %80 : vector<8x32xf32>
    %82 = vector.broadcast %61 : vector<1x32xf32> to vector<8x32xf32>
    %83 = arith.mulf %81, %82 : vector<8x32xf32>
    %84 = vector.broadcast %63 : vector<1x32xf32> to vector<8x32xf32>
    %85 = arith.addf %83, %84 : vector<8x32xf32>
    %86 = arith.addf %85, %4 : vector<8x32xf32>
    %87 = arith.truncf %86 : vector<8x32xf32> to vector<8x32xbf16>
    %c0_46 = arith.constant 0 : index
    %c0_47 = arith.constant 0 : index
    %c0_48 = arith.constant 0 : index
    %88 = vector.load %arg13[%c0_46, %c0_47, %c0_48] : memref<1x32x32xbf16, #tpu.memory_space<vmem>>, vector<1x32x32xbf16>
    %89 = vector.shape_cast %88 : vector<1x32x32xbf16> to vector<32x32xbf16>
    %cst_49 = arith.constant dense<0.000000e+00> : vector<8x32xf32>
    %90 = tpu.matmul %87, %89, %cst_49 {dimension_numbers = #tpu.dot_dimension_numbers<[1], [0], [0], [1], [0, 0, 1, 1], [], []>} : vector<8x32xbf16>, vector<32x32xbf16>, vector<8x32xf32> -> vector<8x32xf32>
    %c0_50 = arith.constant 0 : index
    %c0_51 = arith.constant 0 : index
    %c0_52 = arith.constant 0 : index
    %91 = vector.load %arg14[%c0_50, %c0_51, %c0_52] : memref<1x1x32xf32, #tpu.memory_space<vmem>>, vector<1x1x32xf32>
    %92 = vector.shape_cast %91 : vector<1x1x32xf32> to vector<1x32xf32>
    %93 = vector.broadcast %92 : vector<1x32xf32> to vector<8x32xf32>
    %94 = arith.addf %90, %93 : vector<8x32xf32>
    %95 = arith.truncf %94 : vector<8x32xf32> to vector<8x32xbf16>
    %c0_53 = arith.constant 0 : index
    %c0_54 = arith.constant 0 : index
    %c0_55 = arith.constant 0 : index
    %96 = vector.load %arg15[%c0_53, %c0_54, %c0_55] : memref<1x32x64xbf16, #tpu.memory_space<vmem>>, vector<1x32x64xbf16>
    %97 = vector.shape_cast %96 : vector<1x32x64xbf16> to vector<32x64xbf16>
    %cst_56 = arith.constant dense<0.000000e+00> : vector<20x64xf32>
    %98 = tpu.matmul %6, %97, %cst_56 {dimension_numbers = #tpu.dot_dimension_numbers<[1], [0], [0], [1], [0, 0, 1, 1], [], []>} : vector<20x32xbf16>, vector<32x64xbf16>, vector<20x64xf32> -> vector<20x64xf32>
    %c0_57 = arith.constant 0 : index
    %c0_58 = arith.constant 0 : index
    %c0_59 = arith.constant 0 : index
    %99 = vector.load %arg16[%c0_57, %c0_58, %c0_59] : memref<1x1x64xf32, #tpu.memory_space<vmem>>, vector<1x1x64xf32>
    %100 = vector.shape_cast %99 : vector<1x1x64xf32> to vector<1x64xf32>
    %101 = vector.broadcast %100 : vector<1x64xf32> to vector<20x64xf32>
    %102 = arith.addf %98, %101 : vector<20x64xf32>
    %103 = arith.truncf %102 : vector<20x64xf32> to vector<20x64xbf16>
    %104 = vector.extract_strided_slice %103 {offsets = [0, 0], sizes = [20, 32], strides = [1, 1]} : vector<20x64xbf16> to vector<20x32xbf16>
    %105 = vector.extract_strided_slice %103 {offsets = [0, 32], sizes = [20, 32], strides = [1, 1]} : vector<20x64xbf16> to vector<20x32xbf16>
    %106 = vector.shape_cast %95 : vector<8x32xbf16> to vector<8x4x8xbf16>
    %107 = tpu.transpose %106, [1, 0, 2] : vector<8x4x8xbf16> -> vector<4x8x8xbf16>
    %108 = vector.shape_cast %104 : vector<20x32xbf16> to vector<20x4x8xbf16>
    %109 = tpu.transpose %108, [1, 0, 2] : vector<20x4x8xbf16> -> vector<4x20x8xbf16>
    %110 = vector.shape_cast %105 : vector<20x32xbf16> to vector<20x4x8xbf16>
    %111 = tpu.transpose %110, [1, 0, 2] : vector<20x4x8xbf16> -> vector<4x20x8xbf16>
    %cst_60 = arith.constant dense<0.000000e+00> : vector<4x8x20xf32>
    %112 = tpu.matmul %107, %109, %cst_60 {dimension_numbers = #tpu.dot_dimension_numbers<[2], [2], [1], [1], [0, 0, 0, 1, 1, 1], [0], [0]>} : vector<4x8x8xbf16>, vector<4x20x8xbf16>, vector<4x8x20xf32> -> vector<4x8x20xf32>
    %cst_61 = arith.constant 0.353553385 : f32
    %113 = vector.broadcast %cst_61 : f32 to vector<4x8x20xf32>
    %114 = arith.mulf %112, %113 : vector<4x8x20xf32>
    %cst_62 = arith.constant dense<0xFF800000> : vector<4x8xf32>
    %115 = vector.multi_reduction <maximumf>, %114, %cst_62 [2] : vector<4x8x20xf32> to vector<4x8xf32>
    %116 = vector.shape_cast %115 : vector<4x8xf32> to vector<4x8x1xf32>
    %117 = vector.broadcast %116 : vector<4x8x1xf32> to vector<4x8x20xf32>
    %118 = arith.subf %114, %117 : vector<4x8x20xf32>
    %119 = math.exp %118 : vector<4x8x20xf32>
    %cst_63 = arith.constant dense<0.000000e+00> : vector<4x8xf32>
    %120 = vector.multi_reduction <add>, %119, %cst_63 [2] : vector<4x8x20xf32> to vector<4x8xf32>
    %121 = vector.shape_cast %120 : vector<4x8xf32> to vector<4x8x1xf32>
    %122 = tpu.reciprocal %121 {approx = true} : vector<4x8x1xf32> -> vector<4x8x1xf32>
    %123 = vector.broadcast %122 : vector<4x8x1xf32> to vector<4x8x20xf32>
    %124 = arith.mulf %119, %123 : vector<4x8x20xf32>
    %125 = arith.truncf %124 : vector<4x8x20xf32> to vector<4x8x20xbf16>
    %cst_64 = arith.constant dense<0.000000e+00> : vector<4x8x8xf32>
    %126 = tpu.matmul %125, %111, %cst_64 {dimension_numbers = #tpu.dot_dimension_numbers<[2], [1], [1], [2], [0, 0, 0, 1, 1, 2], [0], [0]>} : vector<4x8x20xbf16>, vector<4x20x8xbf16>, vector<4x8x8xf32> -> vector<4x8x8xf32>
    %127 = tpu.transpose %126, [1, 0, 2] : vector<4x8x8xf32> -> vector<8x4x8xf32>
    %128 = vector.shape_cast %127 : vector<8x4x8xf32> to vector<8x32xf32>
    %c0_65 = arith.constant 0 : index
    %c0_66 = arith.constant 0 : index
    %c0_67 = arith.constant 0 : index
    %129 = vector.load %arg17[%c0_65, %c0_66, %c0_67] : memref<1x32x32xbf16, #tpu.memory_space<vmem>>, vector<1x32x32xbf16>
    %130 = vector.shape_cast %129 : vector<1x32x32xbf16> to vector<32x32xbf16>
    %131 = arith.truncf %128 : vector<8x32xf32> to vector<8x32xbf16>
    %cst_68 = arith.constant dense<0.000000e+00> : vector<8x32xf32>
    %132 = tpu.matmul %131, %130, %cst_68 {dimension_numbers = #tpu.dot_dimension_numbers<[1], [0], [0], [1], [0, 0, 1, 1], [], []>} : vector<8x32xbf16>, vector<32x32xbf16>, vector<8x32xf32> -> vector<8x32xf32>
    %c0_69 = arith.constant 0 : index
    %c0_70 = arith.constant 0 : index
    %c0_71 = arith.constant 0 : index
    %133 = vector.load %arg18[%c0_69, %c0_70, %c0_71] : memref<1x1x32xf32, #tpu.memory_space<vmem>>, vector<1x1x32xf32>
    %134 = vector.shape_cast %133 : vector<1x1x32xf32> to vector<1x32xf32>
    %135 = vector.broadcast %134 : vector<1x32xf32> to vector<8x32xf32>
    %136 = arith.addf %132, %135 : vector<8x32xf32>
    %137 = arith.addf %85, %136 : vector<8x32xf32>
    %c0_72 = arith.constant 0 : index
    %c0_73 = arith.constant 0 : index
    %c0_74 = arith.constant 0 : index
    %138 = vector.load %arg19[%c0_72, %c0_73, %c0_74] : memref<1x1x32xf32, #tpu.memory_space<vmem>>, vector<1x1x32xf32>
    %139 = vector.shape_cast %138 : vector<1x1x32xf32> to vector<1x32xf32>
    %c0_75 = arith.constant 0 : index
    %c0_76 = arith.constant 0 : index
    %c0_77 = arith.constant 0 : index
    %140 = vector.load %arg20[%c0_75, %c0_76, %c0_77] : memref<1x1x32xf32, #tpu.memory_space<vmem>>, vector<1x1x32xf32>
    %141 = vector.shape_cast %140 : vector<1x1x32xf32> to vector<1x32xf32>
    %cst_78 = arith.constant dense<0.000000e+00> : vector<8xf32>
    %142 = vector.multi_reduction <add>, %137, %cst_78 [1] : vector<8x32xf32> to vector<8xf32>
    %143 = vector.shape_cast %142 : vector<8xf32> to vector<8x1xf32>
    %cst_79 = arith.constant 3.200000e+01 : f32
    %144 = vector.broadcast %cst_79 : f32 to vector<8x1xf32>
    %145 = arith.divf %143, %144 : vector<8x1xf32>
    %146 = vector.broadcast %145 : vector<8x1xf32> to vector<8x32xf32>
    %147 = arith.subf %137, %146 : vector<8x32xf32>
    %148 = arith.mulf %147, %147 : vector<8x32xf32>
    %cst_80 = arith.constant dense<0.000000e+00> : vector<8xf32>
    %149 = vector.multi_reduction <add>, %148, %cst_80 [1] : vector<8x32xf32> to vector<8xf32>
    %150 = vector.shape_cast %149 : vector<8xf32> to vector<8x1xf32>
    %cst_81 = arith.constant 3.200000e+01 : f32
    %151 = vector.broadcast %cst_81 : f32 to vector<8x1xf32>
    %152 = arith.divf %150, %151 : vector<8x1xf32>
    %153 = vector.broadcast %145 : vector<8x1xf32> to vector<8x32xf32>
    %154 = arith.subf %137, %153 : vector<8x32xf32>
    %cst_82 = arith.constant 9.99999974E-6 : f32
    %155 = vector.broadcast %cst_82 : f32 to vector<8x1xf32>
    %156 = arith.addf %152, %155 : vector<8x1xf32>
    %157 = math.rsqrt %156 : vector<8x1xf32>
    %158 = vector.broadcast %157 : vector<8x1xf32> to vector<8x32xf32>
    %159 = arith.mulf %154, %158 : vector<8x32xf32>
    %160 = vector.broadcast %139 : vector<1x32xf32> to vector<8x32xf32>
    %161 = arith.mulf %159, %160 : vector<8x32xf32>
    %162 = vector.broadcast %141 : vector<1x32xf32> to vector<8x32xf32>
    %163 = arith.addf %161, %162 : vector<8x32xf32>
    %c0_83 = arith.constant 0 : index
    %c0_84 = arith.constant 0 : index
    %c0_85 = arith.constant 0 : index
    %164 = vector.load %arg21[%c0_83, %c0_84, %c0_85] : memref<1x32x64xbf16, #tpu.memory_space<vmem>>, vector<1x32x64xbf16>
    %165 = vector.shape_cast %164 : vector<1x32x64xbf16> to vector<32x64xbf16>
    %166 = arith.truncf %163 : vector<8x32xf32> to vector<8x32xbf16>
    %cst_86 = arith.constant dense<0.000000e+00> : vector<8x64xf32>
    %167 = tpu.matmul %166, %165, %cst_86 {dimension_numbers = #tpu.dot_dimension_numbers<[1], [0], [0], [1], [0, 0, 1, 1], [], []>} : vector<8x32xbf16>, vector<32x64xbf16>, vector<8x64xf32> -> vector<8x64xf32>
    %c0_87 = arith.constant 0 : index
    %c0_88 = arith.constant 0 : index
    %c0_89 = arith.constant 0 : index
    %168 = vector.load %arg22[%c0_87, %c0_88, %c0_89] : memref<1x1x64xf32, #tpu.memory_space<vmem>>, vector<1x1x64xf32>
    %169 = vector.shape_cast %168 : vector<1x1x64xf32> to vector<1x64xf32>
    %170 = vector.broadcast %169 : vector<1x64xf32> to vector<8x64xf32>
    %171 = arith.addf %167, %170 : vector<8x64xf32>
    %cst_90 = arith.constant 0.000000e+00 : f32
    %172 = vector.broadcast %cst_90 : f32 to vector<8x64xf32>
    %173 = arith.maximumf %171, %172 : vector<8x64xf32>
    %c0_91 = arith.constant 0 : index
    %c0_92 = arith.constant 0 : index
    %c0_93 = arith.constant 0 : index
    %174 = vector.load %arg23[%c0_91, %c0_92, %c0_93] : memref<1x64x32xbf16, #tpu.memory_space<vmem>>, vector<1x64x32xbf16>
    %175 = vector.shape_cast %174 : vector<1x64x32xbf16> to vector<64x32xbf16>
    %176 = arith.truncf %173 : vector<8x64xf32> to vector<8x64xbf16>
    %cst_94 = arith.constant dense<0.000000e+00> : vector<8x32xf32>
    %177 = tpu.matmul %176, %175, %cst_94 {dimension_numbers = #tpu.dot_dimension_numbers<[1], [0], [0], [1], [0, 0, 1, 1], [], []>} : vector<8x64xbf16>, vector<64x32xbf16>, vector<8x32xf32> -> vector<8x32xf32>
    %c0_95 = arith.constant 0 : index
    %c0_96 = arith.constant 0 : index
    %c0_97 = arith.constant 0 : index
    %178 = vector.load %arg24[%c0_95, %c0_96, %c0_97] : memref<1x1x32xf32, #tpu.memory_space<vmem>>, vector<1x1x32xf32>
    %179 = vector.shape_cast %178 : vector<1x1x32xf32> to vector<1x32xf32>
    %180 = vector.broadcast %179 : vector<1x32xf32> to vector<8x32xf32>
    %181 = arith.addf %177, %180 : vector<8x32xf32>
    %182 = arith.addf %163, %181 : vector<8x32xf32>
    %c0_98 = arith.constant 0 : index
    %c0_99 = arith.constant 0 : index
    %c0_100 = arith.constant 0 : index
    %183 = vector.load %arg25[%c0_98, %c0_99, %c0_100] : memref<1x1x32xf32, #tpu.memory_space<vmem>>, vector<1x1x32xf32>
    %184 = vector.shape_cast %183 : vector<1x1x32xf32> to vector<1x32xf32>
    %c0_101 = arith.constant 0 : index
    %c0_102 = arith.constant 0 : index
    %c0_103 = arith.constant 0 : index
    %185 = vector.load %arg26[%c0_101, %c0_102, %c0_103] : memref<1x1x32xf32, #tpu.memory_space<vmem>>, vector<1x1x32xf32>
    %186 = vector.shape_cast %185 : vector<1x1x32xf32> to vector<1x32xf32>
    %cst_104 = arith.constant dense<0.000000e+00> : vector<8xf32>
    %187 = vector.multi_reduction <add>, %182, %cst_104 [1] : vector<8x32xf32> to vector<8xf32>
    %188 = vector.shape_cast %187 : vector<8xf32> to vector<8x1xf32>
    %cst_105 = arith.constant 3.200000e+01 : f32
    %189 = vector.broadcast %cst_105 : f32 to vector<8x1xf32>
    %190 = arith.divf %188, %189 : vector<8x1xf32>
    %191 = vector.broadcast %190 : vector<8x1xf32> to vector<8x32xf32>
    %192 = arith.subf %182, %191 : vector<8x32xf32>
    %193 = arith.mulf %192, %192 : vector<8x32xf32>
    %cst_106 = arith.constant dense<0.000000e+00> : vector<8xf32>
    %194 = vector.multi_reduction <add>, %193, %cst_106 [1] : vector<8x32xf32> to vector<8xf32>
    %195 = vector.shape_cast %194 : vector<8xf32> to vector<8x1xf32>
    %cst_107 = arith.constant 3.200000e+01 : f32
    %196 = vector.broadcast %cst_107 : f32 to vector<8x1xf32>
    %197 = arith.divf %195, %196 : vector<8x1xf32>
    %198 = vector.broadcast %190 : vector<8x1xf32> to vector<8x32xf32>
    %199 = arith.subf %182, %198 : vector<8x32xf32>
    %cst_108 = arith.constant 9.99999974E-6 : f32
    %200 = vector.broadcast %cst_108 : f32 to vector<8x1xf32>
    %201 = arith.addf %197, %200 : vector<8x1xf32>
    %202 = math.rsqrt %201 : vector<8x1xf32>
    %203 = vector.broadcast %202 : vector<8x1xf32> to vector<8x32xf32>
    %204 = arith.mulf %199, %203 : vector<8x32xf32>
    %205 = vector.broadcast %184 : vector<1x32xf32> to vector<8x32xf32>
    %206 = arith.mulf %204, %205 : vector<8x32xf32>
    %207 = vector.broadcast %186 : vector<1x32xf32> to vector<8x32xf32>
    %208 = arith.addf %206, %207 : vector<8x32xf32>
    %209 = arith.truncf %208 : vector<8x32xf32> to vector<8x32xbf16>
    %c0_109 = arith.constant 0 : index
    %c0_110 = arith.constant 0 : index
    %c0_111 = arith.constant 0 : index
    %c0_112 = arith.constant 0 : index
    %210 = vector.load %arg29[%c0_109, %c0_110, %c0_111, %c0_112] : memref<1x1x8x32xbf16, #tpu.memory_space<vmem>>, vector<1x1x8x32xbf16>
    %211 = vector.shape_cast %210 : vector<1x1x8x32xbf16> to vector<8x32xbf16>
    %212 = vector.shape_cast %209 : vector<8x32xbf16> to vector<1x1x8x32xbf16>
    tpu.vector_store %arg29[%c0_109, %c0_110, %c0_111, %c0_112], %212 {strides = array<i32>} : memref<1x1x8x32xbf16, #tpu.memory_space<vmem>>, vector<1x1x8x32xbf16>,
    %c0_113 = arith.constant 0 : index
    %c0_114 = arith.constant 0 : index
    %c0_115 = arith.constant 0 : index
    %213 = vector.load %arg27[%c0_113, %c0_114, %c0_115] : memref<1x1x32xf32, #tpu.memory_space<vmem>>, vector<1x1x32xf32>
    %214 = vector.shape_cast %213 : vector<1x1x32xf32> to vector<1x32xf32>
    %c0_116 = arith.constant 0 : index
    %c0_117 = arith.constant 0 : index
    %c0_118 = arith.constant 0 : index
    %215 = vector.load %arg28[%c0_116, %c0_117, %c0_118] : memref<1x1x32xf32, #tpu.memory_space<vmem>>, vector<1x1x32xf32>
    %216 = vector.shape_cast %215 : vector<1x1x32xf32> to vector<1x32xf32>
    %cst_119 = arith.constant dense<0.000000e+00> : vector<8xf32>
    %217 = vector.multi_reduction <add>, %208, %cst_119 [1] : vector<8x32xf32> to vector<8xf32>
    %218 = vector.shape_cast %217 : vector<8xf32> to vector<8x1xf32>
    %cst_120 = arith.constant 3.200000e+01 : f32
    %219 = vector.broadcast %cst_120 : f32 to vector<8x1xf32>
    %220 = arith.divf %218, %219 : vector<8x1xf32>
    %221 = vector.broadcast %220 : vector<8x1xf32> to vector<8x32xf32>
    %222 = arith.subf %208, %221 : vector<8x32xf32>
    %223 = arith.mulf %222, %222 : vector<8x32xf32>
    %cst_121 = arith.constant dense<0.000000e+00> : vector<8xf32>
    %224 = vector.multi_reduction <add>, %223, %cst_121 [1] : vector<8x32xf32> to vector<8xf32>
    %225 = vector.shape_cast %224 : vector<8xf32> to vector<8x1xf32>
    %cst_122 = arith.constant 3.200000e+01 : f32
    %226 = vector.broadcast %cst_122 : f32 to vector<8x1xf32>
    %227 = arith.divf %225, %226 : vector<8x1xf32>
    %228 = vector.broadcast %220 : vector<8x1xf32> to vector<8x32xf32>
    %229 = arith.subf %208, %228 : vector<8x32xf32>
    %cst_123 = arith.constant 9.99999974E-6 : f32
    %230 = vector.broadcast %cst_123 : f32 to vector<8x1xf32>
    %231 = arith.addf %227, %230 : vector<8x1xf32>
    %232 = math.rsqrt %231 : vector<8x1xf32>
    %233 = vector.broadcast %232 : vector<8x1xf32> to vector<8x32xf32>
    %234 = arith.mulf %229, %233 : vector<8x32xf32>
    %235 = vector.broadcast %214 : vector<1x32xf32> to vector<8x32xf32>
    %236 = arith.mulf %234, %235 : vector<8x32xf32>
    %237 = vector.broadcast %216 : vector<1x32xf32> to vector<8x32xf32>
    %238 = arith.addf %236, %237 : vector<8x32xf32>
    %239 = arith.truncf %238 : vector<8x32xf32> to vector<8x32xbf16>
    %c0_124 = arith.constant 0 : index
    %c0_125 = arith.constant 0 : index
    %c0_126 = arith.constant 0 : index
    %c0_127 = arith.constant 0 : index
    %240 = vector.load %arg30[%c0_124, %c0_125, %c0_126, %c0_127] : memref<1x1x8x32xbf16, #tpu.memory_space<vmem>>, vector<1x1x8x32xbf16>
    %241 = vector.shape_cast %240 : vector<1x1x8x32xbf16> to vector<8x32xbf16>
    %242 = vector.shape_cast %239 : vector<8x32xbf16> to vector<1x1x8x32xbf16>
    tpu.vector_store %arg30[%c0_124, %c0_125, %c0_126, %c0_127], %242 {strides = array<i32>} : memref<1x1x8x32xbf16, #tpu.memory_space<vmem>>, vector<1x1x8x32xbf16>,
    return
  }
  func.func @transform_0(%arg0: i32, %arg1: i32) -> (i32, i32, i32, i32) {
    %c0_i32 = arith.constant 0 : i32
    %c0_i32_0 = arith.constant 0 : i32
    %c0_i32_1 = arith.constant 0 : i32
    return %arg1, %arg0, %c0_i32, %c0_i32_0 : i32, i32, i32, i32
  }
  func.func @transform_1(%arg0: i32, %arg1: i32) -> (i32, i32, i32, i32) {
    %c0_i32 = arith.constant 0 : i32
    %c0_i32_0 = arith.constant 0 : i32
    %c0_i32_1 = arith.constant 0 : i32
    return %arg1, %arg0, %c0_i32, %c0_i32_0 : i32, i32, i32, i32
  }
  func.func @transform_2(%arg0: i32, %arg1: i32) -> (i32, i32, i32) {
    %c0_i32 = arith.constant 0 : i32
    %c0_i32_0 = arith.constant 0 : i32
    %c0_i32_1 = arith.constant 0 : i32
    return %arg0, %c0_i32, %c0_i32_0 : i32, i32, i32
  }
  func.func @transform_3(%arg0: i32, %arg1: i32) -> (i32, i32, i32) {
    %c0_i32 = arith.constant 0 : i32
    %c0_i32_0 = arith.constant 0 : i32
    %c0_i32_1 = arith.constant 0 : i32
    return %arg1, %c0_i32, %c0_i32_0 : i32, i32, i32
  }
  func.func @transform_4(%arg0: i32, %arg1: i32) -> (i32, i32, i32) {
    %c0_i32 = arith.constant 0 : i32
    %c0_i32_0 = arith.constant 0 : i32
    %c0_i32_1 = arith.constant 0 : i32
    return %arg1, %c0_i32, %c0_i32_0 : i32, i32, i32
  }
  func.func @transform_5(%arg0: i32, %arg1: i32) -> (i32, i32, i32) {
    %c0_i32 = arith.constant 0 : i32
    %c0_i32_0 = arith.constant 0 : i32
    %c0_i32_1 = arith.constant 0 : i32
    return %arg1, %c0_i32, %c0_i32_0 : i32, i32, i32
  }
  func.func @transform_6(%arg0: i32, %arg1: i32) -> (i32, i32, i32) {
    %c0_i32 = arith.constant 0 : i32
    %c0_i32_0 = arith.constant 0 : i32
    %c0_i32_1 = arith.constant 0 : i32
    return %arg1, %c0_i32, %c0_i32_0 : i32, i32, i32
  }
  func.func @transform_7(%arg0: i32, %arg1: i32) -> (i32, i32, i32) {
    %c0_i32 = arith.constant 0 : i32
    %c0_i32_0 = arith.constant 0 : i32
    %c0_i32_1 = arith.constant 0 : i32
    return %arg1, %c0_i32, %c0_i32_0 : i32, i32, i32
  }
  func.func @transform_8(%arg0: i32, %arg1: i32) -> (i32, i32, i32) {
    %c0_i32 = arith.constant 0 : i32
    %c0_i32_0 = arith.constant 0 : i32
    %c0_i32_1 = arith.constant 0 : i32
    return %arg1, %c0_i32, %c0_i32_0 : i32, i32, i32
  }
  func.func @transform_9(%arg0: i32, %arg1: i32) -> (i32, i32, i32) {
    %c0_i32 = arith.constant 0 : i32
    %c0_i32_0 = arith.constant 0 : i32
    %c0_i32_1 = arith.constant 0 : i32
    return %arg1, %c0_i32, %c0_i32_0 : i32, i32, i32
  }
  func.func @transform_10(%arg0: i32, %arg1: i32) -> (i32, i32, i32) {
    %c0_i32 = arith.constant 0 : i32
    %c0_i32_0 = arith.constant 0 : i32
    %c0_i32_1 = arith.constant 0 : i32
    return %arg1, %c0_i32, %c0_i32_0 : i32, i32, i32
  }
  func.func @transform_11(%arg0: i32, %arg1: i32) -> (i32, i32, i32) {
    %c0_i32 = arith.constant 0 : i32
    %c0_i32_0 = arith.constant 0 : i32
    %c0_i32_1 = arith.constant 0 : i32
    return %arg1, %c0_i32, %c0_i32_0 : i32, i32, i32
  }
  func.func @transform_12(%arg0: i32, %arg1: i32) -> (i32, i32, i32) {
    %c0_i32 = arith.constant 0 : i32
    %c0_i32_0 = arith.constant 0 : i32
    %c0_i32_1 = arith.constant 0 : i32
    return %arg1, %c0_i32, %c0_i32_0 : i32, i32, i32
  }
  func.func @transform_13(%arg0: i32, %arg1: i32) -> (i32, i32, i32) {
    %c0_i32 = arith.constant 0 : i32
    %c0_i32_0 = arith.constant 0 : i32
    %c0_i32_1 = arith.constant 0 : i32
    return %arg1, %c0_i32, %c0_i32_0 : i32, i32, i32
  }
  func.func @transform_14(%arg0: i32, %arg1: i32) -> (i32, i32, i32) {
    %c0_i32 = arith.constant 0 : i32
    %c0_i32_0 = arith.constant 0 : i32
    %c0_i32_1 = arith.constant 0 : i32
    return %arg1, %c0_i32, %c0_i32_0 : i32, i32, i32
  }
  func.func @transform_15(%arg0: i32, %arg1: i32) -> (i32, i32, i32) {
    %c0_i32 = arith.constant 0 : i32
    %c0_i32_0 = arith.constant 0 : i32
    %c0_i32_1 = arith.constant 0 : i32
    return %arg1, %c0_i32, %c0_i32_0 : i32, i32, i32
  }
  func.func @transform_16(%arg0: i32, %arg1: i32) -> (i32, i32, i32) {
    %c0_i32 = arith.constant 0 : i32
    %c0_i32_0 = arith.constant 0 : i32
    %c0_i32_1 = arith.constant 0 : i32
    return %arg1, %c0_i32, %c0_i32_0 : i32, i32, i32
  }
  func.func @transform_17(%arg0: i32, %arg1: i32) -> (i32, i32, i32) {
    %c0_i32 = arith.constant 0 : i32
    %c0_i32_0 = arith.constant 0 : i32
    %c0_i32_1 = arith.constant 0 : i32
    return %arg1, %c0_i32, %c0_i32_0 : i32, i32, i32
  }
  func.func @transform_18(%arg0: i32, %arg1: i32) -> (i32, i32, i32) {
    %c0_i32 = arith.constant 0 : i32
    %c0_i32_0 = arith.constant 0 : i32
    %c0_i32_1 = arith.constant 0 : i32
    return %arg1, %c0_i32, %c0_i32_0 : i32, i32, i32
  }
  func.func @transform_19(%arg0: i32, %arg1: i32) -> (i32, i32, i32) {
    %c0_i32 = arith.constant 0 : i32
    %c0_i32_0 = arith.constant 0 : i32
    %c0_i32_1 = arith.constant 0 : i32
    return %arg1, %c0_i32, %c0_i32_0 : i32, i32, i32
  }
  func.func @transform_20(%arg0: i32, %arg1: i32) -> (i32, i32, i32) {
    %c0_i32 = arith.constant 0 : i32
    %c0_i32_0 = arith.constant 0 : i32
    %c0_i32_1 = arith.constant 0 : i32
    return %arg1, %c0_i32, %c0_i32_0 : i32, i32, i32
  }
  func.func @transform_21(%arg0: i32, %arg1: i32) -> (i32, i32, i32) {
    %c0_i32 = arith.constant 0 : i32
    %c0_i32_0 = arith.constant 0 : i32
    %c0_i32_1 = arith.constant 0 : i32
    return %arg1, %c0_i32, %c0_i32_0 : i32, i32, i32
  }
  func.func @transform_22(%arg0: i32, %arg1: i32) -> (i32, i32, i32) {
    %c0_i32 = arith.constant 0 : i32
    %c0_i32_0 = arith.constant 0 : i32
    %c0_i32_1 = arith.constant 0 : i32
    return %arg1, %c0_i32, %c0_i32_0 : i32, i32, i32
  }
  func.func @transform_23(%arg0: i32, %arg1: i32) -> (i32, i32, i32) {
    %c0_i32 = arith.constant 0 : i32
    %c0_i32_0 = arith.constant 0 : i32
    %c0_i32_1 = arith.constant 0 : i32
    return %arg1, %c0_i32, %c0_i32_0 : i32, i32, i32
  }
  func.func @transform_24(%arg0: i32, %arg1: i32) -> (i32, i32, i32) {
    %c0_i32 = arith.constant 0 : i32
    %c0_i32_0 = arith.constant 0 : i32
    %c0_i32_1 = arith.constant 0 : i32
    return %arg1, %c0_i32, %c0_i32_0 : i32, i32, i32
  }
  func.func @transform_25(%arg0: i32, %arg1: i32) -> (i32, i32, i32) {
    %c0_i32 = arith.constant 0 : i32
    %c0_i32_0 = arith.constant 0 : i32
    %c0_i32_1 = arith.constant 0 : i32
    return %arg1, %c0_i32, %c0_i32_0 : i32, i32, i32
  }
  func.func @transform_26(%arg0: i32, %arg1: i32) -> (i32, i32, i32) {
    %c0_i32 = arith.constant 0 : i32
    %c0_i32_0 = arith.constant 0 : i32
    %c0_i32_1 = arith.constant 0 : i32
    return %arg1, %c0_i32, %c0_i32_0 : i32, i32, i32
  }
  func.func @transform_27(%arg0: i32, %arg1: i32) -> (i32, i32, i32, i32) {
    %c0_i32 = arith.constant 0 : i32
    %c0_i32_0 = arith.constant 0 : i32
    %c0_i32_1 = arith.constant 0 : i32
    return %arg1, %arg0, %c0_i32, %c0_i32_0 : i32, i32, i32, i32
  }
  func.func @transform_28(%arg0: i32, %arg1: i32) -> (i32, i32, i32, i32) {
    %c0_i32 = arith.constant 0 : i32
    %c0_i32_0 = arith.constant 0 : i32
    %c0_i32_1 = arith.constant 0 : i32
    return %arg1, %arg0, %c0_i32, %c0_i32_0 : i32, i32, i32, i32
  }
}

module attributes {stable_mosaic.version = 11 : i64} {
  func.func @_ternary_fusion_kernel(%arg0: i32, %arg1: memref<16x32xbf16, #tpu.memory_space<vmem>>, %arg2: memref<16x32xbf16, #tpu.memory_space<vmem>>, %arg3: memref<16x16xf32, #tpu.memory_space<vmem>>, %arg4: memref<32x32xbf16, #tpu.memory_space<vmem>>, %arg5: memref<1x32xf32, #tpu.memory_space<vmem>>, %arg6: memref<32x32xbf16, #tpu.memory_space<vmem>>, %arg7: memref<1x32xf32, #tpu.memory_space<vmem>>, %arg8: memref<1x32xf32, #tpu.memory_space<vmem>>, %arg9: memref<1x32xf32, #tpu.memory_space<vmem>>, %arg10: memref<16x64xbf16, #tpu.memory_space<vmem>>, %arg11: memref<1x64xf32, #tpu.memory_space<vmem>>, %arg12: memref<1x64xf32, #tpu.memory_space<vmem>>, %arg13: memref<1x64xf32, #tpu.memory_space<vmem>>, %arg14: memref<64x32xbf16, #tpu.memory_space<vmem>>, %arg15: memref<1x32xf32, #tpu.memory_space<vmem>>, %arg16: memref<32x32xbf16, #tpu.memory_space<vmem>>, %arg17: memref<1x32xf32, #tpu.memory_space<vmem>>, %arg18: memref<1x32xf32, #tpu.memory_space<vmem>>, %arg19: memref<1x32xf32, #tpu.memory_space<vmem>>, %arg20: memref<16x32xbf16, #tpu.memory_space<vmem>>) attributes {dimension_semantics = [#tpu.dimension_semantics<arbitrary>], iteration_bounds = array<i64: 1>, scalar_prefetch = 0 : i64, scratch_operands = 0 : i64, tpu.core_type = #tpu.core_type<tc>, window_params = [{pipeline_mode = #tpu.pipeline_mode<synchronous>, transform_indices = @transform_0, window_bounds = array<i64: 16, 32>}, {pipeline_mode = #tpu.pipeline_mode<synchronous>, transform_indices = @transform_1, window_bounds = array<i64: 16, 32>}, {pipeline_mode = #tpu.pipeline_mode<synchronous>, transform_indices = @transform_2, window_bounds = array<i64: 16, 16>}, {pipeline_mode = #tpu.pipeline_mode<synchronous>, transform_indices = @transform_3, window_bounds = array<i64: 32, 32>}, {pipeline_mode = #tpu.pipeline_mode<synchronous>, transform_indices = @transform_4, window_bounds = array<i64: 1, 32>}, {pipeline_mode = #tpu.pipeline_mode<synchronous>, transform_indices = @transform_5, window_bounds = array<i64: 32, 32>}, {pipeline_mode = #tpu.pipeline_mode<synchronous>, transform_indices = @transform_6, window_bounds = array<i64: 1, 32>}, {pipeline_mode = #tpu.pipeline_mode<synchronous>, transform_indices = @transform_7, window_bounds = array<i64: 1, 32>}, {pipeline_mode = #tpu.pipeline_mode<synchronous>, transform_indices = @transform_8, window_bounds = array<i64: 1, 32>}, {pipeline_mode = #tpu.pipeline_mode<synchronous>, transform_indices = @transform_9, window_bounds = array<i64: 16, 64>}, {pipeline_mode = #tpu.pipeline_mode<synchronous>, transform_indices = @transform_10, window_bounds = array<i64: 1, 64>}, {pipeline_mode = #tpu.pipeline_mode<synchronous>, transform_indices = @transform_11, window_bounds = array<i64: 1, 64>}, {pipeline_mode = #tpu.pipeline_mode<synchronous>, transform_indices = @transform_12, window_bounds = array<i64: 1, 64>}, {pipeline_mode = #tpu.pipeline_mode<synchronous>, transform_indices = @transform_13, window_bounds = array<i64: 64, 32>}, {pipeline_mode = #tpu.pipeline_mode<synchronous>, transform_indices = @transform_14, window_bounds = array<i64: 1, 32>}, {pipeline_mode = #tpu.pipeline_mode<synchronous>, transform_indices = @transform_15, window_bounds = array<i64: 32, 32>}, {pipeline_mode = #tpu.pipeline_mode<synchronous>, transform_indices = @transform_16, window_bounds = array<i64: 1, 32>}, {pipeline_mode = #tpu.pipeline_mode<synchronous>, transform_indices = @transform_17, window_bounds = array<i64: 1, 32>}, {pipeline_mode = #tpu.pipeline_mode<synchronous>, transform_indices = @transform_18, window_bounds = array<i64: 1, 32>}, {pipeline_mode = #tpu.pipeline_mode<synchronous>, transform_indices = @transform_19, window_bounds = array<i64: 16, 32>}]} {
    %c0 = arith.constant 0 : index
    %c0_0 = arith.constant 0 : index
    %0 = vector.load %arg1[%c0, %c0_0] : memref<16x32xbf16, #tpu.memory_space<vmem>>, vector<16x32xbf16>
    %c0_1 = arith.constant 0 : index
    %c0_2 = arith.constant 0 : index
    %1 = vector.load %arg2[%c0_1, %c0_2] : memref<16x32xbf16, #tpu.memory_space<vmem>>, vector<16x32xbf16>
    %c0_3 = arith.constant 0 : index
    %c0_4 = arith.constant 0 : index
    %2 = vector.load %arg3[%c0_3, %c0_4] : memref<16x16xf32, #tpu.memory_space<vmem>>, vector<16x16xf32>
    %c0_5 = arith.constant 0 : index
    %c0_6 = arith.constant 0 : index
    %3 = vector.load %arg4[%c0_5, %c0_6] : memref<32x32xbf16, #tpu.memory_space<vmem>>, vector<32x32xbf16>
    %cst = arith.constant dense<0.000000e+00> : vector<16x32xf32>
    %4 = tpu.matmul %0, %3, %cst {dimension_numbers = #tpu.dot_dimension_numbers<[1], [0], [0], [1], [0, 0, 1, 1], [], []>} : vector<16x32xbf16>, vector<32x32xbf16>, vector<16x32xf32> -> vector<16x32xf32>
    %c0_7 = arith.constant 0 : index
    %c0_8 = arith.constant 0 : index
    %5 = vector.load %arg5[%c0_7, %c0_8] : memref<1x32xf32, #tpu.memory_space<vmem>>, vector<1x32xf32>
    %6 = vector.broadcast %5 : vector<1x32xf32> to vector<16x32xf32>
    %7 = arith.addf %4, %6 : vector<16x32xf32>
    %c0_9 = arith.constant 0 : index
    %c0_10 = arith.constant 0 : index
    %8 = vector.load %arg6[%c0_9, %c0_10] : memref<32x32xbf16, #tpu.memory_space<vmem>>, vector<32x32xbf16>
    %cst_11 = arith.constant dense<0.000000e+00> : vector<16x32xf32>
    %9 = tpu.matmul %1, %8, %cst_11 {dimension_numbers = #tpu.dot_dimension_numbers<[1], [0], [0], [1], [0, 0, 1, 1], [], []>} : vector<16x32xbf16>, vector<32x32xbf16>, vector<16x32xf32> -> vector<16x32xf32>
    %10 = arith.addf %7, %9 : vector<16x32xf32>
    %c0_12 = arith.constant 0 : index
    %c0_13 = arith.constant 0 : index
    %11 = vector.load %arg7[%c0_12, %c0_13] : memref<1x32xf32, #tpu.memory_space<vmem>>, vector<1x32xf32>
    %12 = vector.broadcast %11 : vector<1x32xf32> to vector<16x32xf32>
    %13 = arith.addf %10, %12 : vector<16x32xf32>
    %c0_14 = arith.constant 0 : index
    %c0_15 = arith.constant 0 : index
    %14 = vector.load %arg8[%c0_14, %c0_15] : memref<1x32xf32, #tpu.memory_space<vmem>>, vector<1x32xf32>
    %c0_16 = arith.constant 0 : index
    %c0_17 = arith.constant 0 : index
    %15 = vector.load %arg9[%c0_16, %c0_17] : memref<1x32xf32, #tpu.memory_space<vmem>>, vector<1x32xf32>
    %cst_18 = arith.constant dense<0.000000e+00> : vector<16xf32>
    %16 = vector.multi_reduction <add>, %13, %cst_18 [1] : vector<16x32xf32> to vector<16xf32>
    %17 = vector.shape_cast %16 : vector<16xf32> to vector<16x1xf32>
    %cst_19 = arith.constant 3.200000e+01 : f32
    %18 = vector.broadcast %cst_19 : f32 to vector<16x1xf32>
    %19 = arith.divf %17, %18 : vector<16x1xf32>
    %20 = vector.broadcast %19 : vector<16x1xf32> to vector<16x32xf32>
    %21 = arith.subf %13, %20 : vector<16x32xf32>
    %22 = arith.mulf %21, %21 : vector<16x32xf32>
    %cst_20 = arith.constant dense<0.000000e+00> : vector<16xf32>
    %23 = vector.multi_reduction <add>, %22, %cst_20 [1] : vector<16x32xf32> to vector<16xf32>
    %24 = vector.shape_cast %23 : vector<16xf32> to vector<16x1xf32>
    %cst_21 = arith.constant 3.200000e+01 : f32
    %25 = vector.broadcast %cst_21 : f32 to vector<16x1xf32>
    %26 = arith.divf %24, %25 : vector<16x1xf32>
    %27 = vector.broadcast %19 : vector<16x1xf32> to vector<16x32xf32>
    %28 = arith.subf %13, %27 : vector<16x32xf32>
    %cst_22 = arith.constant 9.99999974E-6 : f32
    %29 = vector.broadcast %cst_22 : f32 to vector<16x1xf32>
    %30 = arith.addf %26, %29 : vector<16x1xf32>
    %31 = math.rsqrt %30 : vector<16x1xf32>
    %32 = vector.broadcast %31 : vector<16x1xf32> to vector<16x32xf32>
    %33 = arith.mulf %28, %32 : vector<16x32xf32>
    %34 = vector.broadcast %14 : vector<1x32xf32> to vector<16x32xf32>
    %35 = arith.mulf %33, %34 : vector<16x32xf32>
    %36 = vector.broadcast %15 : vector<1x32xf32> to vector<16x32xf32>
    %37 = arith.addf %35, %36 : vector<16x32xf32>
    %cst_23 = arith.constant 0.000000e+00 : f32
    %38 = vector.broadcast %cst_23 : f32 to vector<16x32xf32>
    %39 = arith.maximumf %37, %38 : vector<16x32xf32>
    %c0_24 = arith.constant 0 : index
    %c0_25 = arith.constant 0 : index
    %40 = vector.load %arg10[%c0_24, %c0_25] : memref<16x64xbf16, #tpu.memory_space<vmem>>, vector<16x64xbf16>
    %41 = arith.truncf %2 : vector<16x16xf32> to vector<16x16xbf16>
    %cst_26 = arith.constant dense<0.000000e+00> : vector<16x64xf32>
    %42 = tpu.matmul %41, %40, %cst_26 {dimension_numbers = #tpu.dot_dimension_numbers<[1], [0], [0], [1], [0, 0, 1, 1], [], []>} : vector<16x16xbf16>, vector<16x64xbf16>, vector<16x64xf32> -> vector<16x64xf32>
    %c0_27 = arith.constant 0 : index
    %c0_28 = arith.constant 0 : index
    %43 = vector.load %arg11[%c0_27, %c0_28] : memref<1x64xf32, #tpu.memory_space<vmem>>, vector<1x64xf32>
    %44 = vector.broadcast %43 : vector<1x64xf32> to vector<16x64xf32>
    %45 = arith.addf %42, %44 : vector<16x64xf32>
    %c0_29 = arith.constant 0 : index
    %c0_30 = arith.constant 0 : index
    %46 = vector.load %arg12[%c0_29, %c0_30] : memref<1x64xf32, #tpu.memory_space<vmem>>, vector<1x64xf32>
    %c0_31 = arith.constant 0 : index
    %c0_32 = arith.constant 0 : index
    %47 = vector.load %arg13[%c0_31, %c0_32] : memref<1x64xf32, #tpu.memory_space<vmem>>, vector<1x64xf32>
    %cst_33 = arith.constant dense<0.000000e+00> : vector<16xf32>
    %48 = vector.multi_reduction <add>, %45, %cst_33 [1] : vector<16x64xf32> to vector<16xf32>
    %49 = vector.shape_cast %48 : vector<16xf32> to vector<16x1xf32>
    %cst_34 = arith.constant 6.400000e+01 : f32
    %50 = vector.broadcast %cst_34 : f32 to vector<16x1xf32>
    %51 = arith.divf %49, %50 : vector<16x1xf32>
    %52 = vector.broadcast %51 : vector<16x1xf32> to vector<16x64xf32>
    %53 = arith.subf %45, %52 : vector<16x64xf32>
    %54 = arith.mulf %53, %53 : vector<16x64xf32>
    %cst_35 = arith.constant dense<0.000000e+00> : vector<16xf32>
    %55 = vector.multi_reduction <add>, %54, %cst_35 [1] : vector<16x64xf32> to vector<16xf32>
    %56 = vector.shape_cast %55 : vector<16xf32> to vector<16x1xf32>
    %cst_36 = arith.constant 6.400000e+01 : f32
    %57 = vector.broadcast %cst_36 : f32 to vector<16x1xf32>
    %58 = arith.divf %56, %57 : vector<16x1xf32>
    %59 = vector.broadcast %51 : vector<16x1xf32> to vector<16x64xf32>
    %60 = arith.subf %45, %59 : vector<16x64xf32>
    %cst_37 = arith.constant 9.99999974E-6 : f32
    %61 = vector.broadcast %cst_37 : f32 to vector<16x1xf32>
    %62 = arith.addf %58, %61 : vector<16x1xf32>
    %63 = math.rsqrt %62 : vector<16x1xf32>
    %64 = vector.broadcast %63 : vector<16x1xf32> to vector<16x64xf32>
    %65 = arith.mulf %60, %64 : vector<16x64xf32>
    %66 = vector.broadcast %46 : vector<1x64xf32> to vector<16x64xf32>
    %67 = arith.mulf %65, %66 : vector<16x64xf32>
    %68 = vector.broadcast %47 : vector<1x64xf32> to vector<16x64xf32>
    %69 = arith.addf %67, %68 : vector<16x64xf32>
    %cst_38 = arith.constant 0.000000e+00 : f32
    %70 = vector.broadcast %cst_38 : f32 to vector<16x64xf32>
    %71 = arith.maximumf %69, %70 : vector<16x64xf32>
    %c0_39 = arith.constant 0 : index
    %c0_40 = arith.constant 0 : index
    %72 = vector.load %arg14[%c0_39, %c0_40] : memref<64x32xbf16, #tpu.memory_space<vmem>>, vector<64x32xbf16>
    %73 = arith.truncf %71 : vector<16x64xf32> to vector<16x64xbf16>
    %cst_41 = arith.constant dense<0.000000e+00> : vector<16x32xf32>
    %74 = tpu.matmul %73, %72, %cst_41 {dimension_numbers = #tpu.dot_dimension_numbers<[1], [0], [0], [1], [0, 0, 1, 1], [], []>} : vector<16x64xbf16>, vector<64x32xbf16>, vector<16x32xf32> -> vector<16x32xf32>
    %c0_42 = arith.constant 0 : index
    %c0_43 = arith.constant 0 : index
    %75 = vector.load %arg15[%c0_42, %c0_43] : memref<1x32xf32, #tpu.memory_space<vmem>>, vector<1x32xf32>
    %76 = vector.broadcast %75 : vector<1x32xf32> to vector<16x32xf32>
    %77 = arith.addf %74, %76 : vector<16x32xf32>
    %c0_44 = arith.constant 0 : index
    %c0_45 = arith.constant 0 : index
    %78 = vector.load %arg16[%c0_44, %c0_45] : memref<32x32xbf16, #tpu.memory_space<vmem>>, vector<32x32xbf16>
    %79 = arith.truncf %39 : vector<16x32xf32> to vector<16x32xbf16>
    %cst_46 = arith.constant dense<0.000000e+00> : vector<16x32xf32>
    %80 = tpu.matmul %79, %78, %cst_46 {dimension_numbers = #tpu.dot_dimension_numbers<[1], [0], [0], [1], [0, 0, 1, 1], [], []>} : vector<16x32xbf16>, vector<32x32xbf16>, vector<16x32xf32> -> vector<16x32xf32>
    %c0_47 = arith.constant 0 : index
    %c0_48 = arith.constant 0 : index
    %81 = vector.load %arg17[%c0_47, %c0_48] : memref<1x32xf32, #tpu.memory_space<vmem>>, vector<1x32xf32>
    %82 = vector.broadcast %81 : vector<1x32xf32> to vector<16x32xf32>
    %83 = arith.addf %80, %82 : vector<16x32xf32>
    %84 = arith.addf %83, %77 : vector<16x32xf32>
    %c0_49 = arith.constant 0 : index
    %c0_50 = arith.constant 0 : index
    %85 = vector.load %arg18[%c0_49, %c0_50] : memref<1x32xf32, #tpu.memory_space<vmem>>, vector<1x32xf32>
    %c0_51 = arith.constant 0 : index
    %c0_52 = arith.constant 0 : index
    %86 = vector.load %arg19[%c0_51, %c0_52] : memref<1x32xf32, #tpu.memory_space<vmem>>, vector<1x32xf32>
    %cst_53 = arith.constant dense<0.000000e+00> : vector<16xf32>
    %87 = vector.multi_reduction <add>, %84, %cst_53 [1] : vector<16x32xf32> to vector<16xf32>
    %88 = vector.shape_cast %87 : vector<16xf32> to vector<16x1xf32>
    %cst_54 = arith.constant 3.200000e+01 : f32
    %89 = vector.broadcast %cst_54 : f32 to vector<16x1xf32>
    %90 = arith.divf %88, %89 : vector<16x1xf32>
    %91 = vector.broadcast %90 : vector<16x1xf32> to vector<16x32xf32>
    %92 = arith.subf %84, %91 : vector<16x32xf32>
    %93 = arith.mulf %92, %92 : vector<16x32xf32>
    %cst_55 = arith.constant dense<0.000000e+00> : vector<16xf32>
    %94 = vector.multi_reduction <add>, %93, %cst_55 [1] : vector<16x32xf32> to vector<16xf32>
    %95 = vector.shape_cast %94 : vector<16xf32> to vector<16x1xf32>
    %cst_56 = arith.constant 3.200000e+01 : f32
    %96 = vector.broadcast %cst_56 : f32 to vector<16x1xf32>
    %97 = arith.divf %95, %96 : vector<16x1xf32>
    %98 = vector.broadcast %90 : vector<16x1xf32> to vector<16x32xf32>
    %99 = arith.subf %84, %98 : vector<16x32xf32>
    %cst_57 = arith.constant 9.99999974E-6 : f32
    %100 = vector.broadcast %cst_57 : f32 to vector<16x1xf32>
    %101 = arith.addf %97, %100 : vector<16x1xf32>
    %102 = math.rsqrt %101 : vector<16x1xf32>
    %103 = vector.broadcast %102 : vector<16x1xf32> to vector<16x32xf32>
    %104 = arith.mulf %99, %103 : vector<16x32xf32>
    %105 = vector.broadcast %85 : vector<1x32xf32> to vector<16x32xf32>
    %106 = arith.mulf %104, %105 : vector<16x32xf32>
    %107 = vector.broadcast %86 : vector<1x32xf32> to vector<16x32xf32>
    %108 = arith.addf %106, %107 : vector<16x32xf32>
    %109 = arith.truncf %108 : vector<16x32xf32> to vector<16x32xbf16>
    %c0_58 = arith.constant 0 : index
    %c0_59 = arith.constant 0 : index
    %110 = vector.load %arg20[%c0_58, %c0_59] : memref<16x32xbf16, #tpu.memory_space<vmem>>, vector<16x32xbf16>
    tpu.vector_store %arg20[%c0_58, %c0_59], %109 {strides = array<i32>} : memref<16x32xbf16, #tpu.memory_space<vmem>>, vector<16x32xbf16>,
    return
  }
  func.func @transform_0(%arg0: i32) -> (i32, i32) {
    %c0_i32 = arith.constant 0 : i32
    %c0_i32_0 = arith.constant 0 : i32
    %c0_i32_1 = arith.constant 0 : i32
    return %c0_i32, %c0_i32_0 : i32, i32
  }
  func.func @transform_1(%arg0: i32) -> (i32, i32) {
    %c0_i32 = arith.constant 0 : i32
    %c0_i32_0 = arith.constant 0 : i32
    %c0_i32_1 = arith.constant 0 : i32
    return %c0_i32, %c0_i32_0 : i32, i32
  }
  func.func @transform_2(%arg0: i32) -> (i32, i32) {
    %c0_i32 = arith.constant 0 : i32
    %c0_i32_0 = arith.constant 0 : i32
    %c0_i32_1 = arith.constant 0 : i32
    return %c0_i32, %c0_i32_0 : i32, i32
  }
  func.func @transform_3(%arg0: i32) -> (i32, i32) {
    %c0_i32 = arith.constant 0 : i32
    %c0_i32_0 = arith.constant 0 : i32
    %c0_i32_1 = arith.constant 0 : i32
    return %c0_i32, %c0_i32_0 : i32, i32
  }
  func.func @transform_4(%arg0: i32) -> (i32, i32) {
    %c0_i32 = arith.constant 0 : i32
    %c0_i32_0 = arith.constant 0 : i32
    %c0_i32_1 = arith.constant 0 : i32
    return %c0_i32, %c0_i32_0 : i32, i32
  }
  func.func @transform_5(%arg0: i32) -> (i32, i32) {
    %c0_i32 = arith.constant 0 : i32
    %c0_i32_0 = arith.constant 0 : i32
    %c0_i32_1 = arith.constant 0 : i32
    return %c0_i32, %c0_i32_0 : i32, i32
  }
  func.func @transform_6(%arg0: i32) -> (i32, i32) {
    %c0_i32 = arith.constant 0 : i32
    %c0_i32_0 = arith.constant 0 : i32
    %c0_i32_1 = arith.constant 0 : i32
    return %c0_i32, %c0_i32_0 : i32, i32
  }
  func.func @transform_7(%arg0: i32) -> (i32, i32) {
    %c0_i32 = arith.constant 0 : i32
    %c0_i32_0 = arith.constant 0 : i32
    %c0_i32_1 = arith.constant 0 : i32
    return %c0_i32, %c0_i32_0 : i32, i32
  }
  func.func @transform_8(%arg0: i32) -> (i32, i32) {
    %c0_i32 = arith.constant 0 : i32
    %c0_i32_0 = arith.constant 0 : i32
    %c0_i32_1 = arith.constant 0 : i32
    return %c0_i32, %c0_i32_0 : i32, i32
  }
  func.func @transform_9(%arg0: i32) -> (i32, i32) {
    %c0_i32 = arith.constant 0 : i32
    %c0_i32_0 = arith.constant 0 : i32
    %c0_i32_1 = arith.constant 0 : i32
    return %c0_i32, %c0_i32_0 : i32, i32
  }
  func.func @transform_10(%arg0: i32) -> (i32, i32) {
    %c0_i32 = arith.constant 0 : i32
    %c0_i32_0 = arith.constant 0 : i32
    %c0_i32_1 = arith.constant 0 : i32
    return %c0_i32, %c0_i32_0 : i32, i32
  }
  func.func @transform_11(%arg0: i32) -> (i32, i32) {
    %c0_i32 = arith.constant 0 : i32
    %c0_i32_0 = arith.constant 0 : i32
    %c0_i32_1 = arith.constant 0 : i32
    return %c0_i32, %c0_i32_0 : i32, i32
  }
  func.func @transform_12(%arg0: i32) -> (i32, i32) {
    %c0_i32 = arith.constant 0 : i32
    %c0_i32_0 = arith.constant 0 : i32
    %c0_i32_1 = arith.constant 0 : i32
    return %c0_i32, %c0_i32_0 : i32, i32
  }
  func.func @transform_13(%arg0: i32) -> (i32, i32) {
    %c0_i32 = arith.constant 0 : i32
    %c0_i32_0 = arith.constant 0 : i32
    %c0_i32_1 = arith.constant 0 : i32
    return %c0_i32, %c0_i32_0 : i32, i32
  }
  func.func @transform_14(%arg0: i32) -> (i32, i32) {
    %c0_i32 = arith.constant 0 : i32
    %c0_i32_0 = arith.constant 0 : i32
    %c0_i32_1 = arith.constant 0 : i32
    return %c0_i32, %c0_i32_0 : i32, i32
  }
  func.func @transform_15(%arg0: i32) -> (i32, i32) {
    %c0_i32 = arith.constant 0 : i32
    %c0_i32_0 = arith.constant 0 : i32
    %c0_i32_1 = arith.constant 0 : i32
    return %c0_i32, %c0_i32_0 : i32, i32
  }
  func.func @transform_16(%arg0: i32) -> (i32, i32) {
    %c0_i32 = arith.constant 0 : i32
    %c0_i32_0 = arith.constant 0 : i32
    %c0_i32_1 = arith.constant 0 : i32
    return %c0_i32, %c0_i32_0 : i32, i32
  }
  func.func @transform_17(%arg0: i32) -> (i32, i32) {
    %c0_i32 = arith.constant 0 : i32
    %c0_i32_0 = arith.constant 0 : i32
    %c0_i32_1 = arith.constant 0 : i32
    return %c0_i32, %c0_i32_0 : i32, i32
  }
  func.func @transform_18(%arg0: i32) -> (i32, i32) {
    %c0_i32 = arith.constant 0 : i32
    %c0_i32_0 = arith.constant 0 : i32
    %c0_i32_1 = arith.constant 0 : i32
    return %c0_i32, %c0_i32_0 : i32, i32
  }
  func.func @transform_19(%arg0: i32) -> (i32, i32) {
    %c0_i32 = arith.constant 0 : i32
    %c0_i32_0 = arith.constant 0 : i32
    %c0_i32_1 = arith.constant 0 : i32
    return %c0_i32, %c0_i32_0 : i32, i32
  }
}

module attributes {stable_mosaic.version = 11 : i64} {
  func.func @_decoder_layer_kernel(%arg0: i32, %arg1: i32, %arg2: memref<1x1x8x32xbf16, #tpu.memory_space<vmem>>, %arg3: memref<1x1x8x32xbf16, #tpu.memory_space<vmem>>, %arg4: memref<1x20x32xbf16, #tpu.memory_space<vmem>>, %arg5: memref<1x32x64xbf16, #tpu.memory_space<vmem>>, %arg6: memref<1x1x64xf32, #tpu.memory_space<vmem>>, %arg7: memref<1x32x32xbf16, #tpu.memory_space<vmem>>, %arg8: memref<1x1x32xf32, #tpu.memory_space<vmem>>, %arg9: memref<1x32x32xbf16, #tpu.memory_space<vmem>>, %arg10: memref<1x1x32xf32, #tpu.memory_space<vmem>>, %arg11: memref<1x1x32xf32, #tpu.memory_space<vmem>>, %arg12: memref<1x1x32xf32, #tpu.memory_space<vmem>>, %arg13: memref<1x32x32xbf16, #tpu.memory_space<vmem>>, %arg14: memref<1x1x32xf32, #tpu.memory_space<vmem>>, %arg15: memref<1x32x64xbf16, #tpu.memory_space<vmem>>, %arg16: memref<1x1x64xf32, #tpu.memory_space<vmem>>, %arg17: memref<1x32x32xbf16, #tpu.memory_space<vmem>>, %arg18: memref<1x1x32xf32, #tpu.memory_space<vmem>>, %arg19: memref<1x1x32xf32, #tpu.memory_space<vmem>>, %arg20: memref<1x1x32xf32, #tpu.memory_space<vmem>>, %arg21: memref<1x32x64xbf16, #tpu.memory_space<vmem>>, %arg22: memref<1x1x64xf32, #tpu.memory_space<vmem>>, %arg23: memref<1x64x32xbf16, #tpu.memory_space<vmem>>, %arg24: memref<1x1x32xf32, #tpu.memory_space<vmem>>, %arg25: memref<1x1x32xf32, #tpu.memory_space<vmem>>, %arg26: memref<1x1x32xf32, #tpu.memory_space<vmem>>, %arg27: memref<1x1x32xf32, #tpu.memory_space<vmem>>, %arg28: memref<1x1x32xf32, #tpu.memory_space<vmem>>, %arg29: memref<1x1x8x32xbf16, #tpu.memory_space<vmem>>, %arg30: memref<1x1x8x32xbf16, #tpu.memory_space<vmem>>) attributes {dimension_semantics = [#tpu.dimension_semantics<parallel>, #tpu.dimension_semantics<parallel>], iteration_bounds = array<i64: 2, 1>, scalar_prefetch = 0 : i64, scratch_operands = 0 : i64, tpu.core_type = #tpu.core_type<tc>, window_params = [{transform_indices = @transform_0, window_bounds = array<i64: 1, 1, 8, 32>}, {transform_indices = @transform_1, window_bounds = array<i64: 1, 1, 8, 32>}, {transform_indices = @transform_2, window_bounds = array<i64: 1, 20, 32>}, {transform_indices = @transform_3, window_bounds = array<i64: 1, 32, 64>}, {transform_indices = @transform_4, window_bounds = array<i64: 1, 1, 64>}, {transform_indices = @transform_5, window_bounds = array<i64: 1, 32, 32>}, {transform_indices = @transform_6, window_bounds = array<i64: 1, 1, 32>}, {transform_indices = @transform_7, window_bounds = array<i64: 1, 32, 32>}, {transform_indices = @transform_8, window_bounds = array<i64: 1, 1, 32>}, {transform_indices = @transform_9, window_bounds = array<i64: 1, 1, 32>}, {transform_indices = @transform_10, window_bounds = array<i64: 1, 1, 32>}, {transform_indices = @transform_11, window_bounds = array<i64: 1, 32, 32>}, {transform_indices = @transform_12, window_bounds = array<i64: 1, 1, 32>}, {transform_indices = @transform_13, window_bounds = array<i64: 1, 32, 64>}, {transform_indices = @transform_14, window_bounds = array<i64: 1, 1, 64>}, {transform_indices = @transform_15, window_bounds = array<i64: 1, 32, 32>}, {transform_indices = @transform_16, window_bounds = array<i64: 1, 1, 32>}, {transform_indices = @transform_17, window_bounds = array<i64: 1, 1, 32>}, {transform_indices = @transform_18, window_bounds = array<i64: 1, 1, 32>}, {transform_indices = @transform_19, window_bounds = array<i64: 1, 32, 64>}, {transform_indices = @transform_20, window_bounds = array<i64: 1, 1, 64>}, {transform_indices = @transform_21, window_bounds = array<i64: 1, 64, 32>}, {transform_indices = @transform_22, window_bounds = array<i64: 1, 1, 32>}, {transform_indices = @transform_23, window_bounds = array<i64: 1, 1, 32>}, {transform_indices = @transform_24, window_bounds = array<i64: 1, 1, 32>}, {transform_indices = @transform_25, window_bounds = array<i64: 1, 1, 32>}, {transform_indices = @transform_26, window_bounds = array<i64: 1, 1, 32>}, {transform_indices = @transform_27, window_bounds = array<i64: 1, 1, 8, 32>}, {transform_indices = @transform_28, window_bounds = array<i64: 1, 1, 8, 32>}]} {
    %c0 = arith.constant 0 : index
    %c0_0 = arith.constant 0 : index
    %c0_1 = arith.constant 0 : index
    %c0_2 = arith.constant 0 : index
    %0 = vector.load %arg2[%c0, %c0_0, %c0_1, %c0_2] : memref<1x1x8x32xbf16, #tpu.memory_space<vmem>>, vector<1x1x8x32xbf16>
    %1 = vector.shape_cast %0 : vector<1x1x8x32xbf16> to vector<8x32xbf16>
    %c0_3 = arith.constant 0 : index
    %c0_4 = arith.constant 0 : index
    %c0_5 = arith.constant 0 : index
    %c0_6 = arith.constant 0 : index
    %2 = vector.load %arg3[%c0_3, %c0_4, %c0_5, %c0_6] : memref<1x1x8x32xbf16, #tpu.memory_space<vmem>>, vector<1x1x8x32xbf16>
    %3 = vector.shape_cast %2 : vector<1x1x8x32xbf16> to vector<8x32xbf16>
    %4 = arith.extf %3 : vector<8x32xbf16> to vector<8x32xf32>
    %c0_7 = arith.constant 0 : index
    %c0_8 = arith.constant 0 : index
    %c0_9 = arith.constant 0 : index
    %5 = vector.load %arg4[%c0_7, %c0_8, %c0_9] : memref<1x20x32xbf16, #tpu.memory_space<vmem>>, vector<1x20x32xbf16>
    %6 = vector.shape_cast %5 : vector<1x20x32xbf16> to vector<20x32xbf16>
    %7 = arith.extf %1 : vector<8x32xbf16> to vector<8x32xf32>
    %8 = arith.addf %7, %4 : vector<8x32xf32>
    %9 = arith.truncf %8 : vector<8x32xf32> to vector<8x32xbf16>
    %c0_10 = arith.constant 0 : index
    %c0_11 = arith.constant 0 : index
    %c0_12 = arith.constant 0 : index
    %10 = vector.load %arg5[%c0_10, %c0_11, %c0_12] : memref<1x32x64xbf16, #tpu.memory_space<vmem>>, vector<1x32x64xbf16>
    %11 = vector.shape_cast %10 : vector<1x32x64xbf16> to vector<32x64xbf16>
    %cst = arith.constant dense<0.000000e+00> : vector<8x64xf32>
    %12 = tpu.matmul %9, %11, %cst {dimension_numbers = #tpu.dot_dimension_numbers<[1], [0], [0], [1], [0, 0, 1, 1], [], []>} : vector<8x32xbf16>, vector<32x64xbf16>, vector<8x64xf32> -> vector<8x64xf32>
    %c0_13 = arith.constant 0 : index
    %c0_14 = arith.constant 0 : index
    %c0_15 = arith.constant 0 : index
    %13 = vector.load %arg6[%c0_13, %c0_14, %c0_15] : memref<1x1x64xf32, #tpu.memory_space<vmem>>, vector<1x1x64xf32>
    %14 = vector.shape_cast %13 : vector<1x1x64xf32> to vector<1x64xf32>
    %15 = vector.broadcast %14 : vector<1x64xf32> to vector<8x64xf32>
    %16 = arith.addf %12, %15 : vector<8x64xf32>
    %17 = arith.truncf %16 : vector<8x64xf32> to vector<8x64xbf16>
    %c0_16 = arith.constant 0 : index
    %c0_17 = arith.constant 0 : index
    %c0_18 = arith.constant 0 : index
    %18 = vector.load %arg7[%c0_16, %c0_17, %c0_18] : memref<1x32x32xbf16, #tpu.memory_space<vmem>>, vector<1x32x32xbf16>
    %19 = vector.shape_cast %18 : vector<1x32x32xbf16> to vector<32x32xbf16>
    %cst_19 = arith.constant dense<0.000000e+00> : vector<8x32xf32>
    %20 = tpu.matmul %1, %19, %cst_19 {dimension_numbers = #tpu.dot_dimension_numbers<[1], [0], [0], [1], [0, 0, 1, 1], [], []>} : vector<8x32xbf16>, vector<32x32xbf16>, vector<8x32xf32> -> vector<8x32xf32>
    %c0_20 = arith.constant 0 : index
    %c0_21 = arith.constant 0 : index
    %c0_22 = arith.constant 0 : index
    %21 = vector.load %arg8[%c0_20, %c0_21, %c0_22] : memref<1x1x32xf32, #tpu.memory_space<vmem>>, vector<1x1x32xf32>
    %22 = vector.shape_cast %21 : vector<1x1x32xf32> to vector<1x32xf32>
    %23 = vector.broadcast %22 : vector<1x32xf32> to vector<8x32xf32>
    %24 = arith.addf %20, %23 : vector<8x32xf32>
    %25 = arith.truncf %24 : vector<8x32xf32> to vector<8x32xbf16>
    %26 = vector.extract_strided_slice %17 {offsets = [0, 0], sizes = [8, 32], strides = [1, 1]} : vector<8x64xbf16> to vector<8x32xbf16>
    %27 = vector.extract_strided_slice %17 {offsets = [0, 32], sizes = [8, 32], strides = [1, 1]} : vector<8x64xbf16> to vector<8x32xbf16>
    %28 = vector.shape_cast %26 : vector<8x32xbf16> to vector<8x4x8xbf16>
    %29 = tpu.transpose %28, [1, 0, 2] : vector<8x4x8xbf16> -> vector<4x8x8xbf16>
    %30 = vector.shape_cast %27 : vector<8x32xbf16> to vector<8x4x8xbf16>
    %31 = tpu.transpose %30, [1, 0, 2] : vector<8x4x8xbf16> -> vector<4x8x8xbf16>
    %32 = vector.shape_cast %25 : vector<8x32xbf16> to vector<8x4x8xbf16>
    %33 = tpu.transpose %32, [1, 0, 2] : vector<8x4x8xbf16> -> vector<4x8x8xbf16>
    %cst_23 = arith.constant dense<0.000000e+00> : vector<4x8x8xf32>
    %34 = tpu.matmul %29, %31, %cst_23 {dimension_numbers = #tpu.dot_dimension_numbers<[2], [2], [1], [1], [0, 0, 0, 1, 1, 1], [0], [0]>} : vector<4x8x8xbf16>, vector<4x8x8xbf16>, vector<4x8x8xf32> -> vector<4x8x8xf32>
    %cst_24 = arith.constant 0.353553385 : f32
    %35 = vector.broadcast %cst_24 : f32 to vector<4x8x8xf32>
    %36 = arith.mulf %34, %35 : vector<4x8x8xf32>
    %cst_25 = arith.constant dense<0xFF800000> : vector<4x8xf32>
    %37 = vector.multi_reduction <maximumf>, %36, %cst_25 [2] : vector<4x8x8xf32> to vector<4x8xf32>
    %38 = vector.shape_cast %37 : vector<4x8xf32> to vector<4x8x1xf32>
    %39 = vector.broadcast %38 : vector<4x8x1xf32> to vector<4x8x8xf32>
    %40 = arith.subf %36, %39 : vector<4x8x8xf32>
    %41 = math.exp %40 : vector<4x8x8xf32>
    %cst_26 = arith.constant dense<0.000000e+00> : vector<4x8xf32>
    %42 = vector.multi_reduction <add>, %41, %cst_26 [2] : vector<4x8x8xf32> to vector<4x8xf32>
    %43 = vector.shape_cast %42 : vector<4x8xf32> to vector<4x8x1xf32>
    %44 = tpu.reciprocal %43 {approx = true} : vector<4x8x1xf32> -> vector<4x8x1xf32>
    %45 = vector.broadcast %44 : vector<4x8x1xf32> to vector<4x8x8xf32>
    %46 = arith.mulf %41, %45 : vector<4x8x8xf32>
    %47 = arith.truncf %46 : vector<4x8x8xf32> to vector<4x8x8xbf16>
    %cst_27 = arith.constant dense<0.000000e+00> : vector<4x8x8xf32>
    %48 = tpu.matmul %47, %33, %cst_27 {dimension_numbers = #tpu.dot_dimension_numbers<[2], [1], [1], [2], [0, 0, 0, 1, 1, 2], [0], [0]>} : vector<4x8x8xbf16>, vector<4x8x8xbf16>, vector<4x8x8xf32> -> vector<4x8x8xf32>
    %49 = tpu.transpose %48, [1, 0, 2] : vector<4x8x8xf32> -> vector<8x4x8xf32>
    %50 = vector.shape_cast %49 : vector<8x4x8xf32> to vector<8x32xf32>
    %c0_28 = arith.constant 0 : index
    %c0_29 = arith.constant 0 : index
    %c0_30 = arith.constant 0 : index
    %51 = vector.load %arg9[%c0_28, %c0_29, %c0_30] : memref<1x32x32xbf16, #tpu.memory_space<vmem>>, vector<1x32x32xbf16>
    %52 = vector.shape_cast %51 : vector<1x32x32xbf16> to vector<32x32xbf16>
    %53 = arith.truncf %50 : vector<8x32xf32> to vector<8x32xbf16>
    %cst_31 = arith.constant dense<0.000000e+00> : vector<8x32xf32>
    %54 = tpu.matmul %53, %52, %cst_31 {dimension_numbers = #tpu.dot_dimension_numbers<[1], [0], [0], [1], [0, 0, 1, 1], [], []>} : vector<8x32xbf16>, vector<32x32xbf16>, vector<8x32xf32> -> vector<8x32xf32>
    %c0_32 = arith.constant 0 : index
    %c0_33 = arith.constant 0 : index
    %c0_34 = arith.constant 0 : index
    %55 = vector.load %arg10[%c0_32, %c0_33, %c0_34] : memref<1x1x32xf32, #tpu.memory_space<vmem>>, vector<1x1x32xf32>
    %56 = vector.shape_cast %55 : vector<1x1x32xf32> to vector<1x32xf32>
    %57 = vector.broadcast %56 : vector<1x32xf32> to vector<8x32xf32>
    %58 = arith.addf %54, %57 : vector<8x32xf32>
    %59 = arith.addf %7, %58 : vector<8x32xf32>
    %c0_35 = arith.constant 0 : index
    %c0_36 = arith.constant 0 : index
    %c0_37 = arith.constant 0 : index
    %60 = vector.load %arg11[%c0_35, %c0_36, %c0_37] : memref<1x1x32xf32, #tpu.memory_space<vmem>>, vector<1x1x32xf32>
    %61 = vector.shape_cast %60 : vector<1x1x32xf32> to vector<1x32xf32>
    %c0_38 = arith.constant 0 : index
    %c0_39 = arith.constant 0 : index
    %c0_40 = arith.constant 0 : index
    %62 = vector.load %arg12[%c0_38, %c0_39, %c0_40] : memref<1x1x32xf32, #tpu.memory_space<vmem>>, vector<1x1x32xf32>
    %63 = vector.shape_cast %62 : vector<1x1x32xf32> to vector<1x32xf32>
    %cst_41 = arith.constant dense<0.000000e+00> : vector<8xf32>
    %64 = vector.multi_reduction <add>, %59, %cst_41 [1] : vector<8x32xf32> to vector<8xf32>
    %65 = vector.shape_cast %64 : vector<8xf32> to vector<8x1xf32>
    %cst_42 = arith.constant 3.200000e+01 : f32
    %66 = vector.broadcast %cst_42 : f32 to vector<8x1xf32>
    %67 = arith.divf %65, %66 : vector<8x1xf32>
    %68 = vector.broadcast %67 : vector<8x1xf32> to vector<8x32xf32>
    %69 = arith.subf %59, %68 : vector<8x32xf32>
    %70 = arith.mulf %69, %69 : vector<8x32xf32>
    %cst_43 = arith.constant dense<0.000000e+00> : vector<8xf32>
    %71 = vector.multi_reduction <add>, %70, %cst_43 [1] : vector<8x32xf32> to vector<8xf32>
    %72 = vector.shape_cast %71 : vector<8xf32> to vector<8x1xf32>
    %cst_44 = arith.constant 3.200000e+01 : f32
    %73 = vector.broadcast %cst_44 : f32 to vector<8x1xf32>
    %74 = arith.divf %72, %73 : vector<8x1xf32>
    %75 = vector.broadcast %67 : vector<8x1xf32> to vector<8x32xf32>
    %76 = arith.subf %59, %75 : vector<8x32xf32>
    %cst_45 = arith.constant 9.99999974E-6 : f32
    %77 = vector.broadcast %cst_45 : f32 to vector<8x1xf32>
    %78 = arith.addf %74, %77 : vector<8x1xf32>
    %79 = math.rsqrt %78 : vector<8x1xf32>
    %80 = vector.broadcast %79 : vector<8x1xf32> to vector<8x32xf32>
    %81 = arith.mulf %76, %80 : vector<8x32xf32>
    %82 = vector.broadcast %61 : vector<1x32xf32> to vector<8x32xf32>
    %83 = arith.mulf %81, %82 : vector<8x32xf32>
    %84 = vector.broadcast %63 : vector<1x32xf32> to vector<8x32xf32>
    %85 = arith.addf %83, %84 : vector<8x32xf32>
    %86 = arith.addf %85, %4 : vector<8x32xf32>
    %87 = arith.truncf %86 : vector<8x32xf32> to vector<8x32xbf16>
    %c0_46 = arith.constant 0 : index
    %c0_47 = arith.constant 0 : index
    %c0_48 = arith.constant 0 : index
    %88 = vector.load %arg13[%c0_46, %c0_47, %c0_48] : memref<1x32x32xbf16, #tpu.memory_space<vmem>>, vector<1x32x32xbf16>
    %89 = vector.shape_cast %88 : vector<1x32x32xbf16> to vector<32x32xbf16>
    %cst_49 = arith.constant dense<0.000000e+00> : vector<8x32xf32>
    %90 = tpu.matmul %87, %89, %cst_49 {dimension_numbers = #tpu.dot_dimension_numbers<[1], [0], [0], [1], [0, 0, 1, 1], [], []>} : vector<8x32xbf16>, vector<32x32xbf16>, vector<8x32xf32> -> vector<8x32xf32>
    %c0_50 = arith.constant 0 : index
    %c0_51 = arith.constant 0 : index
    %c0_52 = arith.constant 0 : index
    %91 = vector.load %arg14[%c0_50, %c0_51, %c0_52] : memref<1x1x32xf32, #tpu.memory_space<vmem>>, vector<1x1x32xf32>
    %92 = vector.shape_cast %91 : vector<1x1x32xf32> to vector<1x32xf32>
    %93 = vector.broadcast %92 : vector<1x32xf32> to vector<8x32xf32>
    %94 = arith.addf %90, %93 : vector<8x32xf32>
    %95 = arith.truncf %94 : vector<8x32xf32> to vector<8x32xbf16>
    %c0_53 = arith.constant 0 : index
    %c0_54 = arith.constant 0 : index
    %c0_55 = arith.constant 0 : index
    %96 = vector.load %arg15[%c0_53, %c0_54, %c0_55] : memref<1x32x64xbf16, #tpu.memory_space<vmem>>, vector<1x32x64xbf16>
    %97 = vector.shape_cast %96 : vector<1x32x64xbf16> to vector<32x64xbf16>
    %cst_56 = arith.constant dense<0.000000e+00> : vector<20x64xf32>
    %98 = tpu.matmul %6, %97, %cst_56 {dimension_numbers = #tpu.dot_dimension_numbers<[1], [0], [0], [1], [0, 0, 1, 1], [], []>} : vector<20x32xbf16>, vector<32x64xbf16>, vector<20x64xf32> -> vector<20x64xf32>
    %c0_57 = arith.constant 0 : index
    %c0_58 = arith.constant 0 : index
    %c0_59 = arith.constant 0 : index
    %99 = vector.load %arg16[%c0_57, %c0_58, %c0_59] : memref<1x1x64xf32, #tpu.memory_space<vmem>>, vector<1x1x64xf32>
    %100 = vector.shape_cast %99 : vector<1x1x64xf32> to vector<1x64xf32>
    %101 = vector.broadcast %100 : vector<1x64xf32> to vector<20x64xf32>
    %102 = arith.addf %98, %101 : vector<20x64xf32>
    %103 = arith.truncf %102 : vector<20x64xf32> to vector<20x64xbf16>
    %104 = vector.extract_strided_slice %103 {offsets = [0, 0], sizes = [20, 32], strides = [1, 1]} : vector<20x64xbf16> to vector<20x32xbf16>
    %105 = vector.extract_strided_slice %103 {offsets = [0, 32], sizes = [20, 32], strides = [1, 1]} : vector<20x64xbf16> to vector<20x32xbf16>
    %106 = vector.shape_cast %95 : vector<8x32xbf16> to vector<8x4x8xbf16>
    %107 = tpu.transpose %106, [1, 0, 2] : vector<8x4x8xbf16> -> vector<4x8x8xbf16>
    %108 = vector.shape_cast %104 : vector<20x32xbf16> to vector<20x4x8xbf16>
    %109 = tpu.transpose %108, [1, 0, 2] : vector<20x4x8xbf16> -> vector<4x20x8xbf16>
    %110 = vector.shape_cast %105 : vector<20x32xbf16> to vector<20x4x8xbf16>
    %111 = tpu.transpose %110, [1, 0, 2] : vector<20x4x8xbf16> -> vector<4x20x8xbf16>
    %cst_60 = arith.constant dense<0.000000e+00> : vector<4x8x20xf32>
    %112 = tpu.matmul %107, %109, %cst_60 {dimension_numbers = #tpu.dot_dimension_numbers<[2], [2], [1], [1], [0, 0, 0, 1, 1, 1], [0], [0]>} : vector<4x8x8xbf16>, vector<4x20x8xbf16>, vector<4x8x20xf32> -> vector<4x8x20xf32>
    %cst_61 = arith.constant 0.353553385 : f32
    %113 = vector.broadcast %cst_61 : f32 to vector<4x8x20xf32>
    %114 = arith.mulf %112, %113 : vector<4x8x20xf32>
    %cst_62 = arith.constant dense<0xFF800000> : vector<4x8xf32>
    %115 = vector.multi_reduction <maximumf>, %114, %cst_62 [2] : vector<4x8x20xf32> to vector<4x8xf32>
    %116 = vector.shape_cast %115 : vector<4x8xf32> to vector<4x8x1xf32>
    %117 = vector.broadcast %116 : vector<4x8x1xf32> to vector<4x8x20xf32>
    %118 = arith.subf %114, %117 : vector<4x8x20xf32>
    %119 = math.exp %118 : vector<4x8x20xf32>
    %cst_63 = arith.constant dense<0.000000e+00> : vector<4x8xf32>
    %120 = vector.multi_reduction <add>, %119, %cst_63 [2] : vector<4x8x20xf32> to vector<4x8xf32>
    %121 = vector.shape_cast %120 : vector<4x8xf32> to vector<4x8x1xf32>
    %122 = tpu.reciprocal %121 {approx = true} : vector<4x8x1xf32> -> vector<4x8x1xf32>
    %123 = vector.broadcast %122 : vector<4x8x1xf32> to vector<4x8x20xf32>
    %124 = arith.mulf %119, %123 : vector<4x8x20xf32>
    %125 = arith.truncf %124 : vector<4x8x20xf32> to vector<4x8x20xbf16>
    %cst_64 = arith.constant dense<0.000000e+00> : vector<4x8x8xf32>
    %126 = tpu.matmul %125, %111, %cst_64 {dimension_numbers = #tpu.dot_dimension_numbers<[2], [1], [1], [2], [0, 0, 0, 1, 1, 2], [0], [0]>} : vector<4x8x20xbf16>, vector<4x20x8xbf16>, vector<4x8x8xf32> -> vector<4x8x8xf32>
    %127 = tpu.transpose %126, [1, 0, 2] : vector<4x8x8xf32> -> vector<8x4x8xf32>
    %128 = vector.shape_cast %127 : vector<8x4x8xf32> to vector<8x32xf32>
    %c0_65 = arith.constant 0 : index
    %c0_66 = arith.constant 0 : index
    %c0_67 = arith.constant 0 : index
    %129 = vector.load %arg17[%c0_65, %c0_66, %c0_67] : memref<1x32x32xbf16, #tpu.memory_space<vmem>>, vector<1x32x32xbf16>
    %130 = vector.shape_cast %129 : vector<1x32x32xbf16> to vector<32x32xbf16>
    %131 = arith.truncf %128 : vector<8x32xf32> to vector<8x32xbf16>
    %cst_68 = arith.constant dense<0.000000e+00> : vector<8x32xf32>
    %132 = tpu.matmul %131, %130, %cst_68 {dimension_numbers = #tpu.dot_dimension_numbers<[1], [0], [0], [1], [0, 0, 1, 1], [], []>} : vector<8x32xbf16>, vector<32x32xbf16>, vector<8x32xf32> -> vector<8x32xf32>
    %c0_69 = arith.constant 0 : index
    %c0_70 = arith.constant 0 : index
    %c0_71 = arith.constant 0 : index
    %133 = vector.load %arg18[%c0_69, %c0_70, %c0_71] : memref<1x1x32xf32, #tpu.memory_space<vmem>>, vector<1x1x32xf32>
    %134 = vector.shape_cast %133 : vector<1x1x32xf32> to vector<1x32xf32>
    %135 = vector.broadcast %134 : vector<1x32xf32> to vector<8x32xf32>
    %136 = arith.addf %132, %135 : vector<8x32xf32>
    %137 = arith.addf %85, %136 : vector<8x32xf32>
    %c0_72 = arith.constant 0 : index
    %c0_73 = arith.constant 0 : index
    %c0_74 = arith.constant 0 : index
    %138 = vector.load %arg19[%c0_72, %c0_73, %c0_74] : memref<1x1x32xf32, #tpu.memory_space<vmem>>, vector<1x1x32xf32>
    %139 = vector.shape_cast %138 : vector<1x1x32xf32> to vector<1x32xf32>
    %c0_75 = arith.constant 0 : index
    %c0_76 = arith.constant 0 : index
    %c0_77 = arith.constant 0 : index
    %140 = vector.load %arg20[%c0_75, %c0_76, %c0_77] : memref<1x1x32xf32, #tpu.memory_space<vmem>>, vector<1x1x32xf32>
    %141 = vector.shape_cast %140 : vector<1x1x32xf32> to vector<1x32xf32>
    %cst_78 = arith.constant dense<0.000000e+00> : vector<8xf32>
    %142 = vector.multi_reduction <add>, %137, %cst_78 [1] : vector<8x32xf32> to vector<8xf32>
    %143 = vector.shape_cast %142 : vector<8xf32> to vector<8x1xf32>
    %cst_79 = arith.constant 3.200000e+01 : f32
    %144 = vector.broadcast %cst_79 : f32 to vector<8x1xf32>
    %145 = arith.divf %143, %144 : vector<8x1xf32>
    %146 = vector.broadcast %145 : vector<8x1xf32> to vector<8x32xf32>
    %147 = arith.subf %137, %146 : vector<8x32xf32>
    %148 = arith.mulf %147, %147 : vector<8x32xf32>
    %cst_80 = arith.constant dense<0.000000e+00> : vector<8xf32>
    %149 = vector.multi_reduction <add>, %148, %cst_80 [1] : vector<8x32xf32> to vector<8xf32>
    %150 = vector.shape_cast %149 : vector<8xf32> to vector<8x1xf32>
    %cst_81 = arith.constant 3.200000e+01 : f32
    %151 = vector.broadcast %cst_81 : f32 to vector<8x1xf32>
    %152 = arith.divf %150, %151 : vector<8x1xf32>
    %153 = vector.broadcast %145 : vector<8x1xf32> to vector<8x32xf32>
    %154 = arith.subf %137, %153 : vector<8x32xf32>
    %cst_82 = arith.constant 9.99999974E-6 : f32
    %155 = vector.broadcast %cst_82 : f32 to vector<8x1xf32>
    %156 = arith.addf %152, %155 : vector<8x1xf32>
    %157 = math.rsqrt %156 : vector<8x1xf32>
    %158 = vector.broadcast %157 : vector<8x1xf32> to vector<8x32xf32>
    %159 = arith.mulf %154, %158 : vector<8x32xf32>
    %160 = vector.broadcast %139 : vector<1x32xf32> to vector<8x32xf32>
    %161 = arith.mulf %159, %160 : vector<8x32xf32>
    %162 = vector.broadcast %141 : vector<1x32xf32> to vector<8x32xf32>
    %163 = arith.addf %161, %162 : vector<8x32xf32>
    %c0_83 = arith.constant 0 : index
    %c0_84 = arith.constant 0 : index
    %c0_85 = arith.constant 0 : index
    %164 = vector.load %arg21[%c0_83, %c0_84, %c0_85] : memref<1x32x64xbf16, #tpu.memory_space<vmem>>, vector<1x32x64xbf16>
    %165 = vector.shape_cast %164 : vector<1x32x64xbf16> to vector<32x64xbf16>
    %166 = arith.truncf %163 : vector<8x32xf32> to vector<8x32xbf16>
    %cst_86 = arith.constant dense<0.000000e+00> : vector<8x64xf32>
    %167 = tpu.matmul %166, %165, %cst_86 {dimension_numbers = #tpu.dot_dimension_numbers<[1], [0], [0], [1], [0, 0, 1, 1], [], []>} : vector<8x32xbf16>, vector<32x64xbf16>, vector<8x64xf32> -> vector<8x64xf32>
    %c0_87 = arith.constant 0 : index
    %c0_88 = arith.constant 0 : index
    %c0_89 = arith.constant 0 : index
    %168 = vector.load %arg22[%c0_87, %c0_88, %c0_89] : memref<1x1x64xf32, #tpu.memory_space<vmem>>, vector<1x1x64xf32>
    %169 = vector.shape_cast %168 : vector<1x1x64xf32> to vector<1x64xf32>
    %170 = vector.broadcast %169 : vector<1x64xf32> to vector<8x64xf32>
    %171 = arith.addf %167, %170 : vector<8x64xf32>
    %cst_90 = arith.constant 0.000000e+00 : f32
    %172 = vector.broadcast %cst_90 : f32 to vector<8x64xf32>
    %173 = arith.maximumf %171, %172 : vector<8x64xf32>
    %c0_91 = arith.constant 0 : index
    %c0_92 = arith.constant 0 : index
    %c0_93 = arith.constant 0 : index
    %174 = vector.load %arg23[%c0_91, %c0_92, %c0_93] : memref<1x64x32xbf16, #tpu.memory_space<vmem>>, vector<1x64x32xbf16>
    %175 = vector.shape_cast %174 : vector<1x64x32xbf16> to vector<64x32xbf16>
    %176 = arith.truncf %173 : vector<8x64xf32> to vector<8x64xbf16>
    %cst_94 = arith.constant dense<0.000000e+00> : vector<8x32xf32>
    %177 = tpu.matmul %176, %175, %cst_94 {dimension_numbers = #tpu.dot_dimension_numbers<[1], [0], [0], [1], [0, 0, 1, 1], [], []>} : vector<8x64xbf16>, vector<64x32xbf16>, vector<8x32xf32> -> vector<8x32xf32>
    %c0_95 = arith.constant 0 : index
    %c0_96 = arith.constant 0 : index
    %c0_97 = arith.constant 0 : index
    %178 = vector.load %arg24[%c0_95, %c0_96, %c0_97] : memref<1x1x32xf32, #tpu.memory_space<vmem>>, vector<1x1x32xf32>
    %179 = vector.shape_cast %178 : vector<1x1x32xf32> to vector<1x32xf32>
    %180 = vector.broadcast %179 : vector<1x32xf32> to vector<8x32xf32>
    %181 = arith.addf %177, %180 : vector<8x32xf32>
    %182 = arith.addf %163, %181 : vector<8x32xf32>
    %c0_98 = arith.constant 0 : index
    %c0_99 = arith.constant 0 : index
    %c0_100 = arith.constant 0 : index
    %183 = vector.load %arg25[%c0_98, %c0_99, %c0_100] : memref<1x1x32xf32, #tpu.memory_space<vmem>>, vector<1x1x32xf32>
    %184 = vector.shape_cast %183 : vector<1x1x32xf32> to vector<1x32xf32>
    %c0_101 = arith.constant 0 : index
    %c0_102 = arith.constant 0 : index
    %c0_103 = arith.constant 0 : index
    %185 = vector.load %arg26[%c0_101, %c0_102, %c0_103] : memref<1x1x32xf32, #tpu.memory_space<vmem>>, vector<1x1x32xf32>
    %186 = vector.shape_cast %185 : vector<1x1x32xf32> to vector<1x32xf32>
    %cst_104 = arith.constant dense<0.000000e+00> : vector<8xf32>
    %187 = vector.multi_reduction <add>, %182, %cst_104 [1] : vector<8x32xf32> to vector<8xf32>
    %188 = vector.shape_cast %187 : vector<8xf32> to vector<8x1xf32>
    %cst_105 = arith.constant 3.200000e+01 : f32
    %189 = vector.broadcast %cst_105 : f32 to vector<8x1xf32>
    %190 = arith.divf %188, %189 : vector<8x1xf32>
    %191 = vector.broadcast %190 : vector<8x1xf32> to vector<8x32xf32>
    %192 = arith.subf %182, %191 : vector<8x32xf32>
    %193 = arith.mulf %192, %192 : vector<8x32xf32>
    %cst_106 = arith.constant dense<0.000000e+00> : vector<8xf32>
    %194 = vector.multi_reduction <add>, %193, %cst_106 [1] : vector<8x32xf32> to vector<8xf32>
    %195 = vector.shape_cast %194 : vector<8xf32> to vector<8x1xf32>
    %cst_107 = arith.constant 3.200000e+01 : f32
    %196 = vector.broadcast %cst_107 : f32 to vector<8x1xf32>
    %197 = arith.divf %195, %196 : vector<8x1xf32>
    %198 = vector.broadcast %190 : vector<8x1xf32> to vector<8x32xf32>
    %199 = arith.subf %182, %198 : vector<8x32xf32>
    %cst_108 = arith.constant 9.99999974E-6 : f32
    %200 = vector.broadcast %cst_108 : f32 to vector<8x1xf32>
    %201 = arith.addf %197, %200 : vector<8x1xf32>
    %202 = math.rsqrt %201 : vector<8x1xf32>
    %203 = vector.broadcast %202 : vector<8x1xf32> to vector<8x32xf32>
    %204 = arith.mulf %199, %203 : vector<8x32xf32>
    %205 = vector.broadcast %184 : vector<1x32xf32> to vector<8x32xf32>
    %206 = arith.mulf %204, %205 : vector<8x32xf32>
    %207 = vector.broadcast %186 : vector<1x32xf32> to vector<8x32xf32>
    %208 = arith.addf %206, %207 : vector<8x32xf32>
    %209 = arith.truncf %208 : vector<8x32xf32> to vector<8x32xbf16>
    %c0_109 = arith.constant 0 : index
    %c0_110 = arith.constant 0 : index
    %c0_111 = arith.constant 0 : index
    %c0_112 = arith.constant 0 : index
    %210 = vector.load %arg29[%c0_109, %c0_110, %c0_111, %c0_112] : memref<1x1x8x32xbf16, #tpu.memory_space<vmem>>, vector<1x1x8x32xbf16>
    %211 = vector.shape_cast %210 : vector<1x1x8x32xbf16> to vector<8x32xbf16>
    %212 = vector.shape_cast %209 : vector<8x32xbf16> to vector<1x1x8x32xbf16>
    tpu.vector_store %arg29[%c0_109, %c0_110, %c0_111, %c0_112], %212 {strides = array<i32>} : memref<1x1x8x32xbf16, #tpu.memory_space<vmem>>, vector<1x1x8x32xbf16>,
    %c0_113 = arith.constant 0 : index
    %c0_114 = arith.constant 0 : index
    %c0_115 = arith.constant 0 : index
    %213 = vector.load %arg27[%c0_113, %c0_114, %c0_115] : memref<1x1x32xf32, #tpu.memory_space<vmem>>, vector<1x1x32xf32>
    %214 = vector.shape_cast %213 : vector<1x1x32xf32> to vector<1x32xf32>
    %c0_116 = arith.constant 0 : index
    %c0_117 = arith.constant 0 : index
    %c0_118 = arith.constant 0 : index
    %215 = vector.load %arg28[%c0_116, %c0_117, %c0_118] : memref<1x1x32xf32, #tpu.memory_space<vmem>>, vector<1x1x32xf32>
    %216 = vector.shape_cast %215 : vector<1x1x32xf32> to vector<1x32xf32>
    %cst_119 = arith.constant dense<0.000000e+00> : vector<8xf32>
    %217 = vector.multi_reduction <add>, %208, %cst_119 [1] : vector<8x32xf32> to vector<8xf32>
    %218 = vector.shape_cast %217 : vector<8xf32> to vector<8x1xf32>
    %cst_120 = arith.constant 3.200000e+01 : f32
    %219 = vector.broadcast %cst_120 : f32 to vector<8x1xf32>
    %220 = arith.divf %218, %219 : vector<8x1xf32>
    %221 = vector.broadcast %220 : vector<8x1xf32> to vector<8x32xf32>
    %222 = arith.subf %208, %221 : vector<8x32xf32>
    %223 = arith.mulf %222, %222 : vector<8x32xf32>
    %cst_121 = arith.constant dense<0.000000e+00> : vector<8xf32>
    %224 = vector.multi_reduction <add>, %223, %cst_121 [1] : vector<8x32xf32> to vector<8xf32>
    %225 = vector.shape_cast %224 : vector<8xf32> to vector<8x1xf32>
    %cst_122 = arith.constant 3.200000e+01 : f32
    %226 = vector.broadcast %cst_122 : f32 to vector<8x1xf32>
    %227 = arith.divf %225, %226 : vector<8x1xf32>
    %228 = vector.broadcast %220 : vector<8x1xf32> to vector<8x32xf32>
    %229 = arith.subf %208, %228 : vector<8x32xf32>
    %cst_123 = arith.constant 9.99999974E-6 : f32
    %230 = vector.broadcast %cst_123 : f32 to vector<8x1xf32>
    %231 = arith.addf %227, %230 : vector<8x1xf32>
    %232 = math.rsqrt %231 : vector<8x1xf32>
    %233 = vector.broadcast %232 : vector<8x1xf32> to vector<8x32xf32>
    %234 = arith.mulf %229, %233 : vector<8x32xf32>
    %235 = vector.broadcast %214 : vector<1x32xf32> to vector<8x32xf32>
    %236 = arith.mulf %234, %235 : vector<8x32xf32>
    %237 = vector.broadcast %216 : vector<1x32xf32> to vector<8x32xf32>
    %238 = arith.addf %236, %237 : vector<8x32xf32>
    %239 = arith.truncf %238 : vector<8x32xf32> to vector<8x32xbf16>
    %c0_124 = arith.constant 0 : index
    %c0_125 = arith.constant 0 : index
    %c0_126 = arith.constant 0 : index
    %c0_127 = arith.constant 0 : index
    %240 = vector.load %arg30[%c0_124, %c0_125, %c0_126, %c0_127] : memref<1x1x8x32xbf16, #tpu.memory_space<vmem>>, vector<1x1x8x32xbf16>
    %241 = vector.shape_cast %240 : vector<1x1x8x32xbf16> to vector<8x32xbf16>
    %242 = vector.shape_cast %239 : vector<8x32xbf16> to vector<1x1x8x32xbf16>
    tpu.vector_store %arg30[%c0_124, %c0_125, %c0_126, %c0_127], %242 {strides = array<i32>} : memref<1x1x8x32xbf16, #tpu.memory_space<vmem>>, vector<1x1x8x32xbf16>,
    return
  }
  func.func @transform_0(%arg0: i32, %arg1: i32) -> (i32, i32, i32, i32) {
    %c0_i32 = arith.constant 0 : i32
    %c0_i32_0 = arith.constant 0 : i32
    %c0_i32_1 = arith.constant 0 : i32
    return %arg1, %arg0, %c0_i32, %c0_i32_0 : i32, i32, i32, i32
  }
  func.func @transform_1(%arg0: i32, %arg1: i32) -> (i32, i32, i32, i32) {
    %c0_i32 = arith.constant 0 : i32
    %c0_i32_0 = arith.constant 0 : i32
    %c0_i32_1 = arith.constant 0 : i32
    return %arg1, %arg0, %c0_i32, %c0_i32_0 : i32, i32, i32, i32
  }
  func.func @transform_2(%arg0: i32, %arg1: i32) -> (i32, i32, i32) {
    %c0_i32 = arith.constant 0 : i32
    %c0_i32_0 = arith.constant 0 : i32
    %c0_i32_1 = arith.constant 0 : i32
    return %arg0, %c0_i32, %c0_i32_0 : i32, i32, i32
  }
  func.func @transform_3(%arg0: i32, %arg1: i32) -> (i32, i32, i32) {
    %c0_i32 = arith.constant 0 : i32
    %c0_i32_0 = arith.constant 0 : i32
    %c0_i32_1 = arith.constant 0 : i32
    return %arg1, %c0_i32, %c0_i32_0 : i32, i32, i32
  }
  func.func @transform_4(%arg0: i32, %arg1: i32) -> (i32, i32, i32) {
    %c0_i32 = arith.constant 0 : i32
    %c0_i32_0 = arith.constant 0 : i32
    %c0_i32_1 = arith.constant 0 : i32
    return %arg1, %c0_i32, %c0_i32_0 : i32, i32, i32
  }
  func.func @transform_5(%arg0: i32, %arg1: i32) -> (i32, i32, i32) {
    %c0_i32 = arith.constant 0 : i32
    %c0_i32_0 = arith.constant 0 : i32
    %c0_i32_1 = arith.constant 0 : i32
    return %arg1, %c0_i32, %c0_i32_0 : i32, i32, i32
  }
  func.func @transform_6(%arg0: i32, %arg1: i32) -> (i32, i32, i32) {
    %c0_i32 = arith.constant 0 : i32
    %c0_i32_0 = arith.constant 0 : i32
    %c0_i32_1 = arith.constant 0 : i32
    return %arg1, %c0_i32, %c0_i32_0 : i32, i32, i32
  }
  func.func @transform_7(%arg0: i32, %arg1: i32) -> (i32, i32, i32) {
    %c0_i32 = arith.constant 0 : i32
    %c0_i32_0 = arith.constant 0 : i32
    %c0_i32_1 = arith.constant 0 : i32
    return %arg1, %c0_i32, %c0_i32_0 : i32, i32, i32
  }
  func.func @transform_8(%arg0: i32, %arg1: i32) -> (i32, i32, i32) {
    %c0_i32 = arith.constant 0 : i32
    %c0_i32_0 = arith.constant 0 : i32
    %c0_i32_1 = arith.constant 0 : i32
    return %arg1, %c0_i32, %c0_i32_0 : i32, i32, i32
  }
  func.func @transform_9(%arg0: i32, %arg1: i32) -> (i32, i32, i32) {
    %c0_i32 = arith.constant 0 : i32
    %c0_i32_0 = arith.constant 0 : i32
    %c0_i32_1 = arith.constant 0 : i32
    return %arg1, %c0_i32, %c0_i32_0 : i32, i32, i32
  }
  func.func @transform_10(%arg0: i32, %arg1: i32) -> (i32, i32, i32) {
    %c0_i32 = arith.constant 0 : i32
    %c0_i32_0 = arith.constant 0 : i32
    %c0_i32_1 = arith.constant 0 : i32
    return %arg1, %c0_i32, %c0_i32_0 : i32, i32, i32
  }
  func.func @transform_11(%arg0: i32, %arg1: i32) -> (i32, i32, i32) {
    %c0_i32 = arith.constant 0 : i32
    %c0_i32_0 = arith.constant 0 : i32
    %c0_i32_1 = arith.constant 0 : i32
    return %arg1, %c0_i32, %c0_i32_0 : i32, i32, i32
  }
  func.func @transform_12(%arg0: i32, %arg1: i32) -> (i32, i32, i32) {
    %c0_i32 = arith.constant 0 : i32
    %c0_i32_0 = arith.constant 0 : i32
    %c0_i32_1 = arith.constant 0 : i32
    return %arg1, %c0_i32, %c0_i32_0 : i32, i32, i32
  }
  func.func @transform_13(%arg0: i32, %arg1: i32) -> (i32, i32, i32) {
    %c0_i32 = arith.constant 0 : i32
    %c0_i32_0 = arith.constant 0 : i32
    %c0_i32_1 = arith.constant 0 : i32
    return %arg1, %c0_i32, %c0_i32_0 : i32, i32, i32
  }
  func.func @transform_14(%arg0: i32, %arg1: i32) -> (i32, i32, i32) {
    %c0_i32 = arith.constant 0 : i32
    %c0_i32_0 = arith.constant 0 : i32
    %c0_i32_1 = arith.constant 0 : i32
    return %arg1, %c0_i32, %c0_i32_0 : i32, i32, i32
  }
  func.func @transform_15(%arg0: i32, %arg1: i32) -> (i32, i32, i32) {
    %c0_i32 = arith.constant 0 : i32
    %c0_i32_0 = arith.constant 0 : i32
    %c0_i32_1 = arith.constant 0 : i32
    return %arg1, %c0_i32, %c0_i32_0 : i32, i32, i32
  }
  func.func @transform_16(%arg0: i32, %arg1: i32) -> (i32, i32, i32) {
    %c0_i32 = arith.constant 0 : i32
    %c0_i32_0 = arith.constant 0 : i32
    %c0_i32_1 = arith.constant 0 : i32
    return %arg1, %c0_i32, %c0_i32_0 : i32, i32, i32
  }
  func.func @transform_17(%arg0: i32, %arg1: i32) -> (i32, i32, i32) {
    %c0_i32 = arith.constant 0 : i32
    %c0_i32_0 = arith.constant 0 : i32
    %c0_i32_1 = arith.constant 0 : i32
    return %arg1, %c0_i32, %c0_i32_0 : i32, i32, i32
  }
  func.func @transform_18(%arg0: i32, %arg1: i32) -> (i32, i32, i32) {
    %c0_i32 = arith.constant 0 : i32
    %c0_i32_0 = arith.constant 0 : i32
    %c0_i32_1 = arith.constant 0 : i32
    return %arg1, %c0_i32, %c0_i32_0 : i32, i32, i32
  }
  func.func @transform_19(%arg0: i32, %arg1: i32) -> (i32, i32, i32) {
    %c0_i32 = arith.constant 0 : i32
    %c0_i32_0 = arith.constant 0 : i32
    %c0_i32_1 = arith.constant 0 : i32
    return %arg1, %c0_i32, %c0_i32_0 : i32, i32, i32
  }
  func.func @transform_20(%arg0: i32, %arg1: i32) -> (i32, i32, i32) {
    %c0_i32 = arith.constant 0 : i32
    %c0_i32_0 = arith.constant 0 : i32
    %c0_i32_1 = arith.constant 0 : i32
    return %arg1, %c0_i32, %c0_i32_0 : i32, i32, i32
  }
  func.func @transform_21(%arg0: i32, %arg1: i32) -> (i32, i32, i32) {
    %c0_i32 = arith.constant 0 : i32
    %c0_i32_0 = arith.constant 0 : i32
    %c0_i32_1 = arith.constant 0 : i32
    return %arg1, %c0_i32, %c0_i32_0 : i32, i32, i32
  }
  func.func @transform_22(%arg0: i32, %arg1: i32) -> (i32, i32, i32) {
    %c0_i32 = arith.constant 0 : i32
    %c0_i32_0 = arith.constant 0 : i32
    %c0_i32_1 = arith.constant 0 : i32
    return %arg1, %c0_i32, %c0_i32_0 : i32, i32, i32
  }
  func.func @transform_23(%arg0: i32, %arg1: i32) -> (i32, i32, i32) {
    %c0_i32 = arith.constant 0 : i32
    %c0_i32_0 = arith.constant 0 : i32
    %c0_i32_1 = arith.constant 0 : i32
    return %arg1, %c0_i32, %c0_i32_0 : i32, i32, i32
  }
  func.func @transform_24(%arg0: i32, %arg1: i32) -> (i32, i32, i32) {
    %c0_i32 = arith.constant 0 : i32
    %c0_i32_0 = arith.constant 0 : i32
    %c0_i32_1 = arith.constant 0 : i32
    return %arg1, %c0_i32, %c0_i32_0 : i32, i32, i32
  }
  func.func @transform_25(%arg0: i32, %arg1: i32) -> (i32, i32, i32) {
    %c0_i32 = arith.constant 0 : i32
    %c0_i32_0 = arith.constant 0 : i32
    %c0_i32_1 = arith.constant 0 : i32
    return %arg1, %c0_i32, %c0_i32_0 : i32, i32, i32
  }
  func.func @transform_26(%arg0: i32, %arg1: i32) -> (i32, i32, i32) {
    %c0_i32 = arith.constant 0 : i32
    %c0_i32_0 = arith.constant 0 : i32
    %c0_i32_1 = arith.constant 0 : i32
    return %arg1, %c0_i32, %c0_i32_0 : i32, i32, i32
  }
  func.func @transform_27(%arg0: i32, %arg1: i32) -> (i32, i32, i32, i32) {
    %c0_i32 = arith.constant 0 : i32
    %c0_i32_0 = arith.constant 0 : i32
    %c0_i32_1 = arith.constant 0 : i32
    return %arg1, %arg0, %c0_i32, %c0_i32_0 : i32, i32, i32, i32
  }
  func.func @transform_28(%arg0: i32, %arg1: i32) -> (i32, i32, i32, i32) {
    %c0_i32 = arith.constant 0 : i32
    %c0_i32_0 = arith.constant 0 : i32
    %c0_i32_1 = arith.constant 0 : i32
    return %arg1, %arg0, %c0_i32, %c0_i32_0 : i32, i32, i32, i32
  }
}

module attributes {stable_mosaic.version = 11 : i64} {
  func.func @_decoder_layer_kernel(%arg0: i32, %arg1: i32, %arg2: memref<1x1x8x32xbf16, #tpu.memory_space<vmem>>, %arg3: memref<1x1x8x32xbf16, #tpu.memory_space<vmem>>, %arg4: memref<1x20x32xbf16, #tpu.memory_space<vmem>>, %arg5: memref<1x32x64xbf16, #tpu.memory_space<vmem>>, %arg6: memref<1x1x64xf32, #tpu.memory_space<vmem>>, %arg7: memref<1x32x32xbf16, #tpu.memory_space<vmem>>, %arg8: memref<1x1x32xf32, #tpu.memory_space<vmem>>, %arg9: memref<1x32x32xbf16, #tpu.memory_space<vmem>>, %arg10: memref<1x1x32xf32, #tpu.memory_space<vmem>>, %arg11: memref<1x1x32xf32, #tpu.memory_space<vmem>>, %arg12: memref<1x1x32xf32, #tpu.memory_space<vmem>>, %arg13: memref<1x32x32xbf16, #tpu.memory_space<vmem>>, %arg14: memref<1x1x32xf32, #tpu.memory_space<vmem>>, %arg15: memref<1x32x64xbf16, #tpu.memory_space<vmem>>, %arg16: memref<1x1x64xf32, #tpu.memory_space<vmem>>, %arg17: memref<1x32x32xbf16, #tpu.memory_space<vmem>>, %arg18: memref<1x1x32xf32, #tpu.memory_space<vmem>>, %arg19: memref<1x1x32xf32, #tpu.memory_space<vmem>>, %arg20: memref<1x1x32xf32, #tpu.memory_space<vmem>>, %arg21: memref<1x32x64xbf16, #tpu.memory_space<vmem>>, %arg22: memref<1x1x64xf32, #tpu.memory_space<vmem>>, %arg23: memref<1x64x32xbf16, #tpu.memory_space<vmem>>, %arg24: memref<1x1x32xf32, #tpu.memory_space<vmem>>, %arg25: memref<1x1x32xf32, #tpu.memory_space<vmem>>, %arg26: memref<1x1x32xf32, #tpu.memory_space<vmem>>, %arg27: memref<1x1x32xf32, #tpu.memory_space<vmem>>, %arg28: memref<1x1x32xf32, #tpu.memory_space<vmem>>, %arg29: memref<1x1x8x32xbf16, #tpu.memory_space<vmem>>, %arg30: memref<1x1x8x32xbf16, #tpu.memory_space<vmem>>) attributes {dimension_semantics = [#tpu.dimension_semantics<parallel>, #tpu.dimension_semantics<parallel>], iteration_bounds = array<i64: 2, 1>, scalar_prefetch = 0 : i64, scratch_operands = 0 : i64, tpu.core_type = #tpu.core_type<tc>, window_params = [{transform_indices = @transform_0, window_bounds = array<i64: 1, 1, 8, 32>}, {transform_indices = @transform_1, window_bounds = array<i64: 1, 1, 8, 32>}, {transform_indices = @transform_2, window_bounds = array<i64: 1, 20, 32>}, {transform_indices = @transform_3, window_bounds = array<i64: 1, 32, 64>}, {transform_indices = @transform_4, window_bounds = array<i64: 1, 1, 64>}, {transform_indices = @transform_5, window_bounds = array<i64: 1, 32, 32>}, {transform_indices = @transform_6, window_bounds = array<i64: 1, 1, 32>}, {transform_indices = @transform_7, window_bounds = array<i64: 1, 32, 32>}, {transform_indices = @transform_8, window_bounds = array<i64: 1, 1, 32>}, {transform_indices = @transform_9, window_bounds = array<i64: 1, 1, 32>}, {transform_indices = @transform_10, window_bounds = array<i64: 1, 1, 32>}, {transform_indices = @transform_11, window_bounds = array<i64: 1, 32, 32>}, {transform_indices = @transform_12, window_bounds = array<i64: 1, 1, 32>}, {transform_indices = @transform_13, window_bounds = array<i64: 1, 32, 64>}, {transform_indices = @transform_14, window_bounds = array<i64: 1, 1, 64>}, {transform_indices = @transform_15, window_bounds = array<i64: 1, 32, 32>}, {transform_indices = @transform_16, window_bounds = array<i64: 1, 1, 32>}, {transform_indices = @transform_17, window_bounds = array<i64: 1, 1, 32>}, {transform_indices = @transform_18, window_bounds = array<i64: 1, 1, 32>}, {transform_indices = @transform_19, window_bounds = array<i64: 1, 32, 64>}, {transform_indices = @transform_20, window_bounds = array<i64: 1, 1, 64>}, {transform_indices = @transform_21, window_bounds = array<i64: 1, 64, 32>}, {transform_indices = @transform_22, window_bounds = array<i64: 1, 1, 32>}, {transform_indices = @transform_23, window_bounds = array<i64: 1, 1, 32>}, {transform_indices = @transform_24, window_bounds = array<i64: 1, 1, 32>}, {transform_indices = @transform_25, window_bounds = array<i64: 1, 1, 32>}, {transform_indices = @transform_26, window_bounds = array<i64: 1, 1, 32>}, {transform_indices = @transform_27, window_bounds = array<i64: 1, 1, 8, 32>}, {transform_indices = @transform_28, window_bounds = array<i64: 1, 1, 8, 32>}]} {
    %c0 = arith.constant 0 : index
    %c0_0 = arith.constant 0 : index
    %c0_1 = arith.constant 0 : index
    %c0_2 = arith.constant 0 : index
    %0 = vector.load %arg2[%c0, %c0_0, %c0_1, %c0_2] : memref<1x1x8x32xbf16, #tpu.memory_space<vmem>>, vector<1x1x8x32xbf16>
    %1 = vector.shape_cast %0 : vector<1x1x8x32xbf16> to vector<8x32xbf16>
    %c0_3 = arith.constant 0 : index
    %c0_4 = arith.constant 0 : index
    %c0_5 = arith.constant 0 : index
    %c0_6 = arith.constant 0 : index
    %2 = vector.load %arg3[%c0_3, %c0_4, %c0_5, %c0_6] : memref<1x1x8x32xbf16, #tpu.memory_space<vmem>>, vector<1x1x8x32xbf16>
    %3 = vector.shape_cast %2 : vector<1x1x8x32xbf16> to vector<8x32xbf16>
    %4 = arith.extf %3 : vector<8x32xbf16> to vector<8x32xf32>
    %c0_7 = arith.constant 0 : index
    %c0_8 = arith.constant 0 : index
    %c0_9 = arith.constant 0 : index
    %5 = vector.load %arg4[%c0_7, %c0_8, %c0_9] : memref<1x20x32xbf16, #tpu.memory_space<vmem>>, vector<1x20x32xbf16>
    %6 = vector.shape_cast %5 : vector<1x20x32xbf16> to vector<20x32xbf16>
    %7 = arith.extf %1 : vector<8x32xbf16> to vector<8x32xf32>
    %8 = arith.addf %7, %4 : vector<8x32xf32>
    %9 = arith.truncf %8 : vector<8x32xf32> to vector<8x32xbf16>
    %c0_10 = arith.constant 0 : index
    %c0_11 = arith.constant 0 : index
    %c0_12 = arith.constant 0 : index
    %10 = vector.load %arg5[%c0_10, %c0_11, %c0_12] : memref<1x32x64xbf16, #tpu.memory_space<vmem>>, vector<1x32x64xbf16>
    %11 = vector.shape_cast %10 : vector<1x32x64xbf16> to vector<32x64xbf16>
    %cst = arith.constant dense<0.000000e+00> : vector<8x64xf32>
    %12 = tpu.matmul %9, %11, %cst {dimension_numbers = #tpu.dot_dimension_numbers<[1], [0], [0], [1], [0, 0, 1, 1], [], []>} : vector<8x32xbf16>, vector<32x64xbf16>, vector<8x64xf32> -> vector<8x64xf32>
    %c0_13 = arith.constant 0 : index
    %c0_14 = arith.constant 0 : index
    %c0_15 = arith.constant 0 : index
    %13 = vector.load %arg6[%c0_13, %c0_14, %c0_15] : memref<1x1x64xf32, #tpu.memory_space<vmem>>, vector<1x1x64xf32>
    %14 = vector.shape_cast %13 : vector<1x1x64xf32> to vector<1x64xf32>
    %15 = vector.broadcast %14 : vector<1x64xf32> to vector<8x64xf32>
    %16 = arith.addf %12, %15 : vector<8x64xf32>
    %17 = arith.truncf %16 : vector<8x64xf32> to vector<8x64xbf16>
    %c0_16 = arith.constant 0 : index
    %c0_17 = arith.constant 0 : index
    %c0_18 = arith.constant 0 : index
    %18 = vector.load %arg7[%c0_16, %c0_17, %c0_18] : memref<1x32x32xbf16, #tpu.memory_space<vmem>>, vector<1x32x32xbf16>
    %19 = vector.shape_cast %18 : vector<1x32x32xbf16> to vector<32x32xbf16>
    %cst_19 = arith.constant dense<0.000000e+00> : vector<8x32xf32>
    %20 = tpu.matmul %1, %19, %cst_19 {dimension_numbers = #tpu.dot_dimension_numbers<[1], [0], [0], [1], [0, 0, 1, 1], [], []>} : vector<8x32xbf16>, vector<32x32xbf16>, vector<8x32xf32> -> vector<8x32xf32>
    %c0_20 = arith.constant 0 : index
    %c0_21 = arith.constant 0 : index
    %c0_22 = arith.constant 0 : index
    %21 = vector.load %arg8[%c0_20, %c0_21, %c0_22] : memref<1x1x32xf32, #tpu.memory_space<vmem>>, vector<1x1x32xf32>
    %22 = vector.shape_cast %21 : vector<1x1x32xf32> to vector<1x32xf32>
    %23 = vector.broadcast %22 : vector<1x32xf32> to vector<8x32xf32>
    %24 = arith.addf %20, %23 : vector<8x32xf32>
    %25 = arith.truncf %24 : vector<8x32xf32> to vector<8x32xbf16>
    %26 = vector.extract_strided_slice %17 {offsets = [0, 0], sizes = [8, 32], strides = [1, 1]} : vector<8x64xbf16> to vector<8x32xbf16>
    %27 = vector.extract_strided_slice %17 {offsets = [0, 32], sizes = [8, 32], strides = [1, 1]} : vector<8x64xbf16> to vector<8x32xbf16>
    %28 = vector.shape_cast %26 : vector<8x32xbf16> to vector<8x4x8xbf16>
    %29 = tpu.transpose %28, [1, 0, 2] : vector<8x4x8xbf16> -> vector<4x8x8xbf16>
    %30 = vector.shape_cast %27 : vector<8x32xbf16> to vector<8x4x8xbf16>
    %31 = tpu.transpose %30, [1, 0, 2] : vector<8x4x8xbf16> -> vector<4x8x8xbf16>
    %32 = vector.shape_cast %25 : vector<8x32xbf16> to vector<8x4x8xbf16>
    %33 = tpu.transpose %32, [1, 0, 2] : vector<8x4x8xbf16> -> vector<4x8x8xbf16>
    %cst_23 = arith.constant dense<0.000000e+00> : vector<4x8x8xf32>
    %34 = tpu.matmul %29, %31, %cst_23 {dimension_numbers = #tpu.dot_dimension_numbers<[2], [2], [1], [1], [0, 0, 0, 1, 1, 1], [0], [0]>} : vector<4x8x8xbf16>, vector<4x8x8xbf16>, vector<4x8x8xf32> -> vector<4x8x8xf32>
    %cst_24 = arith.constant 0.353553385 : f32
    %35 = vector.broadcast %cst_24 : f32 to vector<4x8x8xf32>
    %36 = arith.mulf %34, %35 : vector<4x8x8xf32>
    %cst_25 = arith.constant dense<0xFF800000> : vector<4x8xf32>
    %37 = vector.multi_reduction <maximumf>, %36, %cst_25 [2] : vector<4x8x8xf32> to vector<4x8xf32>
    %38 = vector.shape_cast %37 : vector<4x8xf32> to vector<4x8x1xf32>
    %39 = vector.broadcast %38 : vector<4x8x1xf32> to vector<4x8x8xf32>
    %40 = arith.subf %36, %39 : vector<4x8x8xf32>
    %41 = math.exp %40 : vector<4x8x8xf32>
    %cst_26 = arith.constant dense<0.000000e+00> : vector<4x8xf32>
    %42 = vector.multi_reduction <add>, %41, %cst_26 [2] : vector<4x8x8xf32> to vector<4x8xf32>
    %43 = vector.shape_cast %42 : vector<4x8xf32> to vector<4x8x1xf32>
    %44 = tpu.reciprocal %43 {approx = true} : vector<4x8x1xf32> -> vector<4x8x1xf32>
    %45 = vector.broadcast %44 : vector<4x8x1xf32> to vector<4x8x8xf32>
    %46 = arith.mulf %41, %45 : vector<4x8x8xf32>
    %47 = arith.truncf %46 : vector<4x8x8xf32> to vector<4x8x8xbf16>
    %cst_27 = arith.constant dense<0.000000e+00> : vector<4x8x8xf32>
    %48 = tpu.matmul %47, %33, %cst_27 {dimension_numbers = #tpu.dot_dimension_numbers<[2], [1], [1], [2], [0, 0, 0, 1, 1, 2], [0], [0]>} : vector<4x8x8xbf16>, vector<4x8x8xbf16>, vector<4x8x8xf32> -> vector<4x8x8xf32>
    %49 = tpu.transpose %48, [1, 0, 2] : vector<4x8x8xf32> -> vector<8x4x8xf32>
    %50 = vector.shape_cast %49 : vector<8x4x8xf32> to vector<8x32xf32>
    %c0_28 = arith.constant 0 : index
    %c0_29 = arith.constant 0 : index
    %c0_30 = arith.constant 0 : index
    %51 = vector.load %arg9[%c0_28, %c0_29, %c0_30] : memref<1x32x32xbf16, #tpu.memory_space<vmem>>, vector<1x32x32xbf16>
    %52 = vector.shape_cast %51 : vector<1x32x32xbf16> to vector<32x32xbf16>
    %53 = arith.truncf %50 : vector<8x32xf32> to vector<8x32xbf16>
    %cst_31 = arith.constant dense<0.000000e+00> : vector<8x32xf32>
    %54 = tpu.matmul %53, %52, %cst_31 {dimension_numbers = #tpu.dot_dimension_numbers<[1], [0], [0], [1], [0, 0, 1, 1], [], []>} : vector<8x32xbf16>, vector<32x32xbf16>, vector<8x32xf32> -> vector<8x32xf32>
    %c0_32 = arith.constant 0 : index
    %c0_33 = arith.constant 0 : index
    %c0_34 = arith.constant 0 : index
    %55 = vector.load %arg10[%c0_32, %c0_33, %c0_34] : memref<1x1x32xf32, #tpu.memory_space<vmem>>, vector<1x1x32xf32>
    %56 = vector.shape_cast %55 : vector<1x1x32xf32> to vector<1x32xf32>
    %57 = vector.broadcast %56 : vector<1x32xf32> to vector<8x32xf32>
    %58 = arith.addf %54, %57 : vector<8x32xf32>
    %59 = arith.addf %7, %58 : vector<8x32xf32>
    %c0_35 = arith.constant 0 : index
    %c0_36 = arith.constant 0 : index
    %c0_37 = arith.constant 0 : index
    %60 = vector.load %arg11[%c0_35, %c0_36, %c0_37] : memref<1x1x32xf32, #tpu.memory_space<vmem>>, vector<1x1x32xf32>
    %61 = vector.shape_cast %60 : vector<1x1x32xf32> to vector<1x32xf32>
    %c0_38 = arith.constant 0 : index
    %c0_39 = arith.constant 0 : index
    %c0_40 = arith.constant 0 : index
    %62 = vector.load %arg12[%c0_38, %c0_39, %c0_40] : memref<1x1x32xf32, #tpu.memory_space<vmem>>, vector<1x1x32xf32>
    %63 = vector.shape_cast %62 : vector<1x1x32xf32> to vector<1x32xf32>
    %cst_41 = arith.constant dense<0.000000e+00> : vector<8xf32>
    %64 = vector.multi_reduction <add>, %59, %cst_41 [1] : vector<8x32xf32> to vector<8xf32>
    %65 = vector.shape_cast %64 : vector<8xf32> to vector<8x1xf32>
    %cst_42 = arith.constant 3.200000e+01 : f32
    %66 = vector.broadcast %cst_42 : f32 to vector<8x1xf32>
    %67 = arith.divf %65, %66 : vector<8x1xf32>
    %68 = vector.broadcast %67 : vector<8x1xf32> to vector<8x32xf32>
    %69 = arith.subf %59, %68 : vector<8x32xf32>
    %70 = arith.mulf %69, %69 : vector<8x32xf32>
    %cst_43 = arith.constant dense<0.000000e+00> : vector<8xf32>
    %71 = vector.multi_reduction <add>, %70, %cst_43 [1] : vector<8x32xf32> to vector<8xf32>
    %72 = vector.shape_cast %71 : vector<8xf32> to vector<8x1xf32>
    %cst_44 = arith.constant 3.200000e+01 : f32
    %73 = vector.broadcast %cst_44 : f32 to vector<8x1xf32>
    %74 = arith.divf %72, %73 : vector<8x1xf32>
    %75 = vector.broadcast %67 : vector<8x1xf32> to vector<8x32xf32>
    %76 = arith.subf %59, %75 : vector<8x32xf32>
    %cst_45 = arith.constant 9.99999974E-6 : f32
    %77 = vector.broadcast %cst_45 : f32 to vector<8x1xf32>
    %78 = arith.addf %74, %77 : vector<8x1xf32>
    %79 = math.rsqrt %78 : vector<8x1xf32>
    %80 = vector.broadcast %79 : vector<8x1xf32> to vector<8x32xf32>
    %81 = arith.mulf %76, %80 : vector<8x32xf32>
    %82 = vector.broadcast %61 : vector<1x32xf32> to vector<8x32xf32>
    %83 = arith.mulf %81, %82 : vector<8x32xf32>
    %84 = vector.broadcast %63 : vector<1x32xf32> to vector<8x32xf32>
    %85 = arith.addf %83, %84 : vector<8x32xf32>
    %86 = arith.addf %85, %4 : vector<8x32xf32>
    %87 = arith.truncf %86 : vector<8x32xf32> to vector<8x32xbf16>
    %c0_46 = arith.constant 0 : index
    %c0_47 = arith.constant 0 : index
    %c0_48 = arith.constant 0 : index
    %88 = vector.load %arg13[%c0_46, %c0_47, %c0_48] : memref<1x32x32xbf16, #tpu.memory_space<vmem>>, vector<1x32x32xbf16>
    %89 = vector.shape_cast %88 : vector<1x32x32xbf16> to vector<32x32xbf16>
    %cst_49 = arith.constant dense<0.000000e+00> : vector<8x32xf32>
    %90 = tpu.matmul %87, %89, %cst_49 {dimension_numbers = #tpu.dot_dimension_numbers<[1], [0], [0], [1], [0, 0, 1, 1], [], []>} : vector<8x32xbf16>, vector<32x32xbf16>, vector<8x32xf32> -> vector<8x32xf32>
    %c0_50 = arith.constant 0 : index
    %c0_51 = arith.constant 0 : index
    %c0_52 = arith.constant 0 : index
    %91 = vector.load %arg14[%c0_50, %c0_51, %c0_52] : memref<1x1x32xf32, #tpu.memory_space<vmem>>, vector<1x1x32xf32>
    %92 = vector.shape_cast %91 : vector<1x1x32xf32> to vector<1x32xf32>
    %93 = vector.broadcast %92 : vector<1x32xf32> to vector<8x32xf32>
    %94 = arith.addf %90, %93 : vector<8x32xf32>
    %95 = arith.truncf %94 : vector<8x32xf32> to vector<8x32xbf16>
    %c0_53 = arith.constant 0 : index
    %c0_54 = arith.constant 0 : index
    %c0_55 = arith.constant 0 : index
    %96 = vector.load %arg15[%c0_53, %c0_54, %c0_55] : memref<1x32x64xbf16, #tpu.memory_space<vmem>>, vector<1x32x64xbf16>
    %97 = vector.shape_cast %96 : vector<1x32x64xbf16> to vector<32x64xbf16>
    %cst_56 = arith.constant dense<0.000000e+00> : vector<20x64xf32>
    %98 = tpu.matmul %6, %97, %cst_56 {dimension_numbers = #tpu.dot_dimension_numbers<[1], [0], [0], [1], [0, 0, 1, 1], [], []>} : vector<20x32xbf16>, vector<32x64xbf16>, vector<20x64xf32> -> vector<20x64xf32>
    %c0_57 = arith.constant 0 : index
    %c0_58 = arith.constant 0 : index
    %c0_59 = arith.constant 0 : index
    %99 = vector.load %arg16[%c0_57, %c0_58, %c0_59] : memref<1x1x64xf32, #tpu.memory_space<vmem>>, vector<1x1x64xf32>
    %100 = vector.shape_cast %99 : vector<1x1x64xf32> to vector<1x64xf32>
    %101 = vector.broadcast %100 : vector<1x64xf32> to vector<20x64xf32>
    %102 = arith.addf %98, %101 : vector<20x64xf32>
    %103 = arith.truncf %102 : vector<20x64xf32> to vector<20x64xbf16>
    %104 = vector.extract_strided_slice %103 {offsets = [0, 0], sizes = [20, 32], strides = [1, 1]} : vector<20x64xbf16> to vector<20x32xbf16>
    %105 = vector.extract_strided_slice %103 {offsets = [0, 32], sizes = [20, 32], strides = [1, 1]} : vector<20x64xbf16> to vector<20x32xbf16>
    %106 = vector.shape_cast %95 : vector<8x32xbf16> to vector<8x4x8xbf16>
    %107 = tpu.transpose %106, [1, 0, 2] : vector<8x4x8xbf16> -> vector<4x8x8xbf16>
    %108 = vector.shape_cast %104 : vector<20x32xbf16> to vector<20x4x8xbf16>
    %109 = tpu.transpose %108, [1, 0, 2] : vector<20x4x8xbf16> -> vector<4x20x8xbf16>
    %110 = vector.shape_cast %105 : vector<20x32xbf16> to vector<20x4x8xbf16>
    %111 = tpu.transpose %110, [1, 0, 2] : vector<20x4x8xbf16> -> vector<4x20x8xbf16>
    %cst_60 = arith.constant dense<0.000000e+00> : vector<4x8x20xf32>
    %112 = tpu.matmul %107, %109, %cst_60 {dimension_numbers = #tpu.dot_dimension_numbers<[2], [2], [1], [1], [0, 0, 0, 1, 1, 1], [0], [0]>} : vector<4x8x8xbf16>, vector<4x20x8xbf16>, vector<4x8x20xf32> -> vector<4x8x20xf32>
    %cst_61 = arith.constant 0.353553385 : f32
    %113 = vector.broadcast %cst_61 : f32 to vector<4x8x20xf32>
    %114 = arith.mulf %112, %113 : vector<4x8x20xf32>
    %cst_62 = arith.constant dense<0xFF800000> : vector<4x8xf32>
    %115 = vector.multi_reduction <maximumf>, %114, %cst_62 [2] : vector<4x8x20xf32> to vector<4x8xf32>
    %116 = vector.shape_cast %115 : vector<4x8xf32> to vector<4x8x1xf32>
    %117 = vector.broadcast %116 : vector<4x8x1xf32> to vector<4x8x20xf32>
    %118 = arith.subf %114, %117 : vector<4x8x20xf32>
    %119 = math.exp %118 : vector<4x8x20xf32>
    %cst_63 = arith.constant dense<0.000000e+00> : vector<4x8xf32>
    %120 = vector.multi_reduction <add>, %119, %cst_63 [2] : vector<4x8x20xf32> to vector<4x8xf32>
    %121 = vector.shape_cast %120 : vector<4x8xf32> to vector<4x8x1xf32>
    %122 = tpu.reciprocal %121 {approx = true} : vector<4x8x1xf32> -> vector<4x8x1xf32>
    %123 = vector.broadcast %122 : vector<4x8x1xf32> to vector<4x8x20xf32>
    %124 = arith.mulf %119, %123 : vector<4x8x20xf32>
    %125 = arith.truncf %124 : vector<4x8x20xf32> to vector<4x8x20xbf16>
    %cst_64 = arith.constant dense<0.000000e+00> : vector<4x8x8xf32>
    %126 = tpu.matmul %125, %111, %cst_64 {dimension_numbers = #tpu.dot_dimension_numbers<[2], [1], [1], [2], [0, 0, 0, 1, 1, 2], [0], [0]>} : vector<4x8x20xbf16>, vector<4x20x8xbf16>, vector<4x8x8xf32> -> vector<4x8x8xf32>
    %127 = tpu.transpose %126, [1, 0, 2] : vector<4x8x8xf32> -> vector<8x4x8xf32>
    %128 = vector.shape_cast %127 : vector<8x4x8xf32> to vector<8x32xf32>
    %c0_65 = arith.constant 0 : index
    %c0_66 = arith.constant 0 : index
    %c0_67 = arith.constant 0 : index
    %129 = vector.load %arg17[%c0_65, %c0_66, %c0_67] : memref<1x32x32xbf16, #tpu.memory_space<vmem>>, vector<1x32x32xbf16>
    %130 = vector.shape_cast %129 : vector<1x32x32xbf16> to vector<32x32xbf16>
    %131 = arith.truncf %128 : vector<8x32xf32> to vector<8x32xbf16>
    %cst_68 = arith.constant dense<0.000000e+00> : vector<8x32xf32>
    %132 = tpu.matmul %131, %130, %cst_68 {dimension_numbers = #tpu.dot_dimension_numbers<[1], [0], [0], [1], [0, 0, 1, 1], [], []>} : vector<8x32xbf16>, vector<32x32xbf16>, vector<8x32xf32> -> vector<8x32xf32>
    %c0_69 = arith.constant 0 : index
    %c0_70 = arith.constant 0 : index
    %c0_71 = arith.constant 0 : index
    %133 = vector.load %arg18[%c0_69, %c0_70, %c0_71] : memref<1x1x32xf32, #tpu.memory_space<vmem>>, vector<1x1x32xf32>
    %134 = vector.shape_cast %133 : vector<1x1x32xf32> to vector<1x32xf32>
    %135 = vector.broadcast %134 : vector<1x32xf32> to vector<8x32xf32>
    %136 = arith.addf %132, %135 : vector<8x32xf32>
    %137 = arith.addf %85, %136 : vector<8x32xf32>
    %c0_72 = arith.constant 0 : index
    %c0_73 = arith.constant 0 : index
    %c0_74 = arith.constant 0 : index
    %138 = vector.load %arg19[%c0_72, %c0_73, %c0_74] : memref<1x1x32xf32, #tpu.memory_space<vmem>>, vector<1x1x32xf32>
    %139 = vector.shape_cast %138 : vector<1x1x32xf32> to vector<1x32xf32>
    %c0_75 = arith.constant 0 : index
    %c0_76 = arith.constant 0 : index
    %c0_77 = arith.constant 0 : index
    %140 = vector.load %arg20[%c0_75, %c0_76, %c0_77] : memref<1x1x32xf32, #tpu.memory_space<vmem>>, vector<1x1x32xf32>
    %141 = vector.shape_cast %140 : vector<1x1x32xf32> to vector<1x32xf32>
    %cst_78 = arith.constant dense<0.000000e+00> : vector<8xf32>
    %142 = vector.multi_reduction <add>, %137, %cst_78 [1] : vector<8x32xf32> to vector<8xf32>
    %143 = vector.shape_cast %142 : vector<8xf32> to vector<8x1xf32>
    %cst_79 = arith.constant 3.200000e+01 : f32
    %144 = vector.broadcast %cst_79 : f32 to vector<8x1xf32>
    %145 = arith.divf %143, %144 : vector<8x1xf32>
    %146 = vector.broadcast %145 : vector<8x1xf32> to vector<8x32xf32>
    %147 = arith.subf %137, %146 : vector<8x32xf32>
    %148 = arith.mulf %147, %147 : vector<8x32xf32>
    %cst_80 = arith.constant dense<0.000000e+00> : vector<8xf32>
    %149 = vector.multi_reduction <add>, %148, %cst_80 [1] : vector<8x32xf32> to vector<8xf32>
    %150 = vector.shape_cast %149 : vector<8xf32> to vector<8x1xf32>
    %cst_81 = arith.constant 3.200000e+01 : f32
    %151 = vector.broadcast %cst_81 : f32 to vector<8x1xf32>
    %152 = arith.divf %150, %151 : vector<8x1xf32>
    %153 = vector.broadcast %145 : vector<8x1xf32> to vector<8x32xf32>
    %154 = arith.subf %137, %153 : vector<8x32xf32>
    %cst_82 = arith.constant 9.99999974E-6 : f32
    %155 = vector.broadcast %cst_82 : f32 to vector<8x1xf32>
    %156 = arith.addf %152, %155 : vector<8x1xf32>
    %157 = math.rsqrt %156 : vector<8x1xf32>
    %158 = vector.broadcast %157 : vector<8x1xf32> to vector<8x32xf32>
    %159 = arith.mulf %154, %158 : vector<8x32xf32>
    %160 = vector.broadcast %139 : vector<1x32xf32> to vector<8x32xf32>
    %161 = arith.mulf %159, %160 : vector<8x32xf32>
    %162 = vector.broadcast %141 : vector<1x32xf32> to vector<8x32xf32>
    %163 = arith.addf %161, %162 : vector<8x32xf32>
    %c0_83 = arith.constant 0 : index
    %c0_84 = arith.constant 0 : index
    %c0_85 = arith.constant 0 : index
    %164 = vector.load %arg21[%c0_83, %c0_84, %c0_85] : memref<1x32x64xbf16, #tpu.memory_space<vmem>>, vector<1x32x64xbf16>
    %165 = vector.shape_cast %164 : vector<1x32x64xbf16> to vector<32x64xbf16>
    %166 = arith.truncf %163 : vector<8x32xf32> to vector<8x32xbf16>
    %cst_86 = arith.constant dense<0.000000e+00> : vector<8x64xf32>
    %167 = tpu.matmul %166, %165, %cst_86 {dimension_numbers = #tpu.dot_dimension_numbers<[1], [0], [0], [1], [0, 0, 1, 1], [], []>} : vector<8x32xbf16>, vector<32x64xbf16>, vector<8x64xf32> -> vector<8x64xf32>
    %c0_87 = arith.constant 0 : index
    %c0_88 = arith.constant 0 : index
    %c0_89 = arith.constant 0 : index
    %168 = vector.load %arg22[%c0_87, %c0_88, %c0_89] : memref<1x1x64xf32, #tpu.memory_space<vmem>>, vector<1x1x64xf32>
    %169 = vector.shape_cast %168 : vector<1x1x64xf32> to vector<1x64xf32>
    %170 = vector.broadcast %169 : vector<1x64xf32> to vector<8x64xf32>
    %171 = arith.addf %167, %170 : vector<8x64xf32>
    %cst_90 = arith.constant 0.000000e+00 : f32
    %172 = vector.broadcast %cst_90 : f32 to vector<8x64xf32>
    %173 = arith.maximumf %171, %172 : vector<8x64xf32>
    %c0_91 = arith.constant 0 : index
    %c0_92 = arith.constant 0 : index
    %c0_93 = arith.constant 0 : index
    %174 = vector.load %arg23[%c0_91, %c0_92, %c0_93] : memref<1x64x32xbf16, #tpu.memory_space<vmem>>, vector<1x64x32xbf16>
    %175 = vector.shape_cast %174 : vector<1x64x32xbf16> to vector<64x32xbf16>
    %176 = arith.truncf %173 : vector<8x64xf32> to vector<8x64xbf16>
    %cst_94 = arith.constant dense<0.000000e+00> : vector<8x32xf32>
    %177 = tpu.matmul %176, %175, %cst_94 {dimension_numbers = #tpu.dot_dimension_numbers<[1], [0], [0], [1], [0, 0, 1, 1], [], []>} : vector<8x64xbf16>, vector<64x32xbf16>, vector<8x32xf32> -> vector<8x32xf32>
    %c0_95 = arith.constant 0 : index
    %c0_96 = arith.constant 0 : index
    %c0_97 = arith.constant 0 : index
    %178 = vector.load %arg24[%c0_95, %c0_96, %c0_97] : memref<1x1x32xf32, #tpu.memory_space<vmem>>, vector<1x1x32xf32>
    %179 = vector.shape_cast %178 : vector<1x1x32xf32> to vector<1x32xf32>
    %180 = vector.broadcast %179 : vector<1x32xf32> to vector<8x32xf32>
    %181 = arith.addf %177, %180 : vector<8x32xf32>
    %182 = arith.addf %163, %181 : vector<8x32xf32>
    %c0_98 = arith.constant 0 : index
    %c0_99 = arith.constant 0 : index
    %c0_100 = arith.constant 0 : index
    %183 = vector.load %arg25[%c0_98, %c0_99, %c0_100] : memref<1x1x32xf32, #tpu.memory_space<vmem>>, vector<1x1x32xf32>
    %184 = vector.shape_cast %183 : vector<1x1x32xf32> to vector<1x32xf32>
    %c0_101 = arith.constant 0 : index
    %c0_102 = arith.constant 0 : index
    %c0_103 = arith.constant 0 : index
    %185 = vector.load %arg26[%c0_101, %c0_102, %c0_103] : memref<1x1x32xf32, #tpu.memory_space<vmem>>, vector<1x1x32xf32>
    %186 = vector.shape_cast %185 : vector<1x1x32xf32> to vector<1x32xf32>
    %cst_104 = arith.constant dense<0.000000e+00> : vector<8xf32>
    %187 = vector.multi_reduction <add>, %182, %cst_104 [1] : vector<8x32xf32> to vector<8xf32>
    %188 = vector.shape_cast %187 : vector<8xf32> to vector<8x1xf32>
    %cst_105 = arith.constant 3.200000e+01 : f32
    %189 = vector.broadcast %cst_105 : f32 to vector<8x1xf32>
    %190 = arith.divf %188, %189 : vector<8x1xf32>
    %191 = vector.broadcast %190 : vector<8x1xf32> to vector<8x32xf32>
    %192 = arith.subf %182, %191 : vector<8x32xf32>
    %193 = arith.mulf %192, %192 : vector<8x32xf32>
    %cst_106 = arith.constant dense<0.000000e+00> : vector<8xf32>
    %194 = vector.multi_reduction <add>, %193, %cst_106 [1] : vector<8x32xf32> to vector<8xf32>
    %195 = vector.shape_cast %194 : vector<8xf32> to vector<8x1xf32>
    %cst_107 = arith.constant 3.200000e+01 : f32
    %196 = vector.broadcast %cst_107 : f32 to vector<8x1xf32>
    %197 = arith.divf %195, %196 : vector<8x1xf32>
    %198 = vector.broadcast %190 : vector<8x1xf32> to vector<8x32xf32>
    %199 = arith.subf %182, %198 : vector<8x32xf32>
    %cst_108 = arith.constant 9.99999974E-6 : f32
    %200 = vector.broadcast %cst_108 : f32 to vector<8x1xf32>
    %201 = arith.addf %197, %200 : vector<8x1xf32>
    %202 = math.rsqrt %201 : vector<8x1xf32>
    %203 = vector.broadcast %202 : vector<8x1xf32> to vector<8x32xf32>
    %204 = arith.mulf %199, %203 : vector<8x32xf32>
    %205 = vector.broadcast %184 : vector<1x32xf32> to vector<8x32xf32>
    %206 = arith.mulf %204, %205 : vector<8x32xf32>
    %207 = vector.broadcast %186 : vector<1x32xf32> to vector<8x32xf32>
    %208 = arith.addf %206, %207 : vector<8x32xf32>
    %209 = arith.truncf %208 : vector<8x32xf32> to vector<8x32xbf16>
    %c0_109 = arith.constant 0 : index
    %c0_110 = arith.constant 0 : index
    %c0_111 = arith.constant 0 : index
    %c0_112 = arith.constant 0 : index
    %210 = vector.load %arg29[%c0_109, %c0_110, %c0_111, %c0_112] : memref<1x1x8x32xbf16, #tpu.memory_space<vmem>>, vector<1x1x8x32xbf16>
    %211 = vector.shape_cast %210 : vector<1x1x8x32xbf16> to vector<8x32xbf16>
    %212 = vector.shape_cast %209 : vector<8x32xbf16> to vector<1x1x8x32xbf16>
    tpu.vector_store %arg29[%c0_109, %c0_110, %c0_111, %c0_112], %212 {strides = array<i32>} : memref<1x1x8x32xbf16, #tpu.memory_space<vmem>>, vector<1x1x8x32xbf16>,
    %c0_113 = arith.constant 0 : index
    %c0_114 = arith.constant 0 : index
    %c0_115 = arith.constant 0 : index
    %213 = vector.load %arg27[%c0_113, %c0_114, %c0_115] : memref<1x1x32xf32, #tpu.memory_space<vmem>>, vector<1x1x32xf32>
    %214 = vector.shape_cast %213 : vector<1x1x32xf32> to vector<1x32xf32>
    %c0_116 = arith.constant 0 : index
    %c0_117 = arith.constant 0 : index
    %c0_118 = arith.constant 0 : index
    %215 = vector.load %arg28[%c0_116, %c0_117, %c0_118] : memref<1x1x32xf32, #tpu.memory_space<vmem>>, vector<1x1x32xf32>
    %216 = vector.shape_cast %215 : vector<1x1x32xf32> to vector<1x32xf32>
    %cst_119 = arith.constant dense<0.000000e+00> : vector<8xf32>
    %217 = vector.multi_reduction <add>, %208, %cst_119 [1] : vector<8x32xf32> to vector<8xf32>
    %218 = vector.shape_cast %217 : vector<8xf32> to vector<8x1xf32>
    %cst_120 = arith.constant 3.200000e+01 : f32
    %219 = vector.broadcast %cst_120 : f32 to vector<8x1xf32>
    %220 = arith.divf %218, %219 : vector<8x1xf32>
    %221 = vector.broadcast %220 : vector<8x1xf32> to vector<8x32xf32>
    %222 = arith.subf %208, %221 : vector<8x32xf32>
    %223 = arith.mulf %222, %222 : vector<8x32xf32>
    %cst_121 = arith.constant dense<0.000000e+00> : vector<8xf32>
    %224 = vector.multi_reduction <add>, %223, %cst_121 [1] : vector<8x32xf32> to vector<8xf32>
    %225 = vector.shape_cast %224 : vector<8xf32> to vector<8x1xf32>
    %cst_122 = arith.constant 3.200000e+01 : f32
    %226 = vector.broadcast %cst_122 : f32 to vector<8x1xf32>
    %227 = arith.divf %225, %226 : vector<8x1xf32>
    %228 = vector.broadcast %220 : vector<8x1xf32> to vector<8x32xf32>
    %229 = arith.subf %208, %228 : vector<8x32xf32>
    %cst_123 = arith.constant 9.99999974E-6 : f32
    %230 = vector.broadcast %cst_123 : f32 to vector<8x1xf32>
    %231 = arith.addf %227, %230 : vector<8x1xf32>
    %232 = math.rsqrt %231 : vector<8x1xf32>
    %233 = vector.broadcast %232 : vector<8x1xf32> to vector<8x32xf32>
    %234 = arith.mulf %229, %233 : vector<8x32xf32>
    %235 = vector.broadcast %214 : vector<1x32xf32> to vector<8x32xf32>
    %236 = arith.mulf %234, %235 : vector<8x32xf32>
    %237 = vector.broadcast %216 : vector<1x32xf32> to vector<8x32xf32>
    %238 = arith.addf %236, %237 : vector<8x32xf32>
    %239 = arith.truncf %238 : vector<8x32xf32> to vector<8x32xbf16>
    %c0_124 = arith.constant 0 : index
    %c0_125 = arith.constant 0 : index
    %c0_126 = arith.constant 0 : index
    %c0_127 = arith.constant 0 : index
    %240 = vector.load %arg30[%c0_124, %c0_125, %c0_126, %c0_127] : memref<1x1x8x32xbf16, #tpu.memory_space<vmem>>, vector<1x1x8x32xbf16>
    %241 = vector.shape_cast %240 : vector<1x1x8x32xbf16> to vector<8x32xbf16>
    %242 = vector.shape_cast %239 : vector<8x32xbf16> to vector<1x1x8x32xbf16>
    tpu.vector_store %arg30[%c0_124, %c0_125, %c0_126, %c0_127], %242 {strides = array<i32>} : memref<1x1x8x32xbf16, #tpu.memory_space<vmem>>, vector<1x1x8x32xbf16>,
    return
  }
  func.func @transform_0(%arg0: i32, %arg1: i32) -> (i32, i32, i32, i32) {
    %c0_i32 = arith.constant 0 : i32
    %c0_i32_0 = arith.constant 0 : i32
    %c0_i32_1 = arith.constant 0 : i32
    return %arg1, %arg0, %c0_i32, %c0_i32_0 : i32, i32, i32, i32
  }
  func.func @transform_1(%arg0: i32, %arg1: i32) -> (i32, i32, i32, i32) {
    %c0_i32 = arith.constant 0 : i32
    %c0_i32_0 = arith.constant 0 : i32
    %c0_i32_1 = arith.constant 0 : i32
    return %arg1, %arg0, %c0_i32, %c0_i32_0 : i32, i32, i32, i32
  }
  func.func @transform_2(%arg0: i32, %arg1: i32) -> (i32, i32, i32) {
    %c0_i32 = arith.constant 0 : i32
    %c0_i32_0 = arith.constant 0 : i32
    %c0_i32_1 = arith.constant 0 : i32
    return %arg0, %c0_i32, %c0_i32_0 : i32, i32, i32
  }
  func.func @transform_3(%arg0: i32, %arg1: i32) -> (i32, i32, i32) {
    %c0_i32 = arith.constant 0 : i32
    %c0_i32_0 = arith.constant 0 : i32
    %c0_i32_1 = arith.constant 0 : i32
    return %arg1, %c0_i32, %c0_i32_0 : i32, i32, i32
  }
  func.func @transform_4(%arg0: i32, %arg1: i32) -> (i32, i32, i32) {
    %c0_i32 = arith.constant 0 : i32
    %c0_i32_0 = arith.constant 0 : i32
    %c0_i32_1 = arith.constant 0 : i32
    return %arg1, %c0_i32, %c0_i32_0 : i32, i32, i32
  }
  func.func @transform_5(%arg0: i32, %arg1: i32) -> (i32, i32, i32) {
    %c0_i32 = arith.constant 0 : i32
    %c0_i32_0 = arith.constant 0 : i32
    %c0_i32_1 = arith.constant 0 : i32
    return %arg1, %c0_i32, %c0_i32_0 : i32, i32, i32
  }
  func.func @transform_6(%arg0: i32, %arg1: i32) -> (i32, i32, i32) {
    %c0_i32 = arith.constant 0 : i32
    %c0_i32_0 = arith.constant 0 : i32
    %c0_i32_1 = arith.constant 0 : i32
    return %arg1, %c0_i32, %c0_i32_0 : i32, i32, i32
  }
  func.func @transform_7(%arg0: i32, %arg1: i32) -> (i32, i32, i32) {
    %c0_i32 = arith.constant 0 : i32
    %c0_i32_0 = arith.constant 0 : i32
    %c0_i32_1 = arith.constant 0 : i32
    return %arg1, %c0_i32, %c0_i32_0 : i32, i32, i32
  }
  func.func @transform_8(%arg0: i32, %arg1: i32) -> (i32, i32, i32) {
    %c0_i32 = arith.constant 0 : i32
    %c0_i32_0 = arith.constant 0 : i32
    %c0_i32_1 = arith.constant 0 : i32
    return %arg1, %c0_i32, %c0_i32_0 : i32, i32, i32
  }
  func.func @transform_9(%arg0: i32, %arg1: i32) -> (i32, i32, i32) {
    %c0_i32 = arith.constant 0 : i32
    %c0_i32_0 = arith.constant 0 : i32
    %c0_i32_1 = arith.constant 0 : i32
    return %arg1, %c0_i32, %c0_i32_0 : i32, i32, i32
  }
  func.func @transform_10(%arg0: i32, %arg1: i32) -> (i32, i32, i32) {
    %c0_i32 = arith.constant 0 : i32
    %c0_i32_0 = arith.constant 0 : i32
    %c0_i32_1 = arith.constant 0 : i32
    return %arg1, %c0_i32, %c0_i32_0 : i32, i32, i32
  }
  func.func @transform_11(%arg0: i32, %arg1: i32) -> (i32, i32, i32) {
    %c0_i32 = arith.constant 0 : i32
    %c0_i32_0 = arith.constant 0 : i32
    %c0_i32_1 = arith.constant 0 : i32
    return %arg1, %c0_i32, %c0_i32_0 : i32, i32, i32
  }
  func.func @transform_12(%arg0: i32, %arg1: i32) -> (i32, i32, i32) {
    %c0_i32 = arith.constant 0 : i32
    %c0_i32_0 = arith.constant 0 : i32
    %c0_i32_1 = arith.constant 0 : i32
    return %arg1, %c0_i32, %c0_i32_0 : i32, i32, i32
  }
  func.func @transform_13(%arg0: i32, %arg1: i32) -> (i32, i32, i32) {
    %c0_i32 = arith.constant 0 : i32
    %c0_i32_0 = arith.constant 0 : i32
    %c0_i32_1 = arith.constant 0 : i32
    return %arg1, %c0_i32, %c0_i32_0 : i32, i32, i32
  }
  func.func @transform_14(%arg0: i32, %arg1: i32) -> (i32, i32, i32) {
    %c0_i32 = arith.constant 0 : i32
    %c0_i32_0 = arith.constant 0 : i32
    %c0_i32_1 = arith.constant 0 : i32
    return %arg1, %c0_i32, %c0_i32_0 : i32, i32, i32
  }
  func.func @transform_15(%arg0: i32, %arg1: i32) -> (i32, i32, i32) {
    %c0_i32 = arith.constant 0 : i32
    %c0_i32_0 = arith.constant 0 : i32
    %c0_i32_1 = arith.constant 0 : i32
    return %arg1, %c0_i32, %c0_i32_0 : i32, i32, i32
  }
  func.func @transform_16(%arg0: i32, %arg1: i32) -> (i32, i32, i32) {
    %c0_i32 = arith.constant 0 : i32
    %c0_i32_0 = arith.constant 0 : i32
    %c0_i32_1 = arith.constant 0 : i32
    return %arg1, %c0_i32, %c0_i32_0 : i32, i32, i32
  }
  func.func @transform_17(%arg0: i32, %arg1: i32) -> (i32, i32, i32) {
    %c0_i32 = arith.constant 0 : i32
    %c0_i32_0 = arith.constant 0 : i32
    %c0_i32_1 = arith.constant 0 : i32
    return %arg1, %c0_i32, %c0_i32_0 : i32, i32, i32
  }
  func.func @transform_18(%arg0: i32, %arg1: i32) -> (i32, i32, i32) {
    %c0_i32 = arith.constant 0 : i32
    %c0_i32_0 = arith.constant 0 : i32
    %c0_i32_1 = arith.constant 0 : i32
    return %arg1, %c0_i32, %c0_i32_0 : i32, i32, i32
  }
  func.func @transform_19(%arg0: i32, %arg1: i32) -> (i32, i32, i32) {
    %c0_i32 = arith.constant 0 : i32
    %c0_i32_0 = arith.constant 0 : i32
    %c0_i32_1 = arith.constant 0 : i32
    return %arg1, %c0_i32, %c0_i32_0 : i32, i32, i32
  }
  func.func @transform_20(%arg0: i32, %arg1: i32) -> (i32, i32, i32) {
    %c0_i32 = arith.constant 0 : i32
    %c0_i32_0 = arith.constant 0 : i32
    %c0_i32_1 = arith.constant 0 : i32
    return %arg1, %c0_i32, %c0_i32_0 : i32, i32, i32
  }
  func.func @transform_21(%arg0: i32, %arg1: i32) -> (i32, i32, i32) {
    %c0_i32 = arith.constant 0 : i32
    %c0_i32_0 = arith.constant 0 : i32
    %c0_i32_1 = arith.constant 0 : i32
    return %arg1, %c0_i32, %c0_i32_0 : i32, i32, i32
  }
  func.func @transform_22(%arg0: i32, %arg1: i32) -> (i32, i32, i32) {
    %c0_i32 = arith.constant 0 : i32
    %c0_i32_0 = arith.constant 0 : i32
    %c0_i32_1 = arith.constant 0 : i32
    return %arg1, %c0_i32, %c0_i32_0 : i32, i32, i32
  }
  func.func @transform_23(%arg0: i32, %arg1: i32) -> (i32, i32, i32) {
    %c0_i32 = arith.constant 0 : i32
    %c0_i32_0 = arith.constant 0 : i32
    %c0_i32_1 = arith.constant 0 : i32
    return %arg1, %c0_i32, %c0_i32_0 : i32, i32, i32
  }
  func.func @transform_24(%arg0: i32, %arg1: i32) -> (i32, i32, i32) {
    %c0_i32 = arith.constant 0 : i32
    %c0_i32_0 = arith.constant 0 : i32
    %c0_i32_1 = arith.constant 0 : i32
    return %arg1, %c0_i32, %c0_i32_0 : i32, i32, i32
  }
  func.func @transform_25(%arg0: i32, %arg1: i32) -> (i32, i32, i32) {
    %c0_i32 = arith.constant 0 : i32
    %c0_i32_0 = arith.constant 0 : i32
    %c0_i32_1 = arith.constant 0 : i32
    return %arg1, %c0_i32, %c0_i32_0 : i32, i32, i32
  }
  func.func @transform_26(%arg0: i32, %arg1: i32) -> (i32, i32, i32) {
    %c0_i32 = arith.constant 0 : i32
    %c0_i32_0 = arith.constant 0 : i32
    %c0_i32_1 = arith.constant 0 : i32
    return %arg1, %c0_i32, %c0_i32_0 : i32, i32, i32
  }
  func.func @transform_27(%arg0: i32, %arg1: i32) -> (i32, i32, i32, i32) {
    %c0_i32 = arith.constant 0 : i32
    %c0_i32_0 = arith.constant 0 : i32
    %c0_i32_1 = arith.constant 0 : i32
    return %arg1, %arg0, %c0_i32, %c0_i32_0 : i32, i32, i32, i32
  }
  func.func @transform_28(%arg0: i32, %arg1: i32) -> (i32, i32, i32, i32) {
    %c0_i32 = arith.constant 0 : i32
    %c0_i32_0 = arith.constant 0 : i32
    %c0_i32_1 = arith.constant 0 : i32
    return %arg1, %arg0, %c0_i32, %c0_i32_0 : i32, i32, i32, i32
  }
}

</mosaic_0001>

<bundles_post_ra>
// kernel: transformer_decoder_forward.14
= control target key start
LH: loop header
LB: loop body
LE: loop exit
PB: predicated region body
PF: predicated region fallthrough
CT: control target
= control target key end

     0   :  { %v713_v0 = vmov 0.0   ;;  %vm714_vm0 = vmmov 0   ;;  %vm97_vm1 = vcmask 261120   ;;  %vm281_vm2 = vcmask 130048   ;;  %s941_s3 = inlined_call_operand.vmem [shape: bf16[32,32], index: 3, kind: input, shape index: {}]   ;;  %s942_s0 = inlined_call_operand.vmem [shape: bf16[16,32], index: 0, kind: input, shape index: {}]   ;;  %s943_s5 = inlined_call_operand.vmem [shape: bf16[32,32], index: 5, kind: input, shape index: {}]   ;;  %s944_s1 = inlined_call_operand.vmem [shape: bf16[16,32], index: 1, kind: input, shape index: {}]   ;;  %s945_s9 = inlined_call_operand.vmem [shape: bf16[16,64], index: 9, kind: input, shape index: {}]   ;;  %s946_s2 = inlined_call_operand.vmem [shape: f32[16,16], index: 2, kind: input, shape index: {}]   ;;  %s947_s4 = inlined_call_operand.vmem [shape: f32[1,32], index: 4, kind: input, shape index: {}]   ;;  %s948_s6 = inlined_call_operand.vmem [shape: f32[1,32], index: 6, kind: input, shape index: {}]   ;;  %s949_s10 = inlined_call_operand.vmem [shape: f32[1,64], index: 10, kind: input, shape index: {}]   ;;  %s950_s13 = inlined_call_operand.vmem [shape: bf16[64,32], index: 13, kind: input, shape index: {}]   ;;  %s951_s15 = inlined_call_operand.vmem [shape: bf16[32,32], index: 15, kind: input, shape index: {}]   ;;  %s952_s11 = inlined_call_operand.vmem [shape: f32[1,64], index: 11, kind: input, shape index: {}]   ;;  %s953_s12 = inlined_call_operand.vmem [shape: f32[1,64], index: 12, kind: input, shape index: {}]   ;;  %s954_s7 = inlined_call_operand.vmem [shape: f32[1,32], index: 7, kind: input, shape index: {}]   ;;  %s955_s8 = inlined_call_operand.vmem [shape: f32[1,32], index: 8, kind: input, shape index: {}]   ;;  %s956_s14 = inlined_call_operand.vmem [shape: f32[1,32], index: 14, kind: input, shape index: {}]   ;;  %s957_s16 = inlined_call_operand.vmem [shape: f32[1,32], index: 16, kind: input, shape index: {}]   ;;  %s958_s17 = inlined_call_operand.vmem [shape: f32[1,32], index: 17, kind: input, shape index: {}]   ;;  %s959_s18 = inlined_call_operand.vmem [shape: f32[1,32], index: 18, kind: input, shape index: {}]   ;;  %s960_s19 = inlined_call_operand.vmem [shape: bf16[16,32], index: 19, kind: output, shape index: {}]  }
   0x1   :  { %963 = sst [smem:[#allocation2_spill]] %s941_s3  ;;  %636 = vmatprep.subr.bf16.mxu0 %v713_v0  ;;  %640 = vmatprep.mubr.msk.bf16.mxu0 %vm714_vm0, %v713_v0  ;;  %v694_v7 = vld [vmem:[%s945_s9] sm:$0xff]   ;;  %v68_v9 = vld [vmem:[%s946_s2 + $0x8] sm:$0xff]  ;;  %vm328_vm3 = vcmask 523264   ;;  %v697_v60 = vld [vmem:[%s950_s13 + $0x10] sm:$0xff]   ;;  %vm580_vm4 = vcmask 257024  }
   0x2   :  { %964 = sst [smem:[#allocation3_spill]] %s942_s0  ;;  %s967_s20 = sld [smem:[#allocation2_spill]]  ;;  %658 = vmatprep.subr.bf16.mxu1 %v713_v0  ;;  %666 = vmatprep.mubr.msk.bf16.mxu1 %vm714_vm0, %v713_v0  ;;  %v67_v8 = vld [vmem:[%s946_s2] sm:$0xff]  ;;  %v696_v59 = vld [vmem:[%s950_s13 + $0x8] sm:$0xff]   ;;  %v698_v61 = vld [vmem:[%s950_s13 + $0x18] sm:$0xff]  }
   0x3   :  { %965 = sst [smem:[#allocation4_spill]] %s943_s5  ;;  %s968_s23 = sld [smem:[#allocation3_spill]]  ;;  %v267_v10 = vpack.c.bf16 %v68_v9, %v67_v8  ;;  %v587_v15 = vld [vmem:[%s947_s4] ss:$0 sm:$0xff] }
   0x4   :  { %966 = sst [smem:[#allocation5_spill]] %s944_s1  ;;  %s969_s1 = sld [smem:[#allocation4_spill]]  ;;  %v596_v18 = vld [vmem:[%s948_s6] ss:$0 sm:$0xff] }
   0x5   :  { %s970_s3 = sld [smem:[#allocation5_spill]]  ;;  %v599_v28 = vld [vmem:[%s949_s10] ss:$0 sm:$0xff] }
   0x6   :  { %v695_v58 = vld [vmem:[%s950_s13] sm:$0xff]  }
   0x7   :  { %659 = vmatpush3.bf16.msra.mxu1 %v695_v58 }
   0x8   :  { %v688_v1 = vld [vmem:[%s967_s20] sm:$0xff]   ;;  %v689_v2 = vld [vmem:[%s967_s20 + $0x8] sm:$0xff]   ;;  %660 = vmatprep.subr.bf16.mxu1 %v713_v0 }
   0x9   :  { %637 = vmatpush3.bf16.msra.mxu0 %v688_v1  ;;  %v690_v3 = vld [vmem:[%s968_s23] sm:$0xff]  }
   0xa   :  { %638 = vmatprep.subr.bf16.mxu0 %v713_v0  ;;  %v691_v4 = vld [vmem:[%s969_s1] sm:$0xff]   ;;  %v692_v5 = vld [vmem:[%s969_s1 + $0x8] sm:$0xff]  }
   0xb   :  { %v693_v6 = vld [vmem:[%s970_s3] sm:$0xff]   ;;  %661 = vmatpush3.bf16.msra.mxu1 %v696_v59 }
   0xc   :  { %662 = vmatprep.subr.bf16.mxu1 %v713_v0 }
   0xd   :  { %639 = vmatpush3.bf16.msra.mxu0 %v689_v2 }
   0xe   :  { %644 = vmatprep.subr.bf16.mxu0 %v713_v0 }
   0xf   :  { %663 = vmatpush3.bf16.msra.mxu1 %v697_v60 }
  0x10   :  { %641 = vmatmul.mubr.msk.bf16.vlgmr.msra.gmra.mrb[0].mxu0 %vm97_vm1, %v690_v3  ;;  %664 = vmatprep.subr.bf16.mxu1 %v713_v0 }
  0x11   :  { %645 = vmatpush3.bf16.msra.mxu0 %v691_v4  ;;  %648 = vmatprep.mubr.msk.bf16.mxu0 %vm714_vm0, %v713_v0 }
  0x12   :  { %646 = vmatprep.subr.bf16.mxu0 %v713_v0 }
  0x13   :  { %665 = vmatpush3.bf16.msra.mxu1 %v698_v61 }
  0x14   :  { %670 = vmatprep.subr.bf16.mxu1 %v713_v0 }
  0x15   :  { %647 = vmatpush3.bf16.msra.mxu0 %v692_v5 }
  0x16   :  { %652 = vmatprep.subr.bf16.mxu0 %v713_v0 }
  0x18   :  { %649 = vmatmul.mubr.msk.bf16.vlgmr.msra.gmra.mrb[4].mxu0 %vm97_vm1, %v693_v6 }
  0x19   :  { %653 = vmatpush3.bf16.msra.mxu0 %v694_v7  ;;  %654 = vmatprep.mubr.msk.bf16.mxu0 %vm714_vm0, %v713_v0 }
  0x20   :  { %655 = vmatmul.mubr.msk.bf16.vlgmr.msra.gmra.mrb[8].mxu0 %vm281_vm2, %v267_v10 }
  0xe3   :  { %v135_v11 = vpop.f32.mrb[0].mxu0 }
  0xe4   :  { %v642_v12 = vpop.f32.mrb[1].mxu0  ;;  %v136_v16 = vadd.f32 %v587_v15, %v135_v11 }
  0xe5   :  { %v138_v13 = vpop.f32.mrb[2].mxu0  ;;  %v602_v12 = vld [vmem:[%s952_s11] ss:$0 sm:$0xff] }
  0xe6   :  { %v643_v14 = vpop.f32.mrb[3].mxu0  ;;  %v139_v19 = vadd.f32 %v587_v15, %v138_v13 }
  0xeb   :  { %v200_v17 = vpop.f32.mrb[4].mxu0 }
  0xec   :  { %v207_v20 = vadd.f32 %v200_v17, %v136_v16  ;;  %v650_v21 = vpop.f32.mrb[5].mxu0  ;;  %v603_v16 = vld [vmem:[%s953_s12] ss:$0 sm:$0xff] }
  0xed   :  { %v203_v22 = vpop.f32.mrb[6].mxu0 }
  0xee   :  { %v208_v23 = vadd.f32 %v203_v22, %v139_v19  ;;  %v651_v24 = vpop.f32.mrb[7].mxu0  ;;  %v216_v25 = vadd.f32 %v596_v18, %v207_v20 }
  0xf0   :  { %v220_v26 = vsel %vm97_vm1, %v216_v25, 0.0  ;;  %v217_v27 = vadd.f32 %v596_v18, %v208_v23 }
  0xf1   :  { %221 = vadd.xlane.f32.xlu1 %v220_v26 }
  0xf2   :  { %v223_v32 = vsel %vm97_vm1, %v217_v27, 0.0 }
  0xf3   :  { %v319_v29 = vpop.f32.mrb[8].mxu0 }
  0xf4   :  { %v320_v30 = vadd.f32 %v599_v28, %v319_v29  ;;  %v656_v31 = vpop.f32.mrb[9].mxu0 }
  0xf5   :  { %224 = vadd.xlane.f32.xlu1 %v223_v32  ;;  %v322_v33 = vpop.f32.mrb[10].mxu0  ;;  %v700_v32 = vld [vmem:[%s951_s15 + $0x8] sm:$0xff]  }
  0xf6   :  { %v323_v34 = vadd.f32 %v599_v28, %v322_v33  ;;  %v657_v35 = vpop.f32.mrb[11].mxu0  ;;  %v329_v36 = vsel %vm328_vm3, %v320_v30, 0.0  ;;  %v699_v28 = vld [vmem:[%s951_s15] sm:$0xff]  }
  0xf7   :  { %330 = vadd.xlane.f32.xlu0 %v329_v36  ;;  %v598_v33 = vld [vmem:[%s955_s8] ss:$0 sm:$0xff] }
  0xf8   :  { %v332_v37 = vsel %vm328_vm3, %v323_v34, 0.0 }
  0xfb   :  { %333 = vadd.xlane.f32.xlu0 %v332_v37 }
 0x17e   :  { %v222_v38 = vpop.xlane.xlu1 %221 }
 0x17f   :  { %v227_v39 = vmul.f32 0.03125, %v222_v38 }
 0x181   :  { %v871_v43 = vsub.f32 %v216_v25, %v227_v39  ;;  %v604_v39 = vld [vmem:[%s956_s14] ss:$0 sm:$0xff] }
 0x182   :  { %v225_v40 = vpop.xlane.xlu1 %224 }
 0x183   :  { %v228_v44 = vmul.f32 0.03125, %v225_v40  ;;  %v231_v52 = vmul.f32 %v871_v43, %v871_v43  ;;  %v610_v40 = vld [vmem:[%s957_s16] ss:$0 sm:$0xff] }
 0x184   :  { %v331_v41 = vpop.xlane.xlu0 %330 }
 0x185   :  { %v336_v42 = vmul.f32 0.015625, %v331_v41  ;;  %v230_v49 = vsub.f32 %v217_v27, %v228_v44  ;;  %v233_v54 = vsel %vm97_vm1, %v231_v52, 0.0  ;;  %v597_v27 = vld [vmem:[%s954_s7] ss:$0 sm:$0xff]  ;;  %v678_v41 = vadd.f32 %v610_v40, %v604_v39 }
 0x187   :  { %v338_v45 = vsub.f32 %v320_v30, %v336_v42  ;;  %v232_v56 = vmul.f32 %v230_v49, %v230_v49 }
 0x188   :  { %v334_v46 = vpop.xlane.xlu0 %333 }
 0x189   :  { %v337_v47 = vmul.f32 0.015625, %v334_v46  ;;  %v340_v48 = vmul.f32 %v338_v45, %v338_v45  ;;  %v236_v57 = vsel %vm97_vm1, %v232_v56, 0.0 }
 0x18b   :  { %v339_v50 = vsub.f32 %v323_v34, %v337_v47  ;;  %v342_v51 = vsel %vm328_vm3, %v340_v48, 0.0 }
 0x18c   :  { %343 = vadd.xlane.f32.xlu0 %v342_v51 }
 0x18d   :  { %v341_v53 = vmul.f32 %v339_v50, %v339_v50 }
 0x18f   :  { %v345_v55 = vsel %vm328_vm3, %v341_v53, 0.0 }
 0x190   :  { %234 = vadd.xlane.f32.xlu0 %v233_v54  ;;  %346 = vadd.xlane.f32.xlu1 %v345_v55 }
 0x194   :  { %237 = vadd.xlane.f32.xlu1 %v236_v57 }
 0x219   :  { %v344_v62 = vpop.xlane.xlu0 %343 }
 0x21a   :  { %v348_v63 = vmul.f32 0.015625, %v344_v62 }
 0x21c   :  { %v350_v1 = vadd.f32 1e-05, %v348_v63 }
 0x21d   :  { %v347_v2 = vpop.xlane.xlu1 %346  ;;  %v235_v3 = vpop.xlane.xlu0 %234 }
 0x21e   :  { %701 = vrsqrt.f32 %v350_v1  ;;  %v349_v4 = vmul.f32 0.015625, %v347_v2  ;;  %v239_v5 = vmul.f32 0.03125, %v235_v3  ;;  %v614_v3 = vld [vmem:[%s958_s17] ss:$0 sm:$0xff] }
 0x220   :  { %v351_v6 = vadd.f32 1e-05, %v349_v4  ;;  %v241_v7 = vadd.f32 1e-05, %v239_v5 }
 0x221   :  { %v238_v8 = vpop.xlane.xlu1 %237 }
 0x222   :  { %703 = vrsqrt.f32 %v351_v6  ;;  %v240_v9 = vmul.f32 0.03125, %v238_v8  ;;  %v615_v6 = vld [vmem:[%s959_s18] ss:$0 sm:$0xff] }
 0x223   :  { %705 = vrsqrt.f32 %v241_v7 }
 0x224   :  { %v242_v10 = vadd.f32 1e-05, %v240_v9 }
 0x226   :  { %707 = vrsqrt.f32 %v242_v10 }
 0x228   :  { %v702_v11 = vpop.eup %701 }
 0x229   :  { %v354_v13 = vmul.f32 %v702_v11, %v338_v45 }
 0x22b   :  { %v362_v14 = vmul.f32 %v602_v12, %v354_v13 }
 0x22c   :  { %v704_v15 = vpop.eup %703 }
 0x22d   :  { %v355_v17 = vmul.f32 %v704_v15, %v339_v50  ;;  %v706_v18 = vpop.eup %705  ;;  %v370_v20 = vadd.f32 %v603_v16, %v362_v14 }
 0x22e   :  { %v245_v24 = vmul.f32 %v706_v18, %v871_v43 }
 0x22f   :  { %v363_v19 = vmul.f32 %v602_v12, %v355_v17  ;;  %v372_v25 = vmax.f32 %v370_v20, 0.0 }
 0x230   :  { %v708_v21 = vpop.eup %707  ;;  %v253_v31 = vmul.f32 %v597_v27, %v245_v24 }
 0x231   :  { %v246_v22 = vmul.f32 %v708_v21, %v230_v49  ;;  %v371_v23 = vadd.f32 %v603_v16, %v363_v19 }
 0x232   :  { %v261_v35 = vadd.f32 %v598_v33, %v253_v31 }
 0x233   :  { %v373_v26 = vmax.f32 %v371_v23, 0.0  ;;  %v254_v29 = vmul.f32 %v597_v27, %v246_v22 }
 0x234   :  { %v263_v37 = vmax.f32 %v261_v35, 0.0 }
 0x235   :  { %v382_v30 = vpack.c.bf16 %v373_v26, %v372_v25  ;;  %v262_v34 = vadd.f32 %v598_v33, %v254_v29 }
 0x237   :  { %667 = vmatmul.mubr.msk.bf16.vlgmr.msra.gmra.mrb[0].mxu1 %vm328_vm3, %v382_v30  ;;  %v264_v36 = vmax.f32 %v262_v34, 0.0 }
 0x238   :  { %671 = vmatpush3.bf16.msra.mxu1 %v699_v28  ;;  %674 = vmatprep.mubr.msk.bf16.mxu1 %vm714_vm0, %v713_v0 }
 0x239   :  { %672 = vmatprep.subr.bf16.mxu1 %v713_v0  ;;  %v462_v38 = vpack.c.bf16 %v264_v36, %v263_v37 }
 0x23c   :  { %673 = vmatpush3.bf16.msra.mxu1 %v700_v32 }
 0x243   :  { %675 = vmatmul.mubr.msk.bf16.vlgmr.msra.gmra.mrb[0].mxu1 %vm97_vm1, %v462_v38 }
 0x316   :  { %v519_v42 = vpop.f32.mrb[0].mxu1 }
 0x317   :  { %v679_v43 = vadd.f32 %v678_v41, %v519_v42  ;;  %v676_v0 = vpop.f32.mrb[1].mxu1 }
 0x318   :  { %v522_v44 = vpop.f32.mrb[2].mxu1 }
 0x319   :  { %v681_v45 = vadd.f32 %v678_v41, %v522_v44  ;;  %v677_v46 = vpop.f32.mrb[3].mxu1  ;;  %v530_v47 = vsel %vm97_vm1, %v679_v43, 0.0 }
 0x31a   :  { %531 = vadd.xlane.f32.xlu0 %v530_v47 }
 0x31b   :  { %v533_v48 = vsel %vm97_vm1, %v681_v45, 0.0 }
 0x31c   :  { %534 = vadd.xlane.f32.xlu1 %v533_v48 }
 0x3a7   :  { %v532_v49 = vpop.xlane.xlu0 %531 }
 0x3a8   :  { %v536_v50 = vmul.f32 0.03125, %v532_v49 }
 0x3a9   :  { %v535_v51 = vpop.xlane.xlu1 %534 }
 0x3aa   :  { %v538_v52 = vsub.f32 %v679_v43, %v536_v50  ;;  %v537_v53 = vmul.f32 0.03125, %v535_v51 }
 0x3ac   :  { %v539_v54 = vsub.f32 %v681_v45, %v537_v53  ;;  %v540_v55 = vmul.f32 %v538_v52, %v538_v52 }
 0x3ae   :  { %v542_v56 = vsel %vm97_vm1, %v540_v55, 0.0  ;;  %v541_v57 = vmul.f32 %v539_v54, %v539_v54 }
 0x3af   :  { %543 = vadd.xlane.f32.xlu0 %v542_v56 }
 0x3b0   :  { %v545_v58 = vsel %vm97_vm1, %v541_v57, 0.0 }
 0x3b1   :  { %546 = vadd.xlane.f32.xlu1 %v545_v58 }
 0x43c   :  { %v544_v59 = vpop.xlane.xlu0 %543 }
 0x43d   :  { %v548_v60 = vmul.f32 0.03125, %v544_v59 }
 0x43e   :  { %v547_v61 = vpop.xlane.xlu1 %546 }
 0x43f   :  { %v550_v62 = vadd.f32 1e-05, %v548_v60  ;;  %v549_v63 = vmul.f32 0.03125, %v547_v61 }
 0x441   :  { %709 = vrsqrt.f32 %v550_v62  ;;  %v551_v1 = vadd.f32 1e-05, %v549_v63 }
 0x443   :  { %711 = vrsqrt.f32 %v551_v1 }
 0x44b   :  { %v710_v2 = vpop.eup %709 }
 0x44c   :  { %v554_v4 = vmul.f32 %v710_v2, %v538_v52 }
 0x44d   :  { %v712_v5 = vpop.eup %711 }
 0x44e   :  { %v562_v7 = vmul.f32 %v614_v3, %v554_v4  ;;  %v555_v8 = vmul.f32 %v712_v5, %v539_v54 }
 0x450   :  { %v570_v9 = vadd.f32 %v615_v6, %v562_v7  ;;  %v563_v10 = vmul.f32 %v614_v3, %v555_v8 }
 0x452   :  { %v618_v11 = vpack.c.bf16 %v570_v9, %v570_v9  ;;  %v571_v12 = vadd.f32 %v615_v6, %v563_v10 }
 0x454   :  { %581 = vst.msk [vmem:[%s960_s19] sm:$0xf] %vm580_vm4, %v618_v11  ;;  %v619_v13 = vpack.c.bf16 %v571_v12, %v571_v12 }
 0x456   :  { %582 = vst.msk [vmem:[%s960_s19 + $0x4] sm:$0xf] %vm580_vm4, %v619_v13 }

// kernel: transformer_decoder_forward.8
= control target key start
LH: loop header
LB: loop body
LE: loop exit
PB: predicated region body
PF: predicated region fallthrough
CT: control target
= control target key end

     0   :  { %v1065_v0 = vmov 0.0   ;;  %vm1066_vm0 = vmmov 0   ;;  %vm132_vm1 = vcmask 523264   ;;  %vm203_vm2 = vcmask 261120   ;;  %s1374_s2 = inlined_call_operand.vmem [shape: bf16[64,32], index: 2, kind: input, shape index: {}]   ;;  %s1375_s0 = inlined_call_operand.vmem [shape: bf16[2,16,64], index: 0, kind: input, shape index: {}]   ;;  %s1376_s4 = inlined_call_operand.vmem [shape: bf16[32,32], index: 4, kind: input, shape index: {}]   ;;  %s1377_s6 = inlined_call_operand.vmem [shape: bf16[64,32], index: 6, kind: input, shape index: {}]   ;;  %s1378_s3 = inlined_call_operand.vmem [shape: f32[1,32], index: 3, kind: input, shape index: {}]   ;;  %s1379_s8 = inlined_call_operand.vmem [shape: bf16[32,32], index: 8, kind: input, shape index: {}]   ;;  %s1380_s12 = inlined_call_operand.vmem [shape: bf16[32,32], index: 12, kind: input, shape index: {}]   ;;  %s1381_s10 = inlined_call_operand.vmem [shape: bf16[32,32], index: 10, kind: input, shape index: {}]   ;;  %s1382_s1 = inlined_call_operand.vmem [shape: bf16[2,16,32], index: 1, kind: input, shape index: {}]   ;;  %s1383_s7 = inlined_call_operand.vmem [shape: f32[1,32], index: 7, kind: input, shape index: {}]   ;;  %s1384_s11 = inlined_call_operand.vmem [shape: f32[1,32], index: 11, kind: input, shape index: {}]   ;;  %s1385_s13 = inlined_call_operand.vmem [shape: f32[1,32], index: 13, kind: input, shape index: {}]   ;;  %s1386_s16 = inlined_call_operand.vmem [shape: bf16[32,32], index: 16, kind: input, shape index: {}]   ;;  %s1387_s18 = inlined_call_operand.vmem [shape: bf16[32,32], index: 18, kind: input, shape index: {}]   ;;  %s1388_s14 = inlined_call_operand.vmem [shape: f32[1,32], index: 14, kind: input, shape index: {}]   ;;  %s1389_s15 = inlined_call_operand.vmem [shape: f32[1,32], index: 15, kind: input, shape index: {}]   ;;  %s1390_s5 = inlined_call_operand.vmem [shape: f32[1,32], index: 5, kind: input, shape index: {}]   ;;  %s1391_s17 = inlined_call_operand.vmem [shape: f32[1,32], index: 17, kind: input, shape index: {}]   ;;  %s1392_s9 = inlined_call_operand.vmem [shape: f32[1,32], index: 9, kind: input, shape index: {}]   ;;  %s1393_s19 = inlined_call_operand.vmem [shape: f32[1,32], index: 19, kind: input, shape index: {}]   ;;  %s1394_s20 = inlined_call_operand.vmem [shape: f32[1,32], index: 20, kind: input, shape index: {}]   ;;  %s1395_s21 = inlined_call_operand.vmem [shape: f32[1,32], index: 21, kind: input, shape index: {}]   ;;  %s1396_s22 = inlined_call_operand.vmem [shape: f32[1,32], index: 22, kind: input, shape index: {}]   ;;  %s1397_s23 = inlined_call_operand.vmem [shape: f32[1,32], index: 23, kind: input, shape index: {}]   ;;  %s1398_s24 = inlined_call_operand.vmem [shape: bf16[2,16,32], index: 24, kind: output, shape index: {}]  }
   0x1   :  { %1407 = sst [smem:[#allocation2_spill]] %s1374_s2  ;;  %939 = vmatprep.subr.bf16.mxu0 %v1065_v0  ;;  %947 = vmatprep.mubr.msk.bf16.mxu0 %vm1066_vm0, %v1065_v0  ;;  %v866_v28 = vld [vmem:[%s1383_s7] ss:$0 sm:$0xff]  ;;  %vm723_vm3 = vcmask 257024  }
   0x2   :  { %1408 = sst [smem:[#allocation3_spill]] %s1375_s0  ;;  %s1416_s27 = sld [smem:[#allocation2_spill]]  ;;  %951 = vmatprep.subr.bf16.mxu1 %v1065_v0  ;;  %955 = vmatprep.mubr.msk.bf16.mxu1 %vm1066_vm0, %v1065_v0  ;;  %v877_v45 = vld [vmem:[%s1384_s11] ss:$0 sm:$0xff] }
   0x3   :  { %1409 = sst [smem:[#allocation4_spill]] %s1376_s4  ;;  %v886_v50 = vld [vmem:[%s1385_s13] ss:$0 sm:$0xff] }
   0x4   :  { %1410 = sst [smem:[#allocation5_spill]] %s1377_s6  ;;  %s1417_s6 = sld [smem:[#allocation3_spill]] }
   0x5   :  { %1411 = sst [smem:[#allocation6_spill]] %s1378_s3  ;;  %s1418_s0 = sld [smem:[#allocation4_spill]] }
   0x6   :  { %1412 = sst [smem:[#allocation7_spill]] %s1379_s8  ;;  %s1420_s2 = sld [smem:[#allocation5_spill]] }
   0x7   :  { %1413 = sst [smem:[#allocation8_spill]] %s1380_s12  ;;  %s1419_s12 = sld [smem:[#allocation6_spill]] }
   0x8   :  { %1414 = sst [smem:[#allocation9_spill]] %s1381_s10  ;;  %v1029_v1 = vld [vmem:[%s1416_s27] sm:$0xff]   ;;  %v1030_v2 = vld [vmem:[%s1416_s27 + $0x8] sm:$0xff]   ;;  %v1031_v3 = vld [vmem:[%s1416_s27 + $0x10] sm:$0xff]   ;;  %s1422_s10 = sld [smem:[#allocation8_spill]] }
   0x9   :  { %1415 = sst [smem:[#allocation10_spill]] %s1382_s1  ;;  %940 = vmatpush3.bf16.msra.mxu0 %v1029_v1  ;;  %v1032_v4 = vld [vmem:[%s1416_s27 + $0x18] sm:$0xff]  }
   0xa   :  { %941 = vmatprep.subr.bf16.mxu0 %v1065_v0  ;;  %v1033_v5 = vld [vmem:[%s1417_s6] sm:$0xff]   ;;  %v1040_v22 = vld [vmem:[%s1417_s6 + $0x8] sm:$0xff]  }
   0xb   :  { %v1034_v6 = vld [vmem:[%s1418_s0] sm:$0xff]   ;;  %v1035_v7 = vld [vmem:[%s1418_s0 + $0x8] sm:$0xff]   ;;  %s1423_s0 = sld [smem:[#allocation10_spill]] }
   0xc   :  { %952 = vmatpush3.bf16.msra.mxu1 %v1034_v6  ;;  %v1036_v17 = vld [vmem:[%s1420_s2] sm:$0xff]   ;;  %v1037_v19 = vld [vmem:[%s1420_s2 + $0x8] sm:$0xff]   ;;  %v1038_v20 = vld [vmem:[%s1420_s2 + $0x10] sm:$0xff]  }
   0xd   :  { %942 = vmatpush3.bf16.msra.mxu0 %v1030_v2  ;;  %953 = vmatprep.subr.bf16.mxu1 %v1065_v0  ;;  %v855_v8 = vld [vmem:[%s1419_s12] ss:$0 sm:$0xff]  ;;  %v1039_v21 = vld [vmem:[%s1420_s2 + $0x18] sm:$0xff]   ;;  %s1421_s12 = sld [smem:[#allocation7_spill]] }
   0xe   :  { %943 = vmatprep.subr.bf16.mxu0 %v1065_v0  ;;  %v1044_v25 = vld [vmem:[%s1422_s10] sm:$0xff]   ;;  %v1046_v26 = vld [vmem:[%s1422_s10 + $0x8] sm:$0xff]  }
   0xf   :  { %v1049_v6 = vld [vmem:[%s1386_s16] sm:$0xff]  }
  0x10   :  { %954 = vmatpush3.bf16.msra.mxu1 %v1035_v7  ;;  %v1050_v7 = vld [vmem:[%s1387_s18] sm:$0xff]  }
  0x11   :  { %944 = vmatpush3.bf16.msra.mxu0 %v1031_v3  ;;  %959 = vmatprep.subr.bf16.mxu1 %v1065_v0  ;;  %v1047_v27 = vld [vmem:[%s1423_s0 + $0x8] sm:$0xff]   ;;  %v1048_v40 = vld [vmem:[%s1423_s0] sm:$0xff]  }
  0x12   :  { %945 = vmatprep.subr.bf16.mxu0 %v1065_v0 }
  0x13   :  { %v1041_v23 = vld [vmem:[%s1421_s12] sm:$0xff]   ;;  %v1042_v24 = vld [vmem:[%s1421_s12 + $0x8] sm:$0xff]   ;;  %s1424_s12 = sld [smem:[#allocation9_spill]] }
  0x15   :  { %946 = vmatpush3.bf16.msra.mxu0 %v1032_v4 }
  0x16   :  { %971 = vmatprep.subr.bf16.mxu0 %v1065_v0 }
  0x18   :  { %948 = vmatmul.mubr.msk.bf16.vlgmr.msra.gmra.mrb[0].mxu0 %vm132_vm1, %v1033_v5 }
  0x19   :  { %975 = vmatprep.mubr.msk.bf16.mxu0 %vm1066_vm0, %v1065_v0  ;;  %972 = vmatpush3.bf16.msra.mxu0 %v1041_v23  ;;  %v1043_v37 = vld [vmem:[%s1424_s12] sm:$0xff]   ;;  %v1045_v39 = vld [vmem:[%s1424_s12 + $0x8] sm:$0xff]  }
  0x1a   :  { %973 = vmatprep.subr.bf16.mxu0 %v1065_v0 }
  0x1d   :  { %974 = vmatpush3.bf16.msra.mxu0 %v1042_v24 }
  0x1e   :  { %979 = vmatprep.subr.bf16.mxu0 %v1065_v0 }
  0xeb   :  { %v170_v9 = vpop.f32.mrb[0].mxu0 }
  0xec   :  { %v171_v10 = vadd.f32 %v855_v8, %v170_v9  ;;  %v949_v11 = vpop.f32.mrb[1].mxu0  ;;  %v1052_v9 = vld [vmem:[%s1387_s18 + $0x8] sm:$0xff]  }
  0xed   :  { %v173_v12 = vpop.f32.mrb[2].mxu0 }
  0xee   :  { %v174_v13 = vadd.f32 %v855_v8, %v173_v12  ;;  %v950_v14 = vpop.f32.mrb[3].mxu0  ;;  %v177_v15 = vmax.f32 %v171_v10, 0.0  ;;  %v1051_v8 = vld [vmem:[%s1386_s16 + $0x8] sm:$0xff]  }
  0xf0   :  { %v178_v16 = vmax.f32 %v174_v13, 0.0 }
  0xf2   :  { %v183_v18 = vpack.c.bf16 %v178_v16, %v177_v15 }
  0xf4   :  { %956 = vmatmul.mubr.msk.bf16.vlgmr.msra.gmra.mrb[0].mxu1 %vm203_vm2, %v183_v18 }
  0xf5   :  { %960 = vmatpush3.bf16.msra.mxu1 %v1036_v17  ;;  %967 = vmatprep.mubr.msk.bf16.mxu1 %vm1066_vm0, %v1065_v0  ;;  %v887_v17 = vld [vmem:[%s1388_s14] ss:$0 sm:$0xff] }
  0xf6   :  { %961 = vmatprep.subr.bf16.mxu1 %v1065_v0 }
  0xf9   :  { %962 = vmatpush3.bf16.msra.mxu1 %v1037_v19 }
  0xfa   :  { %963 = vmatprep.subr.bf16.mxu1 %v1065_v0 }
  0xfd   :  { %964 = vmatpush3.bf16.msra.mxu1 %v1038_v20 }
  0xfe   :  { %965 = vmatprep.subr.bf16.mxu1 %v1065_v0 }
 0x101   :  { %966 = vmatpush3.bf16.msra.mxu1 %v1039_v21 }
 0x102   :  { %987 = vmatprep.subr.bf16.mxu1 %v1065_v0 }
 0x104   :  { %968 = vmatmul.mubr.msk.bf16.vlgmr.msra.gmra.mrb[4].mxu1 %vm132_vm1, %v1040_v22 }
 0x105   :  { %991 = vmatprep.mubr.msk.bf16.mxu1 %vm1066_vm0, %v1065_v0  ;;  %988 = vmatpush3.bf16.msra.mxu1 %v1044_v25 }
 0x106   :  { %989 = vmatprep.subr.bf16.mxu1 %v1065_v0 }
 0x109   :  { %990 = vmatpush3.bf16.msra.mxu1 %v1046_v26 }
 0x10a   :  { %995 = vmatprep.subr.bf16.mxu1 %v1065_v0 }
 0x10c   :  { %992 = vmatmul.mubr.msk.bf16.vlgmr.msra.gmra.mrb[8].mxu1 %vm203_vm2, %v1047_v27 }
 0x10d   :  { %999 = vmatprep.mubr.msk.bf16.mxu1 %vm1066_vm0, %v1065_v0  ;;  %996 = vmatpush3.bf16.msra.mxu1 %v1049_v6 }
 0x10e   :  { %997 = vmatprep.subr.bf16.mxu1 %v1065_v0 }
 0x111   :  { %998 = vmatpush3.bf16.msra.mxu1 %v1051_v8 }
 0x1d7   :  { %v329_v29 = vpop.f32.mrb[4].mxu1 }
 0x1d8   :  { %v330_v30 = vadd.f32 %v866_v28, %v329_v29  ;;  %v969_v31 = vpop.f32.mrb[5].mxu1  ;;  %v889_v29 = vld [vmem:[%s1391_s17] ss:$0 sm:$0xff] }
 0x1d9   :  { %v332_v32 = vpop.f32.mrb[6].mxu1  ;;  %v897_v31 = vld [vmem:[%s1393_s19] ss:$0 sm:$0xff] }
 0x1da   :  { %v333_v33 = vadd.f32 %v866_v28, %v332_v32  ;;  %v970_v34 = vpop.f32.mrb[7].mxu1  ;;  %v336_v35 = vmax.f32 %v330_v30, 0.0  ;;  %v862_v28 = vld [vmem:[%s1390_s5] ss:$0 sm:$0xff] }
 0x1db   :  { %v873_v30 = vld [vmem:[%s1392_s9] ss:$0 sm:$0xff]  ;;  %v1011_v32 = vadd.f32 %v889_v29, %v862_v28 }
 0x1dc   :  { %v337_v36 = vmax.f32 %v333_v33, 0.0  ;;  %v1015_v33 = vadd.f32 %v897_v31, %v873_v30  ;;  %v902_v31 = vld [vmem:[%s1397_s23] ss:$0 sm:$0xff] }
 0x1de   :  { %v342_v38 = vpack.c.bf16 %v337_v36, %v336_v35 }
 0x1df   :  { %v536_v41 = vpop.f32.mrb[8].mxu1 }
 0x1e0   :  { %976 = vmatmul.mubr.msk.bf16.vlgmr.msra.gmra.mrb[4].mxu0 %vm203_vm2, %v342_v38  ;;  %v993_v42 = vpop.f32.mrb[9].mxu1 }
 0x1e1   :  { %980 = vmatpush3.bf16.msra.mxu0 %v1043_v37  ;;  %983 = vmatprep.mubr.msk.bf16.mxu0 %vm1066_vm0, %v1065_v0  ;;  %v539_v43 = vpop.f32.mrb[10].mxu1 }
 0x1e2   :  { %981 = vmatprep.subr.bf16.mxu0 %v1065_v0  ;;  %v994_v44 = vpop.f32.mrb[11].mxu1 }
 0x1e5   :  { %982 = vmatpush3.bf16.msra.mxu0 %v1045_v39 }
 0x1e6   :  { %1003 = vmatprep.subr.bf16.mxu0 %v1065_v0 }
 0x1e8   :  { %984 = vmatmul.mubr.msk.bf16.vlgmr.msra.gmra.mrb[8].mxu0 %vm203_vm2, %v1048_v40 }
 0x1e9   :  { %1007 = vmatprep.mubr.msk.bf16.mxu0 %vm1066_vm0, %v1065_v0  ;;  %1004 = vmatpush3.bf16.msra.mxu0 %v1050_v7 }
 0x1ea   :  { %1005 = vmatprep.subr.bf16.mxu0 %v1065_v0  ;;  %v888_v0 = vld [vmem:[%s1389_s15] ss:$0 sm:$0xff] }
 0x1ed   :  { %1006 = vmatpush3.bf16.msra.mxu0 %v1052_v9 }
 0x2bb   :  { %v471_v46 = vpop.f32.mrb[8].mxu0 }
 0x2bc   :  { %v472_v47 = vadd.f32 %v877_v45, %v471_v46  ;;  %v985_v48 = vpop.f32.mrb[9].mxu0 }
 0x2bd   :  { %v474_v49 = vpop.f32.mrb[10].mxu0 }
 0x2be   :  { %v543_v51 = vadd.f32 %v536_v41, %v472_v47  ;;  %v475_v52 = vadd.f32 %v877_v45, %v474_v49  ;;  %v986_v53 = vpop.f32.mrb[11].mxu0 }
 0x2c0   :  { %v544_v54 = vadd.f32 %v539_v43, %v475_v52  ;;  %v552_v55 = vadd.f32 %v886_v50, %v543_v51 }
 0x2c2   :  { %v556_v56 = vsel %vm203_vm2, %v552_v55, 0.0  ;;  %v553_v57 = vadd.f32 %v886_v50, %v544_v54 }
 0x2c3   :  { %557 = vadd.xlane.f32.xlu0 %v556_v56 }
 0x2c4   :  { %v559_v58 = vsel %vm203_vm2, %v553_v57, 0.0 }
 0x2c7   :  { %560 = vadd.xlane.f32.xlu0 %v559_v58 }
 0x350   :  { %v558_v59 = vpop.xlane.xlu0 %557 }
 0x351   :  { %v563_v60 = vmul.f32 0.03125, %v558_v59 }
 0x353   :  { %v565_v61 = vsub.f32 %v552_v55, %v563_v60 }
 0x354   :  { %v561_v62 = vpop.xlane.xlu0 %560 }
 0x355   :  { %v564_v63 = vmul.f32 0.03125, %v561_v62  ;;  %v567_v1 = vmul.f32 %v565_v61, %v565_v61 }
 0x357   :  { %v566_v2 = vsub.f32 %v553_v57, %v564_v63  ;;  %v569_v3 = vsel %vm203_vm2, %v567_v1, 0.0 }
 0x358   :  { %570 = vadd.xlane.f32.xlu1 %v569_v3 }
 0x359   :  { %v568_v4 = vmul.f32 %v566_v2, %v566_v2 }
 0x35b   :  { %v572_v5 = vsel %vm203_vm2, %v568_v4, 0.0 }
 0x35c   :  { %573 = vadd.xlane.f32.xlu1 %v572_v5 }
 0x3e5   :  { %v571_v10 = vpop.xlane.xlu1 %570 }
 0x3e6   :  { %v575_v11 = vmul.f32 0.03125, %v571_v10 }
 0x3e8   :  { %v577_v12 = vadd.f32 1e-05, %v575_v11 }
 0x3e9   :  { %v574_v13 = vpop.xlane.xlu1 %573 }
 0x3ea   :  { %1053 = vrsqrt.f32 %v577_v12  ;;  %v576_v14 = vmul.f32 0.03125, %v574_v13 }
 0x3ec   :  { %v578_v15 = vadd.f32 1e-05, %v576_v14 }
 0x3ee   :  { %1055 = vrsqrt.f32 %v578_v15 }
 0x3f4   :  { %v1054_v16 = vpop.eup %1053 }
 0x3f5   :  { %v581_v18 = vmul.f32 %v1054_v16, %v565_v61 }
 0x3f7   :  { %v589_v19 = vmul.f32 %v887_v17, %v581_v18 }
 0x3f8   :  { %v1056_v20 = vpop.eup %1055 }
 0x3f9   :  { %v582_v21 = vmul.f32 %v1056_v20, %v566_v2  ;;  %v597_v23 = vadd.f32 %v888_v0, %v589_v19  ;;  %v893_v20 = vld [vmem:[%s1394_s20] ss:$0 sm:$0xff] }
 0x3fb   :  { %v590_v22 = vmul.f32 %v887_v17, %v582_v21  ;;  %v599_v25 = vmax.f32 %v597_v23, 0.0 }
 0x3fd   :  { %v598_v24 = vadd.f32 %v888_v0, %v590_v22  ;;  %v894_v22 = vld [vmem:[%s1395_s21] ss:$0 sm:$0xff] }
 0x3ff   :  { %v600_v26 = vmax.f32 %v598_v24, 0.0 }
 0x401   :  { %v605_v27 = vpack.c.bf16 %v600_v26, %v599_v25  ;;  %v901_v26 = vld [vmem:[%s1396_s22] ss:$0 sm:$0xff] }
 0x403   :  { %1000 = vmatmul.mubr.msk.bf16.vlgmr.msra.gmra.mrb[0].mxu1 %vm203_vm2, %v605_v27  ;;  %1008 = vmatmul.mubr.msk.bf16.vlgmr.msra.gmra.mrb[4].mxu0 %vm203_vm2, %v605_v27 }
 0x4d6   :  { %v662_v34 = vpop.f32.mrb[0].mxu1  ;;  %v783_v35 = vpop.f32.mrb[4].mxu0 }
 0x4d7   :  { %v1012_v36 = vadd.f32 %v1011_v32, %v662_v34  ;;  %v1001_v37 = vpop.f32.mrb[1].mxu1  ;;  %v1009_v38 = vpop.f32.mrb[5].mxu0  ;;  %v1016_v41 = vadd.f32 %v1015_v33, %v783_v35 }
 0x4d8   :  { %v665_v39 = vpop.f32.mrb[2].mxu1  ;;  %v786_v40 = vpop.f32.mrb[6].mxu0 }
 0x4d9   :  { %v1014_v42 = vadd.f32 %v1011_v32, %v665_v39  ;;  %v1002_v43 = vpop.f32.mrb[3].mxu1  ;;  %v1010_v44 = vpop.f32.mrb[7].mxu0  ;;  %v673_v45 = vsel %vm203_vm2, %v1012_v36, 0.0  ;;  %v1018_v46 = vadd.f32 %v1015_v33, %v786_v40  ;;  %v794_v48 = vsel %vm203_vm2, %v1016_v41, 0.0 }
 0x4da   :  { %674 = vadd.xlane.f32.xlu0 %v673_v45 }
 0x4db   :  { %v676_v47 = vsel %vm203_vm2, %v1014_v42, 0.0  ;;  %v797_v49 = vsel %vm203_vm2, %v1018_v46, 0.0 }
 0x4dc   :  { %677 = vadd.xlane.f32.xlu1 %v676_v47 }
 0x4de   :  { %795 = vadd.xlane.f32.xlu0 %v794_v48 }
 0x4e0   :  { %798 = vadd.xlane.f32.xlu1 %v797_v49 }
 0x567   :  { %v675_v50 = vpop.xlane.xlu0 %674 }
 0x568   :  { %v679_v51 = vmul.f32 0.03125, %v675_v50 }
 0x569   :  { %v678_v52 = vpop.xlane.xlu1 %677 }
 0x56a   :  { %v681_v53 = vsub.f32 %v1012_v36, %v679_v51  ;;  %v680_v54 = vmul.f32 0.03125, %v678_v52 }
 0x56b   :  { %v796_v55 = vpop.xlane.xlu0 %795 }
 0x56c   :  { %v682_v56 = vsub.f32 %v1014_v42, %v680_v54  ;;  %v800_v57 = vmul.f32 0.03125, %v796_v55  ;;  %v683_v58 = vmul.f32 %v681_v53, %v681_v53 }
 0x56d   :  { %v799_v59 = vpop.xlane.xlu1 %798 }
 0x56e   :  { %v802_v60 = vsub.f32 %v1016_v41, %v800_v57  ;;  %v801_v61 = vmul.f32 0.03125, %v799_v59  ;;  %v685_v62 = vsel %vm203_vm2, %v683_v58, 0.0  ;;  %v684_v63 = vmul.f32 %v682_v56, %v682_v56 }
 0x56f   :  { %686 = vadd.xlane.f32.xlu0 %v685_v62 }
 0x570   :  { %v803_v1 = vsub.f32 %v1018_v46, %v801_v61  ;;  %v688_v2 = vsel %vm203_vm2, %v684_v63, 0.0  ;;  %v804_v3 = vmul.f32 %v802_v60, %v802_v60 }
 0x571   :  { %689 = vadd.xlane.f32.xlu1 %v688_v2 }
 0x572   :  { %v806_v4 = vsel %vm203_vm2, %v804_v3, 0.0  ;;  %v805_v5 = vmul.f32 %v803_v1, %v803_v1 }
 0x573   :  { %807 = vadd.xlane.f32.xlu0 %v806_v4 }
 0x574   :  { %v809_v6 = vsel %vm203_vm2, %v805_v5, 0.0 }
 0x575   :  { %810 = vadd.xlane.f32.xlu1 %v809_v6 }
 0x5fc   :  { %v687_v7 = vpop.xlane.xlu0 %686 }
 0x5fd   :  { %v691_v8 = vmul.f32 0.03125, %v687_v7 }
 0x5fe   :  { %v690_v9 = vpop.xlane.xlu1 %689 }
 0x5ff   :  { %v693_v10 = vadd.f32 1e-05, %v691_v8  ;;  %v692_v11 = vmul.f32 0.03125, %v690_v9 }
 0x600   :  { %v808_v12 = vpop.xlane.xlu0 %807 }
 0x601   :  { %1057 = vrsqrt.f32 %v693_v10  ;;  %v694_v13 = vadd.f32 1e-05, %v692_v11  ;;  %v812_v14 = vmul.f32 0.03125, %v808_v12 }
 0x602   :  { %v811_v15 = vpop.xlane.xlu1 %810 }
 0x603   :  { %1059 = vrsqrt.f32 %v694_v13  ;;  %v814_v16 = vadd.f32 1e-05, %v812_v14  ;;  %v813_v17 = vmul.f32 0.03125, %v811_v15 }
 0x605   :  { %1061 = vrsqrt.f32 %v814_v16  ;;  %v815_v18 = vadd.f32 1e-05, %v813_v17 }
 0x607   :  { %1063 = vrsqrt.f32 %v815_v18 }
 0x60b   :  { %v1058_v19 = vpop.eup %1057 }
 0x60c   :  { %v697_v0 = vmul.f32 %v1058_v19, %v681_v53 }
 0x60d   :  { %v1060_v21 = vpop.eup %1059 }
 0x60e   :  { %v705_v23 = vmul.f32 %v893_v20, %v697_v0  ;;  %v698_v24 = vmul.f32 %v1060_v21, %v682_v56 }
 0x60f   :  { %v1062_v25 = vpop.eup %1061 }
 0x610   :  { %v713_v27 = vadd.f32 %v894_v22, %v705_v23  ;;  %v706_v28 = vmul.f32 %v893_v20, %v698_v24  ;;  %v818_v29 = vmul.f32 %v1062_v25, %v802_v60 }
 0x611   :  { %v1064_v30 = vpop.eup %1063 }
 0x612   :  { %v907_v32 = vpack.c.bf16 %v713_v27, %v713_v27  ;;  %v714_v33 = vadd.f32 %v894_v22, %v706_v28  ;;  %v826_v34 = vmul.f32 %v901_v26, %v818_v29  ;;  %v819_v35 = vmul.f32 %v1064_v30, %v803_v1 }
 0x614   :  { %724 = vst.msk [vmem:[%s1398_s24] sm:$0xf] %vm723_vm3, %v907_v32  ;;  %v908_v36 = vpack.c.bf16 %v714_v33, %v714_v33  ;;  %v834_v37 = vadd.f32 %v902_v31, %v826_v34  ;;  %v827_v38 = vmul.f32 %v901_v26, %v819_v35 }
 0x616   :  { %725 = vst.msk [vmem:[%s1398_s24 + $0x4] sm:$0xf] %vm723_vm3, %v908_v36  ;;  %v909_v39 = vpack.c.bf16 %v834_v37, %v834_v37  ;;  %v835_v40 = vadd.f32 %v902_v31, %v827_v38 }
 0x618   :  { %905 = vst.msk [vmem:[%s1398_s24 + $0x8] sm:$0xf] %vm723_vm3, %v909_v39  ;;  %v910_v41 = vpack.c.bf16 %v835_v40, %v835_v40 }
 0x61a   :  { %906 = vst.msk [vmem:[%s1398_s24 + $0xc] sm:$0xf] %vm723_vm3, %v910_v41 }

// kernel: transformer_decoder_forward.9
= control target key start
LH: loop header
LB: loop body
LE: loop exit
PB: predicated region body
PF: predicated region fallthrough
CT: control target
= control target key end

     0   :  { %s5742_s30 = smov 0   ;;  %s6519_s0 = inlined_call_operand.vmem [shape: bf16[2,2,8,32], index: 0, kind: input, shape index: {}]   ;;  %s6520_s1 = inlined_call_operand.vmem [shape: bf16[2,2,8,32], index: 1, kind: input, shape index: {}]   ;;  %s6521_s2 = inlined_call_operand.vmem [shape: bf16[2,20,32], index: 2, kind: input, shape index: {}]   ;;  %s6522_s3 = inlined_call_operand.vmem [shape: bf16[2,32,64], index: 3, kind: input, shape index: {}]   ;;  %s6523_s4 = inlined_call_operand.vmem [shape: f32[2,1,64], index: 4, kind: input, shape index: {}]   ;;  %s6524_s5 = inlined_call_operand.vmem [shape: bf16[2,32,32], index: 5, kind: input, shape index: {}]   ;;  %s6525_s6 = inlined_call_operand.vmem [shape: f32[2,1,32], index: 6, kind: input, shape index: {}]   ;;  %s6526_s7 = inlined_call_operand.vmem [shape: bf16[2,32,32], index: 7, kind: input, shape index: {}]   ;;  %s6527_s8 = inlined_call_operand.vmem [shape: f32[2,1,32], index: 8, kind: input, shape index: {}]   ;;  %s6528_s9 = inlined_call_operand.vmem [shape: f32[2,1,32], index: 9, kind: input, shape index: {}]   ;;  %s6529_s10 = inlined_call_operand.vmem [shape: f32[2,1,32], index: 10, kind: input, shape index: {}]   ;;  %s6530_s11 = inlined_call_operand.vmem [shape: bf16[2,32,32], index: 11, kind: input, shape index: {}]   ;;  %s6531_s12 = inlined_call_operand.vmem [shape: f32[2,1,32], index: 12, kind: input, shape index: {}]   ;;  %s6532_s13 = inlined_call_operand.vmem [shape: bf16[2,32,64], index: 13, kind: input, shape index: {}]   ;;  %s6533_s14 = inlined_call_operand.vmem [shape: f32[2,1,64], index: 14, kind: input, shape index: {}]   ;;  %s6534_s15 = inlined_call_operand.vmem [shape: bf16[2,32,32], index: 15, kind: input, shape index: {}]   ;;  %s6535_s16 = inlined_call_operand.vmem [shape: f32[2,1,32], index: 16, kind: input, shape index: {}]   ;;  %s6536_s17 = inlined_call_operand.vmem [shape: f32[2,1,32], index: 17, kind: input, shape index: {}]   ;;  %s6537_s18 = inlined_call_operand.vmem [shape: f32[2,1,32], index: 18, kind: input, shape index: {}]   ;;  %s6538_s19 = inlined_call_operand.vmem [shape: bf16[2,32,64], index: 19, kind: input, shape index: {}]   ;;  %s6539_s20 = inlined_call_operand.vmem [shape: f32[2,1,64], index: 20, kind: input, shape index: {}]   ;;  %s6540_s21 = inlined_call_operand.vmem [shape: bf16[2,64,32], index: 21, kind: input, shape index: {}]   ;;  %s6541_s22 = inlined_call_operand.vmem [shape: f32[2,1,32], index: 22, kind: input, shape index: {}]   ;;  %s6542_s23 = inlined_call_operand.vmem [shape: f32[2,1,32], index: 23, kind: input, shape index: {}]   ;;  %s6543_s24 = inlined_call_operand.vmem [shape: f32[2,1,32], index: 24, kind: input, shape index: {}]   ;;  %s6544_s25 = inlined_call_operand.vmem [shape: f32[2,1,32], index: 25, kind: input, shape index: {}]   ;;  %s6545_s26 = inlined_call_operand.vmem [shape: f32[2,1,32], index: 26, kind: input, shape index: {}]   ;;  %s6546_s27 = inlined_call_operand.vmem [shape: bf16[2,2,8,32], index: 27, kind: output, shape index: {0}]   ;;  %s6547_s28 = inlined_call_operand.vmem [shape: bf16[2,2,8,32], index: 28, kind: output, shape index: {1}]  }
   0x1   :  { %6552 = sst [smem:[#allocation7_spill]] %s6519_s0 }
   0x2   :  { %6553 = sst [smem:[#allocation8_spill]] %s6520_s1 }
   0x3   :  { %6554 = sst [smem:[#allocation9_spill]] %s6521_s2 }
   0x4   :  { %6555 = sst [smem:[#allocation10_spill]] %s6522_s3  ;;  %s5744_s3 = smov 0  }
   0x5   :  { %6556 = sst [smem:[#allocation11_spill]] %s6523_s4 }
   0x6   :  { %6557 = sst [smem:[#allocation12_spill]] %s6524_s5  ;;  %s5738_s5 = smov 0  }
   0x7   :  { %6558 = sst [smem:[#allocation13_spill]] %s6525_s6 }
   0x8   :  { %6559 = sst [smem:[#allocation14_spill]] %s6526_s7 }
   0x9   :  { %6560 = sst [smem:[#allocation15_spill]] %s6527_s8  ;;  %s5736_s8 = smov 0  }
   0xa   :  { %6561 = sst [smem:[#allocation16_spill]] %s6528_s9  ;;  %s5740_s9 = smov 0  }
   0xb   :  { %6562 = sst [smem:[#allocation17_spill]] %s6529_s10 }
   0xc   :  { %6563 = sst [smem:[#allocation18_spill]] %s6530_s11 }
   0xd   :  { %6564 = sst [smem:[#allocation19_spill]] %s6531_s12 }
   0xe   :  { %6565 = sst [smem:[#allocation20_spill]] %s6544_s25 }
   0xf   :  { %6566 = sst [smem:[#allocation21_spill]] %s6545_s26 }
  0x10   :  { %6567 = sst [smem:[#allocation22_spill]] %s6547_s28 }
  0x11 LB: > { %6568 = sst [smem:[#allocation2_spill]] %s5569_s9  ;;  %s48_s6 = sadd.s32 1, %s5569_s9  ;;  %s5577_s3 = sphi %s5744_s3, %s39_s3   ;;  %s5573_s30 = sphi %s5742_s30, %s6594_s30   ;;  %s5569_s9 = sphi %s5740_s9, %s6593_s9   ;;  %s5565_s5 = sphi %s5738_s5, %s6592_s5   ;;  %s5561_s8 = sphi %s5736_s8, %s6591_s8  }
  0x12   : > { %6569 = sst [smem:[#allocation3_spill]] %s5573_s30  ;;  %s51_s10 = sadd.s32 1, %s5573_s30 }
  0x13   : > { %6570 = sst [smem:[#allocation4_spill]] %s5577_s3  ;;  %p49_p0 = scmp.ge.s32.totalorder %s48_s6, 2 }
  0x14   : > { %p5078_p1 = scmp.ge.s32.totalorder %s5577_s3, 1  ;;  %p1019_p2 = scmp.lt.s32.totalorder %s5577_s3, 5 }
  0x15   : > { %s6596_s6 = smov (%p49_p0, %s48_s6), 0  ;;  %s6598_s10 = smov (!%p49_p0, %s51_s10), %s5573_s30 }
  0x16   : > { %6571 = sst [smem:[#allocation5_spill]] %s6596_s6  ;;  %p1020_p3 = pnand %p5078_p1, %p1019_p2 }
  0x17   : > { %p53_p4 = scmp.ge.s32.totalorder %s6598_s10, 2  ;;  %p1208_p5 = scmp.lt.s32.totalorder (!%p1020_p3), %s5561_s8, 1  ;;  %v5579_v0 = vmov (!%p1020_p3), 0.0   ;;  %vm5580_vm0 = vmmov (!%p1020_p3), 0   ;;  %vm1366_vm1 = vcmask (!%p1020_p3), 261120   ;;  %v1488_v18 = vlaneseq (!%p1020_p3) }
  0x18   : > { %1023 = sbr.rel (%p1020_p3) target bundleno = 4892 (0x131c), region = 128  ;;  %p1210_p6 = scmp.lt.s32.totalorder (!%p1020_p3), %s5565_s5, 1  ;;  %5246 = vmatprep.subr.bf16.mxu0 (!%p1020_p3), %v5579_v0  ;;  %5250 = vmatprep.mubr.msk.bf16.mxu0 (!%p1020_p3), %vm5580_vm0, %v5579_v0  ;;  %v5585_v16 = vmov (!%p1020_p3), 1983009808   ;;  %v5586_v19 = vmov (!%p1020_p3), 1934713408  }
  0x19   : > { %s6600_s10 = smov (%p53_p4, %s6598_s10), 0  ;;  %5254 = vmatprep.subr.bf16.mxu1 (!%p1020_p3), %v5579_v0  ;;  %5258 = vmatprep.mubr.msk.bf16.mxu1 (!%p1020_p3), %vm5580_vm0, %v5579_v0  ;;  %s6573_s7 = sld [smem:[#allocation10_spill]] (!%p1020_p3)  ;;  %v1486_v17 = vunpack.c.l.s4 (!%p1020_p3), %v5585_v16  ;;  %v1503_v20 = vunpack.c.l.s4 (!%p1020_p3), %v5586_v19  ;;  %v1489_v22 = vshrl.u32 (!%p1020_p3), %v1488_v18, 7  ;;  %v5587_v41 = vmov (!%p1020_p3), 0  }
  0x1a   : > { %6572 = sst [smem:[#allocation6_spill]] %s6600_s10  ;;  %s6574_s30 = sld [smem:[#allocation7_spill]] (!%p1020_p3)  ;;  %vm1984_vm2 = vcmask (!%p1020_p3), 64512   ;;  %vm2224_vm3 = vcmask (!%p1020_p3), 1043456   ;;  %vm2555_vm4 = vcmask (!%p1020_p3), 130048   ;;  %vm2557_vm5 = vcmask (!%p1020_p3), 195584  }
  0x1b   : > { %s6575_s26 = sld [smem:[#allocation8_spill]] (!%p1020_p3)  ;;  %s6576_s28 = sld [smem:[#allocation11_spill]] (!%p1020_p3)  ;;  %v1487_v21 = vunpack.c.0.s8 (!%p1020_p3), %v1486_v17  ;;  %v1504_v23 = vunpack.c.0.s8 (!%p1020_p3), %v1503_v20  ;;  %vm3973_vm6 = vcmask (!%p1020_p3), 162816   ;;  %vm4025_vm7 = vcmask (!%p1020_p3), 1041408  }
  0x1c   : > { %s5582_s3 = smov (!%p1020_p3), 120   ;;  %s5583_s6 = smov (!%p1020_p3), 96   ;;  %vm4563_vm8 = vcmask (!%p1020_p3), 523264   ;;  %vm4638_vm9 = vcmask (!%p1020_p3), 257024  }
  0x1d   : > { %s5584_s10 = smov (!%p1020_p3), 112   ;;  %v5818_v24 = vsub.s32 (!%p1020_p3), %v1487_v21, %v1489_v22  ;;  %v5821_v28 = vsub.s32 (!%p1020_p3), %v1504_v23, %v1489_v22  ;;  %s6577_s2 = sld [smem:[#allocation12_spill]] (!%p1020_p3) }
  0x1f   : > { %s6602_s8 = smov (!%p1208_p5, %s5561_s8), 1  ;;  %s6604_s5 = smov (!%p1210_p6, %s5565_s5), 1 }
  0x20   : > { %s5777_s0 = sshll.u32 %s6602_s8, 4  ;;  %s5079_s11 = sshll.u32 %s6602_s8, 1 }
  0x21   : > { %s1233_s12 = scalar_lea.vmem %s6573_s7, %s5777_s0  ;;  %s1213_s1 = sadd.s32 %s5079_s11, %s6604_s5 }
  0x22   : > { %v5479_v1 = vld [vmem:[%s1233_s12] sm:$0xff]   ;;  %s5785_s4 = sshll.u32 %s1213_s1, 2  ;;  %v5480_v2 = vld [vmem:[%s1233_s12 + $0x8] sm:$0xff]   ;;  %s6579_s11 = sld [smem:[#allocation14_spill]] }
  0x23   : > { %s1215_s9 = scalar_lea.vmem %s6574_s30, %s5785_s4  ;;  %s1223_s25 = scalar_lea.vmem %s6575_s26, %s5785_s4  ;;  %5247 = vmatpush3.bf16.msra.mxu0 %v5479_v1 }
  0x24   : > { %v5795_v3 = vld [vmem:[%s1215_s9] sm:$0xf]  ;;  %5248 = vmatprep.subr.bf16.mxu0 %v5579_v0  ;;  %s1236_s9 = scalar_lea.vmem %s6576_s28, %s6602_s8  ;;  %s5581_s30 = smov 104  }
  0x25   : > { %v5797_v4 = vld [vmem:[%s1223_s25] sm:$0xf]  ;;  %v1340_v6 = vunpack.c.l.bf16 %v5795_v3  ;;  %s1241_s7 = scalar_lea.vmem %s6577_s2, %s5777_s0  ;;  %s6578_s25 = sld [smem:[#allocation13_spill]] }
  0x26   : > { %v1336_v5 = vunpack.c.l.bf16 %v5797_v4  ;;  %v5104_v9 = vld [vmem:[%s1236_s9] ss:$0 sm:$0xff]  ;;  %v5482_v37 = vld [vmem:[%s1241_s7 + $0x8] sm:$0xff]   ;;  %s5588_s2 = smov 16   ;;  %s6551_s12 = smov 24  }
  0x27   : > { %5249 = vmatpush3.bf16.msra.mxu0 %v5480_v2  ;;  %v5481_v33 = vld [vmem:[%s1241_s7] sm:$0xff]   ;;  %s5589_s7 = smov 8   ;;  %s5426_s1 = smul.u32 12, %s6604_s5 }
  0x28   : > { %v1341_v7 = vadd.f32 %v1340_v6, %v1336_v5  ;;  %5262 = vmatprep.subr.bf16.mxu0 %v5579_v0  ;;  %5255 = vmatpush3.bf16.msra.mxu1 %v5481_v33  ;;  %s1249_s29 = scalar_lea.vmem %s6579_s11, %s5777_s0  ;;  %s6583_s5 = sld [smem:[#allocation16_spill]] }
  0x29   : > { %5256 = vmatprep.subr.bf16.mxu1 %v5579_v0 }
  0x2a   : > { %v1342_v8 = vpack.c.bf16 %v1341_v7, %v1341_v7 }
  0x2b   : > { %s1244_s26 = scalar_lea.vmem %s6578_s25, %s6602_s8  ;;  %s1274_s25 = scalar_lea.vmem %s6533_s14, %s6602_s8 }
  0x2c   : > { %5251 = vmatmul.mubr.msk.bf16.vlgmr.msra.gmra.mrb[0].mxu0 %vm1366_vm1, %v1342_v8  ;;  %5257 = vmatpush3.bf16.msra.mxu1 %v5482_v37 }
  0x2d   : > { %5264 = vmatprep.mubr.msk.bf16.mxu0 %vm5580_vm0, %v5579_v0  ;;  %5268 = vmatprep.subr.bf16.mxu1 %v5579_v0 }
  0x2e   : > { %s1255_s9 = scalar_lea.vmem %s6583_s5, %s6602_s8 }
  0x2f   : > { %5259 = vmatmul.mubr.msk.bf16.vlgmr.msra.gmra.mrb[0].mxu1 %vm1366_vm1, %v5795_v3 }
  0x30   : > { %5270 = vmatprep.mubr.msk.bf16.mxu1 %vm5580_vm0, %v5579_v0 }
  0xff   : > { %v1404_v10 = vpop.f32.mrb[0].mxu0 }
 0x100   : > { %v1405_v11 = vadd.f32 %v5104_v9, %v1404_v10  ;;  %v5252_v12 = vpop.f32.mrb[1].mxu0 }
 0x101   : > { %v1407_v13 = vpop.f32.mrb[2].mxu0 }
 0x102   : > { %v1410_v14 = vpack.c.bf16 %v1405_v11, %v1405_v11  ;;  %v5253_v15 = vpop.f32.mrb[3].mxu0 }
 0x104   : > { %1483 = vrot.lane.b32.xlu1 %v1410_v14, %s5581_s30  ;;  %1479 = vrot.lane.b32.xlu0 %v1410_v14, %s5582_s3  ;;  %v1491_v36 = vrot.slane %v1410_v14, %v5818_v24 }
 0x108   : > { %1646 = vrot.lane.b32.xlu1 %v1410_v14, %s5583_s6  ;;  %1481 = vrot.lane.b32.xlu0 %v1410_v14, %s5584_s10 }
 0x176   : > { %v1484_v25 = vpop.permute.xlu1 %1483  ;;  %v1480_v26 = vpop.permute.xlu0 %1479 }
 0x177   : > { %v1533_v27 = vrot.slane %v1484_v25, %v5818_v24  ;;  %v1525_v29 = vrot.slane %v1480_v26, %v5818_v24  ;;  %1648 = vrot.lane.b32.xlu0 %v1480_v26, %s5583_s6 }
 0x179   : > { %v1534_v30 = vcombine.low %v1525_v29, %v1533_v27  ;;  %v1535_v31 = vcombine.high %v1525_v29, %v1533_v27 }
 0x17a   : > { %v1482_v32 = vpop.permute.xlu0 %1481 }
 0x17b   : > { %v1542_v34 = vrot.slane %v1534_v30, %v5821_v28  ;;  %v1499_v35 = vrot.slane %v1482_v32, %v5818_v24  ;;  %1652 = vrot.lane.b32.xlu0 %v1484_v25, %s5583_s6  ;;  %1650 = vrot.lane.b32.xlu1 %v1482_v32, %s5583_s6  ;;  %v1549_v38 = vrot.slane %v1535_v31, %v5821_v28  ;;  %v1647_v30 = vpop.permute.xlu1 %1646 }
 0x17d   : > { %v1500_v39 = vcombine.low %v1491_v36, %v1499_v35  ;;  %v1501_v40 = vcombine.high %v1491_v36, %v1499_v35  ;;  %v1550_v42 = vcombine.high %v1542_v34, %v5587_v41  ;;  %v1551_v45 = vcombine.high %v1549_v38, %v5587_v41 }
 0x17e   : > { %v1557_v46 = vshrl.u32 %v1542_v34, 16  ;;  %v1573_v52 = vshrl.u32 %v1549_v38, 16  ;;  %v1661_v35 = vrot.slane %v1647_v30, %v5818_v24 }
 0x17f   : > { %v1508_v43 = vrot.slane %v1500_v39, %v5821_v28  ;;  %v1515_v44 = vrot.slane %v1501_v40, %v5821_v28  ;;  %v1565_v51 = vshrl.u32 %v1550_v42, 16  ;;  %v1581_v59 = vshrl.u32 %v1551_v45, 16 }
 0x181   : > { %v1516_v47 = vcombine.high %v1508_v43, %v5587_v41  ;;  %v1517_v48 = vcombine.high %v1515_v44, %v5587_v41  ;;  %v1554_v49 = vpack.i.b16 %v1542_v34, %v1508_v43  ;;  %v1556_v50 = vshrl.u32 %v1508_v43, 16 }
 0x182   : > { %v1570_v53 = vpack.i.b16 %v1549_v38, %v1515_v44  ;;  %v1572_v54 = vshrl.u32 %v1515_v44, 16 }
 0x183   : > { %v1558_v55 = vpack.i.b16 %v1557_v46, %v1556_v50  ;;  %v1562_v56 = vpack.i.b16 %v1550_v42, %v1516_v47  ;;  %v1564_v57 = vshrl.u32 %v1516_v47, 16  ;;  %v1578_v58 = vpack.i.b16 %v1551_v45, %v1517_v48 }
 0x184   : > { %v1574_v60 = vpack.i.b16 %v1573_v52, %v1572_v54  ;;  %v1580_v61 = vshrl.u32 %v1517_v48, 16  ;;  %v1584_v62 = vcombine.low %v1554_v49, %v1570_v53 }
 0x185   : > { %v1566_v63 = vpack.i.b16 %v1565_v51, %v1564_v57  ;;  %v1592_v1 = vcombine.low %v1562_v56, %v1578_v58 }
 0x186   : > { %v1582_v2 = vpack.i.b16 %v1581_v59, %v1580_v61  ;;  %v1609_v7 = vcombine.low %v1558_v55, %v1574_v60  ;;  %v1591_v8 = vrot.slane %v1584_v62, %v5818_v24 }
 0x187   : > { %v1599_v9 = vrot.slane %v1592_v1, %v5818_v24 }
 0x188   : > { %v1617_v10 = vcombine.low %v1566_v63, %v1582_v2  ;;  %v1616_v12 = vrot.slane %v1609_v7, %v5818_v24 }
 0x189   : > { %v1600_v11 = vcombine.low %v1591_v8, %v1599_v9 }
 0x18a   : > { %v1624_v13 = vrot.slane %v1617_v10, %v5818_v24 }
 0x18b   : > { %v5852_v14 = vrot.slane %v1600_v11, %v5821_v28 }
 0x18c   : > { %v1625_v15 = vcombine.low %v1616_v12, %v1624_v13 }
 0x18d   : > { %v5859_v17 = vcombine.high %v5852_v14, %v5587_v41  ;;  %v1637_v19 = vshrl.u32 %v5852_v14, 16 }
 0x18e   : > { %v5855_v16 = vrot.slane %v1625_v15, %v5821_v28 }
 0x18f   : > { %v1643_v25 = vshrl.u32 %v5859_v17, 16 }
 0x190   : > { %v1636_v18 = vpack.i.b16 %v5855_v16, %v5852_v14  ;;  %v1638_v20 = vshrl.u32 %v5855_v16, 16  ;;  %v5867_v21 = vcombine.high %v5855_v16, %v5587_v41  ;;  %v1471_v14 = vpop.f32.mrb[0].mxu1 }
 0x191   : > { %v5260_v16 = vpop.f32.mrb[1].mxu1 }
 0x192   : > { %v5869_v22 = vpack.i.b16 %v1638_v20, %v1637_v19  ;;  %v1642_v23 = vpack.i.b16 %v5867_v21, %v5859_v17  ;;  %v1644_v26 = vshrl.u32 %v5867_v21, 16 }
 0x194   : > { %v5875_v27 = vpack.i.b16 %v1644_v26, %v1643_v25 }
 0x1e9   : > { %v1649_v29 = vpop.permute.xlu0 %1648 }
 0x1ea   : > { %v1695_v32 = vrot.slane %v1649_v29, %v5818_v24 }
 0x1ed   : > { %v1653_v31 = vpop.permute.xlu0 %1652  ;;  %v1651_v33 = vpop.permute.xlu1 %1650 }
 0x1ee   : > { %v1703_v34 = vrot.slane %v1653_v31, %v5818_v24  ;;  %v1669_v36 = vrot.slane %v1651_v33, %v5818_v24 }
 0x1f0   : > { %v1704_v37 = vcombine.low %v1695_v32, %v1703_v34  ;;  %v1705_v38 = vcombine.high %v1695_v32, %v1703_v34  ;;  %v1670_v39 = vcombine.low %v1661_v35, %v1669_v36  ;;  %v1671_v40 = vcombine.high %v1661_v35, %v1669_v36 }
 0x1f2   : > { %v1712_v42 = vrot.slane %v1704_v37, %v5821_v28  ;;  %v1719_v43 = vrot.slane %v1705_v38, %v5821_v28  ;;  %v1678_v44 = vrot.slane %v1670_v39, %v5821_v28  ;;  %v1685_v45 = vrot.slane %v1671_v40, %v5821_v28 }
 0x1f4   : > { %v1720_v46 = vcombine.high %v1712_v42, %v5587_v41  ;;  %v1721_v47 = vcombine.high %v1719_v43, %v5587_v41  ;;  %v1727_v48 = vshrl.u32 %v1712_v42, 16  ;;  %v1743_v49 = vshrl.u32 %v1719_v43, 16 }
 0x1f5   : > { %v1686_v50 = vcombine.high %v1678_v44, %v5587_v41  ;;  %v1687_v51 = vcombine.high %v1685_v45, %v5587_v41  ;;  %v1726_v52 = vshrl.u32 %v1678_v44, 16  ;;  %v1742_v53 = vshrl.u32 %v1685_v45, 16 }
 0x1f6   : > { %v1724_v54 = vpack.i.b16 %v1712_v42, %v1678_v44  ;;  %v1735_v55 = vshrl.u32 %v1720_v46, 16  ;;  %v1740_v56 = vpack.i.b16 %v1719_v43, %v1685_v45  ;;  %v1751_v57 = vshrl.u32 %v1721_v47, 16 }
 0x1f7   : > { %v1734_v58 = vshrl.u32 %v1686_v50, 16  ;;  %v1750_v59 = vshrl.u32 %v1687_v51, 16  ;;  %v1728_v60 = vpack.i.b16 %v1727_v48, %v1726_v52  ;;  %v1732_v61 = vpack.i.b16 %v1720_v46, %v1686_v50 }
 0x1f8   : > { %v1744_v62 = vpack.i.b16 %v1743_v49, %v1742_v53  ;;  %v1748_v63 = vpack.i.b16 %v1721_v47, %v1687_v51  ;;  %v1754_v1 = vcombine.low %v1724_v54, %v1740_v56 }
 0x1f9   : > { %v1736_v2 = vpack.i.b16 %v1735_v55, %v1734_v58  ;;  %v1752_v7 = vpack.i.b16 %v1751_v57, %v1750_v59 }
 0x1fa   : > { %v1762_v8 = vcombine.low %v1732_v61, %v1748_v63  ;;  %v1779_v9 = vcombine.low %v1728_v60, %v1744_v62  ;;  %v1761_v11 = vrot.slane %v1754_v1, %v5818_v24  ;;  %v5108_v1 = vld [vmem:[%s1244_s26] ss:$0 sm:$0xff]  ;;  %s6580_s26 = sld [smem:[#allocation15_spill]] }
 0x1fb   : > { %v1787_v10 = vcombine.low %v1736_v2, %v1752_v7  ;;  %v1472_v2 = vadd.f32 %v5108_v1, %v1471_v14 }
 0x1fc   : > { %v1769_v12 = vrot.slane %v1762_v8, %v5818_v24  ;;  %v1786_v13 = vrot.slane %v1779_v9, %v5818_v24 }
 0x1fd   : > { %v1794_v15 = vrot.slane %v1787_v10, %v5818_v24  ;;  %v1477_v7 = vpack.c.bf16 %v1472_v2, %v1472_v2 }
 0x1fe   : > { %v1770_v19 = vcombine.low %v1761_v11, %v1769_v12 }
 0x1ff   : > { %v1795_v20 = vcombine.low %v1786_v13, %v1794_v15 }
 0x200   : > { %v1777_v25 = vrot.slane %v1770_v19, %v5821_v28  ;;  %s1252_s28 = scalar_lea.vmem %s6580_s26, %s6602_s8  ;;  %s1307_s26 = scalar_lea.vmem %s6542_s23, %s6602_s8 }
 0x201   : > { %v1802_v26 = vrot.slane %v1795_v20, %v5821_v28 }
 0x202   : > { %v1807_v30 = vshrl.u32 %v1777_v25, 16  ;;  %v1778_v35 = vcombine.high %v1777_v25, %v5587_v41 }
 0x203   : > { %v1806_v29 = vpack.i.b16 %v1802_v26, %v1777_v25  ;;  %v1808_v31 = vshrl.u32 %v1802_v26, 16  ;;  %v1803_v32 = vcombine.high %v1802_v26, %v5587_v41 }
 0x204   : > { %v1813_v39 = vshrl.u32 %v1778_v35, 16 }
 0x205   : > { %v1989_v33 = vsel %vm1984_vm2, %v1806_v29, 0  ;;  %v1809_v34 = vpack.i.b16 %v1808_v31, %v1807_v30  ;;  %v1814_v37 = vshrl.u32 %v1803_v32, 16  ;;  %v1812_v38 = vpack.i.b16 %v1803_v32, %v1778_v35 }
 0x206   : > { %5263 = vmatpush3.bf16.xpose.msra.mxu0 %v1989_v33 }
 0x207   : > { %v2035_v36 = vsel %vm1984_vm2, %v1809_v34, 0  ;;  %5274 = vmatprep.subr.bf16.mxu0 %v5579_v0  ;;  %v1815_v40 = vpack.i.b16 %v1814_v37, %v1813_v39  ;;  %v2081_v42 = vsel %vm1984_vm2, %v1812_v38, 0 }
 0x208   : > { %5269 = vmatpush3.bf16.xpose.msra.mxu1 %v2035_v36 }
 0x209   : > { %5280 = vmatprep.subr.bf16.mxu1 %v5579_v0  ;;  %v2127_v43 = vsel %vm1984_vm2, %v1815_v40, 0  ;;  %v1829_v40 = vrot.slane %v1477_v7, %v5818_v24 }
 0x20d   : > { %5265 = vmatmul.mubr.msk.bf16.vlgmr.msra.gmra.mrb[4].mxu0 %vm1984_vm2, %v1636_v18  ;;  %v1474_v18 = vpop.f32.mrb[2].mxu1 }
 0x20e   : > { %5275 = vmatpush3.bf16.xpose.msra.mxu0 %v2081_v42  ;;  %5276 = vmatprep.mubr.msk.bf16.mxu0 %vm5580_vm0, %v5579_v0 }
 0x20f   : > { %5271 = vmatmul.mubr.msk.bf16.vlgmr.msra.gmra.mrb[4].mxu1 %vm1984_vm2, %v5869_v22  ;;  %5286 = vmatprep.subr.bf16.mxu0 %v5579_v0  ;;  %v5261_v22 = vpop.f32.mrb[3].mxu1 }
 0x210   : > { %5281 = vmatpush3.bf16.xpose.msra.mxu1 %v2127_v43  ;;  %5282 = vmatprep.mubr.msk.bf16.mxu1 %vm5580_vm0, %v5579_v0 }
 0x211   : > { %5292 = vmatprep.subr.bf16.mxu1 %v5579_v0 }
 0x215   : > { %5277 = vmatmul.mubr.msk.bf16.vlgmr.msra.gmra.mrb[8].mxu0 %vm1984_vm2, %v1642_v23 }
 0x216   : > { %5288 = vmatprep.mubr.msk.bf16.mxu0 %vm5580_vm0, %v5579_v0 }
 0x217   : > { %5283 = vmatmul.mubr.msk.bf16.vlgmr.msra.gmra.mrb[8].mxu1 %vm1984_vm2, %v5875_v27 }
 0x218   : > { %5294 = vmatprep.mubr.msk.bf16.mxu1 %vm5580_vm0, %v5579_v0 }
 0x2e0   : > { %v2025_v44 = vpop.f32.mrb[4].mxu0 }
 0x2e1   : > { %v2169_v45 = vmul.f32 0.35355338, %v2025_v44  ;;  %v5266_v46 = vpop.f32.mrb[5].mxu0 }
 0x2e2   : > { %v2028_v47 = vpop.f32.mrb[6].mxu0  ;;  %v2071_v17 = vpop.f32.mrb[4].mxu1 }
 0x2e3   : > { %v2170_v21 = vmul.f32 0.35355338, %v2071_v17  ;;  %v5267_v23 = vpop.f32.mrb[7].mxu0  ;;  %v5272_v48 = vpop.f32.mrb[5].mxu1  ;;  %v2173_v49 = vsel %vm1984_vm2, %v2169_v45, -inf }
 0x2e4   : > { %v2074_v50 = vpop.f32.mrb[6].mxu1  ;;  %2174 = vmax.xlane.f32.xlu1 %v2173_v49 }
 0x2e5   : > { %v5273_v27 = vpop.f32.mrb[7].mxu1  ;;  %v2176_v51 = vsel %vm1984_vm2, %v2170_v21, -inf }
 0x2e6   : > { %2177 = vmax.xlane.f32.xlu0 %v2176_v51 }
 0x2e8   : > { %v2117_v52 = vpop.f32.mrb[8].mxu0 }
 0x2e9   : > { %v2171_v53 = vmul.f32 0.35355338, %v2117_v52  ;;  %v5278_v54 = vpop.f32.mrb[9].mxu0 }
 0x2ea   : > { %v2120_v55 = vpop.f32.mrb[10].mxu0  ;;  %v2163_v56 = vpop.f32.mrb[8].mxu1 }
 0x2eb   : > { %v2172_v57 = vmul.f32 0.35355338, %v2163_v56  ;;  %v5279_v58 = vpop.f32.mrb[11].mxu0  ;;  %v5284_v59 = vpop.f32.mrb[9].mxu1  ;;  %v2179_v60 = vsel %vm1984_vm2, %v2171_v53, -inf }
 0x2ec   : > { %v2166_v61 = vpop.f32.mrb[10].mxu1  ;;  %2180 = vmax.xlane.f32.xlu0 %v2179_v60 }
 0x2ed   : > { %v5285_v62 = vpop.f32.mrb[11].mxu1  ;;  %v2182_v63 = vsel %vm1984_vm2, %v2172_v57, -inf }
 0x2ee   : > { %2183 = vmax.xlane.f32.xlu1 %v2182_v63 }
 0x2ff   : > { %1819 = vrot.lane.b32.xlu1 %v1477_v7, %s5584_s10 }
 0x371   : > { %v2175_v8 = vpop.xlane.xlu1 %2174 }
 0x372   : > { %v2185_v9 = vsub.f32 %v2169_v45, %v2175_v8 }
 0x373   : > { %v2178_v10 = vpop.xlane.xlu0 %2177 }
 0x374   : > { %v2189_v11 = vmul.f32 1.442695, %v2185_v9  ;;  %v2186_v12 = vsub.f32 %v2170_v21, %v2178_v10 }
 0x376   : > { %5499 = vpow2.f32 %v2189_v11  ;;  %v2191_v13 = vmul.f32 1.442695, %v2186_v12 }
 0x378   : > { %5501 = vpow2.f32 %v2191_v13 }
 0x379   : > { %v2181_v26 = vpop.xlane.xlu0 %2180 }
 0x37a   : > { %v2187_v30 = vsub.f32 %v2171_v53, %v2181_v26 }
 0x37b   : > { %v2184_v29 = vpop.xlane.xlu1 %2183 }
 0x37c   : > { %v2188_v31 = vsub.f32 %v2172_v57, %v2184_v29  ;;  %v2193_v32 = vmul.f32 1.442695, %v2187_v30 }
 0x37e   : > { %v2195_v33 = vmul.f32 1.442695, %v2188_v31  ;;  %5503 = vpow2.f32 %v2193_v32 }
 0x37f   : > { %v1820_v38 = vpop.permute.xlu1 %1819 }
 0x380   : > { %v5934_v15 = vpop.eup %5499  ;;  %5505 = vpow2.f32 %v2195_v33  ;;  %v1837_v39 = vrot.slane %v1820_v38, %v5818_v24 }
 0x381   : > { %v2197_v19 = vsel %vm1984_vm2, %v5934_v15, 0.0 }
 0x382   : > { %v5938_v20 = vpop.eup %5501  ;;  %2198 = vadd.xlane.f32.xlu0 %v2197_v19  ;;  %v1838_v42 = vcombine.low %v1829_v40, %v1837_v39  ;;  %v1839_v14 = vcombine.high %v1829_v40, %v1837_v39 }
 0x383   : > { %v2200_v25 = vsel %vm1984_vm2, %v5938_v20, 0.0 }
 0x384   : > { %2201 = vadd.xlane.f32.xlu1 %v2200_v25  ;;  %v1846_v18 = vrot.slane %v1838_v42, %v5821_v28  ;;  %v1853_v44 = vrot.slane %v1839_v14, %v5821_v28 }
 0x386   : > { %v1854_v17 = vcombine.high %v1846_v18, %v5587_v41  ;;  %v1855_v48 = vcombine.high %v1853_v44, %v5587_v41  ;;  %v1894_v27 = vshrl.u32 %v1846_v18, 16  ;;  %v1910_v52 = vshrl.u32 %v1853_v44, 16 }
 0x388   : > { %v5944_v34 = vpop.eup %5503  ;;  %v1902_v51 = vshrl.u32 %v1854_v17, 16  ;;  %v1918_v57 = vshrl.u32 %v1855_v48, 16 }
 0x389   : > { %v2203_v36 = vsel %vm1984_vm2, %v5944_v34, 0.0 }
 0x38a   : > { %v5946_v35 = vpop.eup %5505 }
 0x38b   : > { %v2206_v37 = vsel %vm1984_vm2, %v5946_v35, 0.0 }
 0x395   : > { %1821 = vrot.lane.b32.xlu1 %v1477_v7, %s5581_s30 }
 0x398   : > { %1817 = vrot.lane.b32.xlu0 %v1477_v7, %s5582_s3 }
 0x3b7   : > { %2204 = vadd.xlane.f32.xlu0 %v2203_v36 }
 0x3b9   : > { %2207 = vadd.xlane.f32.xlu1 %v2206_v37 }
 0x40f   : > { %v2199_v43 = vpop.xlane.xlu0 %2198 }
 0x410   : > { %5507 = vrcp.f32 %v2199_v43 }
 0x411   : > { %v2202_v16 = vpop.xlane.xlu1 %2201 }
 0x412   : > { %5509 = vrcp.f32 %v2202_v16 }
 0x413   : > { %v1818_v22 = vpop.permute.xlu0 %1817 }
 0x414   : > { %v1863_v46 = vrot.slane %v1818_v22, %v5818_v24 }
 0x415   : > { %v1822_v45 = vpop.permute.xlu1 %1821 }
 0x416   : > { %v1871_v47 = vrot.slane %v1822_v45, %v5818_v24 }
 0x418   : > { %v1872_v21 = vcombine.low %v1863_v46, %v1871_v47  ;;  %v1873_v23 = vcombine.high %v1863_v46, %v1871_v47 }
 0x41a   : > { %v1880_v49 = vrot.slane %v1872_v21, %v5821_v28  ;;  %v1887_v50 = vrot.slane %v1873_v23, %v5821_v28  ;;  %v5508_v31 = vpop.eup %5507 }
 0x41b   : > { %v2213_v38 = vmul.f32 %v5508_v31, %v5934_v15 }
 0x41c   : > { %v1888_v53 = vcombine.high %v1880_v49, %v5587_v41  ;;  %v1889_v54 = vcombine.high %v1887_v50, %v5587_v41  ;;  %v1892_v55 = vpack.i.b16 %v1880_v49, %v1846_v18  ;;  %v1895_v56 = vshrl.u32 %v1880_v49, 16  ;;  %v5510_v36 = vpop.eup %5509 }
 0x41d   : > { %v1908_v58 = vpack.i.b16 %v1887_v50, %v1853_v44  ;;  %v1911_v59 = vshrl.u32 %v1887_v50, 16  ;;  %v2214_v14 = vmul.f32 %v5510_v36, %v5938_v20  ;;  %v2217_v47 = vpack.c.bf16 %v2213_v38, %v2213_v38 }
 0x41e   : > { %v1896_v60 = vpack.i.b16 %v1895_v56, %v1894_v27  ;;  %v1900_v61 = vpack.i.b16 %v1888_v53, %v1854_v17  ;;  %v1903_v62 = vshrl.u32 %v1888_v53, 16  ;;  %v1916_v63 = vpack.i.b16 %v1889_v54, %v1855_v48 }
 0x41f   : > { %v1912_v1 = vpack.i.b16 %v1911_v59, %v1910_v52  ;;  %v1919_v2 = vshrl.u32 %v1889_v54, 16  ;;  %v1922_v7 = vcombine.low %v1892_v55, %v1908_v58  ;;  %v2218_v21 = vpack.c.bf16 %v2214_v14, %v2214_v14 }
 0x420   : > { %v1904_v8 = vpack.i.b16 %v1903_v62, %v1902_v51  ;;  %v1930_v9 = vcombine.low %v1900_v61, %v1916_v63 }
 0x421   : > { %v1920_v10 = vpack.i.b16 %v1919_v2, %v1918_v57  ;;  %v1947_v11 = vcombine.low %v1896_v60, %v1912_v1  ;;  %v1929_v12 = vrot.slane %v1922_v7, %v5818_v24 }
 0x422   : > { %v1937_v13 = vrot.slane %v1930_v9, %v5818_v24 }
 0x423   : > { %v1955_v19 = vcombine.low %v1904_v8, %v1920_v10  ;;  %v1954_v26 = vrot.slane %v1947_v11, %v5818_v24 }
 0x424   : > { %v1938_v25 = vcombine.low %v1929_v12, %v1937_v13 }
 0x425   : > { %v1962_v29 = vrot.slane %v1955_v19, %v5818_v24 }
 0x426   : > { %v1945_v30 = vrot.slane %v1938_v25, %v5821_v28 }
 0x427   : > { %v1963_v32 = vcombine.low %v1954_v26, %v1962_v29 }
 0x428   : > { %v1946_v33 = vcombine.high %v1945_v30, %v5587_v41  ;;  %v1975_v40 = vshrl.u32 %v1945_v30, 16 }
 0x429   : > { %v1970_v37 = vrot.slane %v1963_v32, %v5821_v28 }
 0x42a   : > { %v1981_v16 = vshrl.u32 %v1946_v33, 16 }
 0x42b   : > { %v1974_v39 = vpack.i.b16 %v1970_v37, %v1945_v30  ;;  %v1976_v42 = vshrl.u32 %v1970_v37, 16  ;;  %v1971_v43 = vcombine.high %v1970_v37, %v5587_v41 }
 0x42d   : > { %v2226_v18 = vsel %vm2224_vm3, %v1974_v39, 0  ;;  %v1977_v22 = vpack.i.b16 %v1976_v42, %v1975_v40  ;;  %v1980_v44 = vpack.i.b16 %v1971_v43, %v1946_v33  ;;  %v1982_v45 = vshrl.u32 %v1971_v43, 16  ;;  %v5483_v33 = vld [vmem:[%s1249_s29] sm:$0xff]  }
 0x42e   : > { %5287 = vmatpush3.bf16.msra.mxu0 %v2226_v18 }
 0x42f   : > { %v2272_v46 = vsel %vm2224_vm3, %v1977_v22, 0  ;;  %5298 = vmatprep.subr.bf16.mxu0 %v5579_v0  ;;  %v1983_v15 = vpack.i.b16 %v1982_v45, %v1981_v16  ;;  %v2318_v17 = vsel %vm2224_vm3, %v1980_v44, 0  ;;  %v5484_v16 = vld [vmem:[%s1249_s29 + $0x8] sm:$0xff]   ;;  %s1271_s29 = scalar_lea.vmem %s6532_s13, %s5777_s0 }
 0x430   : > { %5293 = vmatpush3.bf16.msra.mxu1 %v2272_v46 }
 0x431   : > { %5289 = vmatmul.mubr.msk.bf16.vlgmr.msra.gmra.mrb[12].mxu0 %vm1984_vm2, %v2217_v47  ;;  %5304 = vmatprep.subr.bf16.mxu1 %v5579_v0  ;;  %v2364_v20 = vsel %vm2224_vm3, %v1983_v15, 0 }
 0x432   : > { %5299 = vmatpush3.bf16.msra.mxu0 %v2318_v17  ;;  %5300 = vmatprep.mubr.msk.bf16.mxu0 %vm5580_vm0, %v5579_v0 }
 0x433   : > { %5295 = vmatmul.mubr.msk.bf16.vlgmr.msra.gmra.mrb[12].mxu1 %vm1984_vm2, %v2218_v21  ;;  %5310 = vmatprep.subr.bf16.mxu0 %v5579_v0 }
 0x434   : > { %5305 = vmatpush3.bf16.msra.mxu1 %v2364_v20  ;;  %5306 = vmatprep.mubr.msk.bf16.mxu1 %vm5580_vm0, %v5579_v0 }
 0x435   : > { %5318 = vmatprep.subr.bf16.mxu1 %v5579_v0 }
 0x444   : > { %v2205_v23 = vpop.xlane.xlu0 %2204 }
 0x445   : > { %5511 = vrcp.f32 %v2205_v23 }
 0x446   : > { %v2208_v48 = vpop.xlane.xlu1 %2207 }
 0x447   : > { %5513 = vrcp.f32 %v2208_v48 }
 0x44f   : > { %v5512_v49 = vpop.eup %5511 }
 0x450   : > { %v2215_v50 = vmul.f32 %v5512_v49, %v5944_v34 }
 0x451   : > { %v5514_v27 = vpop.eup %5513 }
 0x452   : > { %v2216_v51 = vmul.f32 %v5514_v27, %v5946_v35  ;;  %v2219_v52 = vpack.c.bf16 %v2215_v50, %v2215_v50 }
 0x454   : > { %5301 = vmatmul.mubr.msk.bf16.vlgmr.msra.gmra.mrb[16].mxu0 %vm1984_vm2, %v2219_v52  ;;  %v2220_v53 = vpack.c.bf16 %v2216_v51, %v2216_v51 }
 0x455   : > { %5314 = vmatprep.mubr.msk.bf16.mxu0 %vm5580_vm0, %v5579_v0  ;;  %5311 = vmatpush3.bf16.msra.mxu0 %v5483_v33 }
 0x456   : > { %5307 = vmatmul.mubr.msk.bf16.vlgmr.msra.gmra.mrb[16].mxu1 %vm1984_vm2, %v2220_v53  ;;  %5312 = vmatprep.subr.bf16.mxu0 %v5579_v0 }
 0x457   : > { %5322 = vmatprep.mubr.msk.bf16.mxu1 %vm5580_vm0, %v5579_v0 }
 0x459   : > { %5313 = vmatpush3.bf16.msra.mxu0 %v5484_v16 }
 0x504   : > { %v2262_v54 = vpop.f32.mrb[12].mxu0 }
 0x505   : > { %v5290_v55 = vpop.f32.mrb[13].mxu0 }
 0x506   : > { %v2265_v56 = vpop.f32.mrb[14].mxu0  ;;  %v2308_v57 = vpop.f32.mrb[12].mxu1 }
 0x507   : > { %v5291_v34 = vpop.f32.mrb[15].mxu0  ;;  %v5296_v58 = vpop.f32.mrb[13].mxu1 }
 0x508   : > { %v2311_v59 = vpop.f32.mrb[14].mxu1  ;;  %v5122_v58 = vld [vmem:[%s1252_s28] ss:$0 sm:$0xff]  ;;  %s6581_s28 = sld [smem:[#allocation9_spill]] }
 0x509   : > { %v5297_v35 = vpop.f32.mrb[15].mxu1 }
 0x527   : > { %v2354_v60 = vpop.f32.mrb[16].mxu0 }
 0x528   : > { %v2406_v61 = vcombine.low %v2262_v54, %v2354_v60  ;;  %v2407_v62 = vcombine.high %v2262_v54, %v2354_v60  ;;  %v5302_v63 = vpop.f32.mrb[17].mxu0 }
 0x529   : > { %v2357_v1 = vpop.f32.mrb[18].mxu0  ;;  %v2400_v2 = vpop.f32.mrb[16].mxu1 }
 0x52a   : > { %v2422_v7 = vcombine.low %v2308_v57, %v2400_v2  ;;  %v2423_v8 = vcombine.high %v2308_v57, %v2400_v2  ;;  %v5303_v9 = vpop.f32.mrb[19].mxu0  ;;  %v5308_v10 = vpop.f32.mrb[17].mxu1  ;;  %v2414_v12 = vrot.slane %v2406_v61, %v5818_v24  ;;  %v2421_v13 = vrot.slane %v2407_v62, %v5818_v24  ;;  %v5485_v2 = vld [vmem:[%s1271_s29] sm:$0xff]  }
 0x52b   : > { %v2403_v11 = vpop.f32.mrb[18].mxu1  ;;  %5326 = vmatprep.subr.bf16.mxu0 %v5485_v2 }
 0x52c   : > { %v2430_v19 = vrot.slane %v2422_v7, %v5818_v24  ;;  %v2437_v25 = vrot.slane %v2423_v8, %v5818_v24  ;;  %v5309_v26 = vpop.f32.mrb[19].mxu1  ;;  %v5486_v7 = vld [vmem:[%s1271_s29 + $0x8] sm:$0xff]   ;;  %s6584_s29 = sld [smem:[#allocation17_spill]] }
 0x52e   : > { %v2438_v29 = vcombine.low %v2414_v12, %v2430_v19  ;;  %v2439_v30 = vcombine.high %v2414_v12, %v2430_v19  ;;  %v2454_v31 = vcombine.low %v2421_v13, %v2437_v25  ;;  %v2455_v32 = vcombine.high %v2421_v13, %v2437_v25  ;;  %v5132_v25 = vld [vmem:[%s1274_s25] ss:$0 sm:$0xff] }
 0x530   : > { %v2446_v36 = vrot.slane %v2438_v29, %v5821_v28  ;;  %v2453_v37 = vrot.slane %v2439_v30, %v5821_v28  ;;  %v2462_v38 = vrot.slane %v2454_v31, %v5821_v28  ;;  %v2469_v39 = vrot.slane %v2455_v32, %v5821_v28 }
 0x532   : > { %v2474_v40 = vcombine.low %v2446_v36, %v2453_v37  ;;  %v5120_v42 = vcombine.high %v2446_v36, %v2453_v37  ;;  %v2490_v43 = vcombine.low %v2462_v38, %v2469_v39  ;;  %v5121_v14 = vcombine.high %v2462_v38, %v2469_v39 }
 0x534   : > { %v2481_v18 = vrot.slane %v2474_v40, %v5818_v24  ;;  %v2489_v22 = vrot.slane %v5120_v42, %v5818_v24  ;;  %v2497_v44 = vrot.slane %v2490_v43, %v5818_v24  ;;  %v2505_v45 = vrot.slane %v5121_v14, %v5818_v24  ;;  %v5126_v14 = vld [vmem:[%s1255_s9] ss:$0 sm:$0xff]  ;;  %s6587_s9 = sld [smem:[#allocation20_spill]] }
 0x536   : > { %v2507_v46 = vcombine.high %v2481_v18, %v2489_v22  ;;  %v2523_v47 = vcombine.high %v2497_v44, %v2505_v45  ;;  %v2506_v15 = vcombine.low %v2481_v18, %v2489_v22  ;;  %v2522_v17 = vcombine.low %v2497_v44, %v2505_v45 }
 0x538   : > { %v2521_v21 = vrot.slane %v2507_v46, %v5821_v28  ;;  %v2537_v20 = vrot.slane %v2523_v47, %v5821_v28  ;;  %v2514_v23 = vrot.slane %v2506_v15, %v5821_v28  ;;  %v2530_v48 = vrot.slane %v2522_v17, %v5821_v28 }
 0x53a   : > { %v2540_v49 = vcombine.low %v2521_v21, %v2537_v20  ;;  %v2539_v50 = vcombine.high %v2514_v23, %v2530_v48  ;;  %v2541_v27 = vcombine.high %v2521_v21, %v2537_v20  ;;  %v2538_v51 = vcombine.low %v2514_v23, %v2530_v48 }
 0x53c   : > { %2547 = vrot.lane.b32.xlu1 %v2540_v49, %s5588_s2  ;;  %2543 = vrot.lane.b32.xlu0 %v2539_v50, %s5589_s7 }
 0x540   : > { %2551 = vrot.lane.b32.xlu0 %v2541_v27, %s6551_s12  ;;  %s1228_s12 = scalar_lea.vmem %s6581_s28, %s5426_s1  ;;  %s1258_s1 = scalar_lea.vmem %s6584_s29, %s6602_s8 }
 0x541   : > { %v5487_v3 = vld [vmem:[%s1228_s12] sm:$0xff]   ;;  %s6585_s28 = sld [smem:[#allocation19_spill]]  ;;  %s1293_s29 = scalar_lea.vmem %s6538_s19, %s5777_s0 }
 0x542   : > { %v5127_v18 = vld [vmem:[%s1258_s1] ss:$0 sm:$0xff]  ;;  %s5178_s1 = sshll.u32 %s6602_s8, 5 }
 0x547   : > { %s1266_s5 = scalar_lea.vmem %s6585_s28, %s6602_s8  ;;  %s1301_s28 = scalar_lea.vmem %s6540_s21, %s5178_s1 }
 0x5ae   : > { %v2544_v52 = vpop.permute.xlu0 %2543  ;;  %v2548_v53 = vpop.permute.xlu1 %2547 }
 0x5af   : > { %v2554_v54 = vsel %vm1984_vm2, %v2538_v51, %v2544_v52 }
 0x5b0   : > { %v2556_v56 = vsel %vm2555_vm4, %v2554_v54, %v2548_v53 }
 0x5b2   : > { %v2552_v55 = vpop.permute.xlu0 %2551 }
 0x5b3   : > { %v2558_v57 = vsel %vm2557_vm5, %v2556_v56, %v2552_v55 }
 0x5b4   : > { %v2563_v34 = vpack.c.bf16 %v2558_v57, %v2558_v57 }
 0x5b6   : > { %5315 = vmatmul.mubr.msk.bf16.vlgmr.msra.gmra.mrb[20].mxu0 %vm1366_vm1, %v2563_v34 }
 0x5b7   : > { %5327 = vmatpush3.bf16.msra.mxu0 %v5485_v2  ;;  %5330 = vmatprep.mubr.msk.bf16.mxu0 %vm1366_vm1, %v5487_v3 }
 0x5b8   : > { %5328 = vmatprep.subr.bf16.mxu0 %v5486_v7 }
 0x5bb   : > { %5329 = vmatpush3.bf16.msra.mxu0 %v5486_v7 }
 0x5bc   : > { %5342 = vmatprep.subr.bf16.mxu0 %v5579_v0 }
 0x689   : > { %v2620_v59 = vpop.f32.mrb[20].mxu0 }
 0x68a   : > { %v2621_v35 = vadd.f32 %v5122_v58, %v2620_v59  ;;  %v5316_v60 = vpop.f32.mrb[21].mxu0 }
 0x68b   : > { %v2623_v61 = vpop.f32.mrb[22].mxu0 }
 0x68c   : > { %v5317_v62 = vpop.f32.mrb[23].mxu0  ;;  %v2626_v63 = vadd.f32 %v2621_v35, %v1340_v6  ;;  %v5488_v6 = vld [vmem:[%s1228_s12 + $0x8] ss:$0 sps:$4 sm:$0x33]   ;;  %s6582_s12 = sld [smem:[#allocation18_spill]] }
 0x68d   : > { %5331 = vmatmul.mubr.msk.bf16.vlgmr.msra.gmra.mrb[24].mxu0 %vm1366_vm1, %v5488_v6 }
 0x68e   : > { %v2629_v1 = vsel %vm1366_vm1, %v2626_v63, 0.0  ;;  %5346 = vmatprep.mubr.msk.bf16.mxu0 %vm5580_vm0, %v5579_v0 }
 0x68f   : > { %2630 = vadd.xlane.f32.xlu1 %v2629_v1 }
 0x692   : > { %s1263_s11 = scalar_lea.vmem %s6582_s12, %s5777_s0 }
 0x693   : > { %v5489_v13 = vld [vmem:[%s1263_s11] sm:$0xff]   ;;  %v5490_v19 = vld [vmem:[%s1263_s11 + $0x8] sm:$0xff]  }
 0x694   : > { %5319 = vmatpush3.bf16.msra.mxu1 %v5489_v13 }
 0x695   : > { %5320 = vmatprep.subr.bf16.mxu1 %v5579_v0 }
 0x698   : > { %5321 = vmatpush3.bf16.msra.mxu1 %v5490_v19 }
 0x699   : > { %5334 = vmatprep.subr.bf16.mxu1 %v5579_v0 }
 0x71c   : > { %v2631_v8 = vpop.xlane.xlu1 %2630 }
 0x71d   : > { %v2633_v9 = vmul.f32 0.03125, %v2631_v8 }
 0x71f   : > { %v2634_v10 = vsub.f32 %v2626_v63, %v2633_v9 }
 0x721   : > { %v2635_v11 = vmul.f32 %v2634_v10, %v2634_v10 }
 0x723   : > { %v2636_v12 = vsel %vm1366_vm1, %v2635_v11, 0.0 }
 0x724   : > { %2637 = vadd.xlane.f32.xlu0 %v2636_v12 }
 0x760   : > { %v5332_v26 = vpop.f32.mrb[24].mxu0 }
 0x761   : > { %v2797_v29 = vpop.f32.mrb[25].mxu0  ;;  %v2806_v33 = vadd.f32 %v5332_v26, %v5132_v25 }
 0x762   : > { %v2798_v30 = vadd.f32 %v5132_v25, %v2797_v29  ;;  %v5333_v31 = vpop.f32.mrb[26].mxu0 }
 0x763   : > { %v2800_v32 = vpop.f32.mrb[27].mxu0  ;;  %v6057_v38 = vpack.c.bf16 %v2806_v33, %v2806_v33 }
 0x764   : > { %v2801_v36 = vadd.f32 %v5132_v25, %v2800_v32 }
 0x766   : > { %v6055_v37 = vpack.c.bf16 %v2801_v36, %v2798_v30 }
 0x768   : > { %2988 = vrot.lane.b32.xlu1 %v6055_v37, %s5584_s10  ;;  %2983 = vrot.lane.b32.xlu0 %v6055_v37, %s5582_s3  ;;  %v2998_v47 = vcombine.high %v6055_v37, %v5587_v41  ;;  %v3005_v15 = vrot.slane %v6055_v37, %v5818_v24 }
 0x76a   : > { %v3012_v4 = vrot.slane %v2998_v47, %v5818_v24 }
 0x76c   : > { %2993 = vrot.lane.b32.xlu1 %v6055_v37, %s5581_s30  ;;  %2985 = vrot.lane.b32.xlu0 %v6057_v38, %s5582_s3 }
 0x770   : > { %2990 = vrot.lane.b32.xlu1 %v6057_v38, %s5584_s10  ;;  %2995 = vrot.lane.b32.xlu0 %v6057_v38, %s5581_s30 }
 0x7b1   : > { %v2638_v39 = vpop.xlane.xlu0 %2637 }
 0x7b2   : > { %v2639_v40 = vmul.f32 0.03125, %v2638_v39 }
 0x7b4   : > { %v2640_v42 = vadd.f32 1e-05, %v2639_v40 }
 0x7b6   : > { %5515 = vrsqrt.f32 %v2640_v42 }
 0x7c0   : > { %v5516_v43 = vpop.eup %5515 }
 0x7c1   : > { %v2642_v16 = vmul.f32 %v5516_v43, %v2634_v10 }
 0x7c3   : > { %v2649_v22 = vmul.f32 %v5126_v14, %v2642_v16 }
 0x7c5   : > { %v6079_v44 = vadd.f32 %v5127_v18, %v2649_v22 }
 0x7c7   : > { %v2657_v45 = vadd.f32 %v6079_v44, %v1336_v5 }
 0x7c9   : > { %v2658_v46 = vpack.c.bf16 %v2657_v45, %v2657_v45 }
 0x7cb   : > { %5323 = vmatmul.mubr.msk.bf16.vlgmr.msra.gmra.mrb[20].mxu1 %vm1366_vm1, %v2658_v46 }
 0x7cc   : > { %5338 = vmatprep.mubr.msk.bf16.mxu1 %vm5580_vm0, %v5579_v0 }
 0x7da   : > { %v6091_v17 = vpop.permute.xlu1 %2988  ;;  %v6093_v21 = vpop.permute.xlu0 %2983 }
 0x7db   : > { %v3013_v5 = vcombine.high %v6091_v17, %v5587_v41  ;;  %v3020_v20 = vrot.slane %v6091_v17, %v5818_v24  ;;  %v3064_v23 = vcombine.high %v6093_v21, %v5587_v41  ;;  %v3071_v51 = vrot.slane %v6093_v21, %v5818_v24 }
 0x7dd   : > { %v3027_v48 = vrot.slane %v3013_v5, %v5818_v24  ;;  %v3028_v49 = vcombine.low %v3005_v15, %v3020_v20  ;;  %v3029_v50 = vcombine.high %v3005_v15, %v3020_v20  ;;  %v3078_v58 = vrot.slane %v3064_v23, %v5818_v24 }
 0x7de   : > { %v6103_v27 = vpop.permute.xlu1 %2993  ;;  %v6109_v56 = vpop.permute.xlu0 %2985 }
 0x7df   : > { %v3036_v52 = vrot.slane %v3028_v49, %v5821_v28  ;;  %v3043_v53 = vrot.slane %v3029_v50, %v5821_v28  ;;  %v3044_v54 = vcombine.low %v3012_v4, %v3027_v48  ;;  %v3045_v55 = vcombine.high %v3012_v4, %v3027_v48 }
 0x7e0   : > { %v3079_v57 = vcombine.high %v6103_v27, %v5587_v41  ;;  %v3086_v34 = vrot.slane %v6103_v27, %v5818_v24 }
 0x7e1   : > { %v6117_v59 = vrot.slane %v3044_v54, %v5821_v28  ;;  %v6120_v35 = vrot.slane %v3045_v55, %v5821_v28  ;;  %v3060_v60 = vcombine.high %v3036_v52, %v5587_v41  ;;  %v3061_v61 = vcombine.high %v3043_v53, %v5587_v41 }
 0x7e2   : > { %v3155_v62 = vshrl.u32 %v3036_v52, 16  ;;  %v3093_v63 = vrot.slane %v3079_v57, %v5818_v24  ;;  %v3094_v1 = vcombine.low %v3071_v51, %v3086_v34  ;;  %v3171_v6 = vshrl.u32 %v3043_v53, 16  ;;  %v6131_v12 = vpop.permute.xlu1 %2990  ;;  %v6134_v29 = vpop.permute.xlu0 %2995 }
 0x7e3   : > { %v3062_v2 = vcombine.high %v6117_v59, %v5587_v41  ;;  %v3063_v7 = vcombine.high %v6120_v35, %v5587_v41  ;;  %v3163_v3 = vshrl.u32 %v3060_v60, 16  ;;  %v3179_v8 = vshrl.u32 %v3061_v61, 16 }
 0x7e4   : > { %v3187_v9 = vshrl.u32 %v6117_v59, 16  ;;  %v3095_v10 = vcombine.high %v3071_v51, %v3086_v34  ;;  %v3102_v11 = vrot.slane %v3094_v1, %v5821_v28  ;;  %v3203_v19 = vshrl.u32 %v6120_v35, 16 }
 0x7e5   : > { %v3195_v13 = vshrl.u32 %v3062_v2, 16  ;;  %v3110_v25 = vcombine.low %v3078_v58, %v3093_v63  ;;  %v3111_v26 = vcombine.high %v3078_v58, %v3093_v63  ;;  %v3211_v30 = vshrl.u32 %v3063_v7, 16 }
 0x7e6   : > { %v3109_v31 = vrot.slane %v3095_v10, %v5821_v28  ;;  %v3126_v32 = vcombine.high %v3102_v11, %v5587_v41  ;;  %v3156_v33 = vshrl.u32 %v3102_v11, 16  ;;  %v3153_v40 = vpack.i.b16 %v3102_v11, %v3036_v52 }
 0x7e7   : > { %v3118_v36 = vrot.slane %v3110_v25, %v5821_v28  ;;  %v3125_v39 = vrot.slane %v3111_v26, %v5821_v28  ;;  %v3131_v42 = vcombine.low %v6057_v38, %v6131_v12  ;;  %v3142_v18 = vcombine.low %v6109_v56, %v6134_v29 }
 0x7e8   : > { %v3127_v43 = vcombine.high %v3109_v31, %v5587_v41  ;;  %v3157_v14 = vpack.i.b16 %v3156_v33, %v3155_v62  ;;  %v3164_v16 = vshrl.u32 %v3126_v32, 16  ;;  %v3169_v46 = vpack.i.b16 %v3109_v31, %v3043_v53 }
 0x7e9   : > { %v3128_v22 = vcombine.high %v3118_v36, %v5587_v41  ;;  %v3129_v45 = vcombine.high %v3125_v39, %v5587_v41  ;;  %v3172_v47 = vshrl.u32 %v3109_v31, 16  ;;  %v3161_v15 = vpack.i.b16 %v3126_v32, %v3060_v60 }
 0x7ea   : > { %v3165_v4 = vpack.i.b16 %v3164_v16, %v3163_v3  ;;  %v3177_v5 = vpack.i.b16 %v3127_v43, %v3061_v61  ;;  %v3180_v20 = vshrl.u32 %v3127_v43, 16  ;;  %v3185_v48 = vpack.i.b16 %v3118_v36, %v6117_v59 }
 0x7eb   : > { %v3173_v23 = vpack.i.b16 %v3172_v47, %v3171_v6  ;;  %v3188_v49 = vshrl.u32 %v3118_v36, 16  ;;  %v3196_v50 = vshrl.u32 %v3128_v22, 16  ;;  %v3193_v52 = vpack.i.b16 %v3128_v22, %v3062_v2 }
 0x7ec   : > { %v3181_v51 = vpack.i.b16 %v3180_v20, %v3179_v8  ;;  %v3201_v54 = vpack.i.b16 %v3125_v39, %v6120_v35  ;;  %v3204_v55 = vshrl.u32 %v3125_v39, 16  ;;  %v3209_v57 = vpack.i.b16 %v3129_v45, %v3063_v7 }
 0x7ed   : > { %v3212_v34 = vshrl.u32 %v3129_v45, 16  ;;  %v3227_v58 = vcombine.low %v3153_v40, %v3169_v46  ;;  %v3138_v53 = vrot.slane %v3131_v42, %v5821_v28  ;;  %v3189_v62 = vpack.i.b16 %v3188_v49, %v3187_v9 }
 0x7ee   : > { %v3205_v60 = vpack.i.b16 %v3204_v55, %v3203_v19  ;;  %v3149_v61 = vrot.slane %v3142_v18, %v5821_v28  ;;  %v3235_v63 = vcombine.low %v3161_v15, %v3177_v5  ;;  %v3197_v3 = vpack.i.b16 %v3196_v50, %v3195_v13 }
 0x7ef   : > { %v3139_v1 = vcombine.high %v3138_v53, %v5587_v41  ;;  %v3218_v59 = vshrl.u32 %v3138_v53, 16  ;;  %v3234_v6 = vrot.slane %v3227_v58, %v5818_v24  ;;  %v3213_v8 = vpack.i.b16 %v3212_v34, %v3211_v30 }
 0x7f0   : > { %v3150_v2 = vcombine.high %v3149_v61, %v5587_v41  ;;  %v3219_v35 = vshrl.u32 %v3149_v61, 16  ;;  %v3242_v7 = vrot.slane %v3235_v63, %v5818_v24  ;;  %v3243_v11 = vcombine.low %v3185_v48, %v3201_v54 }
 0x7f1   : > { %v3224_v10 = vshrl.u32 %v3139_v1, 16  ;;  %v3251_v25 = vcombine.low %v3193_v52, %v3209_v57  ;;  %v3277_v9 = vcombine.low %v3157_v14, %v3173_v23  ;;  %v3217_v19 = vpack.i.b16 %v3149_v61, %v3138_v53 }
 0x7f2   : > { %v3225_v26 = vshrl.u32 %v3150_v2, 16  ;;  %v3259_v31 = vcombine.low %v3234_v6, %v3242_v7  ;;  %v3250_v32 = vrot.slane %v3243_v11, %v5818_v24  ;;  %v3285_v36 = vcombine.low %v3165_v4, %v3181_v51 }
 0x7f3   : > { %v3258_v33 = vrot.slane %v3251_v25, %v5818_v24  ;;  %v3284_v13 = vrot.slane %v3277_v9, %v5818_v24  ;;  %v3220_v39 = vpack.i.b16 %v3219_v35, %v3218_v59  ;;  %v3223_v40 = vpack.i.b16 %v3150_v2, %v3139_v1 }
 0x7f4   : > { %v3226_v42 = vpack.i.b16 %v3225_v26, %v3224_v10  ;;  %v3293_v30 = vcombine.low %v3189_v62, %v3205_v60  ;;  %v3266_v43 = vrot.slane %v3259_v31, %v5821_v28  ;;  %v3292_v18 = vrot.slane %v3285_v36, %v5818_v24  ;;  %v5128_v26 = vld [vmem:[%s1266_s5] ss:$0 sm:$0xff]  ;;  %s1310_s5 = scalar_lea.vmem %s6543_s24, %s6602_s8 }
 0x7f5   : > { %v3267_v16 = vcombine.low %v3250_v32, %v3258_v33  ;;  %v3301_v14 = vcombine.low %v3197_v3, %v3213_v8  ;;  %v3329_v15 = vcombine.low %v3217_v19, %v3223_v40 }
 0x7f6   : > { %v3300_v22 = vrot.slane %v3293_v30, %v5818_v24  ;;  %v3309_v47 = vcombine.low %v3284_v13, %v3292_v18  ;;  %v3340_v23 = vcombine.low %v3220_v39, %v3226_v42 }
 0x7f7   : > { %v3274_v45 = vrot.slane %v3267_v16, %v5821_v28  ;;  %v3308_v46 = vrot.slane %v3301_v14, %v5818_v24  ;;  %v3336_v51 = vrot.slane %v3329_v15, %v5821_v28 }
 0x7f8   : > { %v3316_v4 = vrot.slane %v3309_v47, %v5821_v28  ;;  %v3347_v52 = vrot.slane %v3340_v23, %v5821_v28 }
 0x7f9   : > { %v3275_v5 = vcombine.low %v3266_v43, %v3274_v45  ;;  %v3317_v20 = vcombine.low %v3300_v22, %v3308_v46  ;;  %v3364_v58 = vshrl.u32 %v3336_v51, 16  ;;  %v6174_v59 = vcombine.high %v3336_v51, %v5587_v41 }
 0x7fa   : > { %v3365_v53 = vshrl.u32 %v3347_v52, 16  ;;  %v3363_v60 = vpack.i.b16 %v3347_v52, %v3336_v51  ;;  %v6177_v3 = vcombine.high %v3347_v52, %v5587_v41  ;;  %v6187_v7 = vcombine.high %v3266_v43, %v3274_v45 }
 0x7fb   : > { %v3324_v48 = vrot.slane %v3317_v20, %v5821_v28  ;;  %v3352_v50 = vshrl.u32 %v3275_v5, 16  ;;  %v3370_v2 = vshrl.u32 %v6174_v59, 16 }
 0x7fc   : > { %v3366_v61 = vpack.i.b16 %v3365_v53, %v3364_v58  ;;  %v3780_v63 = vsel %vm1984_vm2, %v3363_v60, 0  ;;  %v3369_v6 = vpack.i.b16 %v6177_v3, %v6174_v59  ;;  %v3371_v35 = vshrl.u32 %v6177_v3, 16 }
 0x7fd   : > { %v3325_v49 = vcombine.low %v3316_v4, %v3324_v48  ;;  %v6189_v10 = vcombine.high %v3316_v4, %v3324_v48  ;;  %v3358_v25 = vshrl.u32 %v6187_v7, 16 }
 0x7fe   : > { %v3829_v1 = vsel %vm1984_vm2, %v3366_v61, 0  ;;  %v6185_v8 = vpack.i.b16 %v3371_v35, %v3370_v2 }
 0x7ff   : > { %v3351_v54 = vpack.i.b16 %v3325_v49, %v3275_v5  ;;  %v3353_v55 = vshrl.u32 %v3325_v49, 16  ;;  %v3357_v11 = vpack.i.b16 %v6189_v10, %v6187_v7  ;;  %v3359_v9 = vshrl.u32 %v6189_v10, 16 }
 0x801   : > { %v3777_v57 = vsel %vm1984_vm2, %v3351_v54, 0  ;;  %v3354_v34 = vpack.i.b16 %v3353_v55, %v3352_v50  ;;  %v6195_v19 = vpack.i.b16 %v3359_v9, %v3358_v25 }
 0x802   : > { %5335 = vmatpush3.bf16.xpose.msra.mxu1 %v3777_v57 }
 0x803   : > { %v3826_v62 = vsel %vm1984_vm2, %v3354_v34, 0  ;;  %5336 = vmatprep.subr.bf16.mxu1 %v5579_v0 }
 0x804   : > { %5343 = vmatpush3.bf16.xpose.msra.mxu0 %v3826_v62 }
 0x805   : > { %5344 = vmatprep.subr.bf16.mxu0 %v5579_v0 }
 0x80a   : > { %5337 = vmatpush3.bf16.xpose.msra.mxu1 %v3780_v63 }
 0x80b   : > { %5350 = vmatprep.subr.bf16.mxu1 %v5579_v0 }
 0x80c   : > { %5345 = vmatpush3.bf16.xpose.msra.mxu0 %v3829_v1 }
 0x80d   : > { %5358 = vmatprep.subr.bf16.mxu0 %v5579_v0 }
 0x89e   : > { %v2719_v31 = vpop.f32.mrb[20].mxu1 }
 0x89f   : > { %v2720_v32 = vadd.f32 %v5128_v26, %v2719_v31  ;;  %v5324_v33 = vpop.f32.mrb[21].mxu1 }
 0x8a0   : > { %v2722_v13 = vpop.f32.mrb[22].mxu1 }
 0x8a1   : > { %v2725_v36 = vpack.c.bf16 %v2720_v32, %v2720_v32  ;;  %v5325_v39 = vpop.f32.mrb[23].mxu1 }
 0x8a3   : > { %2814 = vrot.lane.b32.xlu1 %v2725_v36, %s5582_s3  ;;  %2816 = vrot.lane.b32.xlu0 %v2725_v36, %s5584_s10  ;;  %v2826_v30 = vrot.slane %v2725_v36, %v5818_v24  ;;  %s6586_s10 = smov 24  }
 0x8a7   : > { %2818 = vrot.lane.b32.xlu1 %v2725_v36, %s5581_s30  ;;  %3377 = vrot.lane.b32.xlu0 %v6093_v21, %s5583_s6  ;;  %s1285_s30 = scalar_lea.vmem %s6536_s17, %s6602_s8 }
 0x8ab   : > { %3373 = vrot.lane.b32.xlu1 %v6055_v37, %s5583_s6 }
 0x8af   : > { %3381 = vrot.lane.b32.xlu1 %v6091_v17, %s5583_s6 }
 0x8b3   : > { %3385 = vrot.lane.b32.xlu1 %v6103_v27, %s5583_s6 }
 0x915   : > { %v2815_v40 = vpop.permute.xlu1 %2814  ;;  %v2817_v42 = vpop.permute.xlu0 %2816 }
 0x916   : > { %v2834_v43 = vrot.slane %v2817_v42, %v5818_v24  ;;  %v2860_v17 = vrot.slane %v2815_v40, %v5818_v24 }
 0x918   : > { %v2835_v16 = vcombine.low %v2826_v30, %v2834_v43  ;;  %v2836_v18 = vcombine.high %v2826_v30, %v2834_v43 }
 0x919   : > { %v2819_v14 = vpop.permute.xlu1 %2818  ;;  %v3378_v45 = vpop.permute.xlu0 %3377 }
 0x91a   : > { %v2843_v21 = vrot.slane %v2835_v16, %v5821_v28  ;;  %v2850_v22 = vrot.slane %v2836_v18, %v5821_v28  ;;  %v2868_v37 = vrot.slane %v2819_v14, %v5818_v24  ;;  %v3459_v20 = vcombine.high %v3378_v45, %v5587_v41 }
 0x91c   : > { %v2851_v27 = vcombine.high %v2843_v21, %v5587_v41  ;;  %v2852_v46 = vcombine.high %v2850_v22, %v5587_v41  ;;  %v2869_v47 = vcombine.low %v2860_v17, %v2868_v37  ;;  %v2870_v15 = vcombine.high %v2860_v17, %v2868_v37 }
 0x91d   : > { %v3374_v5 = vpop.permute.xlu1 %3373  ;;  %v2891_v23 = vshrl.u32 %v2843_v21, 16  ;;  %v2907_v48 = vshrl.u32 %v2850_v22, 16 }
 0x91e   : > { %v3393_v4 = vcombine.high %v3374_v5, %v5587_v41  ;;  %v2877_v49 = vrot.slane %v2869_v47, %v5821_v28  ;;  %v2884_v50 = vrot.slane %v2870_v15, %v5821_v28  ;;  %v2899_v51 = vshrl.u32 %v2851_v27, 16 }
 0x91f   : > { %v2915_v52 = vshrl.u32 %v2852_v46, 16  ;;  %v3400_v54 = vrot.slane %v3374_v5, %v5818_v24 }
 0x920   : > { %v3407_v55 = vrot.slane %v3393_v4, %v5818_v24  ;;  %v2885_v57 = vcombine.high %v2877_v49, %v5587_v41  ;;  %v2886_v34 = vcombine.high %v2884_v50, %v5587_v41  ;;  %v2889_v58 = vpack.i.b16 %v2877_v49, %v2843_v21 }
 0x921   : > { %v2892_v53 = vshrl.u32 %v2877_v49, 16  ;;  %v3382_v62 = vpop.permute.xlu1 %3381  ;;  %v2905_v60 = vpack.i.b16 %v2884_v50, %v2850_v22  ;;  %v2908_v61 = vshrl.u32 %v2884_v50, 16  ;;  %v3466_v49 = vrot.slane %v3378_v45, %v5818_v24 }
 0x922   : > { %v3408_v63 = vcombine.high %v3382_v62, %v5587_v41  ;;  %v3415_v1 = vrot.slane %v3382_v62, %v5818_v24  ;;  %v2897_v35 = vpack.i.b16 %v2885_v57, %v2851_v27  ;;  %v2900_v25 = vshrl.u32 %v2885_v57, 16 }
 0x923   : > { %v2893_v2 = vpack.i.b16 %v2892_v53, %v2891_v23  ;;  %v2913_v9 = vpack.i.b16 %v2886_v34, %v2852_v46  ;;  %v2909_v26 = vpack.i.b16 %v2908_v61, %v2907_v48  ;;  %v2916_v31 = vshrl.u32 %v2886_v34, 16 }
 0x924   : > { %v2919_v32 = vcombine.low %v2889_v58, %v2905_v60  ;;  %v3422_v33 = vrot.slane %v3408_v63, %v5818_v24  ;;  %v2901_v13 = vpack.i.b16 %v2900_v25, %v2899_v51  ;;  %v3423_v39 = vcombine.low %v3400_v54, %v3415_v1 }
 0x925   : > { %v2927_v36 = vcombine.low %v2897_v35, %v2913_v9  ;;  %v3424_v40 = vcombine.high %v3400_v54, %v3415_v1  ;;  %v3386_v42 = vpop.permute.xlu1 %3385  ;;  %v2917_v30 = vpack.i.b16 %v2916_v31, %v2915_v52  ;;  %v2944_v16 = vcombine.low %v2893_v2, %v2909_v26 }
 0x926   : > { %v2926_v43 = vrot.slane %v2919_v32, %v5818_v24  ;;  %v3439_v18 = vcombine.low %v3407_v55, %v3422_v33  ;;  %v6234_v21 = vrot.slane %v3423_v39, %v5821_v28  ;;  %v3440_v37 = vcombine.high %v3407_v55, %v3422_v33 }
 0x927   : > { %v2934_v14 = vrot.slane %v2927_v36, %v5818_v24  ;;  %v6237_v22 = vrot.slane %v3424_v40, %v5821_v28  ;;  %v2952_v17 = vcombine.low %v2901_v13, %v2917_v30  ;;  %v3474_v46 = vcombine.high %v3386_v42, %v5587_v41 }
 0x928   : > { %v6240_v27 = vrot.slane %v3439_v18, %v5821_v28  ;;  %v6244_v15 = vrot.slane %v3440_v37, %v5821_v28  ;;  %v6248_v5 = vcombine.high %v6234_v21, %v5587_v41  ;;  %v2951_v23 = vrot.slane %v2944_v16, %v5818_v24 }
 0x929   : > { %v2935_v47 = vcombine.low %v2926_v43, %v2934_v14  ;;  %v6252_v4 = vcombine.high %v6237_v22, %v5587_v41  ;;  %v2959_v48 = vrot.slane %v2952_v17, %v5818_v24  ;;  %v3551_v51 = vshrl.u32 %v6234_v21, 16 }
 0x92a   : > { %v6259_v50 = vcombine.high %v6240_v27, %v5587_v41  ;;  %v3473_v52 = vrot.slane %v3459_v20, %v5818_v24  ;;  %v3875_v54 = vsel %vm1984_vm2, %v3357_v11, 0  ;;  %v3458_v57 = vcombine.high %v6244_v15, %v5587_v41 }
 0x92b   : > { %v2960_v55 = vcombine.low %v2951_v23, %v2959_v48  ;;  %v3567_v34 = vshrl.u32 %v6237_v22, 16  ;;  %v3481_v45 = vrot.slane %v3386_v42, %v5818_v24  ;;  %v3559_v58 = vshrl.u32 %v6248_v5, 16 }
 0x92c   : > { %v3575_v53 = vshrl.u32 %v6252_v4, 16  ;;  %v3488_v62 = vrot.slane %v3474_v46, %v5818_v24  ;;  %v6275_v20 = vrot.slane %v2935_v47, %v5821_v28  ;;  %v3583_v7 = vshrl.u32 %v6240_v27, 16 }
 0x92d   : > { %v3489_v10 = vcombine.low %v3466_v49, %v3481_v45  ;;  %v3490_v11 = vcombine.high %v3466_v49, %v3481_v45  ;;  %v2967_v60 = vrot.slane %v2960_v55, %v5821_v28  ;;  %v3591_v61 = vshrl.u32 %v6259_v50, 16 }
 0x92e   : > { %v3599_v63 = vshrl.u32 %v6244_v15, 16  ;;  %v3505_v1 = vcombine.low %v3473_v52, %v3488_v62  ;;  %v3506_v2 = vcombine.high %v3473_v52, %v3488_v62  ;;  %v3607_v35 = vshrl.u32 %v3458_v57, 16 }
 0x92f   : > { %v3497_v25 = vrot.slane %v3489_v10, %v5821_v28  ;;  %v3504_v9 = vrot.slane %v3490_v11, %v5821_v28  ;;  %v2971_v26 = vpack.i.b16 %v2967_v60, %v6275_v20  ;;  %v2972_v33 = vshrl.u32 %v6275_v20, 16 }
 0x930   : > { %v3513_v31 = vrot.slane %v3505_v1, %v5821_v28  ;;  %v3520_v32 = vrot.slane %v3506_v2, %v5821_v28  ;;  %v2973_v13 = vshrl.u32 %v2967_v60, 16 }
 0x931   : > { %v3521_v36 = vcombine.high %v3497_v25, %v5587_v41  ;;  %v3522_v39 = vcombine.high %v3504_v9, %v5587_v41  ;;  %v3549_v40 = vpack.i.b16 %v3497_v25, %v6234_v21  ;;  %v3552_v42 = vshrl.u32 %v3497_v25, 16  ;;  %5339 = vmatmul.mubr.msk.bf16.vlgmr.msra.gmra.mrb[24].mxu1 %vm1984_vm2, %v2971_v26 }
 0x932   : > { %v3523_v30 = vcombine.high %v3513_v31, %v5587_v41  ;;  %v3524_v43 = vcombine.high %v3520_v32, %v5587_v41  ;;  %v3565_v16 = vpack.i.b16 %v3504_v9, %v6237_v22  ;;  %v3568_v18 = vshrl.u32 %v3504_v9, 16  ;;  %5351 = vmatpush3.bf16.xpose.msra.mxu1 %v3875_v54  ;;  %5354 = vmatprep.mubr.msk.bf16.mxu1 %vm5580_vm0, %v5579_v0 }
 0x933   : > { %v3553_v14 = vpack.i.b16 %v3552_v42, %v3551_v51  ;;  %v3557_v37 = vpack.i.b16 %v3521_v36, %v6248_v5  ;;  %v3560_v17 = vshrl.u32 %v3521_v36, 16  ;;  %v3573_v21 = vpack.i.b16 %v3522_v39, %v6252_v4  ;;  %5352 = vmatprep.subr.bf16.mxu1 %v5579_v0 }
 0x934   : > { %v3569_v46 = vpack.i.b16 %v3568_v18, %v3567_v34  ;;  %v3576_v47 = vshrl.u32 %v3522_v39, 16  ;;  %v3581_v23 = vpack.i.b16 %v3513_v31, %v6240_v27  ;;  %v3584_v48 = vshrl.u32 %v3513_v31, 16 }
 0x935   : > { %v3561_v49 = vpack.i.b16 %v3560_v17, %v3559_v58  ;;  %v3589_v22 = vpack.i.b16 %v3523_v30, %v6259_v50  ;;  %v3592_v52 = vshrl.u32 %v3523_v30, 16  ;;  %v3597_v54 = vpack.i.b16 %v3520_v32, %v6244_v15 }
 0x936   : > { %v3577_v55 = vpack.i.b16 %v3576_v47, %v3575_v53  ;;  %v3585_v51 = vpack.i.b16 %v3584_v48, %v3583_v7  ;;  %v3600_v45 = vshrl.u32 %v3520_v32, 16  ;;  %v3605_v5 = vpack.i.b16 %v3524_v43, %v3458_v57 }
 0x937   : > { %v3593_v62 = vpack.i.b16 %v3592_v52, %v3591_v61  ;;  %v3608_v10 = vshrl.u32 %v3524_v43, 16  ;;  %v3623_v4 = vcombine.low %v3549_v40, %v3565_v16  ;;  %v3631_v11 = vcombine.low %v3557_v37, %v3573_v21 }
 0x938   : > { %v3601_v1 = vpack.i.b16 %v3600_v45, %v3599_v63  ;;  %v3639_v34 = vcombine.low %v3581_v23, %v3597_v54  ;;  %v3647_v2 = vcombine.low %v3589_v22, %v3605_v5  ;;  %v3673_v25 = vcombine.low %v3553_v14, %v3569_v46 }
 0x939   : > { %v3609_v27 = vpack.i.b16 %v3608_v10, %v3607_v35  ;;  %v3681_v9 = vcombine.low %v3561_v49, %v3577_v55  ;;  %v2974_v58 = vpack.i.b16 %v2973_v13, %v2972_v33  ;;  %v3878_v15 = vsel %vm1984_vm2, %v3369_v6, 0 }
 0x93a   : > { %v3630_v50 = vrot.slane %v3623_v4, %v5818_v24  ;;  %v3689_v53 = vcombine.low %v3585_v51, %v3601_v1  ;;  %5353 = vmatpush3.bf16.xpose.msra.mxu1 %v3878_v15  ;;  %v2968_v57 = vcombine.high %v2967_v60, %v5587_v41  ;;  %v3638_v7 = vrot.slane %v3631_v11, %v5818_v24 }
 0x93b   : > { %5347 = vmatmul.mubr.msk.bf16.vlgmr.msra.gmra.mrb[28].mxu0 %vm1984_vm2, %v2974_v58  ;;  %v3924_v61 = vsel %vm1984_vm2, %v6195_v19, 0  ;;  %5366 = vmatprep.subr.bf16.mxu1 %v5579_v0  ;;  %v3646_v63 = vrot.slane %v3639_v34, %v5818_v24  ;;  %v3654_v59 = vrot.slane %v3647_v2, %v5818_v24  ;;  %v3688_v3 = vrot.slane %v3681_v9, %v5818_v24 }
 0x93c   : > { %5359 = vmatpush3.bf16.xpose.msra.mxu0 %v3924_v61  ;;  %5362 = vmatprep.mubr.msk.bf16.mxu0 %vm5580_vm0, %v5579_v0  ;;  %v3655_v6 = vcombine.low %v3630_v50, %v3638_v7  ;;  %v3680_v60 = vrot.slane %v3673_v25, %v5818_v24  ;;  %v3697_v35 = vcombine.low %v3593_v62, %v3609_v27  ;;  %v3927_v16 = vsel %vm1984_vm2, %v6185_v8, 0 }
 0x93d   : > { %5360 = vmatprep.subr.bf16.mxu0 %v5579_v0  ;;  %v2943_v19 = vcombine.high %v6275_v20, %v5587_v41  ;;  %v3663_v26 = vcombine.low %v3646_v63, %v3654_v59  ;;  %v3696_v31 = vrot.slane %v3689_v53, %v5818_v24  ;;  %v2979_v37 = vshrl.u32 %v2968_v57, 16 }
 0x93e   : > { %v3704_v32 = vrot.slane %v3697_v35, %v5818_v24  ;;  %v3705_v33 = vcombine.low %v3680_v60, %v3688_v3  ;;  %v3662_v36 = vrot.slane %v3655_v6, %v5821_v28 }
 0x93f   : > { %v2977_v13 = vpack.i.b16 %v2968_v57, %v2943_v19  ;;  %v3670_v39 = vrot.slane %v3663_v26, %v5821_v28  ;;  %v2978_v49 = vshrl.u32 %v2943_v19, 16 }
 0x940   : > { %v3713_v40 = vcombine.low %v3696_v31, %v3704_v32  ;;  %v3712_v43 = vrot.slane %v3705_v33, %v5821_v28 }
 0x941   : > { %5355 = vmatmul.mubr.msk.bf16.vlgmr.msra.gmra.mrb[28].mxu1 %vm1984_vm2, %v2977_v13  ;;  %v3671_v42 = vcombine.low %v3662_v36, %v3670_v39  ;;  %v6327_v30 = vcombine.high %v3662_v36, %v3670_v39  ;;  %v2980_v52 = vpack.i.b16 %v2979_v37, %v2978_v49 }
 0x942   : > { %v3720_v20 = vrot.slane %v3713_v40, %v5821_v28  ;;  %5370 = vmatprep.mubr.msk.bf16.mxu1 %vm5580_vm0, %v5579_v0 }
 0x943   : > { %v3749_v17 = vshrl.u32 %v3671_v42, 16  ;;  %v3757_v21 = vshrl.u32 %v6327_v30, 16 }
 0x944   : > { %5361 = vmatpush3.bf16.xpose.msra.mxu0 %v3927_v16  ;;  %v3721_v18 = vcombine.low %v3712_v43, %v3720_v20  ;;  %v6335_v14 = vcombine.high %v3712_v43, %v3720_v20 }
 0x945   : > { %5374 = vmatprep.subr.bf16.mxu0 %v5579_v0 }
 0x946   : > { %v3747_v46 = vpack.i.b16 %v3721_v18, %v3671_v42  ;;  %v3750_v47 = vshrl.u32 %v3721_v18, 16  ;;  %v3755_v23 = vpack.i.b16 %v6335_v14, %v6327_v30  ;;  %v3758_v48 = vshrl.u32 %v6335_v14, 16 }
 0x948   : > { %5367 = vmatpush3.bf16.msra.mxu1 %v3747_v46  ;;  %v3751_v8 = vpack.i.b16 %v3750_v47, %v3749_v17  ;;  %v6342_v22 = vpack.i.b16 %v3758_v48, %v3757_v21 }
 0x949   : > { %5368 = vmatprep.subr.bf16.mxu1 %v5579_v0 }
 0x94b   : > { %5363 = vmatmul.mubr.msk.bf16.vlgmr.msra.gmra.mrb[32].mxu0 %vm1984_vm2, %v2980_v52 }
 0x94c   : > { %5375 = vmatpush3.bf16.msra.mxu0 %v3751_v8  ;;  %5378 = vmatprep.mubr.msk.bf16.mxu0 %vm5580_vm0, %v5579_v0 }
 0x94d   : > { %5376 = vmatprep.subr.bf16.mxu0 %v5579_v0 }
 0xa04   : > { %v3816_v54 = vpop.f32.mrb[24].mxu1 }
 0xa05   : > { %v3969_v55 = vmul.f32 0.35355338, %v3816_v54  ;;  %v5340_v51 = vpop.f32.mrb[25].mxu1 }
 0xa06   : > { %v3819_v45 = vpop.f32.mrb[26].mxu1 }
 0xa07   : > { %v5341_v5 = vpop.f32.mrb[27].mxu1  ;;  %v3974_v62 = vsel %vm3973_vm6, %v3969_v55, -inf }
 0xa08   : > { %3975 = vmax.xlane.f32.xlu0 %v3974_v62 }
 0xa0e   : > { %v3865_v10 = vpop.f32.mrb[28].mxu0 }
 0xa0f   : > { %v3970_v4 = vmul.f32 0.35355338, %v3865_v10  ;;  %v5348_v11 = vpop.f32.mrb[29].mxu0 }
 0xa10   : > { %v3868_v1 = vpop.f32.mrb[30].mxu0 }
 0xa11   : > { %v5349_v34 = vpop.f32.mrb[31].mxu0  ;;  %v3977_v2 = vsel %vm3973_vm6, %v3970_v4, -inf }
 0xa12   : > { %3978 = vmax.xlane.f32.xlu1 %v3977_v2 }
 0xa14   : > { %v3914_v25 = vpop.f32.mrb[28].mxu1 }
 0xa15   : > { %v3971_v27 = vmul.f32 0.35355338, %v3914_v25  ;;  %v5356_v9 = vpop.f32.mrb[29].mxu1 }
 0xa16   : > { %v3917_v58 = vpop.f32.mrb[30].mxu1 }
 0xa17   : > { %v5357_v15 = vpop.f32.mrb[31].mxu1  ;;  %v3980_v50 = vsel %vm3973_vm6, %v3971_v27, -inf }
 0xa18   : > { %3981 = vmax.xlane.f32.xlu0 %v3980_v50 }
 0xa1e   : > { %v3963_v53 = vpop.f32.mrb[32].mxu0 }
 0xa1f   : > { %v3972_v57 = vmul.f32 0.35355338, %v3963_v53  ;;  %v5364_v7 = vpop.f32.mrb[33].mxu0 }
 0xa20   : > { %v3966_v61 = vpop.f32.mrb[34].mxu0 }
 0xa21   : > { %v5365_v63 = vpop.f32.mrb[35].mxu0  ;;  %v3983_v59 = vsel %vm3973_vm6, %v3972_v57, -inf }
 0xa22   : > { %3984 = vmax.xlane.f32.xlu0 %v3983_v59 }
 0xa23   : > { %3379 = vrot.lane.b32.xlu1 %v6109_v56, %s5583_s6 }
 0xa38   : > { %3375 = vrot.lane.b32.xlu0 %v6057_v38, %s5583_s6 }
 0xa95   : > { %v3976_v3 = vpop.xlane.xlu0 %3975 }
 0xa96   : > { %v3986_v6 = vsub.f32 %v3969_v55, %v3976_v3 }
 0xa98   : > { %v3990_v60 = vmul.f32 1.442695, %v3986_v6 }
 0xa9a   : > { %5517 = vpow2.f32 %v3990_v60 }
 0xa9f   : > { %v3979_v35 = vpop.xlane.xlu1 %3978 }
 0xaa0   : > { %v3987_v19 = vsub.f32 %v3970_v4, %v3979_v35 }
 0xaa2   : > { %v3992_v26 = vmul.f32 1.442695, %v3987_v19 }
 0xaa3   : > { %v3380_v37 = vpop.permute.xlu1 %3379 }
 0xaa4   : > { %v5518_v31 = vpop.eup %5517  ;;  %5519 = vpow2.f32 %v3992_v26 }
 0xaa5   : > { %v3998_v32 = vsel %vm3973_vm6, %v5518_v31, 0.0  ;;  %v3982_v38 = vpop.xlane.xlu0 %3981 }
 0xaa6   : > { %3999 = vadd.xlane.f32.xlu0 %v3998_v32  ;;  %v3988_v56 = vsub.f32 %v3971_v27, %v3982_v38 }
 0xaa8   : > { %v3994_v36 = vmul.f32 1.442695, %v3988_v56 }
 0xaaa   : > { %5521 = vpow2.f32 %v3994_v36 }
 0xaae   : > { %v5520_v33 = vpop.eup %5519 }
 0xaaf   : > { %v4001_v13 = vsel %vm3973_vm6, %v5520_v33, 0.0  ;;  %v3985_v39 = vpop.xlane.xlu0 %3984 }
 0xab0   : > { %4002 = vadd.xlane.f32.xlu1 %v4001_v13  ;;  %v3989_v40 = vsub.f32 %v3972_v57, %v3985_v39 }
 0xab2   : > { %v3996_v42 = vmul.f32 1.442695, %v3989_v40 }
 0xab4   : > { %v6363_v43 = vpop.eup %5521  ;;  %5523 = vpow2.f32 %v3996_v42 }
 0xab5   : > { %v4004_v20 = vsel %vm3973_vm6, %v6363_v43, 0.0 }
 0xabc   : > { %3383 = vrot.lane.b32.xlu0 %v6131_v12, %s5583_s6 }
 0xabe   : > { %v6367_v16 = vpop.eup %5523 }
 0xabf   : > { %v4007_v12 = vsel %vm3973_vm6, %v6367_v16, 0.0 }
 0xac1   : > { %3387 = vrot.lane.b32.xlu1 %v6134_v29, %s5583_s6  ;;  %v3376_v29 = vpop.permute.xlu0 %3375  ;;  %s1279_s6 = scalar_lea.vmem %s6534_s15, %s5777_s0 }
 0xadb   : > { %4005 = vadd.xlane.f32.xlu0 %v4004_v20 }
 0xae5   : > { %4008 = vadd.xlane.f32.xlu1 %v4007_v12 }
 0xb33   : > { %v4000_v18 = vpop.xlane.xlu0 %3999 }
 0xb34   : > { %5525 = vrcp.f32 %v4000_v18 }
 0xb37   : > { %v3384_v17 = vpop.permute.xlu0 %3383 }
 0xb38   : > { %v3527_v21 = vcombine.low %v3376_v29, %v3384_v17 }
 0xb3a   : > { %v3534_v47 = vrot.slane %v3527_v21, %v5821_v28 }
 0xb3c   : > { %v3535_v8 = vcombine.high %v3534_v47, %v5587_v41  ;;  %v3614_v51 = vshrl.u32 %v3534_v47, 16 }
 0xb3d   : > { %v4003_v46 = vpop.xlane.xlu1 %4002 }
 0xb3e   : > { %5527 = vrcp.f32 %v4003_v46  ;;  %v3620_v45 = vshrl.u32 %v3535_v8, 16  ;;  %v5526_v34 = vpop.eup %5525 }
 0xb3f   : > { %v4014_v58 = vmul.f32 %v5526_v34, %v5518_v31 }
 0xb41   : > { %v3388_v48 = vpop.permute.xlu1 %3387  ;;  %v4018_v6 = vpack.c.bf16 %v4014_v58, %v4014_v58 }
 0xb42   : > { %v3538_v49 = vcombine.low %v3380_v37, %v3388_v48 }
 0xb44   : > { %v3545_v52 = vrot.slane %v3538_v49, %v5821_v28 }
 0xb46   : > { %v3546_v54 = vcombine.high %v3545_v52, %v5587_v41  ;;  %v3615_v55 = vshrl.u32 %v3545_v52, 16  ;;  %v3613_v5 = vpack.i.b16 %v3545_v52, %v3534_v47 }
 0xb48   : > { %v3619_v62 = vpack.i.b16 %v3546_v54, %v3535_v8  ;;  %v3621_v10 = vshrl.u32 %v3546_v54, 16  ;;  %v3616_v4 = vpack.i.b16 %v3615_v55, %v3614_v51  ;;  %v5528_v9 = vpop.eup %5527 }
 0xb49   : > { %v4015_v7 = vmul.f32 %v5528_v9, %v5520_v33 }
 0xb4a   : > { %v3622_v11 = vpack.i.b16 %v3621_v10, %v3620_v45  ;;  %v3725_v1 = vcombine.low %v3613_v5, %v3619_v62 }
 0xb4b   : > { %v4019_v35 = vpack.c.bf16 %v4015_v7, %v4015_v7 }
 0xb4c   : > { %v3736_v2 = vcombine.low %v3616_v4, %v3622_v11  ;;  %v3732_v25 = vrot.slane %v3725_v1, %v5821_v28  ;;  %v5491_v1 = vld [vmem:[%s1279_s6] sm:$0xff]  }
 0xb4e   : > { %v3743_v27 = vrot.slane %v3736_v2, %v5821_v28  ;;  %v3764_v50 = vshrl.u32 %v3732_v25, 16  ;;  %v3733_v59 = vcombine.high %v3732_v25, %v5587_v41 }
 0xb50   : > { %v3763_v15 = vpack.i.b16 %v3743_v27, %v3732_v25  ;;  %v3765_v53 = vshrl.u32 %v3743_v27, 16  ;;  %v3744_v57 = vcombine.high %v3743_v27, %v5587_v41  ;;  %v3770_v26 = vshrl.u32 %v3733_v59, 16 }
 0xb52   : > { %v4027_v61 = vsel %vm4025_vm7, %v3763_v15, 0  ;;  %v3766_v63 = vpack.i.b16 %v3765_v53, %v3764_v50  ;;  %v3771_v60 = vshrl.u32 %v3744_v57, 16  ;;  %v3769_v19 = vpack.i.b16 %v3744_v57, %v3733_v59  ;;  %v5492_v53 = vld [vmem:[%s1279_s6 + $0x8] sm:$0xff]   ;;  %s1324_s6 = scalar_lea.vmem %s6546_s27, %s5785_s4 }
 0xb53   : > { %5369 = vmatpush3.bf16.msra.mxu1 %v4027_v61 }
 0xb54   : > { %v4073_v3 = vsel %vm4025_vm7, %v3766_v63, 0  ;;  %5382 = vmatprep.subr.bf16.mxu1 %v5579_v0  ;;  %v3772_v41 = vpack.i.b16 %v3771_v60, %v3770_v26  ;;  %v4119_v31 = vsel %vm4025_vm7, %v3769_v19, 0 }
 0xb55   : > { %5377 = vmatpush3.bf16.msra.mxu0 %v4073_v3 }
 0xb56   : > { %5371 = vmatmul.mubr.msk.bf16.vlgmr.msra.gmra.mrb[32].mxu1 %vm3973_vm6, %v4018_v6  ;;  %5390 = vmatprep.subr.bf16.mxu0 %v5579_v0  ;;  %v4165_v30 = vsel %vm4025_vm7, %v3772_v41, 0 }
 0xb57   : > { %5383 = vmatpush3.bf16.msra.mxu1 %v3755_v23  ;;  %5386 = vmatprep.mubr.msk.bf16.mxu1 %vm5580_vm0, %v5579_v0 }
 0xb58   : > { %5379 = vmatmul.mubr.msk.bf16.vlgmr.msra.gmra.mrb[36].mxu0 %vm3973_vm6, %v4019_v35  ;;  %5384 = vmatprep.subr.bf16.mxu1 %v5579_v0 }
 0xb59   : > { %5391 = vmatpush3.bf16.msra.mxu0 %v6342_v22  ;;  %5394 = vmatprep.mubr.msk.bf16.mxu0 %vm5580_vm0, %v5579_v0 }
 0xb5a   : > { %5392 = vmatprep.subr.bf16.mxu0 %v5579_v0 }
 0xb5b   : > { %5385 = vmatpush3.bf16.msra.mxu1 %v4119_v31 }
 0xb5c   : > { %5398 = vmatprep.subr.bf16.mxu1 %v5579_v0 }
 0xb5d   : > { %5393 = vmatpush3.bf16.msra.mxu0 %v4165_v30 }
 0xb5e   : > { %5406 = vmatprep.subr.bf16.mxu0 %v5579_v0 }
 0xb68   : > { %v4006_v14 = vpop.xlane.xlu0 %4005 }
 0xb69   : > { %5529 = vrcp.f32 %v4006_v14 }
 0xb72   : > { %v4009_v23 = vpop.xlane.xlu1 %4008 }
 0xb73   : > { %v5530_v32 = vpop.eup %5529  ;;  %5531 = vrcp.f32 %v4009_v23 }
 0xb74   : > { %v4016_v22 = vmul.f32 %v5530_v32, %v6363_v43 }
 0xb76   : > { %v4020_v33 = vpack.c.bf16 %v4016_v22, %v4016_v22 }
 0xb78   : > { %5387 = vmatmul.mubr.msk.bf16.vlgmr.msra.gmra.mrb[36].mxu1 %vm3973_vm6, %v4020_v33 }
 0xb79   : > { %5402 = vmatprep.mubr.msk.bf16.mxu1 %vm5580_vm0, %v5579_v0  ;;  %5399 = vmatpush3.bf16.msra.mxu1 %v5491_v1 }
 0xb7a   : > { %5400 = vmatprep.subr.bf16.mxu1 %v5579_v0 }
 0xb7d   : > { %v5532_v13 = vpop.eup %5531  ;;  %5401 = vmatpush3.bf16.msra.mxu1 %v5492_v53 }
 0xb7e   : > { %v4017_v38 = vmul.f32 %v5532_v13, %v6367_v16  ;;  %5414 = vmatprep.subr.bf16.mxu1 %v5579_v0 }
 0xb80   : > { %v4021_v56 = vpack.c.bf16 %v4017_v38, %v4017_v38 }
 0xb82   : > { %5395 = vmatmul.mubr.msk.bf16.vlgmr.msra.gmra.mrb[40].mxu0 %vm3973_vm6, %v4021_v56 }
 0xb83   : > { %5410 = vmatprep.mubr.msk.bf16.mxu0 %vm5580_vm0, %v5579_v0 }
 0xc29   : > { %v4063_v36 = vpop.f32.mrb[32].mxu1 }
 0xc2a   : > { %v5372_v39 = vpop.f32.mrb[33].mxu1 }
 0xc2b   : > { %v4066_v40 = vpop.f32.mrb[34].mxu1  ;;  %v4109_v42 = vpop.f32.mrb[36].mxu0 }
 0xc2c   : > { %v5373_v43 = vpop.f32.mrb[35].mxu1  ;;  %v5380_v20 = vpop.f32.mrb[37].mxu0 }
 0xc2d   : > { %v4112_v12 = vpop.f32.mrb[38].mxu0 }
 0xc2e   : > { %v5381_v29 = vpop.f32.mrb[39].mxu0 }
 0xc4b   : > { %v4155_v18 = vpop.f32.mrb[36].mxu1 }
 0xc4c   : > { %v4207_v37 = vcombine.low %v4063_v36, %v4155_v18  ;;  %v4208_v17 = vcombine.high %v4063_v36, %v4155_v18  ;;  %v5388_v21 = vpop.f32.mrb[37].mxu1 }
 0xc4d   : > { %v4158_v46 = vpop.f32.mrb[38].mxu1 }
 0xc4e   : > { %v5389_v16 = vpop.f32.mrb[39].mxu1  ;;  %v4215_v54 = vrot.slane %v4207_v37, %v5818_v24  ;;  %v4222_v55 = vrot.slane %v4208_v17, %v5818_v24  ;;  %v5493_v46 = vld [vmem:[%s1293_s29] sm:$0xff]  }
 0xc4f   : > { %5407 = vmatpush3.bf16.msra.mxu0 %v5493_v46  ;;  %v5494_v16 = vld [vmem:[%s1293_s29 + $0x8] sm:$0xff]   ;;  %s1304_s29 = scalar_lea.vmem %s6541_s22, %s6602_s8 }
 0xc50   : > { %5408 = vmatprep.subr.bf16.mxu0 %v5579_v0 }
 0xc53   : > { %5409 = vmatpush3.bf16.msra.mxu0 %v5494_v16 }
 0xc55   : > { %v4201_v47 = vpop.f32.mrb[40].mxu0 }
 0xc56   : > { %v4223_v48 = vcombine.low %v4109_v42, %v4201_v47  ;;  %v4224_v49 = vcombine.high %v4109_v42, %v4201_v47  ;;  %v5396_v8 = vpop.f32.mrb[41].mxu0  ;;  %v5496_v47 = vld [vmem:[%s1301_s28 + $0x8] sm:$0xff]  }
 0xc57   : > { %v4204_v52 = vpop.f32.mrb[42].mxu0 }
 0xc58   : > { %v4231_v51 = vrot.slane %v4223_v48, %v5818_v24  ;;  %v4238_v45 = vrot.slane %v4224_v49, %v5818_v24  ;;  %v5397_v5 = vpop.f32.mrb[43].mxu0 }
 0xc5a   : > { %v4239_v62 = vcombine.low %v4215_v54, %v4231_v51  ;;  %v4240_v10 = vcombine.high %v4215_v54, %v4231_v51  ;;  %v4255_v4 = vcombine.low %v4222_v55, %v4238_v45  ;;  %v4256_v11 = vcombine.high %v4222_v55, %v4238_v45  ;;  %v5153_v54 = vld [vmem:[%s1285_s30] ss:$0 sm:$0xff] }
 0xc5c   : > { %v4247_v34 = vrot.slane %v4239_v62, %v5821_v28  ;;  %v4254_v2 = vrot.slane %v4240_v10, %v5821_v28  ;;  %v4263_v25 = vrot.slane %v4255_v4, %v5821_v28  ;;  %v4270_v27 = vrot.slane %v4256_v11, %v5821_v28  ;;  %v5497_v10 = vld [vmem:[%s1301_s28 + $0x10] sm:$0xff]   ;;  %v5498_v4 = vld [vmem:[%s1301_s28 + $0x18] sm:$0xff]  }
 0xc5e   : > { %v4275_v9 = vcombine.low %v4247_v34, %v4254_v2  ;;  %v5147_v58 = vcombine.high %v4247_v34, %v4254_v2  ;;  %v4291_v15 = vcombine.low %v4263_v25, %v4270_v27  ;;  %v5148_v50 = vcombine.high %v4263_v25, %v4270_v27 }
 0xc60   : > { %v4282_v57 = vrot.slane %v4275_v9, %v5818_v24  ;;  %v4290_v7 = vrot.slane %v5147_v58, %v5818_v24  ;;  %v4298_v61 = vrot.slane %v4291_v15, %v5818_v24  ;;  %v4306_v63 = vrot.slane %v5148_v50, %v5818_v24 }
 0xc62   : > { %v4308_v59 = vcombine.high %v4282_v57, %v4290_v7  ;;  %v4324_v3 = vcombine.high %v4298_v61, %v4306_v63  ;;  %v4307_v6 = vcombine.low %v4282_v57, %v4290_v7  ;;  %v4323_v60 = vcombine.low %v4298_v61, %v4306_v63 }
 0xc64   : > { %v4322_v35 = vrot.slane %v4308_v59, %v5821_v28  ;;  %v4338_v19 = vrot.slane %v4324_v3, %v5821_v28  ;;  %v4315_v26 = vrot.slane %v4307_v6, %v5821_v28  ;;  %v4331_v41 = vrot.slane %v4323_v60, %v5821_v28 }
 0xc66   : > { %v4341_v31 = vcombine.low %v4322_v35, %v4338_v19  ;;  %v4340_v30 = vcombine.high %v4315_v26, %v4331_v41  ;;  %v4342_v14 = vcombine.high %v4322_v35, %v4338_v19  ;;  %v4339_v24 = vcombine.low %v4315_v26, %v4331_v41 }
 0xc68   : > { %4348 = vrot.lane.b32.xlu1 %v4341_v31, %s5588_s2  ;;  %4344 = vrot.lane.b32.xlu0 %v4340_v30, %s5589_s7  ;;  %s1282_s7 = scalar_lea.vmem %s6535_s16, %s6602_s8  ;;  %v5165_v30 = vld [vmem:[%s1307_s26] ss:$0 sm:$0xff] }
 0xc69   : > { %v5149_v56 = vld [vmem:[%s1282_s7] ss:$0 sm:$0xff]  ;;  %s1296_s7 = scalar_lea.vmem %s6539_s20, %s6602_s8 }
 0xc6a   : > { %v5155_v11 = vld [vmem:[%s1296_s7] ss:$0 sm:$0xff]  ;;  %s1313_s7 = scalar_lea.vmem %s6587_s9, %s6602_s8 }
 0xc6c   : > { %4352 = vrot.lane.b32.xlu0 %v4342_v14, %s6586_s10  ;;  %s1288_s10 = scalar_lea.vmem %s6537_s18, %s6602_s8 }
 0xc6d   : > { %v5154_v51 = vld [vmem:[%s1288_s10] ss:$0 sm:$0xff] }
 0xcda   : > { %v4345_v23 = vpop.permute.xlu0 %4344  ;;  %v4349_v32 = vpop.permute.xlu1 %4348 }
 0xcdb   : > { %v4355_v22 = vsel %vm1984_vm2, %v4339_v24, %v4345_v23  ;;  %v5166_v24 = vld [vmem:[%s1310_s5] ss:$0 sm:$0xff] }
 0xcdc   : > { %v4356_v13 = vsel %vm2555_vm4, %v4355_v22, %v4349_v32 }
 0xcde   : > { %v4353_v33 = vpop.permute.xlu0 %4352 }
 0xcdf   : > { %v4357_v28 = vsel %vm2557_vm5, %v4356_v13, %v4353_v33 }
 0xce0   : > { %v4362_v38 = vpack.c.bf16 %v4357_v28, %v4357_v28 }
 0xce2   : > { %5403 = vmatmul.mubr.msk.bf16.vlgmr.msra.gmra.mrb[40].mxu1 %vm1366_vm1, %v4362_v38 }
 0xce3   : > { %5422 = vmatprep.mubr.msk.bf16.mxu1 %vm5580_vm0, %v5579_v0 }
 0xdb5   : > { %v4419_v36 = vpop.f32.mrb[40].mxu1 }
 0xdb6   : > { %v4420_v39 = vadd.f32 %v5149_v56, %v4419_v36  ;;  %v5404_v40 = vpop.f32.mrb[41].mxu1 }
 0xdb7   : > { %v4422_v42 = vpop.f32.mrb[42].mxu1 }
 0xdb8   : > { %v5405_v43 = vpop.f32.mrb[43].mxu1  ;;  %v4425_v20 = vadd.f32 %v4420_v39, %v6079_v44  ;;  %v5495_v44 = vld [vmem:[%s1301_s28] sm:$0xff]   ;;  %s6589_s28 = sld [smem:[#allocation22_spill]] }
 0xdb9   : > { %5415 = vmatpush3.bf16.msra.mxu1 %v5495_v44 }
 0xdba   : > { %v4428_v12 = vsel %vm1366_vm1, %v4425_v20, 0.0  ;;  %5416 = vmatprep.subr.bf16.mxu1 %v5579_v0 }
 0xdbb   : > { %4429 = vadd.xlane.f32.xlu1 %v4428_v12 }
 0xdbd   : > { %5417 = vmatpush3.bf16.msra.mxu1 %v5496_v47 }
 0xdbe   : > { %5418 = vmatprep.subr.bf16.mxu1 %v5579_v0  ;;  %s1332_s0 = scalar_lea.vmem %s6589_s28, %s5785_s4 }
 0xdc1   : > { %5419 = vmatpush3.bf16.msra.mxu1 %v5497_v10 }
 0xdc2   : > { %5420 = vmatprep.subr.bf16.mxu1 %v5579_v0  ;;  %v5159_v0 = vld [vmem:[%s1304_s29] ss:$0 sm:$0xff]  ;;  %s6588_s29 = sld [smem:[#allocation21_spill]] }
 0xdc5   : > { %5421 = vmatpush3.bf16.msra.mxu1 %v5498_v4 }
 0xdc8   : > { %s1316_s1 = scalar_lea.vmem %s6588_s29, %s6602_s8 }
 0xe48   : > { %v4430_v29 = vpop.xlane.xlu1 %4429 }
 0xe49   : > { %v4431_v18 = vmul.f32 0.03125, %v4430_v29  ;;  %v5168_v29 = vld [vmem:[%s1316_s1] ss:$0 sm:$0xff] }
 0xe4b   : > { %v4432_v37 = vsub.f32 %v4425_v20, %v4431_v18  ;;  %v5167_v20 = vld [vmem:[%s1313_s7] ss:$0 sm:$0xff] }
 0xe4d   : > { %v4433_v17 = vmul.f32 %v4432_v37, %v4432_v37 }
 0xe4f   : > { %v4434_v21 = vsel %vm1366_vm1, %v4433_v17, 0.0 }
 0xe50   : > { %4435 = vadd.xlane.f32.xlu0 %v4434_v21 }
 0xedd   : > { %v4436_v48 = vpop.xlane.xlu0 %4435 }
 0xede   : > { %v4437_v49 = vmul.f32 0.03125, %v4436_v48 }
 0xee0   : > { %v4438_v8 = vadd.f32 1e-05, %v4437_v49 }
 0xee2   : > { %5533 = vrsqrt.f32 %v4438_v8 }
 0xeec   : > { %v5534_v52 = vpop.eup %5533 }
 0xeed   : > { %v4440_v55 = vmul.f32 %v5534_v52, %v4432_v37 }
 0xeef   : > { %v4447_v45 = vmul.f32 %v5153_v54, %v4440_v55 }
 0xef1   : > { %v4454_v5 = vadd.f32 %v5154_v51, %v4447_v45 }
 0xef3   : > { %v4459_v62 = vpack.c.bf16 %v4454_v5, %v4454_v5 }
 0xef5   : > { %5411 = vmatmul.mubr.msk.bf16.vlgmr.msra.gmra.mrb[44].mxu0 %vm1366_vm1, %v4459_v62 }
 0xfc8   : > { %v4516_v1 = vpop.f32.mrb[44].mxu0 }
 0xfc9   : > { %v4517_v34 = vadd.f32 %v5155_v11, %v4516_v1  ;;  %v5412_v2 = vpop.f32.mrb[45].mxu0 }
 0xfca   : > { %v4519_v25 = vpop.f32.mrb[46].mxu0 }
 0xfcb   : > { %v4522_v27 = vmax.f32 %v4517_v34, 0.0  ;;  %v5413_v9 = vpop.f32.mrb[47].mxu0 }
 0xfcd   : > { %v4531_v58 = vpack.c.bf16 %v4522_v27, %v4522_v27 }
 0xfcf   : > { %5423 = vmatmul.mubr.msk.bf16.vlgmr.msra.gmra.mrb[44].mxu1 %vm4563_vm8, %v4531_v58 }
0x10a2   : > { %v4601_v15 = vpop.f32.mrb[44].mxu1 }
0x10a3   : > { %v4602_v50 = vadd.f32 %v5159_v0, %v4601_v15  ;;  %v5424_v53 = vpop.f32.mrb[45].mxu1 }
0x10a4   : > { %v4604_v57 = vpop.f32.mrb[46].mxu1 }
0x10a5   : > { %v5425_v7 = vpop.f32.mrb[47].mxu1  ;;  %v4607_v61 = vadd.f32 %v4602_v50, %v4454_v5 }
0x10a7   : > { %v4610_v63 = vsel %vm1366_vm1, %v4607_v61, 0.0 }
0x10a8   : > { %4611 = vadd.xlane.f32.xlu0 %v4610_v63 }
0x1135   : > { %v4612_v59 = vpop.xlane.xlu0 %4611 }
0x1136   : > { %v4613_v3 = vmul.f32 0.03125, %v4612_v59 }
0x1138   : > { %v4614_v6 = vsub.f32 %v4607_v61, %v4613_v3 }
0x113a   : > { %v4615_v60 = vmul.f32 %v4614_v6, %v4614_v6 }
0x113c   : > { %v4616_v35 = vsel %vm1366_vm1, %v4615_v60, 0.0 }
0x113d   : > { %4617 = vadd.xlane.f32.xlu1 %v4616_v35 }
0x11ca   : > { %v4618_v19 = vpop.xlane.xlu1 %4617 }
0x11cb   : > { %v4619_v26 = vmul.f32 0.03125, %v4618_v19 }
0x11cd   : > { %v4620_v41 = vadd.f32 1e-05, %v4619_v26 }
0x11cf   : > { %5535 = vrsqrt.f32 %v4620_v41 }
0x11d9   : > { %v5536_v31 = vpop.eup %5535 }
0x11da   : > { %v4622_v14 = vmul.f32 %v5536_v31, %v4614_v6 }
0x11dc   : > { %v4629_v23 = vmul.f32 %v5165_v30, %v4622_v14 }
0x11de   : > { %v4636_v32 = vadd.f32 %v5166_v24, %v4629_v23 }
0x11e0   : > { %v4642_v22 = vsel %vm1366_vm1, %v4636_v32, 0.0  ;;  %v4637_v33 = vpack.c.bf16 %v4636_v32, %v4636_v32 }
0x11e1   : > { %4643 = vadd.xlane.f32.xlu0 %v4642_v22 }
0x11e2   : > { %4639 = vst.msk [vmem:[%s1324_s6] sm:$0xf] %vm4638_vm9, %v4637_v33 }
0x126e   : > { %v4644_v13 = vpop.xlane.xlu0 %4643 }
0x126f   : > { %v4645_v28 = vmul.f32 0.03125, %v4644_v13 }
0x1271   : > { %v4646_v38 = vsub.f32 %v4636_v32, %v4645_v28 }
0x1273   : > { %v4647_v56 = vmul.f32 %v4646_v38, %v4646_v38 }
0x1275   : > { %v4648_v36 = vsel %vm1366_vm1, %v4647_v56, 0.0 }
0x1276   : > { %4649 = vadd.xlane.f32.xlu1 %v4648_v36 }
0x1303   : > { %v4650_v39 = vpop.xlane.xlu1 %4649 }
0x1304   : > { %v4651_v40 = vmul.f32 0.03125, %v4650_v39 }
0x1306   : > { %v4652_v42 = vadd.f32 1e-05, %v4651_v40 }
0x1308   : > { %5537 = vrsqrt.f32 %v4652_v42 }
0x1312   : > { %v5538_v43 = vpop.eup %5537 }
0x1313   : > { %v4654_v12 = vmul.f32 %v5538_v43, %v4646_v38 }
0x1315   : > { %v4661_v18 = vmul.f32 %v5167_v20, %v4654_v12 }
0x1317   : > { %v4668_v37 = vadd.f32 %v5168_v29, %v4661_v18 }
0x1319   : > { %v4669_v17 = vpack.c.bf16 %v4668_v37, %v4668_v37 }
0x131b   : > { %4670 = vst.msk [vmem:[%s1332_s0] sm:$0xf] %vm4638_vm9, %v4669_v17 }
0x131c PF: > { %s6590_s5 = sld [smem:[#allocation4_spill]]  ;;  %s6591_s8 = sld [smem:[#allocation2_spill]] }
0x131d   : > { %s6593_s9 = sld [smem:[#allocation5_spill]]  ;;  %s6594_s30 = sld [smem:[#allocation6_spill]] }
0x1322   : > { %s39_s3 = sadd.s32 1, %s6590_s5   ;;  %s6592_s5 = sld [smem:[#allocation3_spill]] }
0x1323   : > { %p36_p7 = scmp.ge.s32.totalorder %s39_s3, 6  }
0x1325   :  { %38 = sbr.rel (!%p36_p7) target bundleno = 17 (0x11), region = 248 }

// kernel: transformer_decoder_forward.11
= control target key start
LH: loop header
LB: loop body
LE: loop exit
PB: predicated region body
PF: predicated region fallthrough
CT: control target
= control target key end

     0   :  { %s6535_s0 = inlined_call_operand.vmem [shape: bf16[1,2,8,32], index: 0, kind: input, shape index: {}]   ;;  %s6536_s1 = inlined_call_operand.vmem [shape: bf16[1,2,8,32], index: 1, kind: input, shape index: {}]   ;;  %s6537_s2 = inlined_call_operand.vmem [shape: bf16[2,20,32], index: 2, kind: input, shape index: {}]   ;;  %s6538_s3 = inlined_call_operand.vmem [shape: bf16[1,32,64], index: 3, kind: input, shape index: {}]   ;;  %s6539_s4 = inlined_call_operand.vmem [shape: f32[1,1,64], index: 4, kind: input, shape index: {}]   ;;  %s6540_s5 = inlined_call_operand.vmem [shape: bf16[1,32,32], index: 5, kind: input, shape index: {}]   ;;  %s6541_s6 = inlined_call_operand.vmem [shape: f32[1,1,32], index: 6, kind: input, shape index: {}]   ;;  %s6542_s7 = inlined_call_operand.vmem [shape: bf16[1,32,32], index: 7, kind: input, shape index: {}]   ;;  %s6543_s8 = inlined_call_operand.vmem [shape: f32[1,1,32], index: 8, kind: input, shape index: {}]   ;;  %s6544_s9 = inlined_call_operand.vmem [shape: f32[1,1,32], index: 9, kind: input, shape index: {}]   ;;  %s6545_s10 = inlined_call_operand.vmem [shape: f32[1,1,32], index: 10, kind: input, shape index: {}]   ;;  %s6546_s11 = inlined_call_operand.vmem [shape: bf16[1,32,32], index: 11, kind: input, shape index: {}]   ;;  %s6547_s12 = inlined_call_operand.vmem [shape: f32[1,1,32], index: 12, kind: input, shape index: {}]   ;;  %s6548_s13 = inlined_call_operand.vmem [shape: bf16[1,32,64], index: 13, kind: input, shape index: {}]   ;;  %s6549_s14 = inlined_call_operand.vmem [shape: f32[1,1,64], index: 14, kind: input, shape index: {}]   ;;  %s6550_s15 = inlined_call_operand.vmem [shape: bf16[1,32,32], index: 15, kind: input, shape index: {}]   ;;  %s6551_s16 = inlined_call_operand.vmem [shape: f32[1,1,32], index: 16, kind: input, shape index: {}]   ;;  %s6552_s17 = inlined_call_operand.vmem [shape: f32[1,1,32], index: 17, kind: input, shape index: {}]   ;;  %s6553_s18 = inlined_call_operand.vmem [shape: f32[1,1,32], index: 18, kind: input, shape index: {}]   ;;  %s6554_s19 = inlined_call_operand.vmem [shape: bf16[1,32,64], index: 19, kind: input, shape index: {}]   ;;  %s6555_s20 = inlined_call_operand.vmem [shape: f32[1,1,64], index: 20, kind: input, shape index: {}]   ;;  %s6556_s21 = inlined_call_operand.vmem [shape: bf16[1,64,32], index: 21, kind: input, shape index: {}]   ;;  %s6557_s22 = inlined_call_operand.vmem [shape: f32[1,1,32], index: 22, kind: input, shape index: {}]   ;;  %s6558_s23 = inlined_call_operand.vmem [shape: f32[1,1,32], index: 23, kind: input, shape index: {}]   ;;  %s6559_s24 = inlined_call_operand.vmem [shape: f32[1,1,32], index: 24, kind: input, shape index: {}]   ;;  %s6560_s25 = inlined_call_operand.vmem [shape: f32[1,1,32], index: 25, kind: input, shape index: {}]   ;;  %s6561_s26 = inlined_call_operand.vmem [shape: f32[1,1,32], index: 26, kind: input, shape index: {}]   ;;  %s6562_s27 = inlined_call_operand.vmem [shape: bf16[1,2,8,32], index: 27, kind: output, shape index: {0}]   ;;  %s6563_s28 = inlined_call_operand.vmem [shape: bf16[1,2,8,32], index: 28, kind: output, shape index: {1}]  }
   0x1   :  { %6581 = sst [smem:[#allocation2_spill]] %s6535_s0 }
   0x2   :  { %6582 = sst [smem:[#allocation3_spill]] %s6536_s1 }
   0x3   :  { %6583 = sst [smem:[#allocation4_spill]] %s6537_s2 }
   0x4   :  { %6584 = sst [smem:[#allocation5_spill]] %s6538_s3 }
   0x5   :  { %6585 = sst [smem:[#allocation6_spill]] %s6539_s4 }
   0x6   :  { %6586 = sst [smem:[#allocation7_spill]] %s6540_s5  ;;  %s5772_s5 = smov 0  }
   0x7   :  { %6587 = sst [smem:[#allocation8_spill]] %s6541_s6 }
   0x8   :  { %6588 = sst [smem:[#allocation9_spill]] %s6542_s7 }
   0x9   :  { %6589 = sst [smem:[#allocation10_spill]] %s6543_s8  ;;  %s5770_s8 = smov 0  }
   0xa   :  { %6590 = sst [smem:[#allocation11_spill]] %s6544_s9  ;;  %s5774_s9 = smov 0  }
   0xb   :  { %6591 = sst [smem:[#allocation12_spill]] %s6545_s10 }
   0xc   :  { %6592 = sst [smem:[#allocation13_spill]] %s6546_s11 }
   0xd   :  { %6593 = sst [smem:[#allocation14_spill]] %s6547_s12 }
   0xe LB: > { %s51_s30 = sadd.s32 1, %s5607_s5  ;;  %p5172_p0 = scmp.ge.s32.totalorder %s5611_s9, 1  ;;  %s5611_s9 = sphi %s5774_s9, %s39_s9   ;;  %s5607_s5 = sphi %s5772_s5, %s6615_s5   ;;  %s5603_s8 = sphi %s5770_s8, %s6614_s8  }
   0xf   : > { %p53_p1 = scmp.ge.s32.totalorder %s51_s30, 2  ;;  %p1019_p2 = scmp.lt.s32.totalorder %s5611_s9, 3 }
  0x11   : > { %s6617_s30 = smov (%p53_p1, %s51_s30), 0  ;;  %p1020_p3 = pnand %p5172_p0, %p1019_p2 }
  0x12   : > { %s6594_s10 = sld [smem:[#allocation5_spill]] (!%p1020_p3)  ;;  %v5613_v1 = vmov (!%p1020_p3), 0.0   ;;  %vm5614_vm0 = vmmov (!%p1020_p3), 0   ;;  %p1210_p4 = scmp.lt.s32.totalorder (!%p1020_p3), %s5603_s8, 1  ;;  %vm1366_vm1 = vcmask (!%p1020_p3), 261120   ;;  %v1488_v18 = vlaneseq (!%p1020_p3) }
  0x13   : > { %1023 = sbr.rel (%p1020_p3) target bundleno = 4885 (0x1315), region = 128  ;;  %5312 = vmatprep.subr.bf16.mxu0 (!%p1020_p3), %v5613_v1  ;;  %5320 = vmatprep.subr.bf16.mxu1 (!%p1020_p3), %v5613_v1  ;;  %s6595_s12 = sld [smem:[#allocation2_spill]] (!%p1020_p3)  ;;  %v5619_v16 = vmov (!%p1020_p3), 1983009808   ;;  %v5620_v19 = vmov (!%p1020_p3), 1934713408  }
  0x14   : > { %5316 = vmatprep.mubr.msk.bf16.mxu0 (!%p1020_p3), %vm5614_vm0, %v5613_v1  ;;  %5324 = vmatprep.mubr.msk.bf16.mxu1 (!%p1020_p3), %vm5614_vm0, %v5613_v1  ;;  %s6596_s6 = sld [smem:[#allocation3_spill]] (!%p1020_p3)  ;;  %s6597_s7 = sld [smem:[#allocation6_spill]] (!%p1020_p3)  ;;  %v1486_v17 = vunpack.c.l.s4 (!%p1020_p3), %v5619_v16  ;;  %v1503_v20 = vunpack.c.l.s4 (!%p1020_p3), %v5620_v19  ;;  %v1489_v22 = vshrl.u32 (!%p1020_p3), %v1488_v18, 7  ;;  %v5621_v41 = vmov (!%p1020_p3), 0  }
  0x15   : > { %s6568_s4 = smov (!%p1020_p3), 96   ;;  %s6577_s3 = smov (!%p1020_p3), 112   ;;  %vm1984_vm2 = vcmask (!%p1020_p3), 64512   ;;  %vm2224_vm3 = vcmask (!%p1020_p3), 1043456   ;;  %vm2555_vm4 = vcmask (!%p1020_p3), 130048   ;;  %vm2557_vm5 = vcmask (!%p1020_p3), 195584  }
  0x16   : > { %v1487_v21 = vunpack.c.0.s8 (!%p1020_p3), %v1486_v17  ;;  %v1504_v23 = vunpack.c.0.s8 (!%p1020_p3), %v1503_v20  ;;  %s6598_s11 = sld [smem:[#allocation7_spill]] (!%p1020_p3)  ;;  %s6599_s2 = sld [smem:[#allocation8_spill]] (!%p1020_p3)  ;;  %vm3973_vm6 = vcmask (!%p1020_p3), 162816   ;;  %vm4025_vm7 = vcmask (!%p1020_p3), 1041408  }
  0x17   : > { %vm4563_vm8 = vcmask (!%p1020_p3), 523264   ;;  %vm4638_vm9 = vcmask (!%p1020_p3), 257024  }
  0x18   : > { %v5529_v0 = vld [vmem:[%s6594_s10] sm:$0xff] (!%p1020_p3)   ;;  %v5530_v2 = vld [vmem:[%s6594_s10 + $0x8] sm:$0xff] (!%p1020_p3)   ;;  %v5835_v24 = vsub.s32 (!%p1020_p3), %v1487_v21, %v1489_v22  ;;  %v5838_v28 = vsub.s32 (!%p1020_p3), %v1504_v23, %v1489_v22 }
  0x19   : > { %5313 = vmatpush3.bf16.msra.mxu0 (!%p1020_p3), %v5529_v0 }
  0x1a   : > { %5314 = vmatprep.subr.bf16.mxu0 %v5613_v1  ;;  %s6619_s8 = smov (!%p1210_p4, %s5603_s8), 1  ;;  %v5178_v9 = vld [vmem:[%s6597_s7] ss:$0 sm:$0xff]  ;;  %s6570_s7 = smov 8  }
  0x1b   : > { %s5804_s29 = sshll.u32 %s6619_s8, 2 }
  0x1c   : > { %s1215_s1 = scalar_lea.vmem %s6595_s12, %s5804_s29  ;;  %s1223_s0 = scalar_lea.vmem %s6596_s6, %s5804_s29  ;;  %v5531_v33 = vld [vmem:[%s6598_s11] sm:$0xff]   ;;  %v5532_v37 = vld [vmem:[%s6598_s11 + $0x8] sm:$0xff]  }
  0x1d   : > { %5315 = vmatpush3.bf16.msra.mxu0 %v5530_v2  ;;  %v5815_v3 = vld [vmem:[%s1215_s1] sm:$0xf]  ;;  %s6573_s12 = smov 104   ;;  %s6575_s1 = smov 120   ;;  %5321 = vmatpush3.bf16.msra.mxu1 %v5531_v33 }
  0x1e   : > { %5328 = vmatprep.subr.bf16.mxu0 %v5613_v1  ;;  %v5817_v4 = vld [vmem:[%s1223_s0] sm:$0xf]  ;;  %v1340_v6 = vunpack.c.l.bf16 %v5815_v3  ;;  %5322 = vmatprep.subr.bf16.mxu1 %v5613_v1  ;;  %s6600_s0 = sld [smem:[#allocation9_spill]]  ;;  %s6572_s6 = smov 24  }
  0x1f   : > { %v1336_v5 = vunpack.c.l.bf16 %v5817_v4 }
  0x21   : > { %v1341_v7 = vadd.f32 %v1340_v6, %v1336_v5  ;;  %5323 = vmatpush3.bf16.msra.mxu1 %v5532_v37 }
  0x22   : > { %5334 = vmatprep.subr.bf16.mxu1 %v5613_v1 }
  0x23   : > { %v1342_v8 = vpack.c.bf16 %v1341_v7, %v1341_v7 }
  0x24   : > { %5325 = vmatmul.mubr.msk.bf16.vlgmr.msra.gmra.mrb[0].mxu1 %vm1366_vm1, %v5815_v3 }
  0x25   : > { %5317 = vmatmul.mubr.msk.bf16.vlgmr.msra.gmra.mrb[0].mxu0 %vm1366_vm1, %v1342_v8  ;;  %5336 = vmatprep.mubr.msk.bf16.mxu1 %vm5614_vm0, %v5613_v1 }
  0x26   : > { %5330 = vmatprep.mubr.msk.bf16.mxu0 %vm5614_vm0, %v5613_v1 }
  0xf8   : > { %v1404_v10 = vpop.f32.mrb[0].mxu0 }
  0xf9   : > { %v1405_v11 = vadd.f32 %v5178_v9, %v1404_v10  ;;  %v5318_v12 = vpop.f32.mrb[1].mxu0 }
  0xfa   : > { %v1407_v13 = vpop.f32.mrb[2].mxu0 }
  0xfb   : > { %v1410_v14 = vpack.c.bf16 %v1405_v11, %v1405_v11  ;;  %v5319_v15 = vpop.f32.mrb[3].mxu0 }
  0xfd   : > { %1483 = vrot.lane.b32.xlu1 %v1410_v14, %s6573_s12  ;;  %1479 = vrot.lane.b32.xlu0 %v1410_v14, %s6575_s1  ;;  %v1491_v36 = vrot.slane %v1410_v14, %v5835_v24 }
 0x101   : > { %1646 = vrot.lane.b32.xlu1 %v1410_v14, %s6568_s4  ;;  %1481 = vrot.lane.b32.xlu0 %v1410_v14, %s6577_s3 }
 0x16f   : > { %v1484_v25 = vpop.permute.xlu1 %1483  ;;  %v1480_v26 = vpop.permute.xlu0 %1479 }
 0x170   : > { %v1533_v27 = vrot.slane %v1484_v25, %v5835_v24  ;;  %v1525_v29 = vrot.slane %v1480_v26, %v5835_v24  ;;  %1648 = vrot.lane.b32.xlu0 %v1480_v26, %s6568_s4 }
 0x172   : > { %v1534_v30 = vcombine.low %v1525_v29, %v1533_v27  ;;  %v1535_v31 = vcombine.high %v1525_v29, %v1533_v27 }
 0x173   : > { %v1482_v32 = vpop.permute.xlu0 %1481 }
 0x174   : > { %v1542_v34 = vrot.slane %v1534_v30, %v5838_v28  ;;  %v1499_v35 = vrot.slane %v1482_v32, %v5835_v24  ;;  %1652 = vrot.lane.b32.xlu0 %v1484_v25, %s6568_s4  ;;  %1650 = vrot.lane.b32.xlu1 %v1482_v32, %s6568_s4  ;;  %v1549_v38 = vrot.slane %v1535_v31, %v5838_v28  ;;  %v1647_v30 = vpop.permute.xlu1 %1646  ;;  %s6571_s4 = smov 16  }
 0x176   : > { %v1500_v39 = vcombine.low %v1491_v36, %v1499_v35  ;;  %v1501_v40 = vcombine.high %v1491_v36, %v1499_v35  ;;  %v1550_v42 = vcombine.high %v1542_v34, %v5621_v41  ;;  %v1551_v45 = vcombine.high %v1549_v38, %v5621_v41 }
 0x177   : > { %v1557_v46 = vshrl.u32 %v1542_v34, 16  ;;  %v1573_v52 = vshrl.u32 %v1549_v38, 16  ;;  %v1661_v35 = vrot.slane %v1647_v30, %v5835_v24 }
 0x178   : > { %v1508_v43 = vrot.slane %v1500_v39, %v5838_v28  ;;  %v1515_v44 = vrot.slane %v1501_v40, %v5838_v28  ;;  %v1565_v51 = vshrl.u32 %v1550_v42, 16  ;;  %v1581_v59 = vshrl.u32 %v1551_v45, 16 }
 0x17a   : > { %v1516_v47 = vcombine.high %v1508_v43, %v5621_v41  ;;  %v1517_v48 = vcombine.high %v1515_v44, %v5621_v41  ;;  %v1554_v49 = vpack.i.b16 %v1542_v34, %v1508_v43  ;;  %v1556_v50 = vshrl.u32 %v1508_v43, 16 }
 0x17b   : > { %v1570_v53 = vpack.i.b16 %v1549_v38, %v1515_v44  ;;  %v1572_v54 = vshrl.u32 %v1515_v44, 16 }
 0x17c   : > { %v1558_v55 = vpack.i.b16 %v1557_v46, %v1556_v50  ;;  %v1562_v56 = vpack.i.b16 %v1550_v42, %v1516_v47  ;;  %v1564_v57 = vshrl.u32 %v1516_v47, 16  ;;  %v1578_v58 = vpack.i.b16 %v1551_v45, %v1517_v48 }
 0x17d   : > { %v1574_v60 = vpack.i.b16 %v1573_v52, %v1572_v54  ;;  %v1580_v61 = vshrl.u32 %v1517_v48, 16  ;;  %v1584_v62 = vcombine.low %v1554_v49, %v1570_v53 }
 0x17e   : > { %v1566_v63 = vpack.i.b16 %v1565_v51, %v1564_v57  ;;  %v1592_v0 = vcombine.low %v1562_v56, %v1578_v58 }
 0x17f   : > { %v1582_v2 = vpack.i.b16 %v1581_v59, %v1580_v61  ;;  %v1609_v7 = vcombine.low %v1558_v55, %v1574_v60  ;;  %v1591_v8 = vrot.slane %v1584_v62, %v5835_v24 }
 0x180   : > { %v1599_v9 = vrot.slane %v1592_v0, %v5835_v24 }
 0x181   : > { %v1617_v10 = vcombine.low %v1566_v63, %v1582_v2  ;;  %v1616_v12 = vrot.slane %v1609_v7, %v5835_v24 }
 0x182   : > { %v1600_v11 = vcombine.low %v1591_v8, %v1599_v9 }
 0x183   : > { %v1624_v13 = vrot.slane %v1617_v10, %v5835_v24 }
 0x184   : > { %v5871_v14 = vrot.slane %v1600_v11, %v5838_v28 }
 0x185   : > { %v1625_v15 = vcombine.low %v1616_v12, %v1624_v13 }
 0x186   : > { %v5878_v17 = vcombine.high %v5871_v14, %v5621_v41  ;;  %v1637_v19 = vshrl.u32 %v5871_v14, 16 }
 0x187   : > { %v5874_v16 = vrot.slane %v1625_v15, %v5838_v28 }
 0x188   : > { %v1643_v25 = vshrl.u32 %v5878_v17, 16 }
 0x189   : > { %v1636_v18 = vpack.i.b16 %v5874_v16, %v5871_v14  ;;  %v1638_v20 = vshrl.u32 %v5874_v16, 16  ;;  %v5886_v21 = vcombine.high %v5874_v16, %v5621_v41  ;;  %v1471_v14 = vpop.f32.mrb[0].mxu1 }
 0x18a   : > { %v5326_v16 = vpop.f32.mrb[1].mxu1 }
 0x18b   : > { %v5888_v22 = vpack.i.b16 %v1638_v20, %v1637_v19  ;;  %v1642_v23 = vpack.i.b16 %v5886_v21, %v5878_v17  ;;  %v1644_v26 = vshrl.u32 %v5886_v21, 16 }
 0x18d   : > { %v5894_v27 = vpack.i.b16 %v1644_v26, %v1643_v25 }
 0x1e2   : > { %v1649_v29 = vpop.permute.xlu0 %1648 }
 0x1e3   : > { %v1695_v32 = vrot.slane %v1649_v29, %v5835_v24 }
 0x1e6   : > { %v1653_v31 = vpop.permute.xlu0 %1652  ;;  %v1651_v33 = vpop.permute.xlu1 %1650 }
 0x1e7   : > { %v1703_v34 = vrot.slane %v1653_v31, %v5835_v24  ;;  %v1669_v36 = vrot.slane %v1651_v33, %v5835_v24 }
 0x1e9   : > { %v1704_v37 = vcombine.low %v1695_v32, %v1703_v34  ;;  %v1705_v38 = vcombine.high %v1695_v32, %v1703_v34  ;;  %v1670_v39 = vcombine.low %v1661_v35, %v1669_v36  ;;  %v1671_v40 = vcombine.high %v1661_v35, %v1669_v36 }
 0x1eb   : > { %v1712_v42 = vrot.slane %v1704_v37, %v5838_v28  ;;  %v1719_v43 = vrot.slane %v1705_v38, %v5838_v28  ;;  %v1678_v44 = vrot.slane %v1670_v39, %v5838_v28  ;;  %v1685_v45 = vrot.slane %v1671_v40, %v5838_v28 }
 0x1ed   : > { %v1720_v46 = vcombine.high %v1712_v42, %v5621_v41  ;;  %v1721_v47 = vcombine.high %v1719_v43, %v5621_v41  ;;  %v1727_v48 = vshrl.u32 %v1712_v42, 16  ;;  %v1743_v49 = vshrl.u32 %v1719_v43, 16 }
 0x1ee   : > { %v1686_v50 = vcombine.high %v1678_v44, %v5621_v41  ;;  %v1687_v51 = vcombine.high %v1685_v45, %v5621_v41  ;;  %v1726_v52 = vshrl.u32 %v1678_v44, 16  ;;  %v1742_v53 = vshrl.u32 %v1685_v45, 16 }
 0x1ef   : > { %v1724_v54 = vpack.i.b16 %v1712_v42, %v1678_v44  ;;  %v1735_v55 = vshrl.u32 %v1720_v46, 16  ;;  %v1740_v56 = vpack.i.b16 %v1719_v43, %v1685_v45  ;;  %v1751_v57 = vshrl.u32 %v1721_v47, 16 }
 0x1f0   : > { %v1734_v58 = vshrl.u32 %v1686_v50, 16  ;;  %v1750_v59 = vshrl.u32 %v1687_v51, 16  ;;  %v1728_v60 = vpack.i.b16 %v1727_v48, %v1726_v52  ;;  %v1732_v61 = vpack.i.b16 %v1720_v46, %v1686_v50 }
 0x1f1   : > { %v1744_v62 = vpack.i.b16 %v1743_v49, %v1742_v53  ;;  %v1748_v63 = vpack.i.b16 %v1721_v47, %v1687_v51  ;;  %v1754_v0 = vcombine.low %v1724_v54, %v1740_v56 }
 0x1f2   : > { %v1736_v2 = vpack.i.b16 %v1735_v55, %v1734_v58  ;;  %v1752_v7 = vpack.i.b16 %v1751_v57, %v1750_v59 }
 0x1f3   : > { %v1762_v8 = vcombine.low %v1732_v61, %v1748_v63  ;;  %v1779_v9 = vcombine.low %v1728_v60, %v1744_v62  ;;  %v1761_v11 = vrot.slane %v1754_v0, %v5835_v24  ;;  %v5182_v0 = vld [vmem:[%s6599_s2] ss:$0 sm:$0xff]  ;;  %s6606_s2 = smov 104  }
 0x1f4   : > { %v1787_v10 = vcombine.low %v1736_v2, %v1752_v7  ;;  %v1472_v2 = vadd.f32 %v5182_v0, %v1471_v14 }
 0x1f5   : > { %v1769_v12 = vrot.slane %v1762_v8, %v5835_v24  ;;  %v1786_v13 = vrot.slane %v1779_v9, %v5835_v24 }
 0x1f6   : > { %v1794_v15 = vrot.slane %v1787_v10, %v5835_v24  ;;  %v1477_v7 = vpack.c.bf16 %v1472_v2, %v1472_v2 }
 0x1f7   : > { %v1770_v19 = vcombine.low %v1761_v11, %v1769_v12 }
 0x1f8   : > { %v1795_v20 = vcombine.low %v1786_v13, %v1794_v15 }
 0x1f9   : > { %v1777_v25 = vrot.slane %v1770_v19, %v5838_v28 }
 0x1fa   : > { %v1802_v26 = vrot.slane %v1795_v20, %v5838_v28 }
 0x1fb   : > { %v1807_v30 = vshrl.u32 %v1777_v25, 16  ;;  %v1778_v35 = vcombine.high %v1777_v25, %v5621_v41 }
 0x1fc   : > { %v1806_v29 = vpack.i.b16 %v1802_v26, %v1777_v25  ;;  %v1808_v31 = vshrl.u32 %v1802_v26, 16  ;;  %v1803_v32 = vcombine.high %v1802_v26, %v5621_v41 }
 0x1fd   : > { %v1813_v39 = vshrl.u32 %v1778_v35, 16 }
 0x1fe   : > { %v1989_v33 = vsel %vm1984_vm2, %v1806_v29, 0  ;;  %v1809_v34 = vpack.i.b16 %v1808_v31, %v1807_v30  ;;  %v1814_v37 = vshrl.u32 %v1803_v32, 16  ;;  %v1812_v38 = vpack.i.b16 %v1803_v32, %v1778_v35 }
 0x1ff   : > { %5329 = vmatpush3.bf16.xpose.msra.mxu0 %v1989_v33 }
 0x200   : > { %v2035_v36 = vsel %vm1984_vm2, %v1809_v34, 0  ;;  %5340 = vmatprep.subr.bf16.mxu0 %v5613_v1  ;;  %v1815_v40 = vpack.i.b16 %v1814_v37, %v1813_v39  ;;  %v2081_v42 = vsel %vm1984_vm2, %v1812_v38, 0 }
 0x201   : > { %5335 = vmatpush3.bf16.xpose.msra.mxu1 %v2035_v36 }
 0x202   : > { %5346 = vmatprep.subr.bf16.mxu1 %v5613_v1  ;;  %v2127_v43 = vsel %vm1984_vm2, %v1815_v40, 0  ;;  %v1829_v40 = vrot.slane %v1477_v7, %v5835_v24 }
 0x206   : > { %5331 = vmatmul.mubr.msk.bf16.vlgmr.msra.gmra.mrb[4].mxu0 %vm1984_vm2, %v1636_v18  ;;  %v1474_v18 = vpop.f32.mrb[2].mxu1 }
 0x207   : > { %5341 = vmatpush3.bf16.xpose.msra.mxu0 %v2081_v42  ;;  %5342 = vmatprep.mubr.msk.bf16.mxu0 %vm5614_vm0, %v5613_v1 }
 0x208   : > { %5337 = vmatmul.mubr.msk.bf16.vlgmr.msra.gmra.mrb[4].mxu1 %vm1984_vm2, %v5888_v22  ;;  %5352 = vmatprep.subr.bf16.mxu0 %v5613_v1  ;;  %v5327_v22 = vpop.f32.mrb[3].mxu1 }
 0x209   : > { %5347 = vmatpush3.bf16.xpose.msra.mxu1 %v2127_v43  ;;  %5348 = vmatprep.mubr.msk.bf16.mxu1 %vm5614_vm0, %v5613_v1 }
 0x20a   : > { %5358 = vmatprep.subr.bf16.mxu1 %v5613_v1 }
 0x20e   : > { %5343 = vmatmul.mubr.msk.bf16.vlgmr.msra.gmra.mrb[8].mxu0 %vm1984_vm2, %v1642_v23 }
 0x20f   : > { %5354 = vmatprep.mubr.msk.bf16.mxu0 %vm5614_vm0, %v5613_v1 }
 0x210   : > { %5349 = vmatmul.mubr.msk.bf16.vlgmr.msra.gmra.mrb[8].mxu1 %vm1984_vm2, %v5894_v27 }
 0x211   : > { %5360 = vmatprep.mubr.msk.bf16.mxu1 %vm5614_vm0, %v5613_v1 }
 0x2d9   : > { %v2025_v44 = vpop.f32.mrb[4].mxu0 }
 0x2da   : > { %v2169_v45 = vmul.f32 0.35355338, %v2025_v44  ;;  %v5332_v46 = vpop.f32.mrb[5].mxu0 }
 0x2db   : > { %v2028_v47 = vpop.f32.mrb[6].mxu0  ;;  %v2071_v17 = vpop.f32.mrb[4].mxu1 }
 0x2dc   : > { %v2170_v21 = vmul.f32 0.35355338, %v2071_v17  ;;  %v5333_v23 = vpop.f32.mrb[7].mxu0  ;;  %v5338_v48 = vpop.f32.mrb[5].mxu1  ;;  %v2173_v49 = vsel %vm1984_vm2, %v2169_v45, -inf }
 0x2dd   : > { %v2074_v50 = vpop.f32.mrb[6].mxu1  ;;  %2174 = vmax.xlane.f32.xlu1 %v2173_v49 }
 0x2de   : > { %v5339_v27 = vpop.f32.mrb[7].mxu1  ;;  %v2176_v51 = vsel %vm1984_vm2, %v2170_v21, -inf }
 0x2df   : > { %2177 = vmax.xlane.f32.xlu0 %v2176_v51 }
 0x2e1   : > { %v2117_v52 = vpop.f32.mrb[8].mxu0 }
 0x2e2   : > { %v2171_v53 = vmul.f32 0.35355338, %v2117_v52  ;;  %v5344_v54 = vpop.f32.mrb[9].mxu0 }
 0x2e3   : > { %v2120_v55 = vpop.f32.mrb[10].mxu0  ;;  %v2163_v56 = vpop.f32.mrb[8].mxu1 }
 0x2e4   : > { %v2172_v57 = vmul.f32 0.35355338, %v2163_v56  ;;  %v5345_v58 = vpop.f32.mrb[11].mxu0  ;;  %v5350_v59 = vpop.f32.mrb[9].mxu1  ;;  %v2179_v60 = vsel %vm1984_vm2, %v2171_v53, -inf }
 0x2e5   : > { %v2166_v61 = vpop.f32.mrb[10].mxu1  ;;  %2180 = vmax.xlane.f32.xlu0 %v2179_v60 }
 0x2e6   : > { %v5351_v62 = vpop.f32.mrb[11].mxu1  ;;  %v2182_v63 = vsel %vm1984_vm2, %v2172_v57, -inf }
 0x2e7   : > { %2183 = vmax.xlane.f32.xlu1 %v2182_v63 }
 0x2f8   : > { %1819 = vrot.lane.b32.xlu1 %v1477_v7, %s6577_s3  ;;  %s6610_s3 = smov 96  }
 0x36a   : > { %v2175_v8 = vpop.xlane.xlu1 %2174 }
 0x36b   : > { %v2185_v9 = vsub.f32 %v2169_v45, %v2175_v8 }
 0x36c   : > { %v2178_v10 = vpop.xlane.xlu0 %2177 }
 0x36d   : > { %v2189_v11 = vmul.f32 1.442695, %v2185_v9  ;;  %v2186_v12 = vsub.f32 %v2170_v21, %v2178_v10 }
 0x36f   : > { %5549 = vpow2.f32 %v2189_v11  ;;  %v2191_v13 = vmul.f32 1.442695, %v2186_v12 }
 0x371   : > { %5551 = vpow2.f32 %v2191_v13 }
 0x372   : > { %v2181_v26 = vpop.xlane.xlu0 %2180 }
 0x373   : > { %v2187_v30 = vsub.f32 %v2171_v53, %v2181_v26 }
 0x374   : > { %v2184_v29 = vpop.xlane.xlu1 %2183 }
 0x375   : > { %v2188_v31 = vsub.f32 %v2172_v57, %v2184_v29  ;;  %v2193_v32 = vmul.f32 1.442695, %v2187_v30 }
 0x377   : > { %v2195_v33 = vmul.f32 1.442695, %v2188_v31  ;;  %5553 = vpow2.f32 %v2193_v32 }
 0x378   : > { %v1820_v38 = vpop.permute.xlu1 %1819 }
 0x379   : > { %v5952_v15 = vpop.eup %5549  ;;  %5555 = vpow2.f32 %v2195_v33  ;;  %v1837_v39 = vrot.slane %v1820_v38, %v5835_v24 }
 0x37a   : > { %v2197_v19 = vsel %vm1984_vm2, %v5952_v15, 0.0 }
 0x37b   : > { %v5956_v20 = vpop.eup %5551  ;;  %2198 = vadd.xlane.f32.xlu0 %v2197_v19  ;;  %v1838_v42 = vcombine.low %v1829_v40, %v1837_v39  ;;  %v1839_v14 = vcombine.high %v1829_v40, %v1837_v39 }
 0x37c   : > { %v2200_v25 = vsel %vm1984_vm2, %v5956_v20, 0.0 }
 0x37d   : > { %2201 = vadd.xlane.f32.xlu1 %v2200_v25  ;;  %v1846_v18 = vrot.slane %v1838_v42, %v5838_v28  ;;  %v1853_v44 = vrot.slane %v1839_v14, %v5838_v28 }
 0x37f   : > { %v1854_v17 = vcombine.high %v1846_v18, %v5621_v41  ;;  %v1855_v48 = vcombine.high %v1853_v44, %v5621_v41  ;;  %v1894_v27 = vshrl.u32 %v1846_v18, 16  ;;  %v1910_v52 = vshrl.u32 %v1853_v44, 16 }
 0x381   : > { %v5962_v34 = vpop.eup %5553  ;;  %v1902_v51 = vshrl.u32 %v1854_v17, 16  ;;  %v1918_v57 = vshrl.u32 %v1855_v48, 16 }
 0x382   : > { %v2203_v36 = vsel %vm1984_vm2, %v5962_v34, 0.0 }
 0x383   : > { %v5964_v35 = vpop.eup %5555 }
 0x384   : > { %v2206_v37 = vsel %vm1984_vm2, %v5964_v35, 0.0 }
 0x38e   : > { %1821 = vrot.lane.b32.xlu1 %v1477_v7, %s6573_s12  ;;  %s6613_s12 = smov 24  }
 0x391   : > { %1817 = vrot.lane.b32.xlu0 %v1477_v7, %s6575_s1  ;;  %s6603_s1 = sld [smem:[#allocation13_spill]] }
 0x3b0   : > { %2204 = vadd.xlane.f32.xlu0 %v2203_v36 }
 0x3b2   : > { %2207 = vadd.xlane.f32.xlu1 %v2206_v37 }
 0x408   : > { %v2199_v43 = vpop.xlane.xlu0 %2198 }
 0x409   : > { %5557 = vrcp.f32 %v2199_v43 }
 0x40a   : > { %v2202_v16 = vpop.xlane.xlu1 %2201 }
 0x40b   : > { %5559 = vrcp.f32 %v2202_v16 }
 0x40c   : > { %v1818_v22 = vpop.permute.xlu0 %1817 }
 0x40d   : > { %v1863_v46 = vrot.slane %v1818_v22, %v5835_v24 }
 0x40e   : > { %v1822_v45 = vpop.permute.xlu1 %1821 }
 0x40f   : > { %v1871_v47 = vrot.slane %v1822_v45, %v5835_v24 }
 0x411   : > { %v1872_v21 = vcombine.low %v1863_v46, %v1871_v47  ;;  %v1873_v23 = vcombine.high %v1863_v46, %v1871_v47 }
 0x413   : > { %v1880_v49 = vrot.slane %v1872_v21, %v5838_v28  ;;  %v1887_v50 = vrot.slane %v1873_v23, %v5838_v28  ;;  %v5558_v31 = vpop.eup %5557 }
 0x414   : > { %v2213_v38 = vmul.f32 %v5558_v31, %v5952_v15 }
 0x415   : > { %v1888_v53 = vcombine.high %v1880_v49, %v5621_v41  ;;  %v1889_v54 = vcombine.high %v1887_v50, %v5621_v41  ;;  %v1892_v55 = vpack.i.b16 %v1880_v49, %v1846_v18  ;;  %v1895_v56 = vshrl.u32 %v1880_v49, 16  ;;  %v5560_v36 = vpop.eup %5559 }
 0x416   : > { %v1908_v58 = vpack.i.b16 %v1887_v50, %v1853_v44  ;;  %v1911_v59 = vshrl.u32 %v1887_v50, 16  ;;  %v2214_v14 = vmul.f32 %v5560_v36, %v5956_v20  ;;  %v2217_v47 = vpack.c.bf16 %v2213_v38, %v2213_v38 }
 0x417   : > { %v1896_v60 = vpack.i.b16 %v1895_v56, %v1894_v27  ;;  %v1900_v61 = vpack.i.b16 %v1888_v53, %v1854_v17  ;;  %v1903_v62 = vshrl.u32 %v1888_v53, 16  ;;  %v1916_v63 = vpack.i.b16 %v1889_v54, %v1855_v48 }
 0x418   : > { %v1912_v0 = vpack.i.b16 %v1911_v59, %v1910_v52  ;;  %v1919_v2 = vshrl.u32 %v1889_v54, 16  ;;  %v1922_v7 = vcombine.low %v1892_v55, %v1908_v58  ;;  %v2218_v21 = vpack.c.bf16 %v2214_v14, %v2214_v14 }
 0x419   : > { %v1904_v8 = vpack.i.b16 %v1903_v62, %v1902_v51  ;;  %v1930_v9 = vcombine.low %v1900_v61, %v1916_v63 }
 0x41a   : > { %v1920_v10 = vpack.i.b16 %v1919_v2, %v1918_v57  ;;  %v1947_v11 = vcombine.low %v1896_v60, %v1912_v0  ;;  %v1929_v12 = vrot.slane %v1922_v7, %v5835_v24 }
 0x41b   : > { %v1937_v13 = vrot.slane %v1930_v9, %v5835_v24 }
 0x41c   : > { %v1955_v19 = vcombine.low %v1904_v8, %v1920_v10  ;;  %v1954_v26 = vrot.slane %v1947_v11, %v5835_v24 }
 0x41d   : > { %v1938_v25 = vcombine.low %v1929_v12, %v1937_v13 }
 0x41e   : > { %v1962_v29 = vrot.slane %v1955_v19, %v5835_v24 }
 0x41f   : > { %v1945_v30 = vrot.slane %v1938_v25, %v5838_v28 }
 0x420   : > { %v1963_v32 = vcombine.low %v1954_v26, %v1962_v29 }
 0x421   : > { %v1946_v33 = vcombine.high %v1945_v30, %v5621_v41  ;;  %v1975_v40 = vshrl.u32 %v1945_v30, 16 }
 0x422   : > { %v1970_v37 = vrot.slane %v1963_v32, %v5838_v28 }
 0x423   : > { %v1981_v16 = vshrl.u32 %v1946_v33, 16 }
 0x424   : > { %v1974_v39 = vpack.i.b16 %v1970_v37, %v1945_v30  ;;  %v1976_v42 = vshrl.u32 %v1970_v37, 16  ;;  %v1971_v43 = vcombine.high %v1970_v37, %v5621_v41 }
 0x426   : > { %v2226_v18 = vsel %vm2224_vm3, %v1974_v39, 0  ;;  %v1977_v22 = vpack.i.b16 %v1976_v42, %v1975_v40  ;;  %v1980_v44 = vpack.i.b16 %v1971_v43, %v1946_v33  ;;  %v1982_v45 = vshrl.u32 %v1971_v43, 16  ;;  %v5533_v33 = vld [vmem:[%s6600_s0] sm:$0xff]  }
 0x427   : > { %5353 = vmatpush3.bf16.msra.mxu0 %v2226_v18 }
 0x428   : > { %v2272_v46 = vsel %vm2224_vm3, %v1977_v22, 0  ;;  %5364 = vmatprep.subr.bf16.mxu0 %v5613_v1  ;;  %v1983_v15 = vpack.i.b16 %v1982_v45, %v1981_v16  ;;  %v2318_v17 = vsel %vm2224_vm3, %v1980_v44, 0  ;;  %v5534_v16 = vld [vmem:[%s6600_s0 + $0x8] sm:$0xff]   ;;  %s6602_s0 = sld [smem:[#allocation4_spill]] }
 0x429   : > { %5359 = vmatpush3.bf16.msra.mxu1 %v2272_v46 }
 0x42a   : > { %5355 = vmatmul.mubr.msk.bf16.vlgmr.msra.gmra.mrb[12].mxu0 %vm1984_vm2, %v2217_v47  ;;  %5370 = vmatprep.subr.bf16.mxu1 %v5613_v1  ;;  %v2364_v20 = vsel %vm2224_vm3, %v1983_v15, 0 }
 0x42b   : > { %5365 = vmatpush3.bf16.msra.mxu0 %v2318_v17  ;;  %5366 = vmatprep.mubr.msk.bf16.mxu0 %vm5614_vm0, %v5613_v1 }
 0x42c   : > { %5361 = vmatmul.mubr.msk.bf16.vlgmr.msra.gmra.mrb[12].mxu1 %vm1984_vm2, %v2218_v21  ;;  %5376 = vmatprep.subr.bf16.mxu0 %v5613_v1 }
 0x42d   : > { %5371 = vmatpush3.bf16.msra.mxu1 %v2364_v20  ;;  %5372 = vmatprep.mubr.msk.bf16.mxu1 %vm5614_vm0, %v5613_v1 }
 0x42e   : > { %5384 = vmatprep.subr.bf16.mxu1 %v5613_v1 }
 0x43d   : > { %v2205_v23 = vpop.xlane.xlu0 %2204 }
 0x43e   : > { %5561 = vrcp.f32 %v2205_v23 }
 0x43f   : > { %v2208_v48 = vpop.xlane.xlu1 %2207 }
 0x440   : > { %5563 = vrcp.f32 %v2208_v48 }
 0x448   : > { %v5562_v49 = vpop.eup %5561 }
 0x449   : > { %v2215_v50 = vmul.f32 %v5562_v49, %v5962_v34 }
 0x44a   : > { %v5564_v27 = vpop.eup %5563 }
 0x44b   : > { %v2216_v51 = vmul.f32 %v5564_v27, %v5964_v35  ;;  %v2219_v52 = vpack.c.bf16 %v2215_v50, %v2215_v50 }
 0x44d   : > { %5367 = vmatmul.mubr.msk.bf16.vlgmr.msra.gmra.mrb[16].mxu0 %vm1984_vm2, %v2219_v52  ;;  %v2220_v53 = vpack.c.bf16 %v2216_v51, %v2216_v51 }
 0x44e   : > { %5380 = vmatprep.mubr.msk.bf16.mxu0 %vm5614_vm0, %v5613_v1  ;;  %5377 = vmatpush3.bf16.msra.mxu0 %v5533_v33 }
 0x44f   : > { %5373 = vmatmul.mubr.msk.bf16.vlgmr.msra.gmra.mrb[16].mxu1 %vm1984_vm2, %v2220_v53  ;;  %5378 = vmatprep.subr.bf16.mxu0 %v5613_v1 }
 0x450   : > { %5388 = vmatprep.mubr.msk.bf16.mxu1 %vm5614_vm0, %v5613_v1 }
 0x452   : > { %5379 = vmatpush3.bf16.msra.mxu0 %v5534_v16 }
 0x4fd   : > { %v2262_v54 = vpop.f32.mrb[12].mxu0 }
 0x4fe   : > { %v5356_v55 = vpop.f32.mrb[13].mxu0 }
 0x4ff   : > { %v2265_v56 = vpop.f32.mrb[14].mxu0  ;;  %v2308_v57 = vpop.f32.mrb[12].mxu1 }
 0x500   : > { %v5357_v34 = vpop.f32.mrb[15].mxu0  ;;  %v5362_v58 = vpop.f32.mrb[13].mxu1 }
 0x501   : > { %v2311_v59 = vpop.f32.mrb[14].mxu1 }
 0x502   : > { %v5363_v35 = vpop.f32.mrb[15].mxu1 }
 0x520   : > { %v2354_v60 = vpop.f32.mrb[16].mxu0 }
 0x521   : > { %v2406_v61 = vcombine.low %v2262_v54, %v2354_v60  ;;  %v2407_v62 = vcombine.high %v2262_v54, %v2354_v60  ;;  %v5368_v63 = vpop.f32.mrb[17].mxu0 }
 0x522   : > { %v2357_v0 = vpop.f32.mrb[18].mxu0  ;;  %v2400_v2 = vpop.f32.mrb[16].mxu1 }
 0x523   : > { %v2422_v7 = vcombine.low %v2308_v57, %v2400_v2  ;;  %v2423_v8 = vcombine.high %v2308_v57, %v2400_v2  ;;  %v5369_v9 = vpop.f32.mrb[19].mxu0  ;;  %v5374_v10 = vpop.f32.mrb[17].mxu1  ;;  %v2414_v12 = vrot.slane %v2406_v61, %v5835_v24  ;;  %v2421_v13 = vrot.slane %v2407_v62, %v5835_v24  ;;  %v5535_v2 = vld [vmem:[%s6548_s13] sm:$0xff]  }
 0x524   : > { %v2403_v11 = vpop.f32.mrb[18].mxu1  ;;  %5392 = vmatprep.subr.bf16.mxu0 %v5535_v2 }
 0x525   : > { %v2430_v19 = vrot.slane %v2422_v7, %v5835_v24  ;;  %v2437_v25 = vrot.slane %v2423_v8, %v5835_v24  ;;  %v5375_v26 = vpop.f32.mrb[19].mxu1  ;;  %v5536_v7 = vld [vmem:[%s6548_s13 + $0x8] sm:$0xff]  }
 0x527   : > { %v2438_v29 = vcombine.low %v2414_v12, %v2430_v19  ;;  %v2439_v30 = vcombine.high %v2414_v12, %v2430_v19  ;;  %v2454_v31 = vcombine.low %v2421_v13, %v2437_v25  ;;  %v2455_v32 = vcombine.high %v2421_v13, %v2437_v25  ;;  %v5539_v13 = vld [vmem:[%s6603_s1] sm:$0xff]   ;;  %v5540_v19 = vld [vmem:[%s6603_s1 + $0x8] sm:$0xff]  }
 0x528   : > { %5385 = vmatpush3.bf16.msra.mxu1 %v5539_v13  ;;  %v5206_v25 = vld [vmem:[%s6549_s14] ss:$0 sm:$0xff] }
 0x529   : > { %v2446_v36 = vrot.slane %v2438_v29, %v5838_v28  ;;  %v2453_v37 = vrot.slane %v2439_v30, %v5838_v28  ;;  %v2462_v38 = vrot.slane %v2454_v31, %v5838_v28  ;;  %v2469_v39 = vrot.slane %v2455_v32, %v5838_v28  ;;  %5386 = vmatprep.subr.bf16.mxu1 %v5613_v1 }
 0x52b   : > { %v2474_v40 = vcombine.low %v2446_v36, %v2453_v37  ;;  %v5194_v42 = vcombine.high %v2446_v36, %v2453_v37  ;;  %v2490_v43 = vcombine.low %v2462_v38, %v2469_v39  ;;  %v5195_v14 = vcombine.high %v2462_v38, %v2469_v39 }
 0x52c   : > { %5387 = vmatpush3.bf16.msra.mxu1 %v5540_v19 }
 0x52d   : > { %v2481_v18 = vrot.slane %v2474_v40, %v5835_v24  ;;  %v2489_v22 = vrot.slane %v5194_v42, %v5835_v24  ;;  %v2497_v44 = vrot.slane %v2490_v43, %v5835_v24  ;;  %v2505_v45 = vrot.slane %v5195_v14, %v5835_v24  ;;  %5400 = vmatprep.subr.bf16.mxu1 %v5613_v1 }
 0x52f   : > { %v2507_v46 = vcombine.high %v2481_v18, %v2489_v22  ;;  %v2523_v47 = vcombine.high %v2497_v44, %v2505_v45  ;;  %v2506_v15 = vcombine.low %v2481_v18, %v2489_v22  ;;  %v2522_v17 = vcombine.low %v2497_v44, %v2505_v45 }
 0x531   : > { %v2521_v21 = vrot.slane %v2507_v46, %v5838_v28  ;;  %v2537_v20 = vrot.slane %v2523_v47, %v5838_v28  ;;  %v2514_v23 = vrot.slane %v2506_v15, %v5838_v28  ;;  %v2530_v48 = vrot.slane %v2522_v17, %v5838_v28 }
 0x533   : > { %v2540_v49 = vcombine.low %v2521_v21, %v2537_v20  ;;  %v2539_v50 = vcombine.high %v2514_v23, %v2530_v48  ;;  %v2541_v27 = vcombine.high %v2521_v21, %v2537_v20  ;;  %v2538_v51 = vcombine.low %v2514_v23, %v2530_v48 }
 0x535   : > { %2547 = vrot.lane.b32.xlu1 %v2540_v49, %s6571_s4  ;;  %2543 = vrot.lane.b32.xlu0 %v2539_v50, %s6570_s7  ;;  %s6601_s4 = sld [smem:[#allocation10_spill]]  ;;  %s6604_s7 = smov 112  }
 0x539   : > { %2551 = vrot.lane.b32.xlu0 %v2541_v27, %s6572_s6  ;;  %s6608_s6 = sld [smem:[#allocation12_spill]] }
 0x53b   : > { %v5196_v58 = vld [vmem:[%s6601_s4] ss:$0 sm:$0xff]  ;;  %s5492_s4 = smul.u32 12, %s6619_s8  ;;  %s6612_s8 = smov 8  }
 0x53d   : > { %s1228_s10 = scalar_lea.vmem %s6602_s0, %s5492_s4  ;;  %s6605_s4 = smov 120  }
 0x53e   : > { %v5537_v3 = vld [vmem:[%s1228_s10] sm:$0xff]  }
 0x53f   : > { %v5201_v18 = vld [vmem:[%s6608_s6] ss:$0 sm:$0xff]  ;;  %s6611_s6 = smov 16  }
 0x5a7   : > { %v2544_v52 = vpop.permute.xlu0 %2543  ;;  %v2548_v53 = vpop.permute.xlu1 %2547 }
 0x5a8   : > { %v2554_v54 = vsel %vm1984_vm2, %v2538_v51, %v2544_v52 }
 0x5a9   : > { %v2556_v56 = vsel %vm2555_vm4, %v2554_v54, %v2548_v53 }
 0x5ab   : > { %v2552_v55 = vpop.permute.xlu0 %2551 }
 0x5ac   : > { %v2558_v57 = vsel %vm2557_vm5, %v2556_v56, %v2552_v55 }
 0x5ad   : > { %v2563_v34 = vpack.c.bf16 %v2558_v57, %v2558_v57 }
 0x5af   : > { %5381 = vmatmul.mubr.msk.bf16.vlgmr.msra.gmra.mrb[20].mxu0 %vm1366_vm1, %v2563_v34 }
 0x5b0   : > { %5393 = vmatpush3.bf16.msra.mxu0 %v5535_v2  ;;  %5396 = vmatprep.mubr.msk.bf16.mxu0 %vm1366_vm1, %v5537_v3 }
 0x5b1   : > { %5394 = vmatprep.subr.bf16.mxu0 %v5536_v7 }
 0x5b4   : > { %5395 = vmatpush3.bf16.msra.mxu0 %v5536_v7 }
 0x5b5   : > { %5408 = vmatprep.subr.bf16.mxu0 %v5613_v1 }
 0x682   : > { %v2620_v59 = vpop.f32.mrb[20].mxu0 }
 0x683   : > { %v2621_v35 = vadd.f32 %v5196_v58, %v2620_v59  ;;  %v5382_v60 = vpop.f32.mrb[21].mxu0 }
 0x684   : > { %v2623_v61 = vpop.f32.mrb[22].mxu0 }
 0x685   : > { %v5383_v62 = vpop.f32.mrb[23].mxu0  ;;  %v2626_v63 = vadd.f32 %v2621_v35, %v1340_v6  ;;  %v5538_v6 = vld [vmem:[%s1228_s10 + $0x8] ss:$0 sps:$4 sm:$0x33]   ;;  %s6607_s10 = sld [smem:[#allocation11_spill]] }
 0x686   : > { %5397 = vmatmul.mubr.msk.bf16.vlgmr.msra.gmra.mrb[24].mxu0 %vm1366_vm1, %v5538_v6 }
 0x687   : > { %v2629_v0 = vsel %vm1366_vm1, %v2626_v63, 0.0  ;;  %5412 = vmatprep.mubr.msk.bf16.mxu0 %vm5614_vm0, %v5613_v1 }
 0x688   : > { %2630 = vadd.xlane.f32.xlu1 %v2629_v0 }
 0x68b   : > { %v5200_v14 = vld [vmem:[%s6607_s10] ss:$0 sm:$0xff]  ;;  %s6609_s10 = sld [smem:[#allocation14_spill]] }
 0x715   : > { %v2631_v8 = vpop.xlane.xlu1 %2630 }
 0x716   : > { %v2633_v9 = vmul.f32 0.03125, %v2631_v8 }
 0x718   : > { %v2634_v10 = vsub.f32 %v2626_v63, %v2633_v9 }
 0x71a   : > { %v2635_v11 = vmul.f32 %v2634_v10, %v2634_v10 }
 0x71c   : > { %v2636_v12 = vsel %vm1366_vm1, %v2635_v11, 0.0 }
 0x71d   : > { %2637 = vadd.xlane.f32.xlu0 %v2636_v12 }
 0x759   : > { %v5398_v26 = vpop.f32.mrb[24].mxu0 }
 0x75a   : > { %v2797_v29 = vpop.f32.mrb[25].mxu0  ;;  %v2806_v33 = vadd.f32 %v5398_v26, %v5206_v25 }
 0x75b   : > { %v2798_v30 = vadd.f32 %v5206_v25, %v2797_v29  ;;  %v5399_v31 = vpop.f32.mrb[26].mxu0 }
 0x75c   : > { %v2800_v32 = vpop.f32.mrb[27].mxu0  ;;  %v6079_v38 = vpack.c.bf16 %v2806_v33, %v2806_v33 }
 0x75d   : > { %v2801_v36 = vadd.f32 %v5206_v25, %v2800_v32 }
 0x75f   : > { %v6077_v37 = vpack.c.bf16 %v2801_v36, %v2798_v30 }
 0x761   : > { %2988 = vrot.lane.b32.xlu1 %v6077_v37, %s6604_s7  ;;  %2983 = vrot.lane.b32.xlu0 %v6077_v37, %s6605_s4  ;;  %v2998_v47 = vcombine.high %v6077_v37, %v5621_v41  ;;  %v3005_v15 = vrot.slane %v6077_v37, %v5835_v24 }
 0x763   : > { %v3012_v4 = vrot.slane %v2998_v47, %v5835_v24 }
 0x765   : > { %2993 = vrot.lane.b32.xlu1 %v6077_v37, %s6606_s2  ;;  %2985 = vrot.lane.b32.xlu0 %v6079_v38, %s6605_s4 }
 0x769   : > { %2990 = vrot.lane.b32.xlu1 %v6079_v38, %s6604_s7  ;;  %2995 = vrot.lane.b32.xlu0 %v6079_v38, %s6606_s2 }
 0x7aa   : > { %v2638_v39 = vpop.xlane.xlu0 %2637 }
 0x7ab   : > { %v2639_v40 = vmul.f32 0.03125, %v2638_v39 }
 0x7ad   : > { %v2640_v42 = vadd.f32 1e-05, %v2639_v40 }
 0x7af   : > { %5565 = vrsqrt.f32 %v2640_v42 }
 0x7b9   : > { %v5566_v43 = vpop.eup %5565 }
 0x7ba   : > { %v2642_v16 = vmul.f32 %v5566_v43, %v2634_v10 }
 0x7bc   : > { %v2649_v22 = vmul.f32 %v5200_v14, %v2642_v16 }
 0x7be   : > { %v6099_v44 = vadd.f32 %v5201_v18, %v2649_v22 }
 0x7c0   : > { %v2657_v45 = vadd.f32 %v6099_v44, %v1336_v5 }
 0x7c2   : > { %v2658_v46 = vpack.c.bf16 %v2657_v45, %v2657_v45 }
 0x7c4   : > { %5389 = vmatmul.mubr.msk.bf16.vlgmr.msra.gmra.mrb[20].mxu1 %vm1366_vm1, %v2658_v46 }
 0x7c5   : > { %5404 = vmatprep.mubr.msk.bf16.mxu1 %vm5614_vm0, %v5613_v1 }
 0x7d3   : > { %v6111_v17 = vpop.permute.xlu1 %2988  ;;  %v6113_v21 = vpop.permute.xlu0 %2983 }
 0x7d4   : > { %v3013_v5 = vcombine.high %v6111_v17, %v5621_v41  ;;  %v3020_v20 = vrot.slane %v6111_v17, %v5835_v24  ;;  %v3064_v23 = vcombine.high %v6113_v21, %v5621_v41  ;;  %v3071_v51 = vrot.slane %v6113_v21, %v5835_v24 }
 0x7d6   : > { %v3027_v48 = vrot.slane %v3013_v5, %v5835_v24  ;;  %v3028_v49 = vcombine.low %v3005_v15, %v3020_v20  ;;  %v3029_v50 = vcombine.high %v3005_v15, %v3020_v20  ;;  %v3078_v58 = vrot.slane %v3064_v23, %v5835_v24 }
 0x7d7   : > { %v6123_v27 = vpop.permute.xlu1 %2993  ;;  %v6129_v56 = vpop.permute.xlu0 %2985 }
 0x7d8   : > { %v3036_v52 = vrot.slane %v3028_v49, %v5838_v28  ;;  %v3043_v53 = vrot.slane %v3029_v50, %v5838_v28  ;;  %v3044_v54 = vcombine.low %v3012_v4, %v3027_v48  ;;  %v3045_v55 = vcombine.high %v3012_v4, %v3027_v48 }
 0x7d9   : > { %v3079_v57 = vcombine.high %v6123_v27, %v5621_v41  ;;  %v3086_v34 = vrot.slane %v6123_v27, %v5835_v24 }
 0x7da   : > { %v6137_v59 = vrot.slane %v3044_v54, %v5838_v28  ;;  %v6140_v35 = vrot.slane %v3045_v55, %v5838_v28  ;;  %v3060_v60 = vcombine.high %v3036_v52, %v5621_v41  ;;  %v3061_v61 = vcombine.high %v3043_v53, %v5621_v41 }
 0x7db   : > { %v3155_v62 = vshrl.u32 %v3036_v52, 16  ;;  %v3093_v63 = vrot.slane %v3079_v57, %v5835_v24  ;;  %v3094_v0 = vcombine.low %v3071_v51, %v3086_v34  ;;  %v3171_v6 = vshrl.u32 %v3043_v53, 16  ;;  %v6151_v12 = vpop.permute.xlu1 %2990  ;;  %v6154_v29 = vpop.permute.xlu0 %2995 }
 0x7dc   : > { %v3062_v2 = vcombine.high %v6137_v59, %v5621_v41  ;;  %v3063_v7 = vcombine.high %v6140_v35, %v5621_v41  ;;  %v3163_v3 = vshrl.u32 %v3060_v60, 16  ;;  %v3179_v8 = vshrl.u32 %v3061_v61, 16 }
 0x7dd   : > { %v3187_v9 = vshrl.u32 %v6137_v59, 16  ;;  %v3095_v10 = vcombine.high %v3071_v51, %v3086_v34  ;;  %v3102_v11 = vrot.slane %v3094_v0, %v5838_v28  ;;  %v3203_v19 = vshrl.u32 %v6140_v35, 16 }
 0x7de   : > { %v3195_v13 = vshrl.u32 %v3062_v2, 16  ;;  %v3110_v25 = vcombine.low %v3078_v58, %v3093_v63  ;;  %v3111_v26 = vcombine.high %v3078_v58, %v3093_v63  ;;  %v3211_v30 = vshrl.u32 %v3063_v7, 16 }
 0x7df   : > { %v3109_v31 = vrot.slane %v3095_v10, %v5838_v28  ;;  %v3126_v32 = vcombine.high %v3102_v11, %v5621_v41  ;;  %v3156_v33 = vshrl.u32 %v3102_v11, 16  ;;  %v3153_v40 = vpack.i.b16 %v3102_v11, %v3036_v52 }
 0x7e0   : > { %v3118_v36 = vrot.slane %v3110_v25, %v5838_v28  ;;  %v3125_v39 = vrot.slane %v3111_v26, %v5838_v28  ;;  %v3131_v42 = vcombine.low %v6079_v38, %v6151_v12  ;;  %v3142_v18 = vcombine.low %v6129_v56, %v6154_v29 }
 0x7e1   : > { %v3127_v43 = vcombine.high %v3109_v31, %v5621_v41  ;;  %v3157_v14 = vpack.i.b16 %v3156_v33, %v3155_v62  ;;  %v3164_v16 = vshrl.u32 %v3126_v32, 16  ;;  %v3169_v46 = vpack.i.b16 %v3109_v31, %v3043_v53 }
 0x7e2   : > { %v3128_v22 = vcombine.high %v3118_v36, %v5621_v41  ;;  %v3129_v45 = vcombine.high %v3125_v39, %v5621_v41  ;;  %v3172_v47 = vshrl.u32 %v3109_v31, 16  ;;  %v3161_v15 = vpack.i.b16 %v3126_v32, %v3060_v60 }
 0x7e3   : > { %v3165_v4 = vpack.i.b16 %v3164_v16, %v3163_v3  ;;  %v3177_v5 = vpack.i.b16 %v3127_v43, %v3061_v61  ;;  %v3180_v20 = vshrl.u32 %v3127_v43, 16  ;;  %v3185_v48 = vpack.i.b16 %v3118_v36, %v6137_v59 }
 0x7e4   : > { %v3173_v23 = vpack.i.b16 %v3172_v47, %v3171_v6  ;;  %v3188_v49 = vshrl.u32 %v3118_v36, 16  ;;  %v3196_v50 = vshrl.u32 %v3128_v22, 16  ;;  %v3193_v52 = vpack.i.b16 %v3128_v22, %v3062_v2 }
 0x7e5   : > { %v3181_v51 = vpack.i.b16 %v3180_v20, %v3179_v8  ;;  %v3201_v54 = vpack.i.b16 %v3125_v39, %v6140_v35  ;;  %v3204_v55 = vshrl.u32 %v3125_v39, 16  ;;  %v3209_v57 = vpack.i.b16 %v3129_v45, %v3063_v7 }
 0x7e6   : > { %v3212_v34 = vshrl.u32 %v3129_v45, 16  ;;  %v3227_v58 = vcombine.low %v3153_v40, %v3169_v46  ;;  %v3138_v53 = vrot.slane %v3131_v42, %v5838_v28  ;;  %v3189_v62 = vpack.i.b16 %v3188_v49, %v3187_v9 }
 0x7e7   : > { %v3205_v60 = vpack.i.b16 %v3204_v55, %v3203_v19  ;;  %v3149_v61 = vrot.slane %v3142_v18, %v5838_v28  ;;  %v3235_v63 = vcombine.low %v3161_v15, %v3177_v5  ;;  %v3197_v3 = vpack.i.b16 %v3196_v50, %v3195_v13 }
 0x7e8   : > { %v3139_v0 = vcombine.high %v3138_v53, %v5621_v41  ;;  %v3218_v59 = vshrl.u32 %v3138_v53, 16  ;;  %v3234_v6 = vrot.slane %v3227_v58, %v5835_v24  ;;  %v3213_v8 = vpack.i.b16 %v3212_v34, %v3211_v30 }
 0x7e9   : > { %v3150_v2 = vcombine.high %v3149_v61, %v5621_v41  ;;  %v3219_v35 = vshrl.u32 %v3149_v61, 16  ;;  %v3242_v7 = vrot.slane %v3235_v63, %v5835_v24  ;;  %v3243_v11 = vcombine.low %v3185_v48, %v3201_v54 }
 0x7ea   : > { %v3224_v10 = vshrl.u32 %v3139_v0, 16  ;;  %v3251_v25 = vcombine.low %v3193_v52, %v3209_v57  ;;  %v3277_v9 = vcombine.low %v3157_v14, %v3173_v23  ;;  %v3217_v19 = vpack.i.b16 %v3149_v61, %v3138_v53 }
 0x7eb   : > { %v3225_v26 = vshrl.u32 %v3150_v2, 16  ;;  %v3259_v31 = vcombine.low %v3234_v6, %v3242_v7  ;;  %v3250_v32 = vrot.slane %v3243_v11, %v5835_v24  ;;  %v3285_v36 = vcombine.low %v3165_v4, %v3181_v51 }
 0x7ec   : > { %v3258_v33 = vrot.slane %v3251_v25, %v5835_v24  ;;  %v3284_v13 = vrot.slane %v3277_v9, %v5835_v24  ;;  %v3220_v39 = vpack.i.b16 %v3219_v35, %v3218_v59  ;;  %v3223_v40 = vpack.i.b16 %v3150_v2, %v3139_v0 }
 0x7ed   : > { %v3226_v42 = vpack.i.b16 %v3225_v26, %v3224_v10  ;;  %v3293_v30 = vcombine.low %v3189_v62, %v3205_v60  ;;  %v3266_v43 = vrot.slane %v3259_v31, %v5838_v28  ;;  %v3292_v18 = vrot.slane %v3285_v36, %v5835_v24  ;;  %v5202_v26 = vld [vmem:[%s6609_s10] ss:$0 sm:$0xff] }
 0x7ee   : > { %v3267_v16 = vcombine.low %v3250_v32, %v3258_v33  ;;  %v3301_v14 = vcombine.low %v3197_v3, %v3213_v8  ;;  %v3329_v15 = vcombine.low %v3217_v19, %v3223_v40 }
 0x7ef   : > { %v3300_v22 = vrot.slane %v3293_v30, %v5835_v24  ;;  %v3309_v47 = vcombine.low %v3284_v13, %v3292_v18  ;;  %v3340_v23 = vcombine.low %v3220_v39, %v3226_v42 }
 0x7f0   : > { %v3274_v45 = vrot.slane %v3267_v16, %v5838_v28  ;;  %v3308_v46 = vrot.slane %v3301_v14, %v5835_v24  ;;  %v3336_v51 = vrot.slane %v3329_v15, %v5838_v28 }
 0x7f1   : > { %v3316_v4 = vrot.slane %v3309_v47, %v5838_v28  ;;  %v3347_v52 = vrot.slane %v3340_v23, %v5838_v28 }
 0x7f2   : > { %v3275_v5 = vcombine.low %v3266_v43, %v3274_v45  ;;  %v3317_v20 = vcombine.low %v3300_v22, %v3308_v46  ;;  %v3364_v58 = vshrl.u32 %v3336_v51, 16  ;;  %v6194_v59 = vcombine.high %v3336_v51, %v5621_v41 }
 0x7f3   : > { %v3365_v53 = vshrl.u32 %v3347_v52, 16  ;;  %v3363_v60 = vpack.i.b16 %v3347_v52, %v3336_v51  ;;  %v6197_v3 = vcombine.high %v3347_v52, %v5621_v41  ;;  %v6207_v7 = vcombine.high %v3266_v43, %v3274_v45 }
 0x7f4   : > { %v3324_v48 = vrot.slane %v3317_v20, %v5838_v28  ;;  %v3352_v50 = vshrl.u32 %v3275_v5, 16  ;;  %v3370_v2 = vshrl.u32 %v6194_v59, 16 }
 0x7f5   : > { %v3366_v61 = vpack.i.b16 %v3365_v53, %v3364_v58  ;;  %v3780_v63 = vsel %vm1984_vm2, %v3363_v60, 0  ;;  %v3369_v6 = vpack.i.b16 %v6197_v3, %v6194_v59  ;;  %v3371_v35 = vshrl.u32 %v6197_v3, 16 }
 0x7f6   : > { %v3325_v49 = vcombine.low %v3316_v4, %v3324_v48  ;;  %v6209_v10 = vcombine.high %v3316_v4, %v3324_v48  ;;  %v3358_v25 = vshrl.u32 %v6207_v7, 16 }
 0x7f7   : > { %v3829_v0 = vsel %vm1984_vm2, %v3366_v61, 0  ;;  %v6205_v8 = vpack.i.b16 %v3371_v35, %v3370_v2 }
 0x7f8   : > { %v3351_v54 = vpack.i.b16 %v3325_v49, %v3275_v5  ;;  %v3353_v55 = vshrl.u32 %v3325_v49, 16  ;;  %v3357_v11 = vpack.i.b16 %v6209_v10, %v6207_v7  ;;  %v3359_v9 = vshrl.u32 %v6209_v10, 16 }
 0x7fa   : > { %v3777_v57 = vsel %vm1984_vm2, %v3351_v54, 0  ;;  %v3354_v34 = vpack.i.b16 %v3353_v55, %v3352_v50  ;;  %v6215_v19 = vpack.i.b16 %v3359_v9, %v3358_v25 }
 0x7fb   : > { %5401 = vmatpush3.bf16.xpose.msra.mxu1 %v3777_v57 }
 0x7fc   : > { %v3826_v62 = vsel %vm1984_vm2, %v3354_v34, 0  ;;  %5402 = vmatprep.subr.bf16.mxu1 %v5613_v1 }
 0x7fd   : > { %5409 = vmatpush3.bf16.xpose.msra.mxu0 %v3826_v62 }
 0x7fe   : > { %5410 = vmatprep.subr.bf16.mxu0 %v5613_v1 }
 0x803   : > { %5403 = vmatpush3.bf16.xpose.msra.mxu1 %v3780_v63 }
 0x804   : > { %5416 = vmatprep.subr.bf16.mxu1 %v5613_v1 }
 0x805   : > { %5411 = vmatpush3.bf16.xpose.msra.mxu0 %v3829_v0 }
 0x806   : > { %5424 = vmatprep.subr.bf16.mxu0 %v5613_v1 }
 0x897   : > { %v2719_v31 = vpop.f32.mrb[20].mxu1 }
 0x898   : > { %v2720_v32 = vadd.f32 %v5202_v26, %v2719_v31  ;;  %v5390_v33 = vpop.f32.mrb[21].mxu1 }
 0x899   : > { %v2722_v13 = vpop.f32.mrb[22].mxu1 }
 0x89a   : > { %v2725_v36 = vpack.c.bf16 %v2720_v32, %v2720_v32  ;;  %v5391_v39 = vpop.f32.mrb[23].mxu1 }
 0x89c   : > { %2814 = vrot.lane.b32.xlu1 %v2725_v36, %s6605_s4  ;;  %2816 = vrot.lane.b32.xlu0 %v2725_v36, %s6604_s7  ;;  %v2826_v30 = vrot.slane %v2725_v36, %v5835_v24 }
 0x8a0   : > { %2818 = vrot.lane.b32.xlu1 %v2725_v36, %s6606_s2  ;;  %3377 = vrot.lane.b32.xlu0 %v6113_v21, %s6610_s3 }
 0x8a4   : > { %3373 = vrot.lane.b32.xlu1 %v6077_v37, %s6610_s3 }
 0x8a8   : > { %3381 = vrot.lane.b32.xlu1 %v6111_v17, %s6610_s3 }
 0x8ac   : > { %3385 = vrot.lane.b32.xlu1 %v6123_v27, %s6610_s3 }
 0x90e   : > { %v2815_v40 = vpop.permute.xlu1 %2814  ;;  %v2817_v42 = vpop.permute.xlu0 %2816 }
 0x90f   : > { %v2834_v43 = vrot.slane %v2817_v42, %v5835_v24  ;;  %v2860_v17 = vrot.slane %v2815_v40, %v5835_v24 }
 0x911   : > { %v2835_v16 = vcombine.low %v2826_v30, %v2834_v43  ;;  %v2836_v18 = vcombine.high %v2826_v30, %v2834_v43 }
 0x912   : > { %v2819_v14 = vpop.permute.xlu1 %2818  ;;  %v3378_v45 = vpop.permute.xlu0 %3377 }
 0x913   : > { %v2843_v21 = vrot.slane %v2835_v16, %v5838_v28  ;;  %v2850_v22 = vrot.slane %v2836_v18, %v5838_v28  ;;  %v2868_v37 = vrot.slane %v2819_v14, %v5835_v24  ;;  %v3459_v20 = vcombine.high %v3378_v45, %v5621_v41 }
 0x915   : > { %v2851_v27 = vcombine.high %v2843_v21, %v5621_v41  ;;  %v2852_v46 = vcombine.high %v2850_v22, %v5621_v41  ;;  %v2869_v47 = vcombine.low %v2860_v17, %v2868_v37  ;;  %v2870_v15 = vcombine.high %v2860_v17, %v2868_v37 }
 0x916   : > { %v3374_v5 = vpop.permute.xlu1 %3373  ;;  %v2891_v23 = vshrl.u32 %v2843_v21, 16  ;;  %v2907_v48 = vshrl.u32 %v2850_v22, 16 }
 0x917   : > { %v3393_v4 = vcombine.high %v3374_v5, %v5621_v41  ;;  %v2877_v49 = vrot.slane %v2869_v47, %v5838_v28  ;;  %v2884_v50 = vrot.slane %v2870_v15, %v5838_v28  ;;  %v2899_v51 = vshrl.u32 %v2851_v27, 16 }
 0x918   : > { %v2915_v52 = vshrl.u32 %v2852_v46, 16  ;;  %v3400_v54 = vrot.slane %v3374_v5, %v5835_v24 }
 0x919   : > { %v3407_v55 = vrot.slane %v3393_v4, %v5835_v24  ;;  %v2885_v57 = vcombine.high %v2877_v49, %v5621_v41  ;;  %v2886_v34 = vcombine.high %v2884_v50, %v5621_v41  ;;  %v2889_v58 = vpack.i.b16 %v2877_v49, %v2843_v21 }
 0x91a   : > { %v2892_v53 = vshrl.u32 %v2877_v49, 16  ;;  %v3382_v62 = vpop.permute.xlu1 %3381  ;;  %v2905_v60 = vpack.i.b16 %v2884_v50, %v2850_v22  ;;  %v2908_v61 = vshrl.u32 %v2884_v50, 16  ;;  %v3466_v49 = vrot.slane %v3378_v45, %v5835_v24 }
 0x91b   : > { %v3408_v63 = vcombine.high %v3382_v62, %v5621_v41  ;;  %v3415_v0 = vrot.slane %v3382_v62, %v5835_v24  ;;  %v2897_v35 = vpack.i.b16 %v2885_v57, %v2851_v27  ;;  %v2900_v25 = vshrl.u32 %v2885_v57, 16 }
 0x91c   : > { %v2893_v2 = vpack.i.b16 %v2892_v53, %v2891_v23  ;;  %v2913_v9 = vpack.i.b16 %v2886_v34, %v2852_v46  ;;  %v2909_v26 = vpack.i.b16 %v2908_v61, %v2907_v48  ;;  %v2916_v31 = vshrl.u32 %v2886_v34, 16 }
 0x91d   : > { %v2919_v32 = vcombine.low %v2889_v58, %v2905_v60  ;;  %v3422_v33 = vrot.slane %v3408_v63, %v5835_v24  ;;  %v2901_v13 = vpack.i.b16 %v2900_v25, %v2899_v51  ;;  %v3423_v39 = vcombine.low %v3400_v54, %v3415_v0 }
 0x91e   : > { %v2927_v36 = vcombine.low %v2897_v35, %v2913_v9  ;;  %v3424_v40 = vcombine.high %v3400_v54, %v3415_v0  ;;  %v3386_v42 = vpop.permute.xlu1 %3385  ;;  %v2917_v30 = vpack.i.b16 %v2916_v31, %v2915_v52  ;;  %v2944_v16 = vcombine.low %v2893_v2, %v2909_v26 }
 0x91f   : > { %v2926_v43 = vrot.slane %v2919_v32, %v5835_v24  ;;  %v3439_v18 = vcombine.low %v3407_v55, %v3422_v33  ;;  %v6253_v21 = vrot.slane %v3423_v39, %v5838_v28  ;;  %v3440_v37 = vcombine.high %v3407_v55, %v3422_v33 }
 0x920   : > { %v2934_v14 = vrot.slane %v2927_v36, %v5835_v24  ;;  %v6256_v22 = vrot.slane %v3424_v40, %v5838_v28  ;;  %v2952_v17 = vcombine.low %v2901_v13, %v2917_v30  ;;  %v3474_v46 = vcombine.high %v3386_v42, %v5621_v41 }
 0x921   : > { %v6259_v27 = vrot.slane %v3439_v18, %v5838_v28  ;;  %v6263_v15 = vrot.slane %v3440_v37, %v5838_v28  ;;  %v6267_v5 = vcombine.high %v6253_v21, %v5621_v41  ;;  %v2951_v23 = vrot.slane %v2944_v16, %v5835_v24 }
 0x922   : > { %v2935_v47 = vcombine.low %v2926_v43, %v2934_v14  ;;  %v6271_v4 = vcombine.high %v6256_v22, %v5621_v41  ;;  %v2959_v48 = vrot.slane %v2952_v17, %v5835_v24  ;;  %v3551_v51 = vshrl.u32 %v6253_v21, 16 }
 0x923   : > { %v6278_v50 = vcombine.high %v6259_v27, %v5621_v41  ;;  %v3473_v52 = vrot.slane %v3459_v20, %v5835_v24  ;;  %v3875_v54 = vsel %vm1984_vm2, %v3357_v11, 0  ;;  %v3458_v57 = vcombine.high %v6263_v15, %v5621_v41 }
 0x924   : > { %v2960_v55 = vcombine.low %v2951_v23, %v2959_v48  ;;  %v3567_v34 = vshrl.u32 %v6256_v22, 16  ;;  %v3481_v45 = vrot.slane %v3386_v42, %v5835_v24  ;;  %v3559_v58 = vshrl.u32 %v6267_v5, 16 }
 0x925   : > { %v3575_v53 = vshrl.u32 %v6271_v4, 16  ;;  %v3488_v62 = vrot.slane %v3474_v46, %v5835_v24  ;;  %v6294_v20 = vrot.slane %v2935_v47, %v5838_v28  ;;  %v3583_v7 = vshrl.u32 %v6259_v27, 16 }
 0x926   : > { %v3489_v10 = vcombine.low %v3466_v49, %v3481_v45  ;;  %v3490_v11 = vcombine.high %v3466_v49, %v3481_v45  ;;  %v2967_v60 = vrot.slane %v2960_v55, %v5838_v28  ;;  %v3591_v61 = vshrl.u32 %v6278_v50, 16 }
 0x927   : > { %v3599_v63 = vshrl.u32 %v6263_v15, 16  ;;  %v3505_v0 = vcombine.low %v3473_v52, %v3488_v62  ;;  %v3506_v2 = vcombine.high %v3473_v52, %v3488_v62  ;;  %v3607_v35 = vshrl.u32 %v3458_v57, 16 }
 0x928   : > { %v3497_v25 = vrot.slane %v3489_v10, %v5838_v28  ;;  %v3504_v9 = vrot.slane %v3490_v11, %v5838_v28  ;;  %v2971_v26 = vpack.i.b16 %v2967_v60, %v6294_v20  ;;  %v2972_v33 = vshrl.u32 %v6294_v20, 16 }
 0x929   : > { %v3513_v31 = vrot.slane %v3505_v0, %v5838_v28  ;;  %v3520_v32 = vrot.slane %v3506_v2, %v5838_v28  ;;  %v2973_v13 = vshrl.u32 %v2967_v60, 16 }
 0x92a   : > { %v3521_v36 = vcombine.high %v3497_v25, %v5621_v41  ;;  %v3522_v39 = vcombine.high %v3504_v9, %v5621_v41  ;;  %v3549_v40 = vpack.i.b16 %v3497_v25, %v6253_v21  ;;  %v3552_v42 = vshrl.u32 %v3497_v25, 16  ;;  %5405 = vmatmul.mubr.msk.bf16.vlgmr.msra.gmra.mrb[24].mxu1 %vm1984_vm2, %v2971_v26 }
 0x92b   : > { %v3523_v30 = vcombine.high %v3513_v31, %v5621_v41  ;;  %v3524_v43 = vcombine.high %v3520_v32, %v5621_v41  ;;  %v3565_v16 = vpack.i.b16 %v3504_v9, %v6256_v22  ;;  %v3568_v18 = vshrl.u32 %v3504_v9, 16  ;;  %5417 = vmatpush3.bf16.xpose.msra.mxu1 %v3875_v54  ;;  %5420 = vmatprep.mubr.msk.bf16.mxu1 %vm5614_vm0, %v5613_v1 }
 0x92c   : > { %v3553_v14 = vpack.i.b16 %v3552_v42, %v3551_v51  ;;  %v3557_v37 = vpack.i.b16 %v3521_v36, %v6267_v5  ;;  %v3560_v17 = vshrl.u32 %v3521_v36, 16  ;;  %v3573_v21 = vpack.i.b16 %v3522_v39, %v6271_v4  ;;  %5418 = vmatprep.subr.bf16.mxu1 %v5613_v1 }
 0x92d   : > { %v3569_v46 = vpack.i.b16 %v3568_v18, %v3567_v34  ;;  %v3576_v47 = vshrl.u32 %v3522_v39, 16  ;;  %v3581_v23 = vpack.i.b16 %v3513_v31, %v6259_v27  ;;  %v3584_v48 = vshrl.u32 %v3513_v31, 16 }
 0x92e   : > { %v3561_v49 = vpack.i.b16 %v3560_v17, %v3559_v58  ;;  %v3589_v22 = vpack.i.b16 %v3523_v30, %v6278_v50  ;;  %v3592_v52 = vshrl.u32 %v3523_v30, 16  ;;  %v3597_v54 = vpack.i.b16 %v3520_v32, %v6263_v15 }
 0x92f   : > { %v3577_v55 = vpack.i.b16 %v3576_v47, %v3575_v53  ;;  %v3585_v51 = vpack.i.b16 %v3584_v48, %v3583_v7  ;;  %v3600_v45 = vshrl.u32 %v3520_v32, 16  ;;  %v3605_v5 = vpack.i.b16 %v3524_v43, %v3458_v57 }
 0x930   : > { %v3593_v62 = vpack.i.b16 %v3592_v52, %v3591_v61  ;;  %v3608_v10 = vshrl.u32 %v3524_v43, 16  ;;  %v3623_v4 = vcombine.low %v3549_v40, %v3565_v16  ;;  %v3631_v11 = vcombine.low %v3557_v37, %v3573_v21 }
 0x931   : > { %v3601_v0 = vpack.i.b16 %v3600_v45, %v3599_v63  ;;  %v3639_v34 = vcombine.low %v3581_v23, %v3597_v54  ;;  %v3647_v2 = vcombine.low %v3589_v22, %v3605_v5  ;;  %v3673_v25 = vcombine.low %v3553_v14, %v3569_v46 }
 0x932   : > { %v3609_v27 = vpack.i.b16 %v3608_v10, %v3607_v35  ;;  %v3681_v9 = vcombine.low %v3561_v49, %v3577_v55  ;;  %v2974_v58 = vpack.i.b16 %v2973_v13, %v2972_v33  ;;  %v3878_v15 = vsel %vm1984_vm2, %v3369_v6, 0 }
 0x933   : > { %v3630_v50 = vrot.slane %v3623_v4, %v5835_v24  ;;  %v3689_v53 = vcombine.low %v3585_v51, %v3601_v0  ;;  %5419 = vmatpush3.bf16.xpose.msra.mxu1 %v3878_v15  ;;  %v2968_v57 = vcombine.high %v2967_v60, %v5621_v41  ;;  %v3638_v7 = vrot.slane %v3631_v11, %v5835_v24 }
 0x934   : > { %5413 = vmatmul.mubr.msk.bf16.vlgmr.msra.gmra.mrb[28].mxu0 %vm1984_vm2, %v2974_v58  ;;  %v3924_v61 = vsel %vm1984_vm2, %v6215_v19, 0  ;;  %5432 = vmatprep.subr.bf16.mxu1 %v5613_v1  ;;  %v3646_v63 = vrot.slane %v3639_v34, %v5835_v24  ;;  %v3654_v59 = vrot.slane %v3647_v2, %v5835_v24  ;;  %v3688_v3 = vrot.slane %v3681_v9, %v5835_v24 }
 0x935   : > { %5425 = vmatpush3.bf16.xpose.msra.mxu0 %v3924_v61  ;;  %5428 = vmatprep.mubr.msk.bf16.mxu0 %vm5614_vm0, %v5613_v1  ;;  %v3655_v6 = vcombine.low %v3630_v50, %v3638_v7  ;;  %v3680_v60 = vrot.slane %v3673_v25, %v5835_v24  ;;  %v3697_v35 = vcombine.low %v3593_v62, %v3609_v27  ;;  %v3927_v16 = vsel %vm1984_vm2, %v6205_v8, 0 }
 0x936   : > { %5426 = vmatprep.subr.bf16.mxu0 %v5613_v1  ;;  %v2943_v19 = vcombine.high %v6294_v20, %v5621_v41  ;;  %v3663_v26 = vcombine.low %v3646_v63, %v3654_v59  ;;  %v3696_v31 = vrot.slane %v3689_v53, %v5835_v24  ;;  %v2979_v37 = vshrl.u32 %v2968_v57, 16 }
 0x937   : > { %v3704_v32 = vrot.slane %v3697_v35, %v5835_v24  ;;  %v3705_v33 = vcombine.low %v3680_v60, %v3688_v3  ;;  %v3662_v36 = vrot.slane %v3655_v6, %v5838_v28 }
 0x938   : > { %v2977_v13 = vpack.i.b16 %v2968_v57, %v2943_v19  ;;  %v3670_v39 = vrot.slane %v3663_v26, %v5838_v28  ;;  %v2978_v49 = vshrl.u32 %v2943_v19, 16 }
 0x939   : > { %v3713_v40 = vcombine.low %v3696_v31, %v3704_v32  ;;  %v3712_v43 = vrot.slane %v3705_v33, %v5838_v28 }
 0x93a   : > { %5421 = vmatmul.mubr.msk.bf16.vlgmr.msra.gmra.mrb[28].mxu1 %vm1984_vm2, %v2977_v13  ;;  %v3671_v42 = vcombine.low %v3662_v36, %v3670_v39  ;;  %v6346_v30 = vcombine.high %v3662_v36, %v3670_v39  ;;  %v2980_v52 = vpack.i.b16 %v2979_v37, %v2978_v49 }
 0x93b   : > { %v3720_v20 = vrot.slane %v3713_v40, %v5838_v28  ;;  %5436 = vmatprep.mubr.msk.bf16.mxu1 %vm5614_vm0, %v5613_v1 }
 0x93c   : > { %v3749_v17 = vshrl.u32 %v3671_v42, 16  ;;  %v3757_v21 = vshrl.u32 %v6346_v30, 16 }
 0x93d   : > { %5427 = vmatpush3.bf16.xpose.msra.mxu0 %v3927_v16  ;;  %v3721_v18 = vcombine.low %v3712_v43, %v3720_v20  ;;  %v6354_v14 = vcombine.high %v3712_v43, %v3720_v20 }
 0x93e   : > { %5440 = vmatprep.subr.bf16.mxu0 %v5613_v1 }
 0x93f   : > { %v3747_v46 = vpack.i.b16 %v3721_v18, %v3671_v42  ;;  %v3750_v47 = vshrl.u32 %v3721_v18, 16  ;;  %v3755_v23 = vpack.i.b16 %v6354_v14, %v6346_v30  ;;  %v3758_v48 = vshrl.u32 %v6354_v14, 16 }
 0x941   : > { %5433 = vmatpush3.bf16.msra.mxu1 %v3747_v46  ;;  %v3751_v8 = vpack.i.b16 %v3750_v47, %v3749_v17  ;;  %v6361_v22 = vpack.i.b16 %v3758_v48, %v3757_v21 }
 0x942   : > { %5434 = vmatprep.subr.bf16.mxu1 %v5613_v1 }
 0x944   : > { %5429 = vmatmul.mubr.msk.bf16.vlgmr.msra.gmra.mrb[32].mxu0 %vm1984_vm2, %v2980_v52 }
 0x945   : > { %5441 = vmatpush3.bf16.msra.mxu0 %v3751_v8  ;;  %5444 = vmatprep.mubr.msk.bf16.mxu0 %vm5614_vm0, %v5613_v1 }
 0x946   : > { %5442 = vmatprep.subr.bf16.mxu0 %v5613_v1 }
 0x9fd   : > { %v3816_v54 = vpop.f32.mrb[24].mxu1 }
 0x9fe   : > { %v3969_v55 = vmul.f32 0.35355338, %v3816_v54  ;;  %v5406_v51 = vpop.f32.mrb[25].mxu1 }
 0x9ff   : > { %v3819_v45 = vpop.f32.mrb[26].mxu1 }
 0xa00   : > { %v5407_v5 = vpop.f32.mrb[27].mxu1  ;;  %v3974_v62 = vsel %vm3973_vm6, %v3969_v55, -inf }
 0xa01   : > { %3975 = vmax.xlane.f32.xlu0 %v3974_v62 }
 0xa07   : > { %v3865_v10 = vpop.f32.mrb[28].mxu0 }
 0xa08   : > { %v3970_v4 = vmul.f32 0.35355338, %v3865_v10  ;;  %v5414_v11 = vpop.f32.mrb[29].mxu0 }
 0xa09   : > { %v3868_v0 = vpop.f32.mrb[30].mxu0 }
 0xa0a   : > { %v5415_v34 = vpop.f32.mrb[31].mxu0  ;;  %v3977_v2 = vsel %vm3973_vm6, %v3970_v4, -inf }
 0xa0b   : > { %3978 = vmax.xlane.f32.xlu1 %v3977_v2 }
 0xa0d   : > { %v3914_v25 = vpop.f32.mrb[28].mxu1 }
 0xa0e   : > { %v3971_v27 = vmul.f32 0.35355338, %v3914_v25  ;;  %v5422_v9 = vpop.f32.mrb[29].mxu1 }
 0xa0f   : > { %v3917_v58 = vpop.f32.mrb[30].mxu1 }
 0xa10   : > { %v5423_v15 = vpop.f32.mrb[31].mxu1  ;;  %v3980_v50 = vsel %vm3973_vm6, %v3971_v27, -inf }
 0xa11   : > { %3981 = vmax.xlane.f32.xlu0 %v3980_v50 }
 0xa17   : > { %v3963_v53 = vpop.f32.mrb[32].mxu0 }
 0xa18   : > { %v3972_v57 = vmul.f32 0.35355338, %v3963_v53  ;;  %v5430_v7 = vpop.f32.mrb[33].mxu0 }
 0xa19   : > { %v3966_v61 = vpop.f32.mrb[34].mxu0 }
 0xa1a   : > { %v5431_v63 = vpop.f32.mrb[35].mxu0  ;;  %v3983_v59 = vsel %vm3973_vm6, %v3972_v57, -inf }
 0xa1b   : > { %3984 = vmax.xlane.f32.xlu0 %v3983_v59 }
 0xa1c   : > { %3379 = vrot.lane.b32.xlu1 %v6129_v56, %s6610_s3 }
 0xa31   : > { %3375 = vrot.lane.b32.xlu0 %v6079_v38, %s6610_s3 }
 0xa8e   : > { %v3976_v3 = vpop.xlane.xlu0 %3975 }
 0xa8f   : > { %v3986_v6 = vsub.f32 %v3969_v55, %v3976_v3 }
 0xa91   : > { %v3990_v60 = vmul.f32 1.442695, %v3986_v6 }
 0xa93   : > { %5567 = vpow2.f32 %v3990_v60 }
 0xa98   : > { %v3979_v35 = vpop.xlane.xlu1 %3978 }
 0xa99   : > { %v3987_v19 = vsub.f32 %v3970_v4, %v3979_v35 }
 0xa9b   : > { %v3992_v26 = vmul.f32 1.442695, %v3987_v19 }
 0xa9c   : > { %v3380_v37 = vpop.permute.xlu1 %3379 }
 0xa9d   : > { %v5568_v31 = vpop.eup %5567  ;;  %5569 = vpow2.f32 %v3992_v26 }
 0xa9e   : > { %v3998_v32 = vsel %vm3973_vm6, %v5568_v31, 0.0  ;;  %v3982_v38 = vpop.xlane.xlu0 %3981 }
 0xa9f   : > { %3999 = vadd.xlane.f32.xlu0 %v3998_v32  ;;  %v3988_v56 = vsub.f32 %v3971_v27, %v3982_v38 }
 0xaa1   : > { %v3994_v36 = vmul.f32 1.442695, %v3988_v56 }
 0xaa3   : > { %5571 = vpow2.f32 %v3994_v36 }
 0xaa7   : > { %v5570_v33 = vpop.eup %5569 }
 0xaa8   : > { %v4001_v13 = vsel %vm3973_vm6, %v5570_v33, 0.0  ;;  %v3985_v39 = vpop.xlane.xlu0 %3984 }
 0xaa9   : > { %4002 = vadd.xlane.f32.xlu1 %v4001_v13  ;;  %v3989_v40 = vsub.f32 %v3972_v57, %v3985_v39 }
 0xaab   : > { %v3996_v42 = vmul.f32 1.442695, %v3989_v40 }
 0xaad   : > { %v6382_v43 = vpop.eup %5571  ;;  %5573 = vpow2.f32 %v3996_v42 }
 0xaae   : > { %v4004_v20 = vsel %vm3973_vm6, %v6382_v43, 0.0 }
 0xab5   : > { %3383 = vrot.lane.b32.xlu0 %v6151_v12, %s6610_s3 }
 0xab7   : > { %v6386_v16 = vpop.eup %5573 }
 0xab8   : > { %v4007_v12 = vsel %vm3973_vm6, %v6386_v16, 0.0 }
 0xaba   : > { %3387 = vrot.lane.b32.xlu1 %v6154_v29, %s6610_s3  ;;  %v3376_v29 = vpop.permute.xlu0 %3375  ;;  %s1324_s3 = scalar_lea.vmem %s6562_s27, %s5804_s29 }
 0xad4   : > { %4005 = vadd.xlane.f32.xlu0 %v4004_v20 }
 0xade   : > { %4008 = vadd.xlane.f32.xlu1 %v4007_v12 }
 0xb2c   : > { %v4000_v18 = vpop.xlane.xlu0 %3999 }
 0xb2d   : > { %5575 = vrcp.f32 %v4000_v18 }
 0xb30   : > { %v3384_v17 = vpop.permute.xlu0 %3383 }
 0xb31   : > { %v3527_v21 = vcombine.low %v3376_v29, %v3384_v17 }
 0xb33   : > { %v3534_v47 = vrot.slane %v3527_v21, %v5838_v28 }
 0xb35   : > { %v3535_v8 = vcombine.high %v3534_v47, %v5621_v41  ;;  %v3614_v51 = vshrl.u32 %v3534_v47, 16 }
 0xb36   : > { %v4003_v46 = vpop.xlane.xlu1 %4002 }
 0xb37   : > { %5577 = vrcp.f32 %v4003_v46  ;;  %v3620_v45 = vshrl.u32 %v3535_v8, 16  ;;  %v5576_v34 = vpop.eup %5575 }
 0xb38   : > { %v4014_v58 = vmul.f32 %v5576_v34, %v5568_v31 }
 0xb3a   : > { %v3388_v48 = vpop.permute.xlu1 %3387  ;;  %v4018_v6 = vpack.c.bf16 %v4014_v58, %v4014_v58 }
 0xb3b   : > { %v3538_v49 = vcombine.low %v3380_v37, %v3388_v48 }
 0xb3d   : > { %v3545_v52 = vrot.slane %v3538_v49, %v5838_v28 }
 0xb3f   : > { %v3546_v54 = vcombine.high %v3545_v52, %v5621_v41  ;;  %v3615_v55 = vshrl.u32 %v3545_v52, 16  ;;  %v3613_v5 = vpack.i.b16 %v3545_v52, %v3534_v47 }
 0xb41   : > { %v3619_v62 = vpack.i.b16 %v3546_v54, %v3535_v8  ;;  %v3621_v10 = vshrl.u32 %v3546_v54, 16  ;;  %v3616_v4 = vpack.i.b16 %v3615_v55, %v3614_v51  ;;  %v5578_v9 = vpop.eup %5577 }
 0xb42   : > { %v4015_v7 = vmul.f32 %v5578_v9, %v5570_v33 }
 0xb43   : > { %v3622_v11 = vpack.i.b16 %v3621_v10, %v3620_v45  ;;  %v3725_v0 = vcombine.low %v3613_v5, %v3619_v62 }
 0xb44   : > { %v4019_v35 = vpack.c.bf16 %v4015_v7, %v4015_v7 }
 0xb45   : > { %v3736_v2 = vcombine.low %v3616_v4, %v3622_v11  ;;  %v3732_v25 = vrot.slane %v3725_v0, %v5838_v28  ;;  %v5541_v0 = vld [vmem:[%s6550_s15] sm:$0xff]  }
 0xb47   : > { %v3743_v27 = vrot.slane %v3736_v2, %v5838_v28  ;;  %v3764_v50 = vshrl.u32 %v3732_v25, 16  ;;  %v3733_v59 = vcombine.high %v3732_v25, %v5621_v41 }
 0xb49   : > { %v3763_v15 = vpack.i.b16 %v3743_v27, %v3732_v25  ;;  %v3765_v53 = vshrl.u32 %v3743_v27, 16  ;;  %v3744_v57 = vcombine.high %v3743_v27, %v5621_v41  ;;  %v3770_v26 = vshrl.u32 %v3733_v59, 16 }
 0xb4b   : > { %v4027_v61 = vsel %vm4025_vm7, %v3763_v15, 0  ;;  %v3766_v63 = vpack.i.b16 %v3765_v53, %v3764_v50  ;;  %v3771_v60 = vshrl.u32 %v3744_v57, 16  ;;  %v3769_v19 = vpack.i.b16 %v3744_v57, %v3733_v59  ;;  %v5542_v53 = vld [vmem:[%s6550_s15 + $0x8] sm:$0xff]  }
 0xb4c   : > { %5435 = vmatpush3.bf16.msra.mxu1 %v4027_v61 }
 0xb4d   : > { %v4073_v3 = vsel %vm4025_vm7, %v3766_v63, 0  ;;  %5448 = vmatprep.subr.bf16.mxu1 %v5613_v1  ;;  %v3772_v41 = vpack.i.b16 %v3771_v60, %v3770_v26  ;;  %v4119_v31 = vsel %vm4025_vm7, %v3769_v19, 0 }
 0xb4e   : > { %5443 = vmatpush3.bf16.msra.mxu0 %v4073_v3 }
 0xb4f   : > { %5437 = vmatmul.mubr.msk.bf16.vlgmr.msra.gmra.mrb[32].mxu1 %vm3973_vm6, %v4018_v6  ;;  %5456 = vmatprep.subr.bf16.mxu0 %v5613_v1  ;;  %v4165_v30 = vsel %vm4025_vm7, %v3772_v41, 0 }
 0xb50   : > { %5449 = vmatpush3.bf16.msra.mxu1 %v3755_v23  ;;  %5452 = vmatprep.mubr.msk.bf16.mxu1 %vm5614_vm0, %v5613_v1 }
 0xb51   : > { %5445 = vmatmul.mubr.msk.bf16.vlgmr.msra.gmra.mrb[36].mxu0 %vm3973_vm6, %v4019_v35  ;;  %5450 = vmatprep.subr.bf16.mxu1 %v5613_v1 }
 0xb52   : > { %5457 = vmatpush3.bf16.msra.mxu0 %v6361_v22  ;;  %5460 = vmatprep.mubr.msk.bf16.mxu0 %vm5614_vm0, %v5613_v1 }
 0xb53   : > { %5458 = vmatprep.subr.bf16.mxu0 %v5613_v1 }
 0xb54   : > { %5451 = vmatpush3.bf16.msra.mxu1 %v4119_v31 }
 0xb55   : > { %5464 = vmatprep.subr.bf16.mxu1 %v5613_v1 }
 0xb56   : > { %5459 = vmatpush3.bf16.msra.mxu0 %v4165_v30 }
 0xb57   : > { %5472 = vmatprep.subr.bf16.mxu0 %v5613_v1 }
 0xb61   : > { %v4006_v14 = vpop.xlane.xlu0 %4005 }
 0xb62   : > { %5579 = vrcp.f32 %v4006_v14 }
 0xb6b   : > { %v4009_v23 = vpop.xlane.xlu1 %4008 }
 0xb6c   : > { %v5580_v32 = vpop.eup %5579  ;;  %5581 = vrcp.f32 %v4009_v23 }
 0xb6d   : > { %v4016_v22 = vmul.f32 %v5580_v32, %v6382_v43 }
 0xb6f   : > { %v4020_v33 = vpack.c.bf16 %v4016_v22, %v4016_v22 }
 0xb71   : > { %5453 = vmatmul.mubr.msk.bf16.vlgmr.msra.gmra.mrb[36].mxu1 %vm3973_vm6, %v4020_v33 }
 0xb72   : > { %5468 = vmatprep.mubr.msk.bf16.mxu1 %vm5614_vm0, %v5613_v1  ;;  %5465 = vmatpush3.bf16.msra.mxu1 %v5541_v0 }
 0xb73   : > { %5466 = vmatprep.subr.bf16.mxu1 %v5613_v1 }
 0xb76   : > { %v5582_v13 = vpop.eup %5581  ;;  %5467 = vmatpush3.bf16.msra.mxu1 %v5542_v53 }
 0xb77   : > { %v4017_v38 = vmul.f32 %v5582_v13, %v6386_v16  ;;  %5480 = vmatprep.subr.bf16.mxu1 %v5613_v1 }
 0xb79   : > { %v4021_v56 = vpack.c.bf16 %v4017_v38, %v4017_v38 }
 0xb7b   : > { %5461 = vmatmul.mubr.msk.bf16.vlgmr.msra.gmra.mrb[40].mxu0 %vm3973_vm6, %v4021_v56  ;;  %v5223_v56 = vld [vmem:[%s6551_s16] ss:$0 sm:$0xff] }
 0xb7c   : > { %5476 = vmatprep.mubr.msk.bf16.mxu0 %vm5614_vm0, %v5613_v1 }
 0xc22   : > { %v4063_v36 = vpop.f32.mrb[32].mxu1 }
 0xc23   : > { %v5438_v39 = vpop.f32.mrb[33].mxu1 }
 0xc24   : > { %v4066_v40 = vpop.f32.mrb[34].mxu1  ;;  %v4109_v42 = vpop.f32.mrb[36].mxu0 }
 0xc25   : > { %v5439_v43 = vpop.f32.mrb[35].mxu1  ;;  %v5446_v20 = vpop.f32.mrb[37].mxu0 }
 0xc26   : > { %v4112_v12 = vpop.f32.mrb[38].mxu0 }
 0xc27   : > { %v5447_v29 = vpop.f32.mrb[39].mxu0 }
 0xc44   : > { %v4155_v18 = vpop.f32.mrb[36].mxu1 }
 0xc45   : > { %v4207_v37 = vcombine.low %v4063_v36, %v4155_v18  ;;  %v4208_v17 = vcombine.high %v4063_v36, %v4155_v18  ;;  %v5454_v21 = vpop.f32.mrb[37].mxu1 }
 0xc46   : > { %v4158_v46 = vpop.f32.mrb[38].mxu1 }
 0xc47   : > { %v5455_v16 = vpop.f32.mrb[39].mxu1  ;;  %v4215_v54 = vrot.slane %v4207_v37, %v5835_v24  ;;  %v4222_v55 = vrot.slane %v4208_v17, %v5835_v24  ;;  %v5543_v46 = vld [vmem:[%s6554_s19] sm:$0xff]  }
 0xc48   : > { %5473 = vmatpush3.bf16.msra.mxu0 %v5543_v46  ;;  %v5544_v16 = vld [vmem:[%s6554_s19 + $0x8] sm:$0xff]  }
 0xc49   : > { %5474 = vmatprep.subr.bf16.mxu0 %v5613_v1 }
 0xc4c   : > { %5475 = vmatpush3.bf16.msra.mxu0 %v5544_v16 }
 0xc4e   : > { %v4201_v47 = vpop.f32.mrb[40].mxu0 }
 0xc4f   : > { %v4223_v48 = vcombine.low %v4109_v42, %v4201_v47  ;;  %v4224_v49 = vcombine.high %v4109_v42, %v4201_v47  ;;  %v5462_v8 = vpop.f32.mrb[41].mxu0  ;;  %v5546_v47 = vld [vmem:[%s6556_s21 + $0x8] sm:$0xff]  }
 0xc50   : > { %v4204_v52 = vpop.f32.mrb[42].mxu0 }
 0xc51   : > { %v4231_v51 = vrot.slane %v4223_v48, %v5835_v24  ;;  %v4238_v45 = vrot.slane %v4224_v49, %v5835_v24  ;;  %v5463_v5 = vpop.f32.mrb[43].mxu0 }
 0xc53   : > { %v4239_v62 = vcombine.low %v4215_v54, %v4231_v51  ;;  %v4240_v10 = vcombine.high %v4215_v54, %v4231_v51  ;;  %v4255_v4 = vcombine.low %v4222_v55, %v4238_v45  ;;  %v4256_v11 = vcombine.high %v4222_v55, %v4238_v45  ;;  %v5227_v54 = vld [vmem:[%s6552_s17] ss:$0 sm:$0xff] }
 0xc54   : > { %v5228_v51 = vld [vmem:[%s6553_s18] ss:$0 sm:$0xff] }
 0xc55   : > { %v4247_v34 = vrot.slane %v4239_v62, %v5838_v28  ;;  %v4254_v2 = vrot.slane %v4240_v10, %v5838_v28  ;;  %v4263_v25 = vrot.slane %v4255_v4, %v5838_v28  ;;  %v4270_v27 = vrot.slane %v4256_v11, %v5838_v28  ;;  %v5547_v10 = vld [vmem:[%s6556_s21 + $0x10] sm:$0xff]   ;;  %v5548_v4 = vld [vmem:[%s6556_s21 + $0x18] sm:$0xff]   ;;  %v5229_v11 = vld [vmem:[%s6555_s20] ss:$0 sm:$0xff] }
 0xc57   : > { %v4275_v9 = vcombine.low %v4247_v34, %v4254_v2  ;;  %v5221_v58 = vcombine.high %v4247_v34, %v4254_v2  ;;  %v4291_v15 = vcombine.low %v4263_v25, %v4270_v27  ;;  %v5222_v50 = vcombine.high %v4263_v25, %v4270_v27 }
 0xc59   : > { %v4282_v57 = vrot.slane %v4275_v9, %v5835_v24  ;;  %v4290_v7 = vrot.slane %v5221_v58, %v5835_v24  ;;  %v4298_v61 = vrot.slane %v4291_v15, %v5835_v24  ;;  %v4306_v63 = vrot.slane %v5222_v50, %v5835_v24 }
 0xc5b   : > { %v4308_v59 = vcombine.high %v4282_v57, %v4290_v7  ;;  %v4324_v3 = vcombine.high %v4298_v61, %v4306_v63  ;;  %v4307_v6 = vcombine.low %v4282_v57, %v4290_v7  ;;  %v4323_v60 = vcombine.low %v4298_v61, %v4306_v63 }
 0xc5d   : > { %v4322_v35 = vrot.slane %v4308_v59, %v5838_v28  ;;  %v4338_v19 = vrot.slane %v4324_v3, %v5838_v28  ;;  %v4315_v26 = vrot.slane %v4307_v6, %v5838_v28  ;;  %v4331_v41 = vrot.slane %v4323_v60, %v5838_v28 }
 0xc5f   : > { %v4341_v31 = vcombine.low %v4322_v35, %v4338_v19  ;;  %v4340_v30 = vcombine.high %v4315_v26, %v4331_v41  ;;  %v4342_v14 = vcombine.high %v4322_v35, %v4338_v19  ;;  %v4339_v23 = vcombine.low %v4315_v26, %v4331_v41 }
 0xc61   : > { %4348 = vrot.lane.b32.xlu1 %v4341_v31, %s6611_s6  ;;  %4344 = vrot.lane.b32.xlu0 %v4340_v30, %s6612_s8  ;;  %v5239_v30 = vld [vmem:[%s6558_s23] ss:$0 sm:$0xff] }
 0xc65   : > { %4352 = vrot.lane.b32.xlu0 %v4342_v14, %s6613_s12  ;;  %s1332_s12 = scalar_lea.vmem %s6563_s28, %s5804_s29 }
 0xcd3   : > { %v4345_v24 = vpop.permute.xlu0 %4344  ;;  %v4349_v32 = vpop.permute.xlu1 %4348 }
 0xcd4   : > { %v4355_v22 = vsel %vm1984_vm2, %v4339_v23, %v4345_v24  ;;  %v5240_v23 = vld [vmem:[%s6559_s24] ss:$0 sm:$0xff] }
 0xcd5   : > { %v4356_v13 = vsel %vm2555_vm4, %v4355_v22, %v4349_v32 }
 0xcd7   : > { %v4353_v33 = vpop.permute.xlu0 %4352 }
 0xcd8   : > { %v4357_v38 = vsel %vm2557_vm5, %v4356_v13, %v4353_v33 }
 0xcd9   : > { %v4362_v28 = vpack.c.bf16 %v4357_v38, %v4357_v38 }
 0xcdb   : > { %5469 = vmatmul.mubr.msk.bf16.vlgmr.msra.gmra.mrb[40].mxu1 %vm1366_vm1, %v4362_v28 }
 0xcdc   : > { %5488 = vmatprep.mubr.msk.bf16.mxu1 %vm5614_vm0, %v5613_v1 }
 0xdae   : > { %v4419_v36 = vpop.f32.mrb[40].mxu1 }
 0xdaf   : > { %v4420_v39 = vadd.f32 %v5223_v56, %v4419_v36  ;;  %v5470_v40 = vpop.f32.mrb[41].mxu1 }
 0xdb0   : > { %v4422_v42 = vpop.f32.mrb[42].mxu1 }
 0xdb1   : > { %v5471_v43 = vpop.f32.mrb[43].mxu1  ;;  %v4425_v20 = vadd.f32 %v4420_v39, %v6099_v44  ;;  %v5545_v44 = vld [vmem:[%s6556_s21] sm:$0xff]  }
 0xdb2   : > { %5481 = vmatpush3.bf16.msra.mxu1 %v5545_v44 }
 0xdb3   : > { %v4428_v12 = vsel %vm1366_vm1, %v4425_v20, 0.0  ;;  %5482 = vmatprep.subr.bf16.mxu1 %v5613_v1 }
 0xdb4   : > { %4429 = vadd.xlane.f32.xlu1 %v4428_v12 }
 0xdb6   : > { %5483 = vmatpush3.bf16.msra.mxu1 %v5546_v47 }
 0xdb7   : > { %5484 = vmatprep.subr.bf16.mxu1 %v5613_v1 }
 0xdba   : > { %5485 = vmatpush3.bf16.msra.mxu1 %v5547_v10 }
 0xdbb   : > { %5486 = vmatprep.subr.bf16.mxu1 %v5613_v1  ;;  %v5233_v1 = vld [vmem:[%s6557_s22] ss:$0 sm:$0xff] }
 0xdbe   : > { %5487 = vmatpush3.bf16.msra.mxu1 %v5548_v4 }
 0xe41   : > { %v4430_v29 = vpop.xlane.xlu1 %4429 }
 0xe42   : > { %v4431_v18 = vmul.f32 0.03125, %v4430_v29  ;;  %v5242_v29 = vld [vmem:[%s6561_s26] ss:$0 sm:$0xff] }
 0xe44   : > { %v4432_v37 = vsub.f32 %v4425_v20, %v4431_v18  ;;  %v5241_v20 = vld [vmem:[%s6560_s25] ss:$0 sm:$0xff] }
 0xe46   : > { %v4433_v17 = vmul.f32 %v4432_v37, %v4432_v37 }
 0xe48   : > { %v4434_v21 = vsel %vm1366_vm1, %v4433_v17, 0.0 }
 0xe49   : > { %4435 = vadd.xlane.f32.xlu0 %v4434_v21 }
 0xed6   : > { %v4436_v48 = vpop.xlane.xlu0 %4435 }
 0xed7   : > { %v4437_v49 = vmul.f32 0.03125, %v4436_v48 }
 0xed9   : > { %v4438_v8 = vadd.f32 1e-05, %v4437_v49 }
 0xedb   : > { %5583 = vrsqrt.f32 %v4438_v8 }
 0xee5   : > { %v5584_v52 = vpop.eup %5583 }
 0xee6   : > { %v4440_v55 = vmul.f32 %v5584_v52, %v4432_v37 }
 0xee8   : > { %v4447_v45 = vmul.f32 %v5227_v54, %v4440_v55 }
 0xeea   : > { %v4454_v5 = vadd.f32 %v5228_v51, %v4447_v45 }
 0xeec   : > { %v4459_v62 = vpack.c.bf16 %v4454_v5, %v4454_v5 }
 0xeee   : > { %5477 = vmatmul.mubr.msk.bf16.vlgmr.msra.gmra.mrb[44].mxu0 %vm1366_vm1, %v4459_v62 }
 0xfc1   : > { %v4516_v0 = vpop.f32.mrb[44].mxu0 }
 0xfc2   : > { %v4517_v34 = vadd.f32 %v5229_v11, %v4516_v0  ;;  %v5478_v2 = vpop.f32.mrb[45].mxu0 }
 0xfc3   : > { %v4519_v25 = vpop.f32.mrb[46].mxu0 }
 0xfc4   : > { %v4522_v27 = vmax.f32 %v4517_v34, 0.0  ;;  %v5479_v9 = vpop.f32.mrb[47].mxu0 }
 0xfc6   : > { %v4531_v58 = vpack.c.bf16 %v4522_v27, %v4522_v27 }
 0xfc8   : > { %5489 = vmatmul.mubr.msk.bf16.vlgmr.msra.gmra.mrb[44].mxu1 %vm4563_vm8, %v4531_v58 }
0x109b   : > { %v4601_v15 = vpop.f32.mrb[44].mxu1 }
0x109c   : > { %v4602_v50 = vadd.f32 %v5233_v1, %v4601_v15  ;;  %v5490_v53 = vpop.f32.mrb[45].mxu1 }
0x109d   : > { %v4604_v57 = vpop.f32.mrb[46].mxu1 }
0x109e   : > { %v5491_v7 = vpop.f32.mrb[47].mxu1  ;;  %v4607_v61 = vadd.f32 %v4602_v50, %v4454_v5 }
0x10a0   : > { %v4610_v63 = vsel %vm1366_vm1, %v4607_v61, 0.0 }
0x10a1   : > { %4611 = vadd.xlane.f32.xlu0 %v4610_v63 }
0x112e   : > { %v4612_v59 = vpop.xlane.xlu0 %4611 }
0x112f   : > { %v4613_v3 = vmul.f32 0.03125, %v4612_v59 }
0x1131   : > { %v4614_v6 = vsub.f32 %v4607_v61, %v4613_v3 }
0x1133   : > { %v4615_v60 = vmul.f32 %v4614_v6, %v4614_v6 }
0x1135   : > { %v4616_v35 = vsel %vm1366_vm1, %v4615_v60, 0.0 }
0x1136   : > { %4617 = vadd.xlane.f32.xlu1 %v4616_v35 }
0x11c3   : > { %v4618_v19 = vpop.xlane.xlu1 %4617 }
0x11c4   : > { %v4619_v26 = vmul.f32 0.03125, %v4618_v19 }
0x11c6   : > { %v4620_v41 = vadd.f32 1e-05, %v4619_v26 }
0x11c8   : > { %5585 = vrsqrt.f32 %v4620_v41 }
0x11d2   : > { %v5586_v31 = vpop.eup %5585 }
0x11d3   : > { %v4622_v14 = vmul.f32 %v5586_v31, %v4614_v6 }
0x11d5   : > { %v4629_v24 = vmul.f32 %v5239_v30, %v4622_v14 }
0x11d7   : > { %v4636_v32 = vadd.f32 %v5240_v23, %v4629_v24 }
0x11d9   : > { %v4642_v22 = vsel %vm1366_vm1, %v4636_v32, 0.0  ;;  %v4637_v33 = vpack.c.bf16 %v4636_v32, %v4636_v32 }
0x11da   : > { %4643 = vadd.xlane.f32.xlu0 %v4642_v22 }
0x11db   : > { %4639 = vst.msk [vmem:[%s1324_s3] sm:$0xf] %vm4638_vm9, %v4637_v33 }
0x1267   : > { %v4644_v13 = vpop.xlane.xlu0 %4643 }
0x1268   : > { %v4645_v38 = vmul.f32 0.03125, %v4644_v13 }
0x126a   : > { %v4646_v28 = vsub.f32 %v4636_v32, %v4645_v38 }
0x126c   : > { %v4647_v56 = vmul.f32 %v4646_v28, %v4646_v28 }
0x126e   : > { %v4648_v36 = vsel %vm1366_vm1, %v4647_v56, 0.0 }
0x126f   : > { %4649 = vadd.xlane.f32.xlu1 %v4648_v36 }
0x12fc   : > { %v4650_v39 = vpop.xlane.xlu1 %4649 }
0x12fd   : > { %v4651_v40 = vmul.f32 0.03125, %v4650_v39 }
0x12ff   : > { %v4652_v42 = vadd.f32 1e-05, %v4651_v40 }
0x1301   : > { %5587 = vrsqrt.f32 %v4652_v42 }
0x130b   : > { %v5588_v43 = vpop.eup %5587 }
0x130c   : > { %v4654_v12 = vmul.f32 %v5588_v43, %v4646_v28 }
0x130e   : > { %v4661_v18 = vmul.f32 %v5241_v20, %v4654_v12 }
0x1310   : > { %v4668_v37 = vadd.f32 %v5242_v29, %v4661_v18 }
0x1312   : > { %v4669_v17 = vpack.c.bf16 %v4668_v37, %v4668_v37 }
0x1314   : > { %4670 = vst.msk [vmem:[%s1332_s12] sm:$0xf] %vm4638_vm9, %v4669_v17 }
0x1315 PF: > { %s39_s9 = sadd.s32 1, %s5611_s9   ;;  %s6614_s8 = smov %s5607_s5 }
0x1316   : > { %p36_p5 = scmp.ge.s32.totalorder %s39_s9, 4   ;;  %s6615_s5 = smov %s6617_s30 }
0x1318   :  { %38 = sbr.rel (!%p36_p5) target bundleno = 14 (0xe), region = 248 }

// kernel: transformer_decoder_forward.15
= control target key start
LH: loop header
LB: loop body
LE: loop exit
PB: predicated region body
PF: predicated region fallthrough
CT: control target
= control target key end

     0   :  { %s6696_s0 = inlined_call_operand.vmem [shape: bf16[1,2,8,32], index: 0, kind: input, shape index: {}]   ;;  %s6697_s1 = inlined_call_operand.vmem [shape: bf16[1,2,8,32], index: 1, kind: input, shape index: {}]   ;;  %s6698_s2 = inlined_call_operand.vmem [shape: bf16[2,20,32], index: 2, kind: input, shape index: {}]   ;;  %s6699_s3 = inlined_call_operand.vmem [shape: bf16[1,32,64], index: 3, kind: input, shape index: {}]   ;;  %s6700_s4 = inlined_call_operand.vmem [shape: f32[1,1,64], index: 4, kind: input, shape index: {}]   ;;  %s6701_s5 = inlined_call_operand.vmem [shape: bf16[1,32,32], index: 5, kind: input, shape index: {}]   ;;  %s6702_s6 = inlined_call_operand.vmem [shape: f32[1,1,32], index: 6, kind: input, shape index: {}]   ;;  %s6703_s7 = inlined_call_operand.vmem [shape: bf16[1,32,32], index: 7, kind: input, shape index: {}]   ;;  %s6704_s8 = inlined_call_operand.vmem [shape: f32[1,1,32], index: 8, kind: input, shape index: {}]   ;;  %s6705_s9 = inlined_call_operand.vmem [shape: f32[1,1,32], index: 9, kind: input, shape index: {}]   ;;  %s6706_s10 = inlined_call_operand.vmem [shape: f32[1,1,32], index: 10, kind: input, shape index: {}]   ;;  %s6707_s11 = inlined_call_operand.vmem [shape: bf16[1,32,32], index: 11, kind: input, shape index: {}]   ;;  %s6708_s12 = inlined_call_operand.vmem [shape: f32[1,1,32], index: 12, kind: input, shape index: {}]   ;;  %s6709_s13 = inlined_call_operand.vmem [shape: bf16[1,32,64], index: 13, kind: input, shape index: {}]   ;;  %s6710_s14 = inlined_call_operand.vmem [shape: f32[1,1,64], index: 14, kind: input, shape index: {}]   ;;  %s6711_s15 = inlined_call_operand.vmem [shape: bf16[1,32,32], index: 15, kind: input, shape index: {}]   ;;  %s6712_s16 = inlined_call_operand.vmem [shape: f32[1,1,32], index: 16, kind: input, shape index: {}]   ;;  %s6713_s17 = inlined_call_operand.vmem [shape: f32[1,1,32], index: 17, kind: input, shape index: {}]   ;;  %s6714_s18 = inlined_call_operand.vmem [shape: f32[1,1,32], index: 18, kind: input, shape index: {}]   ;;  %s6715_s19 = inlined_call_operand.vmem [shape: bf16[1,32,64], index: 19, kind: input, shape index: {}]   ;;  %s6716_s20 = inlined_call_operand.vmem [shape: f32[1,1,64], index: 20, kind: input, shape index: {}]   ;;  %s6717_s21 = inlined_call_operand.vmem [shape: bf16[1,64,32], index: 21, kind: input, shape index: {}]   ;;  %s6718_s22 = inlined_call_operand.vmem [shape: f32[1,1,32], index: 22, kind: input, shape index: {}]   ;;  %s6719_s23 = inlined_call_operand.vmem [shape: f32[1,1,32], index: 23, kind: input, shape index: {}]   ;;  %s6720_s24 = inlined_call_operand.vmem [shape: f32[1,1,32], index: 24, kind: input, shape index: {}]   ;;  %s6721_s25 = inlined_call_operand.vmem [shape: f32[1,1,32], index: 25, kind: input, shape index: {}]   ;;  %s6722_s26 = inlined_call_operand.vmem [shape: f32[1,1,32], index: 26, kind: input, shape index: {}]   ;;  %s6723_s27 = inlined_call_operand.hbm [shape: bf16[1,2,8,32], index: 27, kind: output, shape index: {0}]   ;;  %s6724_s28 = inlined_call_operand.vmem [shape: bf16[1,2,8,32], index: 28, kind: output, shape index: {1}]  }
   0x1   :  { %6751 = sst [smem:[#allocation12_spill]] %s6696_s0 }
   0x2   :  { %6752 = sst [smem:[#allocation13_spill]] %s6697_s1 }
   0x3   :  { %6753 = sst [smem:[#allocation14_spill]] %s6698_s2 }
   0x4   :  { %6754 = sst [smem:[#allocation15_spill]] %s6699_s3 }
   0x5   :  { %6755 = sst [smem:[#allocation16_spill]] %s6700_s4 }
   0x6   :  { %6756 = sst [smem:[#allocation17_spill]] %s6701_s5 }
   0x7   :  { %6757 = sst [smem:[#allocation18_spill]] %s6702_s6 }
   0x8   :  { %6758 = sst [smem:[#allocation19_spill]] %s6703_s7 }
   0x9   :  { %6759 = sst [smem:[#allocation20_spill]] %s6704_s8 }
   0xa   :  { %6760 = sst [smem:[#allocation21_spill]] %s6705_s9 }
   0xb   :  { %6761 = sst [smem:[#allocation22_spill]] %s6706_s10 }
   0xc   :  { %6762 = sst [smem:[#allocation23_spill]] %s6707_s11 }
   0xd   :  { %6763 = sst [smem:[#allocation24_spill]] %s6708_s12 }
   0xe   :  { %6764 = sst [smem:[#allocation25_spill]] %s6724_s28 }
   0xf   :  { %34 = vsyncpa [#allocation3], 0 }
  0x10   :  { %36 = vsyncpa [#allocation3 + $0x1], 0  ;;  %s5859_s8 = smov 0   ;;  %s5861_s5 = smov 0  }
  0x11   :  { %s5863_s9 = smov 0   ;;  %s5865_s30 = smov 0  }
  0x12   :  { %s5867_s3 = smov 0   ;;  %s5869_s6 = smov 0  }
  0x13 LB: > { %6765 = sst [smem:[#allocation5_spill]] %s5679_s8  ;;  %s5143_s10 = sadd.s32 4294967295, %s5699_s6   ;;  %s5699_s6 = sphi %s5869_s6, %s42_s6   ;;  %s5695_s3 = sphi %s5867_s3, %s6804_s3   ;;  %s5691_s30 = sphi %s5865_s30, %s6803_s30   ;;  %s5687_s9 = sphi %s5863_s9, %s6802_s9   ;;  %s5683_s5 = sphi %s5861_s5, %s6806_s5   ;;  %s5679_s8 = sphi %s5859_s8, %s6805_s8  }
  0x14   : > { %6766 = sst [smem:[#allocation6_spill]] %s5687_s9  ;;  %s5144_s0 = sadd.s32 4294967294, %s5699_s6  }
  0x15   : > { %6767 = sst [smem:[#allocation7_spill]] %s5695_s3  ;;  %s54_s11 = sadd.s32 1, %s5695_s3 }
  0x16   : > { %6768 = sst [smem:[#allocation8_spill]] %s5699_s6  ;;  %s769_s29 = sadd.s32 1, %s5687_s9 }
  0x17   : > { %p56_p0 = scmp.ge.s32.totalorder %s54_s11, 2  ;;  %p779_p1 = scmp.ne.s32.totalorder %s5687_s9, %s5683_s5 }
  0x18   : > { %p780_p2 = scmp.eq.s32.totalorder %s5143_s10, 1  ;;  %p785_p3 = scmp.ne.s32.totalorder %s5683_s5, %s5679_s8 }
  0x19   : > { %s6808_s11 = smov (%p56_p0, %s54_s11), 0  ;;  %p786_p5 = scmp.eq.s32.totalorder %s5144_s0, 1 }
  0x1a   : > { %6769 = sst [smem:[#allocation9_spill]] %s6808_s11  ;;  %p5899_p4 = por %p780_p2, %p779_p1 }
  0x1b   : > { %s765_s7 = ssub.s32 %s5695_s3, %s6808_s11  ;;  %p5171_p6 = scmp.ge.s32.totalorder %s5699_s6, 1 }
  0x1c   : > { %p767_p7 = scmp.eq.s32.totalorder %s765_s7, 0  ;;  %p5906_p8 = por %p786_p5, %p785_p3 }
  0x1d   : > { %p1022_p9 = scmp.lt.s32.totalorder %s5699_s6, 3 }
  0x1e   : > { %s6771_s12 = scalar_select %p5906_p8, 1, 0 }
  0x1f   : > { %s5912_s1 = scalar_select %p767_p7, %s5687_s9, %s769_s29  }
  0x20   : > { %6772 = sst [smem:[#allocation10_spill]] %s6771_s12  ;;  %p1023_p10 = pnand %p5171_p6, %p1022_p9 }
  0x21   : > { %6773 = sst [smem:[#allocation11_spill]] %s5912_s1  ;;  %s6774_s8 = sld [smem:[#allocation15_spill]] (!%p1023_p10)  ;;  %v5701_v1 = vmov (!%p1023_p10), 0.0   ;;  %vm5702_vm0 = vmmov (!%p1023_p10), 0   ;;  %vm1358_vm1 = vcmask (!%p1023_p10), 261120   ;;  %v1480_v18 = vlaneseq (!%p1023_p10) }
  0x22   : > { %1026 = sbr.rel (%p1023_p10) target bundleno = 4901 (0x1325), region = 128  ;;  %5313 = vmatprep.subr.bf16.mxu0 (!%p1023_p10), %v5701_v1  ;;  %5321 = vmatprep.subr.bf16.mxu1 (!%p1023_p10), %v5701_v1  ;;  %p1210_p11 = scmp.lt.s32.totalorder (!%p1023_p10), %s5691_s30, 1  ;;  %v5707_v16 = vmov (!%p1023_p10), 1983009808   ;;  %v5708_v19 = vmov (!%p1023_p10), 1934713408  }
  0x23   : > { %5317 = vmatprep.mubr.msk.bf16.mxu0 (!%p1023_p10), %vm5702_vm0, %v5701_v1  ;;  %5325 = vmatprep.mubr.msk.bf16.mxu1 (!%p1023_p10), %vm5702_vm0, %v5701_v1  ;;  %s6776_s0 = sld [smem:[#allocation12_spill]] (!%p1023_p10)  ;;  %s6777_s3 = sld [smem:[#allocation13_spill]] (!%p1023_p10)  ;;  %v1478_v17 = vunpack.c.l.s4 (!%p1023_p10), %v5707_v16  ;;  %v1495_v20 = vunpack.c.l.s4 (!%p1023_p10), %v5708_v19  ;;  %v1481_v22 = vshrl.u32 (!%p1023_p10), %v1480_v18, 7  ;;  %v5709_v41 = vmov (!%p1023_p10), 0  }
  0x24   : > { %s6778_s11 = sld [smem:[#allocation16_spill]] (!%p1023_p10)  ;;  %s6733_s4 = smov (!%p1023_p10), 120   ;;  %vm1976_vm2 = vcmask (!%p1023_p10), 64512   ;;  %vm2216_vm3 = vcmask (!%p1023_p10), 1043456   ;;  %vm2547_vm4 = vcmask (!%p1023_p10), 130048   ;;  %vm2549_vm5 = vcmask (!%p1023_p10), 195584  }
  0x25   : > { %s6737_s10 = smov (!%p1023_p10), 96   ;;  %v1479_v21 = vunpack.c.0.s8 (!%p1023_p10), %v1478_v17  ;;  %v1496_v23 = vunpack.c.0.s8 (!%p1023_p10), %v1495_v20  ;;  %s6786_s12 = sld [smem:[#allocation14_spill]] (!%p1023_p10)  ;;  %vm3965_vm6 = vcmask (!%p1023_p10), 162816   ;;  %vm4017_vm7 = vcmask (!%p1023_p10), 1041408  }
  0x26   : > { %s6793_s9 = smov (!%p1023_p10), 96   ;;  %vm4555_vm8 = vcmask (!%p1023_p10), 523264   ;;  %vm4630_vm9 = vcmask (!%p1023_p10), 257024  }
  0x27   : > { %s6775_s28 = smov (!%p1023_p10), %s6774_s8  ;;  %v5561_v0 = vld [vmem:[%s6774_s8] sm:$0xff] (!%p1023_p10)   ;;  %v5963_v24 = vsub.s32 (!%p1023_p10), %v1479_v21, %v1481_v22  ;;  %v5966_v28 = vsub.s32 (!%p1023_p10), %v1496_v23, %v1481_v22 }
  0x28   : > { %5314 = vmatpush3.bf16.msra.mxu0 (!%p1023_p10), %v5561_v0  ;;  %v5562_v2 = vld [vmem:[%s6775_s28 + $0x8] sm:$0xff] (!%p1023_p10)   ;;  %s6782_s28 = smov (!%p1023_p10), 104  }
  0x29   : > { %5315 = vmatprep.subr.bf16.mxu0 %v5701_v1  ;;  %s5929_s8 = scalar_select %p1210_p11, %s5691_s30, 1 }
  0x2a   : > { %v5177_v9 = vld [vmem:[%s6778_s11] ss:$0 sm:$0xff] }
  0x2b   : > { %s5932_s29 = sshll.u32 %s5929_s8, 2 }
  0x2c   : > { %5316 = vmatpush3.bf16.msra.mxu0 %v5562_v2  ;;  %s1215_s7 = scalar_lea.vmem %s6776_s0, %s5932_s29  ;;  %s1223_s1 = scalar_lea.vmem %s6777_s3, %s5932_s29 }
  0x2d   : > { %5329 = vmatprep.subr.bf16.mxu0 %v5701_v1  ;;  %v5943_v3 = vld [vmem:[%s1215_s7] sm:$0xf]  ;;  %s6739_s0 = smov 112   ;;  %s6779_s3 = sld [smem:[#allocation17_spill]] }
  0x2e   : > { %v5945_v4 = vld [vmem:[%s1223_s1] sm:$0xf]  ;;  %v1332_v6 = vunpack.c.l.bf16 %v5943_v3  ;;  %s6735_s1 = smov 104   ;;  %s6781_s7 = sld [smem:[#allocation18_spill]] }
  0x2f   : > { %v1328_v5 = vunpack.c.l.bf16 %v5945_v4 }
  0x31   : > { %v1333_v7 = vadd.f32 %v1332_v6, %v1328_v5 }
  0x33   : > { %v1334_v8 = vpack.c.bf16 %v1333_v7, %v1333_v7  ;;  %s6780_s11 = smov %s6779_s3  ;;  %v5563_v33 = vld [vmem:[%s6779_s3] sm:$0xff]   ;;  %s6783_s3 = smov 120  }
  0x34   : > { %5322 = vmatpush3.bf16.msra.mxu1 %v5563_v33  ;;  %v5564_v37 = vld [vmem:[%s6780_s11 + $0x8] sm:$0xff]  }
  0x35   : > { %5318 = vmatmul.mubr.msk.bf16.vlgmr.msra.gmra.mrb[0].mxu0 %vm1358_vm1, %v1334_v8  ;;  %5323 = vmatprep.subr.bf16.mxu1 %v5701_v1 }
  0x36   : > { %5331 = vmatprep.mubr.msk.bf16.mxu0 %vm5702_vm0, %v5701_v1 }
  0x38   : > { %5324 = vmatpush3.bf16.msra.mxu1 %v5564_v37 }
  0x39   : > { %5335 = vmatprep.subr.bf16.mxu1 %v5701_v1 }
  0x3b   : > { %5326 = vmatmul.mubr.msk.bf16.vlgmr.msra.gmra.mrb[0].mxu1 %vm1358_vm1, %v5943_v3 }
  0x3c   : > { %5337 = vmatprep.mubr.msk.bf16.mxu1 %vm5702_vm0, %v5701_v1 }
 0x108   : > { %v1396_v10 = vpop.f32.mrb[0].mxu0 }
 0x109   : > { %v1397_v11 = vadd.f32 %v5177_v9, %v1396_v10  ;;  %v5319_v12 = vpop.f32.mrb[1].mxu0 }
 0x10a   : > { %v1399_v13 = vpop.f32.mrb[2].mxu0 }
 0x10b   : > { %v1402_v14 = vpack.c.bf16 %v1397_v11, %v1397_v11  ;;  %v5320_v15 = vpop.f32.mrb[3].mxu0 }
 0x10d   : > { %1475 = vrot.lane.b32.xlu1 %v1402_v14, %s6735_s1  ;;  %1471 = vrot.lane.b32.xlu0 %v1402_v14, %s6733_s4  ;;  %v1483_v36 = vrot.slane %v1402_v14, %v5963_v24  ;;  %s6743_s1 = smov 24   ;;  %s6792_s4 = sld [smem:[#allocation24_spill]] }
 0x111   : > { %1638 = vrot.lane.b32.xlu1 %v1402_v14, %s6737_s10  ;;  %1473 = vrot.lane.b32.xlu0 %v1402_v14, %s6739_s0 }
 0x17f   : > { %v1476_v25 = vpop.permute.xlu1 %1475  ;;  %v1472_v26 = vpop.permute.xlu0 %1471 }
 0x180   : > { %v1525_v27 = vrot.slane %v1476_v25, %v5963_v24  ;;  %v1517_v29 = vrot.slane %v1472_v26, %v5963_v24  ;;  %1640 = vrot.lane.b32.xlu0 %v1472_v26, %s6737_s10 }
 0x182   : > { %v1526_v30 = vcombine.low %v1517_v29, %v1525_v27  ;;  %v1527_v31 = vcombine.high %v1517_v29, %v1525_v27 }
 0x183   : > { %v1474_v32 = vpop.permute.xlu0 %1473 }
 0x184   : > { %v1534_v34 = vrot.slane %v1526_v30, %v5966_v28  ;;  %v1491_v35 = vrot.slane %v1474_v32, %v5963_v24  ;;  %1644 = vrot.lane.b32.xlu0 %v1476_v25, %s6737_s10  ;;  %1642 = vrot.lane.b32.xlu1 %v1474_v32, %s6737_s10  ;;  %v1541_v38 = vrot.slane %v1527_v31, %v5966_v28  ;;  %v1639_v30 = vpop.permute.xlu1 %1638  ;;  %s6742_s10 = smov 16  }
 0x186   : > { %v1492_v39 = vcombine.low %v1483_v36, %v1491_v35  ;;  %v1493_v40 = vcombine.high %v1483_v36, %v1491_v35  ;;  %v1542_v42 = vcombine.high %v1534_v34, %v5709_v41  ;;  %v1543_v45 = vcombine.high %v1541_v38, %v5709_v41 }
 0x187   : > { %v1549_v46 = vshrl.u32 %v1534_v34, 16  ;;  %v1565_v52 = vshrl.u32 %v1541_v38, 16  ;;  %v1653_v35 = vrot.slane %v1639_v30, %v5963_v24 }
 0x188   : > { %v1500_v43 = vrot.slane %v1492_v39, %v5966_v28  ;;  %v1507_v44 = vrot.slane %v1493_v40, %v5966_v28  ;;  %v1557_v51 = vshrl.u32 %v1542_v42, 16  ;;  %v1573_v59 = vshrl.u32 %v1543_v45, 16 }
 0x18a   : > { %v1508_v47 = vcombine.high %v1500_v43, %v5709_v41  ;;  %v1509_v48 = vcombine.high %v1507_v44, %v5709_v41  ;;  %v1546_v49 = vpack.i.b16 %v1534_v34, %v1500_v43  ;;  %v1548_v50 = vshrl.u32 %v1500_v43, 16 }
 0x18b   : > { %v1562_v53 = vpack.i.b16 %v1541_v38, %v1507_v44  ;;  %v1564_v54 = vshrl.u32 %v1507_v44, 16 }
 0x18c   : > { %v1550_v55 = vpack.i.b16 %v1549_v46, %v1548_v50  ;;  %v1554_v56 = vpack.i.b16 %v1542_v42, %v1508_v47  ;;  %v1556_v57 = vshrl.u32 %v1508_v47, 16  ;;  %v1570_v58 = vpack.i.b16 %v1543_v45, %v1509_v48 }
 0x18d   : > { %v1566_v60 = vpack.i.b16 %v1565_v52, %v1564_v54  ;;  %v1572_v61 = vshrl.u32 %v1509_v48, 16  ;;  %v1576_v62 = vcombine.low %v1546_v49, %v1562_v53 }
 0x18e   : > { %v1558_v63 = vpack.i.b16 %v1557_v51, %v1556_v57  ;;  %v1584_v0 = vcombine.low %v1554_v56, %v1570_v58 }
 0x18f   : > { %v1574_v2 = vpack.i.b16 %v1573_v59, %v1572_v61  ;;  %v1601_v7 = vcombine.low %v1550_v55, %v1566_v60  ;;  %v1583_v8 = vrot.slane %v1576_v62, %v5963_v24 }
 0x190   : > { %v1591_v9 = vrot.slane %v1584_v0, %v5963_v24 }
 0x191   : > { %v1609_v10 = vcombine.low %v1558_v63, %v1574_v2  ;;  %v1608_v12 = vrot.slane %v1601_v7, %v5963_v24 }
 0x192   : > { %v1592_v11 = vcombine.low %v1583_v8, %v1591_v9 }
 0x193   : > { %v1616_v13 = vrot.slane %v1609_v10, %v5963_v24 }
 0x194   : > { %v5999_v14 = vrot.slane %v1592_v11, %v5966_v28 }
 0x195   : > { %v1617_v15 = vcombine.low %v1608_v12, %v1616_v13 }
 0x196   : > { %v6006_v17 = vcombine.high %v5999_v14, %v5709_v41  ;;  %v1629_v19 = vshrl.u32 %v5999_v14, 16 }
 0x197   : > { %v6002_v16 = vrot.slane %v1617_v15, %v5966_v28 }
 0x198   : > { %v1635_v25 = vshrl.u32 %v6006_v17, 16 }
 0x199   : > { %v1628_v18 = vpack.i.b16 %v6002_v16, %v5999_v14  ;;  %v1630_v20 = vshrl.u32 %v6002_v16, 16  ;;  %v6014_v21 = vcombine.high %v6002_v16, %v5709_v41  ;;  %v1463_v14 = vpop.f32.mrb[0].mxu1 }
 0x19a   : > { %v5327_v16 = vpop.f32.mrb[1].mxu1 }
 0x19b   : > { %v6016_v22 = vpack.i.b16 %v1630_v20, %v1629_v19  ;;  %v1634_v23 = vpack.i.b16 %v6014_v21, %v6006_v17  ;;  %v1636_v26 = vshrl.u32 %v6014_v21, 16 }
 0x19d   : > { %v6022_v27 = vpack.i.b16 %v1636_v26, %v1635_v25 }
 0x1f2   : > { %v1641_v29 = vpop.permute.xlu0 %1640 }
 0x1f3   : > { %v1687_v32 = vrot.slane %v1641_v29, %v5963_v24 }
 0x1f6   : > { %v1645_v31 = vpop.permute.xlu0 %1644  ;;  %v1643_v33 = vpop.permute.xlu1 %1642 }
 0x1f7   : > { %v1695_v34 = vrot.slane %v1645_v31, %v5963_v24  ;;  %v1661_v36 = vrot.slane %v1643_v33, %v5963_v24 }
 0x1f9   : > { %v1696_v37 = vcombine.low %v1687_v32, %v1695_v34  ;;  %v1697_v38 = vcombine.high %v1687_v32, %v1695_v34  ;;  %v1662_v39 = vcombine.low %v1653_v35, %v1661_v36  ;;  %v1663_v40 = vcombine.high %v1653_v35, %v1661_v36 }
 0x1fb   : > { %v1704_v42 = vrot.slane %v1696_v37, %v5966_v28  ;;  %v1711_v43 = vrot.slane %v1697_v38, %v5966_v28  ;;  %v1670_v44 = vrot.slane %v1662_v39, %v5966_v28  ;;  %v1677_v45 = vrot.slane %v1663_v40, %v5966_v28 }
 0x1fd   : > { %v1712_v46 = vcombine.high %v1704_v42, %v5709_v41  ;;  %v1713_v47 = vcombine.high %v1711_v43, %v5709_v41  ;;  %v1719_v48 = vshrl.u32 %v1704_v42, 16  ;;  %v1735_v49 = vshrl.u32 %v1711_v43, 16 }
 0x1fe   : > { %v1678_v50 = vcombine.high %v1670_v44, %v5709_v41  ;;  %v1679_v51 = vcombine.high %v1677_v45, %v5709_v41  ;;  %v1718_v52 = vshrl.u32 %v1670_v44, 16  ;;  %v1734_v53 = vshrl.u32 %v1677_v45, 16 }
 0x1ff   : > { %v1716_v54 = vpack.i.b16 %v1704_v42, %v1670_v44  ;;  %v1727_v55 = vshrl.u32 %v1712_v46, 16  ;;  %v1732_v56 = vpack.i.b16 %v1711_v43, %v1677_v45  ;;  %v1743_v57 = vshrl.u32 %v1713_v47, 16 }
 0x200   : > { %v1726_v58 = vshrl.u32 %v1678_v50, 16  ;;  %v1742_v59 = vshrl.u32 %v1679_v51, 16  ;;  %v1720_v60 = vpack.i.b16 %v1719_v48, %v1718_v52  ;;  %v1724_v61 = vpack.i.b16 %v1712_v46, %v1678_v50 }
 0x201   : > { %v1736_v62 = vpack.i.b16 %v1735_v49, %v1734_v53  ;;  %v1740_v63 = vpack.i.b16 %v1713_v47, %v1679_v51  ;;  %v1746_v0 = vcombine.low %v1716_v54, %v1732_v56 }
 0x202   : > { %v1728_v2 = vpack.i.b16 %v1727_v55, %v1726_v58  ;;  %v1744_v7 = vpack.i.b16 %v1743_v57, %v1742_v59 }
 0x203   : > { %v1754_v8 = vcombine.low %v1724_v61, %v1740_v63  ;;  %v1771_v9 = vcombine.low %v1720_v60, %v1736_v62  ;;  %v1753_v11 = vrot.slane %v1746_v0, %v5963_v24  ;;  %v5181_v0 = vld [vmem:[%s6781_s7] ss:$0 sm:$0xff]  ;;  %s6784_s7 = sld [smem:[#allocation19_spill]] }
 0x204   : > { %v1779_v10 = vcombine.low %v1728_v2, %v1744_v7  ;;  %v1464_v2 = vadd.f32 %v5181_v0, %v1463_v14 }
 0x205   : > { %v1761_v12 = vrot.slane %v1754_v8, %v5963_v24  ;;  %v1778_v13 = vrot.slane %v1771_v9, %v5963_v24 }
 0x206   : > { %v1786_v15 = vrot.slane %v1779_v10, %v5963_v24  ;;  %v1469_v7 = vpack.c.bf16 %v1464_v2, %v1464_v2 }
 0x207   : > { %v1762_v19 = vcombine.low %v1753_v11, %v1761_v12 }
 0x208   : > { %v1787_v20 = vcombine.low %v1778_v13, %v1786_v15 }
 0x209   : > { %v1769_v25 = vrot.slane %v1762_v19, %v5966_v28 }
 0x20a   : > { %v1794_v26 = vrot.slane %v1787_v20, %v5966_v28 }
 0x20b   : > { %v1799_v30 = vshrl.u32 %v1769_v25, 16  ;;  %v1770_v35 = vcombine.high %v1769_v25, %v5709_v41 }
 0x20c   : > { %v1798_v29 = vpack.i.b16 %v1794_v26, %v1769_v25  ;;  %v1800_v31 = vshrl.u32 %v1794_v26, 16  ;;  %v1795_v32 = vcombine.high %v1794_v26, %v5709_v41 }
 0x20d   : > { %v1805_v39 = vshrl.u32 %v1770_v35, 16 }
 0x20e   : > { %v1981_v33 = vsel %vm1976_vm2, %v1798_v29, 0  ;;  %v1801_v34 = vpack.i.b16 %v1800_v31, %v1799_v30  ;;  %v1806_v37 = vshrl.u32 %v1795_v32, 16  ;;  %v1804_v38 = vpack.i.b16 %v1795_v32, %v1770_v35 }
 0x20f   : > { %5330 = vmatpush3.bf16.xpose.msra.mxu0 %v1981_v33 }
 0x210   : > { %v2027_v36 = vsel %vm1976_vm2, %v1801_v34, 0  ;;  %5341 = vmatprep.subr.bf16.mxu0 %v5701_v1  ;;  %v1807_v40 = vpack.i.b16 %v1806_v37, %v1805_v39  ;;  %v2073_v42 = vsel %vm1976_vm2, %v1804_v38, 0 }
 0x211   : > { %5336 = vmatpush3.bf16.xpose.msra.mxu1 %v2027_v36 }
 0x212   : > { %5347 = vmatprep.subr.bf16.mxu1 %v5701_v1  ;;  %v2119_v43 = vsel %vm1976_vm2, %v1807_v40, 0  ;;  %v1821_v40 = vrot.slane %v1469_v7, %v5963_v24 }
 0x216   : > { %5332 = vmatmul.mubr.msk.bf16.vlgmr.msra.gmra.mrb[4].mxu0 %vm1976_vm2, %v1628_v18  ;;  %v1466_v18 = vpop.f32.mrb[2].mxu1 }
 0x217   : > { %5342 = vmatpush3.bf16.xpose.msra.mxu0 %v2073_v42  ;;  %5343 = vmatprep.mubr.msk.bf16.mxu0 %vm5702_vm0, %v5701_v1 }
 0x218   : > { %5338 = vmatmul.mubr.msk.bf16.vlgmr.msra.gmra.mrb[4].mxu1 %vm1976_vm2, %v6016_v22  ;;  %5353 = vmatprep.subr.bf16.mxu0 %v5701_v1  ;;  %v5328_v22 = vpop.f32.mrb[3].mxu1 }
 0x219   : > { %5348 = vmatpush3.bf16.xpose.msra.mxu1 %v2119_v43  ;;  %5349 = vmatprep.mubr.msk.bf16.mxu1 %vm5702_vm0, %v5701_v1 }
 0x21a   : > { %5359 = vmatprep.subr.bf16.mxu1 %v5701_v1 }
 0x21e   : > { %5344 = vmatmul.mubr.msk.bf16.vlgmr.msra.gmra.mrb[8].mxu0 %vm1976_vm2, %v1634_v23 }
 0x21f   : > { %5355 = vmatprep.mubr.msk.bf16.mxu0 %vm5702_vm0, %v5701_v1 }
 0x220   : > { %5350 = vmatmul.mubr.msk.bf16.vlgmr.msra.gmra.mrb[8].mxu1 %vm1976_vm2, %v6022_v27 }
 0x221   : > { %5361 = vmatprep.mubr.msk.bf16.mxu1 %vm5702_vm0, %v5701_v1 }
 0x2e9   : > { %v2017_v44 = vpop.f32.mrb[4].mxu0 }
 0x2ea   : > { %v2161_v45 = vmul.f32 0.35355338, %v2017_v44  ;;  %v5333_v46 = vpop.f32.mrb[5].mxu0 }
 0x2eb   : > { %v2020_v47 = vpop.f32.mrb[6].mxu0  ;;  %v2063_v17 = vpop.f32.mrb[4].mxu1 }
 0x2ec   : > { %v2162_v21 = vmul.f32 0.35355338, %v2063_v17  ;;  %v5334_v23 = vpop.f32.mrb[7].mxu0  ;;  %v5339_v48 = vpop.f32.mrb[5].mxu1  ;;  %v2165_v49 = vsel %vm1976_vm2, %v2161_v45, -inf }
 0x2ed   : > { %v2066_v50 = vpop.f32.mrb[6].mxu1  ;;  %2166 = vmax.xlane.f32.xlu1 %v2165_v49 }
 0x2ee   : > { %v5340_v27 = vpop.f32.mrb[7].mxu1  ;;  %v2168_v51 = vsel %vm1976_vm2, %v2162_v21, -inf }
 0x2ef   : > { %2169 = vmax.xlane.f32.xlu0 %v2168_v51 }
 0x2f1   : > { %v2109_v52 = vpop.f32.mrb[8].mxu0 }
 0x2f2   : > { %v2163_v53 = vmul.f32 0.35355338, %v2109_v52  ;;  %v5345_v54 = vpop.f32.mrb[9].mxu0 }
 0x2f3   : > { %v2112_v55 = vpop.f32.mrb[10].mxu0  ;;  %v2155_v56 = vpop.f32.mrb[8].mxu1 }
 0x2f4   : > { %v2164_v57 = vmul.f32 0.35355338, %v2155_v56  ;;  %v5346_v58 = vpop.f32.mrb[11].mxu0  ;;  %v5351_v59 = vpop.f32.mrb[9].mxu1  ;;  %v2171_v60 = vsel %vm1976_vm2, %v2163_v53, -inf }
 0x2f5   : > { %v2158_v61 = vpop.f32.mrb[10].mxu1  ;;  %2172 = vmax.xlane.f32.xlu0 %v2171_v60 }
 0x2f6   : > { %v5352_v62 = vpop.f32.mrb[11].mxu1  ;;  %v2174_v63 = vsel %vm1976_vm2, %v2164_v57, -inf }
 0x2f7   : > { %2175 = vmax.xlane.f32.xlu1 %v2174_v63 }
 0x308   : > { %1811 = vrot.lane.b32.xlu1 %v1469_v7, %s6739_s0  ;;  %s6741_s0 = smov 8  }
 0x37a   : > { %v2167_v8 = vpop.xlane.xlu1 %2166 }
 0x37b   : > { %v2177_v9 = vsub.f32 %v2161_v45, %v2167_v8 }
 0x37c   : > { %v2170_v10 = vpop.xlane.xlu0 %2169 }
 0x37d   : > { %v2181_v11 = vmul.f32 1.442695, %v2177_v9  ;;  %v2178_v12 = vsub.f32 %v2162_v21, %v2170_v10 }
 0x37f   : > { %5581 = vpow2.f32 %v2181_v11  ;;  %v2183_v13 = vmul.f32 1.442695, %v2178_v12 }
 0x381   : > { %5583 = vpow2.f32 %v2183_v13 }
 0x382   : > { %v2173_v26 = vpop.xlane.xlu0 %2172 }
 0x383   : > { %v2179_v30 = vsub.f32 %v2163_v53, %v2173_v26 }
 0x384   : > { %v2176_v29 = vpop.xlane.xlu1 %2175 }
 0x385   : > { %v2180_v31 = vsub.f32 %v2164_v57, %v2176_v29  ;;  %v2185_v32 = vmul.f32 1.442695, %v2179_v30 }
 0x387   : > { %v2187_v33 = vmul.f32 1.442695, %v2180_v31  ;;  %5585 = vpow2.f32 %v2185_v32 }
 0x388   : > { %v1812_v38 = vpop.permute.xlu1 %1811 }
 0x389   : > { %v6080_v15 = vpop.eup %5581  ;;  %5587 = vpow2.f32 %v2187_v33  ;;  %v1829_v39 = vrot.slane %v1812_v38, %v5963_v24 }
 0x38a   : > { %v2189_v19 = vsel %vm1976_vm2, %v6080_v15, 0.0 }
 0x38b   : > { %v6084_v20 = vpop.eup %5583  ;;  %2190 = vadd.xlane.f32.xlu0 %v2189_v19  ;;  %v1830_v42 = vcombine.low %v1821_v40, %v1829_v39  ;;  %v1831_v14 = vcombine.high %v1821_v40, %v1829_v39 }
 0x38c   : > { %v2192_v25 = vsel %vm1976_vm2, %v6084_v20, 0.0 }
 0x38d   : > { %2193 = vadd.xlane.f32.xlu1 %v2192_v25  ;;  %v1838_v18 = vrot.slane %v1830_v42, %v5966_v28  ;;  %v1845_v44 = vrot.slane %v1831_v14, %v5966_v28 }
 0x38f   : > { %v1846_v17 = vcombine.high %v1838_v18, %v5709_v41  ;;  %v1847_v48 = vcombine.high %v1845_v44, %v5709_v41  ;;  %v1886_v27 = vshrl.u32 %v1838_v18, 16  ;;  %v1902_v52 = vshrl.u32 %v1845_v44, 16 }
 0x391   : > { %v6090_v34 = vpop.eup %5585  ;;  %v1894_v51 = vshrl.u32 %v1846_v17, 16  ;;  %v1910_v57 = vshrl.u32 %v1847_v48, 16 }
 0x392   : > { %v2195_v36 = vsel %vm1976_vm2, %v6090_v34, 0.0 }
 0x393   : > { %v6092_v35 = vpop.eup %5587 }
 0x394   : > { %v2198_v37 = vsel %vm1976_vm2, %v6092_v35, 0.0 }
 0x39e   : > { %1813 = vrot.lane.b32.xlu1 %v1469_v7, %s6782_s28 }
 0x3a1   : > { %1809 = vrot.lane.b32.xlu0 %v1469_v7, %s6783_s3 }
 0x3c0   : > { %2196 = vadd.xlane.f32.xlu0 %v2195_v36 }
 0x3c2   : > { %2199 = vadd.xlane.f32.xlu1 %v2198_v37 }
 0x418   : > { %v2191_v43 = vpop.xlane.xlu0 %2190 }
 0x419   : > { %5589 = vrcp.f32 %v2191_v43 }
 0x41a   : > { %v2194_v16 = vpop.xlane.xlu1 %2193 }
 0x41b   : > { %5591 = vrcp.f32 %v2194_v16 }
 0x41c   : > { %v1810_v22 = vpop.permute.xlu0 %1809 }
 0x41d   : > { %v1855_v46 = vrot.slane %v1810_v22, %v5963_v24 }
 0x41e   : > { %v1814_v45 = vpop.permute.xlu1 %1813 }
 0x41f   : > { %v1863_v47 = vrot.slane %v1814_v45, %v5963_v24 }
 0x421   : > { %v1864_v21 = vcombine.low %v1855_v46, %v1863_v47  ;;  %v1865_v23 = vcombine.high %v1855_v46, %v1863_v47 }
 0x423   : > { %v1872_v49 = vrot.slane %v1864_v21, %v5966_v28  ;;  %v1879_v50 = vrot.slane %v1865_v23, %v5966_v28  ;;  %v5590_v31 = vpop.eup %5589 }
 0x424   : > { %v2205_v38 = vmul.f32 %v5590_v31, %v6080_v15 }
 0x425   : > { %v1880_v53 = vcombine.high %v1872_v49, %v5709_v41  ;;  %v1881_v54 = vcombine.high %v1879_v50, %v5709_v41  ;;  %v1884_v55 = vpack.i.b16 %v1872_v49, %v1838_v18  ;;  %v1887_v56 = vshrl.u32 %v1872_v49, 16  ;;  %v5592_v36 = vpop.eup %5591 }
 0x426   : > { %v1900_v58 = vpack.i.b16 %v1879_v50, %v1845_v44  ;;  %v1903_v59 = vshrl.u32 %v1879_v50, 16  ;;  %v2206_v14 = vmul.f32 %v5592_v36, %v6084_v20  ;;  %v2209_v47 = vpack.c.bf16 %v2205_v38, %v2205_v38 }
 0x427   : > { %v1888_v60 = vpack.i.b16 %v1887_v56, %v1886_v27  ;;  %v1892_v61 = vpack.i.b16 %v1880_v53, %v1846_v17  ;;  %v1895_v62 = vshrl.u32 %v1880_v53, 16  ;;  %v1908_v63 = vpack.i.b16 %v1881_v54, %v1847_v48 }
 0x428   : > { %v1904_v0 = vpack.i.b16 %v1903_v59, %v1902_v52  ;;  %v1911_v2 = vshrl.u32 %v1881_v54, 16  ;;  %v1914_v7 = vcombine.low %v1884_v55, %v1900_v58  ;;  %v2210_v21 = vpack.c.bf16 %v2206_v14, %v2206_v14 }
 0x429   : > { %v1896_v8 = vpack.i.b16 %v1895_v62, %v1894_v51  ;;  %v1922_v9 = vcombine.low %v1892_v61, %v1908_v63 }
 0x42a   : > { %v1912_v10 = vpack.i.b16 %v1911_v2, %v1910_v57  ;;  %v1939_v11 = vcombine.low %v1888_v60, %v1904_v0  ;;  %v1921_v12 = vrot.slane %v1914_v7, %v5963_v24 }
 0x42b   : > { %v1929_v13 = vrot.slane %v1922_v9, %v5963_v24 }
 0x42c   : > { %v1947_v19 = vcombine.low %v1896_v8, %v1912_v10  ;;  %v1946_v26 = vrot.slane %v1939_v11, %v5963_v24 }
 0x42d   : > { %v1930_v25 = vcombine.low %v1921_v12, %v1929_v13 }
 0x42e   : > { %v1954_v29 = vrot.slane %v1947_v19, %v5963_v24 }
 0x42f   : > { %v1937_v30 = vrot.slane %v1930_v25, %v5966_v28 }
 0x430   : > { %v1955_v32 = vcombine.low %v1946_v26, %v1954_v29 }
 0x431   : > { %v1938_v33 = vcombine.high %v1937_v30, %v5709_v41  ;;  %v1967_v40 = vshrl.u32 %v1937_v30, 16 }
 0x432   : > { %v1962_v37 = vrot.slane %v1955_v32, %v5966_v28 }
 0x433   : > { %v1973_v16 = vshrl.u32 %v1938_v33, 16 }
 0x434   : > { %v1966_v39 = vpack.i.b16 %v1962_v37, %v1937_v30  ;;  %v1968_v42 = vshrl.u32 %v1962_v37, 16  ;;  %v1963_v43 = vcombine.high %v1962_v37, %v5709_v41 }
 0x436   : > { %v2218_v18 = vsel %vm2216_vm3, %v1966_v39, 0  ;;  %v1969_v22 = vpack.i.b16 %v1968_v42, %v1967_v40  ;;  %v1972_v44 = vpack.i.b16 %v1963_v43, %v1938_v33  ;;  %v1974_v45 = vshrl.u32 %v1963_v43, 16  ;;  %v5565_v33 = vld [vmem:[%s6784_s7] sm:$0xff]  }
 0x437   : > { %5354 = vmatpush3.bf16.msra.mxu0 %v2218_v18 }
 0x438   : > { %v2264_v46 = vsel %vm2216_vm3, %v1969_v22, 0  ;;  %5365 = vmatprep.subr.bf16.mxu0 %v5701_v1  ;;  %v1975_v15 = vpack.i.b16 %v1974_v45, %v1973_v16  ;;  %v2310_v17 = vsel %vm2216_vm3, %v1972_v44, 0  ;;  %v5566_v16 = vld [vmem:[%s6784_s7 + $0x8] sm:$0xff]   ;;  %s6791_s7 = sld [smem:[#allocation22_spill]] }
 0x439   : > { %5360 = vmatpush3.bf16.msra.mxu1 %v2264_v46 }
 0x43a   : > { %5356 = vmatmul.mubr.msk.bf16.vlgmr.msra.gmra.mrb[12].mxu0 %vm1976_vm2, %v2209_v47  ;;  %5371 = vmatprep.subr.bf16.mxu1 %v5701_v1  ;;  %v2356_v20 = vsel %vm2216_vm3, %v1975_v15, 0 }
 0x43b   : > { %5366 = vmatpush3.bf16.msra.mxu0 %v2310_v17  ;;  %5367 = vmatprep.mubr.msk.bf16.mxu0 %vm5702_vm0, %v5701_v1 }
 0x43c   : > { %5362 = vmatmul.mubr.msk.bf16.vlgmr.msra.gmra.mrb[12].mxu1 %vm1976_vm2, %v2210_v21  ;;  %5377 = vmatprep.subr.bf16.mxu0 %v5701_v1 }
 0x43d   : > { %5372 = vmatpush3.bf16.msra.mxu1 %v2356_v20  ;;  %5373 = vmatprep.mubr.msk.bf16.mxu1 %vm5702_vm0, %v5701_v1 }
 0x43e   : > { %5385 = vmatprep.subr.bf16.mxu1 %v5701_v1 }
 0x44d   : > { %v2197_v23 = vpop.xlane.xlu0 %2196 }
 0x44e   : > { %5593 = vrcp.f32 %v2197_v23 }
 0x44f   : > { %v2200_v48 = vpop.xlane.xlu1 %2199 }
 0x450   : > { %5595 = vrcp.f32 %v2200_v48 }
 0x458   : > { %v5594_v49 = vpop.eup %5593 }
 0x459   : > { %v2207_v50 = vmul.f32 %v5594_v49, %v6090_v34 }
 0x45a   : > { %v5596_v27 = vpop.eup %5595 }
 0x45b   : > { %v2208_v51 = vmul.f32 %v5596_v27, %v6092_v35  ;;  %v2211_v52 = vpack.c.bf16 %v2207_v50, %v2207_v50 }
 0x45d   : > { %5368 = vmatmul.mubr.msk.bf16.vlgmr.msra.gmra.mrb[16].mxu0 %vm1976_vm2, %v2211_v52  ;;  %v2212_v53 = vpack.c.bf16 %v2208_v51, %v2208_v51 }
 0x45e   : > { %5381 = vmatprep.mubr.msk.bf16.mxu0 %vm5702_vm0, %v5701_v1  ;;  %5378 = vmatpush3.bf16.msra.mxu0 %v5565_v33 }
 0x45f   : > { %5374 = vmatmul.mubr.msk.bf16.vlgmr.msra.gmra.mrb[16].mxu1 %vm1976_vm2, %v2212_v53  ;;  %5379 = vmatprep.subr.bf16.mxu0 %v5701_v1 }
 0x460   : > { %5389 = vmatprep.mubr.msk.bf16.mxu1 %vm5702_vm0, %v5701_v1 }
 0x462   : > { %5380 = vmatpush3.bf16.msra.mxu0 %v5566_v16 }
 0x50d   : > { %v2254_v54 = vpop.f32.mrb[12].mxu0 }
 0x50e   : > { %v5357_v55 = vpop.f32.mrb[13].mxu0 }
 0x50f   : > { %v2257_v56 = vpop.f32.mrb[14].mxu0  ;;  %v2300_v57 = vpop.f32.mrb[12].mxu1 }
 0x510   : > { %v5358_v34 = vpop.f32.mrb[15].mxu0  ;;  %v5363_v58 = vpop.f32.mrb[13].mxu1 }
 0x511   : > { %v2303_v59 = vpop.f32.mrb[14].mxu1 }
 0x512   : > { %v5364_v35 = vpop.f32.mrb[15].mxu1 }
 0x530   : > { %v2346_v60 = vpop.f32.mrb[16].mxu0 }
 0x531   : > { %v2398_v61 = vcombine.low %v2254_v54, %v2346_v60  ;;  %v2399_v62 = vcombine.high %v2254_v54, %v2346_v60  ;;  %v5369_v63 = vpop.f32.mrb[17].mxu0 }
 0x532   : > { %v2349_v0 = vpop.f32.mrb[18].mxu0  ;;  %v2392_v2 = vpop.f32.mrb[16].mxu1 }
 0x533   : > { %v2414_v7 = vcombine.low %v2300_v57, %v2392_v2  ;;  %v2415_v8 = vcombine.high %v2300_v57, %v2392_v2  ;;  %v5370_v9 = vpop.f32.mrb[19].mxu0  ;;  %v5375_v10 = vpop.f32.mrb[17].mxu1  ;;  %v2406_v12 = vrot.slane %v2398_v61, %v5963_v24  ;;  %v2413_v13 = vrot.slane %v2399_v62, %v5963_v24  ;;  %v5567_v2 = vld [vmem:[%s6709_s13] sm:$0xff]  }
 0x534   : > { %v2395_v11 = vpop.f32.mrb[18].mxu1  ;;  %5393 = vmatprep.subr.bf16.mxu0 %v5567_v2 }
 0x535   : > { %v2422_v19 = vrot.slane %v2414_v7, %v5963_v24  ;;  %v2429_v25 = vrot.slane %v2415_v8, %v5963_v24  ;;  %v5376_v26 = vpop.f32.mrb[19].mxu1  ;;  %v5568_v7 = vld [vmem:[%s6709_s13 + $0x8] sm:$0xff]  }
 0x537   : > { %v2430_v29 = vcombine.low %v2406_v12, %v2422_v19  ;;  %v2431_v30 = vcombine.high %v2406_v12, %v2422_v19  ;;  %v2446_v31 = vcombine.low %v2413_v13, %v2429_v25  ;;  %v2447_v32 = vcombine.high %v2413_v13, %v2429_v25  ;;  %v5205_v25 = vld [vmem:[%s6710_s14] ss:$0 sm:$0xff] }
 0x539   : > { %v2438_v36 = vrot.slane %v2430_v29, %v5966_v28  ;;  %v2445_v37 = vrot.slane %v2431_v30, %v5966_v28  ;;  %v2454_v38 = vrot.slane %v2446_v31, %v5966_v28  ;;  %v2461_v39 = vrot.slane %v2447_v32, %v5966_v28 }
 0x53b   : > { %v2466_v40 = vcombine.low %v2438_v36, %v2445_v37  ;;  %v5193_v42 = vcombine.high %v2438_v36, %v2445_v37  ;;  %v2482_v43 = vcombine.low %v2454_v38, %v2461_v39  ;;  %v5194_v14 = vcombine.high %v2454_v38, %v2461_v39 }
 0x53d   : > { %v2473_v18 = vrot.slane %v2466_v40, %v5963_v24  ;;  %v2481_v22 = vrot.slane %v5193_v42, %v5963_v24  ;;  %v2489_v44 = vrot.slane %v2482_v43, %v5963_v24  ;;  %v2497_v45 = vrot.slane %v5194_v14, %v5963_v24 }
 0x53f   : > { %v2499_v46 = vcombine.high %v2473_v18, %v2481_v22  ;;  %v2515_v47 = vcombine.high %v2489_v44, %v2497_v45  ;;  %v2498_v15 = vcombine.low %v2473_v18, %v2481_v22  ;;  %v2514_v17 = vcombine.low %v2489_v44, %v2497_v45  ;;  %v5200_v18 = vld [vmem:[%s6791_s7] ss:$0 sm:$0xff]  ;;  %s6796_s7 = smov 24  }
 0x541   : > { %v2513_v21 = vrot.slane %v2499_v46, %v5966_v28  ;;  %v2529_v20 = vrot.slane %v2515_v47, %v5966_v28  ;;  %v2506_v23 = vrot.slane %v2498_v15, %v5966_v28  ;;  %v2522_v48 = vrot.slane %v2514_v17, %v5966_v28 }
 0x543   : > { %v2532_v49 = vcombine.low %v2513_v21, %v2529_v20  ;;  %v2531_v50 = vcombine.high %v2506_v23, %v2522_v48  ;;  %v2533_v27 = vcombine.high %v2513_v21, %v2529_v20  ;;  %v2530_v51 = vcombine.low %v2506_v23, %v2522_v48 }
 0x545   : > { %2539 = vrot.lane.b32.xlu1 %v2532_v49, %s6742_s10  ;;  %2535 = vrot.lane.b32.xlu0 %v2531_v50, %s6741_s0  ;;  %s6785_s10 = sld [smem:[#allocation20_spill]] }
 0x549   : > { %2543 = vrot.lane.b32.xlu0 %v2533_v27, %s6743_s1 }
 0x54b   : > { %v5195_v58 = vld [vmem:[%s6785_s10] ss:$0 sm:$0xff]  ;;  %s5493_s10 = smul.u32 12, %s5929_s8  ;;  %s6787_s8 = sld [smem:[#allocation23_spill]] }
 0x54d   : > { %s1228_s6 = scalar_lea.vmem %s6786_s12, %s5493_s10  ;;  %s6789_s10 = smov 112  }
 0x54e   : > { %v5569_v3 = vld [vmem:[%s1228_s6] sm:$0xff]   ;;  %s6790_s12 = sld [smem:[#allocation21_spill]] }
 0x551   : > { %s6788_s11 = smov %s6787_s8  ;;  %v5571_v13 = vld [vmem:[%s6787_s8] sm:$0xff]   ;;  %s6794_s8 = smov 16  }
 0x552   : > { %5386 = vmatpush3.bf16.msra.mxu1 %v5571_v13  ;;  %v5572_v19 = vld [vmem:[%s6788_s11 + $0x8] sm:$0xff]  }
 0x553   : > { %5387 = vmatprep.subr.bf16.mxu1 %v5701_v1 }
 0x554   : > { %v5199_v14 = vld [vmem:[%s6790_s12] ss:$0 sm:$0xff]  ;;  %s5243_s12 = sshll.u32 %s5691_s30, 6 }
 0x556   : > { %5388 = vmatpush3.bf16.msra.mxu1 %v5572_v19 }
 0x557   : > { %5401 = vmatprep.subr.bf16.mxu1 %v5701_v1 }
 0x5b7   : > { %v2536_v52 = vpop.permute.xlu0 %2535  ;;  %v2540_v53 = vpop.permute.xlu1 %2539 }
 0x5b8   : > { %v2546_v54 = vsel %vm1976_vm2, %v2530_v51, %v2536_v52 }
 0x5b9   : > { %v2548_v56 = vsel %vm2547_vm4, %v2546_v54, %v2540_v53 }
 0x5bb   : > { %v2544_v55 = vpop.permute.xlu0 %2543 }
 0x5bc   : > { %v2550_v57 = vsel %vm2549_vm5, %v2548_v56, %v2544_v55 }
 0x5bd   : > { %v2555_v34 = vpack.c.bf16 %v2550_v57, %v2550_v57 }
 0x5bf   : > { %5382 = vmatmul.mubr.msk.bf16.vlgmr.msra.gmra.mrb[20].mxu0 %vm1358_vm1, %v2555_v34 }
 0x5c0   : > { %5394 = vmatpush3.bf16.msra.mxu0 %v5567_v2  ;;  %5397 = vmatprep.mubr.msk.bf16.mxu0 %vm1358_vm1, %v5569_v3 }
 0x5c1   : > { %5395 = vmatprep.subr.bf16.mxu0 %v5568_v7 }
 0x5c4   : > { %5396 = vmatpush3.bf16.msra.mxu0 %v5568_v7 }
 0x5c5   : > { %5409 = vmatprep.subr.bf16.mxu0 %v5701_v1 }
 0x692   : > { %v2612_v59 = vpop.f32.mrb[20].mxu0 }
 0x693   : > { %v2613_v35 = vadd.f32 %v5195_v58, %v2612_v59  ;;  %v5383_v60 = vpop.f32.mrb[21].mxu0 }
 0x694   : > { %v2615_v61 = vpop.f32.mrb[22].mxu0 }
 0x695   : > { %v5384_v62 = vpop.f32.mrb[23].mxu0  ;;  %v2618_v63 = vadd.f32 %v2613_v35, %v1332_v6  ;;  %v5570_v6 = vld [vmem:[%s1228_s6 + $0x8] ss:$0 sps:$4 sm:$0x33]   ;;  %s6795_s6 = smov 8  }
 0x696   : > { %5398 = vmatmul.mubr.msk.bf16.vlgmr.msra.gmra.mrb[24].mxu0 %vm1358_vm1, %v5570_v6 }
 0x697   : > { %v2621_v0 = vsel %vm1358_vm1, %v2618_v63, 0.0  ;;  %5413 = vmatprep.mubr.msk.bf16.mxu0 %vm5702_vm0, %v5701_v1 }
 0x698   : > { %2622 = vadd.xlane.f32.xlu1 %v2621_v0 }
 0x725   : > { %v2623_v8 = vpop.xlane.xlu1 %2622 }
 0x726   : > { %v2625_v9 = vmul.f32 0.03125, %v2623_v8 }
 0x728   : > { %v2626_v10 = vsub.f32 %v2618_v63, %v2625_v9 }
 0x72a   : > { %v2627_v11 = vmul.f32 %v2626_v10, %v2626_v10 }
 0x72c   : > { %v2628_v12 = vsel %vm1358_vm1, %v2627_v11, 0.0 }
 0x72d   : > { %2629 = vadd.xlane.f32.xlu0 %v2628_v12 }
 0x769   : > { %v5399_v26 = vpop.f32.mrb[24].mxu0 }
 0x76a   : > { %v2789_v29 = vpop.f32.mrb[25].mxu0  ;;  %v2798_v33 = vadd.f32 %v5399_v26, %v5205_v25 }
 0x76b   : > { %v2790_v30 = vadd.f32 %v5205_v25, %v2789_v29  ;;  %v5400_v31 = vpop.f32.mrb[26].mxu0 }
 0x76c   : > { %v2792_v32 = vpop.f32.mrb[27].mxu0  ;;  %v6207_v38 = vpack.c.bf16 %v2798_v33, %v2798_v33 }
 0x76d   : > { %v2793_v36 = vadd.f32 %v5205_v25, %v2792_v32 }
 0x76f   : > { %v6205_v37 = vpack.c.bf16 %v2793_v36, %v2790_v30 }
 0x771   : > { %2980 = vrot.lane.b32.xlu1 %v6205_v37, %s6789_s10  ;;  %2975 = vrot.lane.b32.xlu0 %v6205_v37, %s6783_s3  ;;  %v2990_v47 = vcombine.high %v6205_v37, %v5709_v41  ;;  %v2997_v15 = vrot.slane %v6205_v37, %v5963_v24 }
 0x773   : > { %v3004_v4 = vrot.slane %v2990_v47, %v5963_v24 }
 0x775   : > { %2985 = vrot.lane.b32.xlu1 %v6205_v37, %s6782_s28  ;;  %2977 = vrot.lane.b32.xlu0 %v6207_v38, %s6783_s3 }
 0x779   : > { %2982 = vrot.lane.b32.xlu1 %v6207_v38, %s6789_s10  ;;  %2987 = vrot.lane.b32.xlu0 %v6207_v38, %s6782_s28 }
 0x7ba   : > { %v2630_v39 = vpop.xlane.xlu0 %2629 }
 0x7bb   : > { %v2631_v40 = vmul.f32 0.03125, %v2630_v39 }
 0x7bd   : > { %v2632_v42 = vadd.f32 1e-05, %v2631_v40 }
 0x7bf   : > { %5597 = vrsqrt.f32 %v2632_v42 }
 0x7c9   : > { %v5598_v43 = vpop.eup %5597 }
 0x7ca   : > { %v2634_v16 = vmul.f32 %v5598_v43, %v2626_v10 }
 0x7cc   : > { %v2641_v22 = vmul.f32 %v5199_v14, %v2634_v16 }
 0x7ce   : > { %v6227_v44 = vadd.f32 %v5200_v18, %v2641_v22 }
 0x7d0   : > { %v2649_v45 = vadd.f32 %v6227_v44, %v1328_v5 }
 0x7d2   : > { %v2650_v46 = vpack.c.bf16 %v2649_v45, %v2649_v45 }
 0x7d4   : > { %5390 = vmatmul.mubr.msk.bf16.vlgmr.msra.gmra.mrb[20].mxu1 %vm1358_vm1, %v2650_v46 }
 0x7d5   : > { %5405 = vmatprep.mubr.msk.bf16.mxu1 %vm5702_vm0, %v5701_v1 }
 0x7e3   : > { %v6239_v17 = vpop.permute.xlu1 %2980  ;;  %v6241_v21 = vpop.permute.xlu0 %2975 }
 0x7e4   : > { %v3005_v5 = vcombine.high %v6239_v17, %v5709_v41  ;;  %v3012_v20 = vrot.slane %v6239_v17, %v5963_v24  ;;  %v3056_v23 = vcombine.high %v6241_v21, %v5709_v41  ;;  %v3063_v51 = vrot.slane %v6241_v21, %v5963_v24 }
 0x7e6   : > { %v3019_v48 = vrot.slane %v3005_v5, %v5963_v24  ;;  %v3020_v49 = vcombine.low %v2997_v15, %v3012_v20  ;;  %v3021_v50 = vcombine.high %v2997_v15, %v3012_v20  ;;  %v3070_v58 = vrot.slane %v3056_v23, %v5963_v24 }
 0x7e7   : > { %v6251_v27 = vpop.permute.xlu1 %2985  ;;  %v6257_v56 = vpop.permute.xlu0 %2977 }
 0x7e8   : > { %v3028_v52 = vrot.slane %v3020_v49, %v5966_v28  ;;  %v3035_v53 = vrot.slane %v3021_v50, %v5966_v28  ;;  %v3036_v54 = vcombine.low %v3004_v4, %v3019_v48  ;;  %v3037_v55 = vcombine.high %v3004_v4, %v3019_v48 }
 0x7e9   : > { %v3071_v57 = vcombine.high %v6251_v27, %v5709_v41  ;;  %v3078_v34 = vrot.slane %v6251_v27, %v5963_v24 }
 0x7ea   : > { %v6265_v59 = vrot.slane %v3036_v54, %v5966_v28  ;;  %v6268_v35 = vrot.slane %v3037_v55, %v5966_v28  ;;  %v3052_v60 = vcombine.high %v3028_v52, %v5709_v41  ;;  %v3053_v61 = vcombine.high %v3035_v53, %v5709_v41 }
 0x7eb   : > { %v3147_v62 = vshrl.u32 %v3028_v52, 16  ;;  %v3085_v63 = vrot.slane %v3071_v57, %v5963_v24  ;;  %v3086_v0 = vcombine.low %v3063_v51, %v3078_v34  ;;  %v3163_v6 = vshrl.u32 %v3035_v53, 16  ;;  %v6279_v12 = vpop.permute.xlu1 %2982  ;;  %v6282_v29 = vpop.permute.xlu0 %2987 }
 0x7ec   : > { %v3054_v2 = vcombine.high %v6265_v59, %v5709_v41  ;;  %v3055_v7 = vcombine.high %v6268_v35, %v5709_v41  ;;  %v3155_v3 = vshrl.u32 %v3052_v60, 16  ;;  %v3171_v8 = vshrl.u32 %v3053_v61, 16 }
 0x7ed   : > { %v3179_v9 = vshrl.u32 %v6265_v59, 16  ;;  %v3087_v10 = vcombine.high %v3063_v51, %v3078_v34  ;;  %v3094_v11 = vrot.slane %v3086_v0, %v5966_v28  ;;  %v3195_v19 = vshrl.u32 %v6268_v35, 16 }
 0x7ee   : > { %v3187_v13 = vshrl.u32 %v3054_v2, 16  ;;  %v3102_v25 = vcombine.low %v3070_v58, %v3085_v63  ;;  %v3103_v26 = vcombine.high %v3070_v58, %v3085_v63  ;;  %v3203_v30 = vshrl.u32 %v3055_v7, 16 }
 0x7ef   : > { %v3101_v31 = vrot.slane %v3087_v10, %v5966_v28  ;;  %v3118_v32 = vcombine.high %v3094_v11, %v5709_v41  ;;  %v3148_v33 = vshrl.u32 %v3094_v11, 16  ;;  %v3145_v40 = vpack.i.b16 %v3094_v11, %v3028_v52 }
 0x7f0   : > { %v3110_v36 = vrot.slane %v3102_v25, %v5966_v28  ;;  %v3117_v39 = vrot.slane %v3103_v26, %v5966_v28  ;;  %v3123_v42 = vcombine.low %v6207_v38, %v6279_v12  ;;  %v3134_v18 = vcombine.low %v6257_v56, %v6282_v29 }
 0x7f1   : > { %v3119_v43 = vcombine.high %v3101_v31, %v5709_v41  ;;  %v3149_v14 = vpack.i.b16 %v3148_v33, %v3147_v62  ;;  %v3156_v16 = vshrl.u32 %v3118_v32, 16  ;;  %v3161_v46 = vpack.i.b16 %v3101_v31, %v3035_v53 }
 0x7f2   : > { %v3120_v22 = vcombine.high %v3110_v36, %v5709_v41  ;;  %v3121_v45 = vcombine.high %v3117_v39, %v5709_v41  ;;  %v3164_v47 = vshrl.u32 %v3101_v31, 16  ;;  %v3153_v15 = vpack.i.b16 %v3118_v32, %v3052_v60 }
 0x7f3   : > { %v3157_v4 = vpack.i.b16 %v3156_v16, %v3155_v3  ;;  %v3169_v5 = vpack.i.b16 %v3119_v43, %v3053_v61  ;;  %v3172_v20 = vshrl.u32 %v3119_v43, 16  ;;  %v3177_v48 = vpack.i.b16 %v3110_v36, %v6265_v59 }
 0x7f4   : > { %v3165_v23 = vpack.i.b16 %v3164_v47, %v3163_v6  ;;  %v3180_v49 = vshrl.u32 %v3110_v36, 16  ;;  %v3188_v50 = vshrl.u32 %v3120_v22, 16  ;;  %v3185_v52 = vpack.i.b16 %v3120_v22, %v3054_v2 }
 0x7f5   : > { %v3173_v51 = vpack.i.b16 %v3172_v20, %v3171_v8  ;;  %v3193_v54 = vpack.i.b16 %v3117_v39, %v6268_v35  ;;  %v3196_v55 = vshrl.u32 %v3117_v39, 16  ;;  %v3201_v57 = vpack.i.b16 %v3121_v45, %v3055_v7 }
 0x7f6   : > { %v3204_v34 = vshrl.u32 %v3121_v45, 16  ;;  %v3219_v58 = vcombine.low %v3145_v40, %v3161_v46  ;;  %v3130_v53 = vrot.slane %v3123_v42, %v5966_v28  ;;  %v3181_v62 = vpack.i.b16 %v3180_v49, %v3179_v9 }
 0x7f7   : > { %v3197_v60 = vpack.i.b16 %v3196_v55, %v3195_v19  ;;  %v3141_v61 = vrot.slane %v3134_v18, %v5966_v28  ;;  %v3227_v63 = vcombine.low %v3153_v15, %v3169_v5  ;;  %v3189_v3 = vpack.i.b16 %v3188_v50, %v3187_v13 }
 0x7f8   : > { %v3131_v0 = vcombine.high %v3130_v53, %v5709_v41  ;;  %v3210_v59 = vshrl.u32 %v3130_v53, 16  ;;  %v3226_v6 = vrot.slane %v3219_v58, %v5963_v24  ;;  %v3205_v8 = vpack.i.b16 %v3204_v34, %v3203_v30 }
 0x7f9   : > { %v3142_v2 = vcombine.high %v3141_v61, %v5709_v41  ;;  %v3211_v35 = vshrl.u32 %v3141_v61, 16  ;;  %v3234_v7 = vrot.slane %v3227_v63, %v5963_v24  ;;  %v3235_v11 = vcombine.low %v3177_v48, %v3193_v54 }
 0x7fa   : > { %v3216_v10 = vshrl.u32 %v3131_v0, 16  ;;  %v3243_v25 = vcombine.low %v3185_v52, %v3201_v57  ;;  %v3269_v9 = vcombine.low %v3149_v14, %v3165_v23  ;;  %v3209_v19 = vpack.i.b16 %v3141_v61, %v3130_v53 }
 0x7fb   : > { %v3217_v26 = vshrl.u32 %v3142_v2, 16  ;;  %v3251_v31 = vcombine.low %v3226_v6, %v3234_v7  ;;  %v3242_v32 = vrot.slane %v3235_v11, %v5963_v24  ;;  %v3277_v36 = vcombine.low %v3157_v4, %v3173_v51 }
 0x7fc   : > { %v3250_v33 = vrot.slane %v3243_v25, %v5963_v24  ;;  %v3276_v13 = vrot.slane %v3269_v9, %v5963_v24  ;;  %v3212_v39 = vpack.i.b16 %v3211_v35, %v3210_v59  ;;  %v3215_v40 = vpack.i.b16 %v3142_v2, %v3131_v0 }
 0x7fd   : > { %v3218_v42 = vpack.i.b16 %v3217_v26, %v3216_v10  ;;  %v3285_v30 = vcombine.low %v3181_v62, %v3197_v60  ;;  %v3258_v43 = vrot.slane %v3251_v31, %v5966_v28  ;;  %v3284_v18 = vrot.slane %v3277_v36, %v5963_v24  ;;  %v5201_v26 = vld [vmem:[%s6792_s4] ss:$0 sm:$0xff]  ;;  %s1195_s4 = sand.u32 1, %s5683_s5  }
 0x7fe   : > { %v3259_v16 = vcombine.low %v3242_v32, %v3250_v33  ;;  %v3293_v14 = vcombine.low %v3189_v3, %v3205_v8  ;;  %v3321_v15 = vcombine.low %v3209_v19, %v3215_v40  ;;  %s4664_s0 = scalar_lea.sflag [#allocation3], %s1195_s4 }
 0x7ff   : > { %v3292_v22 = vrot.slane %v3285_v30, %v5963_v24  ;;  %v3301_v47 = vcombine.low %v3276_v13, %v3284_v18  ;;  %v3332_v23 = vcombine.low %v3212_v39, %v3218_v42 }
 0x800   : > { %v3266_v45 = vrot.slane %v3259_v16, %v5966_v28  ;;  %v3300_v46 = vrot.slane %v3293_v14, %v5963_v24  ;;  %v3328_v51 = vrot.slane %v3321_v15, %v5966_v28 }
 0x801   : > { %v3308_v4 = vrot.slane %v3301_v47, %v5966_v28  ;;  %v3339_v52 = vrot.slane %v3332_v23, %v5966_v28 }
 0x802   : > { %v3267_v5 = vcombine.low %v3258_v43, %v3266_v45  ;;  %v3309_v20 = vcombine.low %v3292_v22, %v3300_v46  ;;  %v3356_v58 = vshrl.u32 %v3328_v51, 16  ;;  %v6322_v59 = vcombine.high %v3328_v51, %v5709_v41 }
 0x803   : > { %v3357_v53 = vshrl.u32 %v3339_v52, 16  ;;  %v3355_v60 = vpack.i.b16 %v3339_v52, %v3328_v51  ;;  %v6325_v3 = vcombine.high %v3339_v52, %v5709_v41  ;;  %v6335_v7 = vcombine.high %v3258_v43, %v3266_v45 }
 0x804   : > { %v3316_v48 = vrot.slane %v3309_v20, %v5966_v28  ;;  %v3344_v50 = vshrl.u32 %v3267_v5, 16  ;;  %v3362_v2 = vshrl.u32 %v6322_v59, 16 }
 0x805   : > { %v3358_v61 = vpack.i.b16 %v3357_v53, %v3356_v58  ;;  %v3772_v63 = vsel %vm1976_vm2, %v3355_v60, 0  ;;  %v3361_v6 = vpack.i.b16 %v6325_v3, %v6322_v59  ;;  %v3363_v35 = vshrl.u32 %v6325_v3, 16 }
 0x806   : > { %v3317_v49 = vcombine.low %v3308_v4, %v3316_v48  ;;  %v6337_v10 = vcombine.high %v3308_v4, %v3316_v48  ;;  %v3350_v25 = vshrl.u32 %v6335_v7, 16 }
 0x807   : > { %v3821_v0 = vsel %vm1976_vm2, %v3358_v61, 0  ;;  %v6333_v8 = vpack.i.b16 %v3363_v35, %v3362_v2 }
 0x808   : > { %v3343_v54 = vpack.i.b16 %v3317_v49, %v3267_v5  ;;  %v3345_v55 = vshrl.u32 %v3317_v49, 16  ;;  %v3349_v11 = vpack.i.b16 %v6337_v10, %v6335_v7  ;;  %v3351_v9 = vshrl.u32 %v6337_v10, 16 }
 0x80a   : > { %v3769_v57 = vsel %vm1976_vm2, %v3343_v54, 0  ;;  %v3346_v34 = vpack.i.b16 %v3345_v55, %v3344_v50  ;;  %v6343_v19 = vpack.i.b16 %v3351_v9, %v3350_v25 }
 0x80b   : > { %5402 = vmatpush3.bf16.xpose.msra.mxu1 %v3769_v57 }
 0x80c   : > { %v3818_v62 = vsel %vm1976_vm2, %v3346_v34, 0  ;;  %5403 = vmatprep.subr.bf16.mxu1 %v5701_v1 }
 0x80d   : > { %5410 = vmatpush3.bf16.xpose.msra.mxu0 %v3818_v62 }
 0x80e   : > { %5411 = vmatprep.subr.bf16.mxu0 %v5701_v1 }
 0x813   : > { %5404 = vmatpush3.bf16.xpose.msra.mxu1 %v3772_v63 }
 0x814   : > { %5417 = vmatprep.subr.bf16.mxu1 %v5701_v1 }
 0x815   : > { %5412 = vmatpush3.bf16.xpose.msra.mxu0 %v3821_v0 }
 0x816   : > { %5425 = vmatprep.subr.bf16.mxu0 %v5701_v1 }
 0x8a7   : > { %v2711_v31 = vpop.f32.mrb[20].mxu1 }
 0x8a8   : > { %v2712_v32 = vadd.f32 %v5201_v26, %v2711_v31  ;;  %v5391_v33 = vpop.f32.mrb[21].mxu1 }
 0x8a9   : > { %v2714_v13 = vpop.f32.mrb[22].mxu1 }
 0x8aa   : > { %v2717_v36 = vpack.c.bf16 %v2712_v32, %v2712_v32  ;;  %v5392_v39 = vpop.f32.mrb[23].mxu1 }
 0x8ac   : > { %2806 = vrot.lane.b32.xlu1 %v2717_v36, %s6783_s3  ;;  %2808 = vrot.lane.b32.xlu0 %v2717_v36, %s6789_s10  ;;  %v2818_v30 = vrot.slane %v2717_v36, %v5963_v24  ;;  %s5172_s3 = sshll.u32 %s1195_s4, 2 }
 0x8ad   : > { %s1197_s10 = scalar_lea.vmem [#allocation2], %s5172_s3 }
 0x8ae   : > { %s4687_s1 = sshll.u32 %s1197_s10, 4  ;;  %s4688_s1 = int_to_ptr.vmem [resolvable:$true] %s4687_s1 }
 0x8b0   : > { %2810 = vrot.lane.b32.xlu1 %v2717_v36, %s6782_s28  ;;  %3369 = vrot.lane.b32.xlu0 %v6241_v21, %s6793_s9  ;;  %s5713_s28 = smov [#allocation2]  }
 0x8b1   : > { %s5625_s3 = sshll.u32 %s5713_s28, 4  ;;  %s5626_s3 = int_to_ptr.vmem [resolvable:$false] %s5625_s3 }
 0x8b2   : > { %s5627_s11 = scalar_lea.vmem %s5626_s3, 128  ;;  %p5628_p1 = scmp.lt.s32.totalorder %s4688_s1, %s5626_s3 }
 0x8b4   : > { %3365 = vrot.lane.b32.xlu1 %v6205_v37, %s6793_s9 }
 0x8b8   : > { %3373 = vrot.lane.b32.xlu1 %v6239_v17, %s6793_s9 }
 0x8bc   : > { %3377 = vrot.lane.b32.xlu1 %v6251_v27, %s6793_s9 }
 0x91e   : > { %v2807_v40 = vpop.permute.xlu1 %2806  ;;  %v2809_v42 = vpop.permute.xlu0 %2808 }
 0x91f   : > { %v2826_v43 = vrot.slane %v2809_v42, %v5963_v24  ;;  %v2852_v17 = vrot.slane %v2807_v40, %v5963_v24 }
 0x921   : > { %v2827_v16 = vcombine.low %v2818_v30, %v2826_v43  ;;  %v2828_v18 = vcombine.high %v2818_v30, %v2826_v43 }
 0x922   : > { %v2811_v14 = vpop.permute.xlu1 %2810  ;;  %v3370_v45 = vpop.permute.xlu0 %3369 }
 0x923   : > { %v2835_v21 = vrot.slane %v2827_v16, %v5966_v28  ;;  %v2842_v22 = vrot.slane %v2828_v18, %v5966_v28  ;;  %v2860_v37 = vrot.slane %v2811_v14, %v5963_v24  ;;  %v3451_v20 = vcombine.high %v3370_v45, %v5709_v41 }
 0x925   : > { %v2843_v27 = vcombine.high %v2835_v21, %v5709_v41  ;;  %v2844_v46 = vcombine.high %v2842_v22, %v5709_v41  ;;  %v2861_v47 = vcombine.low %v2852_v17, %v2860_v37  ;;  %v2862_v15 = vcombine.high %v2852_v17, %v2860_v37 }
 0x926   : > { %v3366_v5 = vpop.permute.xlu1 %3365  ;;  %v2883_v23 = vshrl.u32 %v2835_v21, 16  ;;  %v2899_v48 = vshrl.u32 %v2842_v22, 16 }
 0x927   : > { %v3385_v4 = vcombine.high %v3366_v5, %v5709_v41  ;;  %v2869_v49 = vrot.slane %v2861_v47, %v5966_v28  ;;  %v2876_v50 = vrot.slane %v2862_v15, %v5966_v28  ;;  %v2891_v51 = vshrl.u32 %v2843_v27, 16 }
 0x928   : > { %v2907_v52 = vshrl.u32 %v2844_v46, 16  ;;  %v3392_v54 = vrot.slane %v3366_v5, %v5963_v24 }
 0x929   : > { %v3399_v55 = vrot.slane %v3385_v4, %v5963_v24  ;;  %v2877_v57 = vcombine.high %v2869_v49, %v5709_v41  ;;  %v2878_v34 = vcombine.high %v2876_v50, %v5709_v41  ;;  %v2881_v58 = vpack.i.b16 %v2869_v49, %v2835_v21 }
 0x92a   : > { %v2884_v53 = vshrl.u32 %v2869_v49, 16  ;;  %v3374_v62 = vpop.permute.xlu1 %3373  ;;  %v2897_v60 = vpack.i.b16 %v2876_v50, %v2842_v22  ;;  %v2900_v61 = vshrl.u32 %v2876_v50, 16  ;;  %v3458_v49 = vrot.slane %v3370_v45, %v5963_v24 }
 0x92b   : > { %v3400_v63 = vcombine.high %v3374_v62, %v5709_v41  ;;  %v3407_v0 = vrot.slane %v3374_v62, %v5963_v24  ;;  %v2889_v35 = vpack.i.b16 %v2877_v57, %v2843_v27  ;;  %v2892_v25 = vshrl.u32 %v2877_v57, 16 }
 0x92c   : > { %v2885_v2 = vpack.i.b16 %v2884_v53, %v2883_v23  ;;  %v2905_v9 = vpack.i.b16 %v2878_v34, %v2844_v46  ;;  %v2901_v26 = vpack.i.b16 %v2900_v61, %v2899_v48  ;;  %v2908_v31 = vshrl.u32 %v2878_v34, 16 }
 0x92d   : > { %v2911_v32 = vcombine.low %v2881_v58, %v2897_v60  ;;  %v3414_v33 = vrot.slane %v3400_v63, %v5963_v24  ;;  %v2893_v13 = vpack.i.b16 %v2892_v25, %v2891_v51  ;;  %v3415_v39 = vcombine.low %v3392_v54, %v3407_v0 }
 0x92e   : > { %v2919_v36 = vcombine.low %v2889_v35, %v2905_v9  ;;  %v3416_v40 = vcombine.high %v3392_v54, %v3407_v0  ;;  %v3378_v42 = vpop.permute.xlu1 %3377  ;;  %v2909_v30 = vpack.i.b16 %v2908_v31, %v2907_v52  ;;  %v2936_v16 = vcombine.low %v2885_v2, %v2901_v26 }
 0x92f   : > { %v2918_v43 = vrot.slane %v2911_v32, %v5963_v24  ;;  %v3431_v18 = vcombine.low %v3399_v55, %v3414_v33  ;;  %v6381_v21 = vrot.slane %v3415_v39, %v5966_v28  ;;  %v3432_v37 = vcombine.high %v3399_v55, %v3414_v33 }
 0x930   : > { %v2926_v14 = vrot.slane %v2919_v36, %v5963_v24  ;;  %v6384_v22 = vrot.slane %v3416_v40, %v5966_v28  ;;  %v2944_v17 = vcombine.low %v2893_v13, %v2909_v30  ;;  %v3466_v46 = vcombine.high %v3378_v42, %v5709_v41 }
 0x931   : > { %v6387_v27 = vrot.slane %v3431_v18, %v5966_v28  ;;  %v6391_v15 = vrot.slane %v3432_v37, %v5966_v28  ;;  %v6395_v5 = vcombine.high %v6381_v21, %v5709_v41  ;;  %v2943_v23 = vrot.slane %v2936_v16, %v5963_v24 }
 0x932   : > { %v2927_v47 = vcombine.low %v2918_v43, %v2926_v14  ;;  %v6399_v4 = vcombine.high %v6384_v22, %v5709_v41  ;;  %v2951_v48 = vrot.slane %v2944_v17, %v5963_v24  ;;  %v3543_v51 = vshrl.u32 %v6381_v21, 16 }
 0x933   : > { %v6406_v50 = vcombine.high %v6387_v27, %v5709_v41  ;;  %v3465_v52 = vrot.slane %v3451_v20, %v5963_v24  ;;  %v3867_v54 = vsel %vm1976_vm2, %v3349_v11, 0  ;;  %v3450_v57 = vcombine.high %v6391_v15, %v5709_v41 }
 0x934   : > { %v2952_v55 = vcombine.low %v2943_v23, %v2951_v48  ;;  %v3559_v34 = vshrl.u32 %v6384_v22, 16  ;;  %v3473_v45 = vrot.slane %v3378_v42, %v5963_v24  ;;  %v3551_v58 = vshrl.u32 %v6395_v5, 16 }
 0x935   : > { %v3567_v53 = vshrl.u32 %v6399_v4, 16  ;;  %v3480_v62 = vrot.slane %v3466_v46, %v5963_v24  ;;  %v6422_v20 = vrot.slane %v2927_v47, %v5966_v28  ;;  %v3575_v7 = vshrl.u32 %v6387_v27, 16 }
 0x936   : > { %v3481_v10 = vcombine.low %v3458_v49, %v3473_v45  ;;  %v3482_v11 = vcombine.high %v3458_v49, %v3473_v45  ;;  %v2959_v60 = vrot.slane %v2952_v55, %v5966_v28  ;;  %v3583_v61 = vshrl.u32 %v6406_v50, 16 }
 0x937   : > { %v3591_v63 = vshrl.u32 %v6391_v15, 16  ;;  %v3497_v0 = vcombine.low %v3465_v52, %v3480_v62  ;;  %v3498_v2 = vcombine.high %v3465_v52, %v3480_v62  ;;  %v3599_v35 = vshrl.u32 %v3450_v57, 16 }
 0x938   : > { %v3489_v25 = vrot.slane %v3481_v10, %v5966_v28  ;;  %v3496_v9 = vrot.slane %v3482_v11, %v5966_v28  ;;  %v2963_v26 = vpack.i.b16 %v2959_v60, %v6422_v20  ;;  %v2964_v33 = vshrl.u32 %v6422_v20, 16 }
 0x939   : > { %v3505_v31 = vrot.slane %v3497_v0, %v5966_v28  ;;  %v3512_v32 = vrot.slane %v3498_v2, %v5966_v28  ;;  %v2965_v13 = vshrl.u32 %v2959_v60, 16 }
 0x93a   : > { %v3513_v36 = vcombine.high %v3489_v25, %v5709_v41  ;;  %v3514_v39 = vcombine.high %v3496_v9, %v5709_v41  ;;  %v3541_v40 = vpack.i.b16 %v3489_v25, %v6381_v21  ;;  %v3544_v42 = vshrl.u32 %v3489_v25, 16  ;;  %5406 = vmatmul.mubr.msk.bf16.vlgmr.msra.gmra.mrb[24].mxu1 %vm1976_vm2, %v2963_v26 }
 0x93b   : > { %v3515_v30 = vcombine.high %v3505_v31, %v5709_v41  ;;  %v3516_v43 = vcombine.high %v3512_v32, %v5709_v41  ;;  %v3557_v16 = vpack.i.b16 %v3496_v9, %v6384_v22  ;;  %v3560_v18 = vshrl.u32 %v3496_v9, 16  ;;  %5418 = vmatpush3.bf16.xpose.msra.mxu1 %v3867_v54  ;;  %5421 = vmatprep.mubr.msk.bf16.mxu1 %vm5702_vm0, %v5701_v1 }
 0x93c   : > { %v3545_v14 = vpack.i.b16 %v3544_v42, %v3543_v51  ;;  %v3549_v37 = vpack.i.b16 %v3513_v36, %v6395_v5  ;;  %v3552_v17 = vshrl.u32 %v3513_v36, 16  ;;  %v3565_v21 = vpack.i.b16 %v3514_v39, %v6399_v4  ;;  %5419 = vmatprep.subr.bf16.mxu1 %v5701_v1 }
 0x93d   : > { %v3561_v46 = vpack.i.b16 %v3560_v18, %v3559_v34  ;;  %v3568_v47 = vshrl.u32 %v3514_v39, 16  ;;  %v3573_v23 = vpack.i.b16 %v3505_v31, %v6387_v27  ;;  %v3576_v48 = vshrl.u32 %v3505_v31, 16 }
 0x93e   : > { %v3553_v49 = vpack.i.b16 %v3552_v17, %v3551_v58  ;;  %v3581_v22 = vpack.i.b16 %v3515_v30, %v6406_v50  ;;  %v3584_v52 = vshrl.u32 %v3515_v30, 16  ;;  %v3589_v54 = vpack.i.b16 %v3512_v32, %v6391_v15 }
 0x93f   : > { %v3569_v55 = vpack.i.b16 %v3568_v47, %v3567_v53  ;;  %v3577_v51 = vpack.i.b16 %v3576_v48, %v3575_v7  ;;  %v3592_v45 = vshrl.u32 %v3512_v32, 16  ;;  %v3597_v5 = vpack.i.b16 %v3516_v43, %v3450_v57 }
 0x940   : > { %v3585_v62 = vpack.i.b16 %v3584_v52, %v3583_v61  ;;  %v3600_v10 = vshrl.u32 %v3516_v43, 16  ;;  %v3615_v4 = vcombine.low %v3541_v40, %v3557_v16  ;;  %v3623_v11 = vcombine.low %v3549_v37, %v3565_v21 }
 0x941   : > { %v3593_v0 = vpack.i.b16 %v3592_v45, %v3591_v63  ;;  %v3631_v34 = vcombine.low %v3573_v23, %v3589_v54  ;;  %v3639_v2 = vcombine.low %v3581_v22, %v3597_v5  ;;  %v3665_v25 = vcombine.low %v3545_v14, %v3561_v46 }
 0x942   : > { %v3601_v27 = vpack.i.b16 %v3600_v10, %v3599_v35  ;;  %v3673_v9 = vcombine.low %v3553_v49, %v3569_v55  ;;  %v2966_v58 = vpack.i.b16 %v2965_v13, %v2964_v33  ;;  %v3870_v15 = vsel %vm1976_vm2, %v3361_v6, 0 }
 0x943   : > { %v3622_v50 = vrot.slane %v3615_v4, %v5963_v24  ;;  %v3681_v53 = vcombine.low %v3577_v51, %v3593_v0  ;;  %5420 = vmatpush3.bf16.xpose.msra.mxu1 %v3870_v15  ;;  %v2960_v57 = vcombine.high %v2959_v60, %v5709_v41  ;;  %v3630_v7 = vrot.slane %v3623_v11, %v5963_v24 }
 0x944   : > { %5414 = vmatmul.mubr.msk.bf16.vlgmr.msra.gmra.mrb[28].mxu0 %vm1976_vm2, %v2966_v58  ;;  %v3916_v61 = vsel %vm1976_vm2, %v6343_v19, 0  ;;  %5433 = vmatprep.subr.bf16.mxu1 %v5701_v1  ;;  %v3638_v63 = vrot.slane %v3631_v34, %v5963_v24  ;;  %v3646_v59 = vrot.slane %v3639_v2, %v5963_v24  ;;  %v3680_v3 = vrot.slane %v3673_v9, %v5963_v24 }
 0x945   : > { %5426 = vmatpush3.bf16.xpose.msra.mxu0 %v3916_v61  ;;  %5429 = vmatprep.mubr.msk.bf16.mxu0 %vm5702_vm0, %v5701_v1  ;;  %v3647_v6 = vcombine.low %v3622_v50, %v3630_v7  ;;  %v3672_v60 = vrot.slane %v3665_v25, %v5963_v24  ;;  %v3689_v35 = vcombine.low %v3585_v62, %v3601_v27  ;;  %v3919_v16 = vsel %vm1976_vm2, %v6333_v8, 0 }
 0x946   : > { %5427 = vmatprep.subr.bf16.mxu0 %v5701_v1  ;;  %v2935_v19 = vcombine.high %v6422_v20, %v5709_v41  ;;  %v3655_v26 = vcombine.low %v3638_v63, %v3646_v59  ;;  %v3688_v31 = vrot.slane %v3681_v53, %v5963_v24  ;;  %v2971_v37 = vshrl.u32 %v2960_v57, 16 }
 0x947   : > { %v3696_v32 = vrot.slane %v3689_v35, %v5963_v24  ;;  %v3697_v33 = vcombine.low %v3672_v60, %v3680_v3  ;;  %v3654_v36 = vrot.slane %v3647_v6, %v5966_v28 }
 0x948   : > { %v2969_v13 = vpack.i.b16 %v2960_v57, %v2935_v19  ;;  %v3662_v39 = vrot.slane %v3655_v26, %v5966_v28  ;;  %v2970_v49 = vshrl.u32 %v2935_v19, 16 }
 0x949   : > { %v3705_v40 = vcombine.low %v3688_v31, %v3696_v32  ;;  %v3704_v43 = vrot.slane %v3697_v33, %v5966_v28 }
 0x94a   : > { %5422 = vmatmul.mubr.msk.bf16.vlgmr.msra.gmra.mrb[28].mxu1 %vm1976_vm2, %v2969_v13  ;;  %v3663_v42 = vcombine.low %v3654_v36, %v3662_v39  ;;  %v6474_v30 = vcombine.high %v3654_v36, %v3662_v39  ;;  %v2972_v52 = vpack.i.b16 %v2971_v37, %v2970_v49 }
 0x94b   : > { %v3712_v20 = vrot.slane %v3705_v40, %v5966_v28  ;;  %5437 = vmatprep.mubr.msk.bf16.mxu1 %vm5702_vm0, %v5701_v1 }
 0x94c   : > { %v3741_v17 = vshrl.u32 %v3663_v42, 16  ;;  %v3749_v21 = vshrl.u32 %v6474_v30, 16 }
 0x94d   : > { %5428 = vmatpush3.bf16.xpose.msra.mxu0 %v3919_v16  ;;  %v3713_v18 = vcombine.low %v3704_v43, %v3712_v20  ;;  %v6482_v14 = vcombine.high %v3704_v43, %v3712_v20 }
 0x94e   : > { %5441 = vmatprep.subr.bf16.mxu0 %v5701_v1 }
 0x94f   : > { %v3739_v46 = vpack.i.b16 %v3713_v18, %v3663_v42  ;;  %v3742_v47 = vshrl.u32 %v3713_v18, 16  ;;  %v3747_v23 = vpack.i.b16 %v6482_v14, %v6474_v30  ;;  %v3750_v48 = vshrl.u32 %v6482_v14, 16 }
 0x951   : > { %5434 = vmatpush3.bf16.msra.mxu1 %v3739_v46  ;;  %v3743_v8 = vpack.i.b16 %v3742_v47, %v3741_v17  ;;  %v6489_v22 = vpack.i.b16 %v3750_v48, %v3749_v21 }
 0x952   : > { %5435 = vmatprep.subr.bf16.mxu1 %v5701_v1 }
 0x954   : > { %5430 = vmatmul.mubr.msk.bf16.vlgmr.msra.gmra.mrb[32].mxu0 %vm1976_vm2, %v2972_v52 }
 0x955   : > { %5442 = vmatpush3.bf16.msra.mxu0 %v3743_v8  ;;  %5445 = vmatprep.mubr.msk.bf16.mxu0 %vm5702_vm0, %v5701_v1 }
 0x956   : > { %5443 = vmatprep.subr.bf16.mxu0 %v5701_v1 }
 0xa0d   : > { %v3808_v54 = vpop.f32.mrb[24].mxu1 }
 0xa0e   : > { %v3961_v55 = vmul.f32 0.35355338, %v3808_v54  ;;  %v5407_v51 = vpop.f32.mrb[25].mxu1 }
 0xa0f   : > { %v3811_v45 = vpop.f32.mrb[26].mxu1 }
 0xa10   : > { %v5408_v5 = vpop.f32.mrb[27].mxu1  ;;  %v3966_v62 = vsel %vm3965_vm6, %v3961_v55, -inf }
 0xa11   : > { %3967 = vmax.xlane.f32.xlu0 %v3966_v62 }
 0xa17   : > { %v3857_v10 = vpop.f32.mrb[28].mxu0 }
 0xa18   : > { %v3962_v4 = vmul.f32 0.35355338, %v3857_v10  ;;  %v5415_v11 = vpop.f32.mrb[29].mxu0 }
 0xa19   : > { %v3860_v0 = vpop.f32.mrb[30].mxu0 }
 0xa1a   : > { %v5416_v34 = vpop.f32.mrb[31].mxu0  ;;  %v3969_v2 = vsel %vm3965_vm6, %v3962_v4, -inf }
 0xa1b   : > { %3970 = vmax.xlane.f32.xlu1 %v3969_v2 }
 0xa1d   : > { %v3906_v25 = vpop.f32.mrb[28].mxu1 }
 0xa1e   : > { %v3963_v27 = vmul.f32 0.35355338, %v3906_v25  ;;  %v5423_v9 = vpop.f32.mrb[29].mxu1 }
 0xa1f   : > { %v3909_v58 = vpop.f32.mrb[30].mxu1 }
 0xa20   : > { %v5424_v15 = vpop.f32.mrb[31].mxu1  ;;  %v3972_v50 = vsel %vm3965_vm6, %v3963_v27, -inf }
 0xa21   : > { %3973 = vmax.xlane.f32.xlu0 %v3972_v50 }
 0xa27   : > { %v3955_v53 = vpop.f32.mrb[32].mxu0 }
 0xa28   : > { %v3964_v57 = vmul.f32 0.35355338, %v3955_v53  ;;  %v5431_v7 = vpop.f32.mrb[33].mxu0 }
 0xa29   : > { %v3958_v61 = vpop.f32.mrb[34].mxu0 }
 0xa2a   : > { %v5432_v63 = vpop.f32.mrb[35].mxu0  ;;  %v3975_v59 = vsel %vm3965_vm6, %v3964_v57, -inf }
 0xa2b   : > { %3976 = vmax.xlane.f32.xlu0 %v3975_v59 }
 0xa2c   : > { %3371 = vrot.lane.b32.xlu1 %v6257_v56, %s6793_s9 }
 0xa41   : > { %3367 = vrot.lane.b32.xlu0 %v6207_v38, %s6793_s9 }
 0xa9e   : > { %v3968_v3 = vpop.xlane.xlu0 %3967 }
 0xa9f   : > { %v3978_v6 = vsub.f32 %v3961_v55, %v3968_v3 }
 0xaa1   : > { %v3982_v60 = vmul.f32 1.442695, %v3978_v6 }
 0xaa3   : > { %5599 = vpow2.f32 %v3982_v60 }
 0xaa8   : > { %v3971_v35 = vpop.xlane.xlu1 %3970 }
 0xaa9   : > { %v3979_v19 = vsub.f32 %v3962_v4, %v3971_v35 }
 0xaab   : > { %v3984_v26 = vmul.f32 1.442695, %v3979_v19 }
 0xaac   : > { %v3372_v37 = vpop.permute.xlu1 %3371 }
 0xaad   : > { %v5600_v31 = vpop.eup %5599  ;;  %5601 = vpow2.f32 %v3984_v26 }
 0xaae   : > { %v3990_v32 = vsel %vm3965_vm6, %v5600_v31, 0.0  ;;  %v3974_v38 = vpop.xlane.xlu0 %3973 }
 0xaaf   : > { %3991 = vadd.xlane.f32.xlu0 %v3990_v32  ;;  %v3980_v56 = vsub.f32 %v3963_v27, %v3974_v38 }
 0xab1   : > { %v3986_v36 = vmul.f32 1.442695, %v3980_v56 }
 0xab3   : > { %5603 = vpow2.f32 %v3986_v36 }
 0xab7   : > { %v5602_v33 = vpop.eup %5601 }
 0xab8   : > { %v3993_v13 = vsel %vm3965_vm6, %v5602_v33, 0.0  ;;  %v3977_v39 = vpop.xlane.xlu0 %3976 }
 0xab9   : > { %3994 = vadd.xlane.f32.xlu1 %v3993_v13  ;;  %v3981_v40 = vsub.f32 %v3964_v57, %v3977_v39 }
 0xabb   : > { %v3988_v42 = vmul.f32 1.442695, %v3981_v40 }
 0xabd   : > { %v6510_v43 = vpop.eup %5603  ;;  %5605 = vpow2.f32 %v3988_v42 }
 0xabe   : > { %v3996_v20 = vsel %vm3965_vm6, %v6510_v43, 0.0 }
 0xac5   : > { %3375 = vrot.lane.b32.xlu0 %v6279_v12, %s6793_s9 }
 0xac7   : > { %v6514_v16 = vpop.eup %5605 }
 0xac8   : > { %v3999_v12 = vsel %vm3965_vm6, %v6514_v16, 0.0 }
 0xaca   : > { %3379 = vrot.lane.b32.xlu1 %v6282_v29, %s6793_s9  ;;  %v3368_v29 = vpop.permute.xlu0 %3367  ;;  %s5621_s9 = scalar_lea.vmem %s4688_s1, 64 }
 0xacb   : > { %p5622_p12 = scmp.ne.s32.totalorder %s4688_s1, %s5621_s9  ;;  %p5629_p2 = scmp.lt.s32.totalorder %s5627_s11, %s5621_s9 }
 0xacd   : > { %p5623_p13 = pnand %p5622_p12, %p5899_p4  ;;  %p5630_p3 = por %p5629_p2, %p5628_p1 }
 0xacf   : > { %p5624_p0 = pneg %p5623_p13 }
 0xad1   : > { %p5631_p5 = pnand %p5630_p3, %p5624_p0 }
 0xae4   : > { %3997 = vadd.xlane.f32.xlu0 %v3996_v20 }
 0xaee   : > { %4000 = vadd.xlane.f32.xlu1 %v3999_v12 }
 0xb3c   : > { %v3992_v18 = vpop.xlane.xlu0 %3991 }
 0xb3d   : > { %5607 = vrcp.f32 %v3992_v18 }
 0xb40   : > { %v3376_v17 = vpop.permute.xlu0 %3375 }
 0xb41   : > { %v3519_v21 = vcombine.low %v3368_v29, %v3376_v17 }
 0xb43   : > { %v3526_v47 = vrot.slane %v3519_v21, %v5966_v28 }
 0xb45   : > { %v3527_v8 = vcombine.high %v3526_v47, %v5709_v41  ;;  %v3606_v51 = vshrl.u32 %v3526_v47, 16 }
 0xb46   : > { %v3995_v46 = vpop.xlane.xlu1 %3994 }
 0xb47   : > { %5609 = vrcp.f32 %v3995_v46  ;;  %v3612_v45 = vshrl.u32 %v3527_v8, 16  ;;  %v5608_v34 = vpop.eup %5607 }
 0xb48   : > { %v4006_v58 = vmul.f32 %v5608_v34, %v5600_v31 }
 0xb4a   : > { %v3380_v48 = vpop.permute.xlu1 %3379  ;;  %v4010_v6 = vpack.c.bf16 %v4006_v58, %v4006_v58 }
 0xb4b   : > { %v3530_v49 = vcombine.low %v3372_v37, %v3380_v48 }
 0xb4d   : > { %v3537_v52 = vrot.slane %v3530_v49, %v5966_v28 }
 0xb4f   : > { %v3538_v54 = vcombine.high %v3537_v52, %v5709_v41  ;;  %v3607_v55 = vshrl.u32 %v3537_v52, 16  ;;  %v3605_v5 = vpack.i.b16 %v3537_v52, %v3526_v47 }
 0xb51   : > { %v3611_v62 = vpack.i.b16 %v3538_v54, %v3527_v8  ;;  %v3613_v10 = vshrl.u32 %v3538_v54, 16  ;;  %v3608_v4 = vpack.i.b16 %v3607_v55, %v3606_v51  ;;  %v5610_v9 = vpop.eup %5609 }
 0xb52   : > { %v4007_v7 = vmul.f32 %v5610_v9, %v5602_v33 }
 0xb53   : > { %v3614_v11 = vpack.i.b16 %v3613_v10, %v3612_v45  ;;  %v3717_v0 = vcombine.low %v3605_v5, %v3611_v62 }
 0xb54   : > { %v4011_v35 = vpack.c.bf16 %v4007_v7, %v4007_v7 }
 0xb55   : > { %v3728_v2 = vcombine.low %v3608_v4, %v3614_v11  ;;  %v3724_v25 = vrot.slane %v3717_v0, %v5966_v28  ;;  %v5573_v0 = vld [vmem:[%s6711_s15] sm:$0xff]  }
 0xb57   : > { %v3735_v27 = vrot.slane %v3728_v2, %v5966_v28  ;;  %v3756_v50 = vshrl.u32 %v3724_v25, 16  ;;  %v3725_v59 = vcombine.high %v3724_v25, %v5709_v41 }
 0xb59   : > { %v3755_v15 = vpack.i.b16 %v3735_v27, %v3724_v25  ;;  %v3757_v53 = vshrl.u32 %v3735_v27, 16  ;;  %v3736_v57 = vcombine.high %v3735_v27, %v5709_v41  ;;  %v3762_v26 = vshrl.u32 %v3725_v59, 16 }
 0xb5b   : > { %v4019_v61 = vsel %vm4017_vm7, %v3755_v15, 0  ;;  %v3758_v63 = vpack.i.b16 %v3757_v53, %v3756_v50  ;;  %v3763_v60 = vshrl.u32 %v3736_v57, 16  ;;  %v3761_v19 = vpack.i.b16 %v3736_v57, %v3725_v59  ;;  %v5574_v53 = vld [vmem:[%s6711_s15 + $0x8] sm:$0xff]  }
 0xb5c   : > { %5436 = vmatpush3.bf16.msra.mxu1 %v4019_v61 }
 0xb5d   : > { %v4065_v3 = vsel %vm4017_vm7, %v3758_v63, 0  ;;  %5449 = vmatprep.subr.bf16.mxu1 %v5701_v1  ;;  %v3764_v41 = vpack.i.b16 %v3763_v60, %v3762_v26  ;;  %v4111_v31 = vsel %vm4017_vm7, %v3761_v19, 0 }
 0xb5e   : > { %5444 = vmatpush3.bf16.msra.mxu0 %v4065_v3 }
 0xb5f   : > { %5438 = vmatmul.mubr.msk.bf16.vlgmr.msra.gmra.mrb[32].mxu1 %vm3965_vm6, %v4010_v6  ;;  %5457 = vmatprep.subr.bf16.mxu0 %v5701_v1  ;;  %v4157_v30 = vsel %vm4017_vm7, %v3764_v41, 0 }
 0xb60   : > { %5450 = vmatpush3.bf16.msra.mxu1 %v3747_v23  ;;  %5453 = vmatprep.mubr.msk.bf16.mxu1 %vm5702_vm0, %v5701_v1 }
 0xb61   : > { %5446 = vmatmul.mubr.msk.bf16.vlgmr.msra.gmra.mrb[36].mxu0 %vm3965_vm6, %v4011_v35  ;;  %5451 = vmatprep.subr.bf16.mxu1 %v5701_v1 }
 0xb62   : > { %5458 = vmatpush3.bf16.msra.mxu0 %v6489_v22  ;;  %5461 = vmatprep.mubr.msk.bf16.mxu0 %vm5702_vm0, %v5701_v1 }
 0xb63   : > { %5459 = vmatprep.subr.bf16.mxu0 %v5701_v1 }
 0xb64   : > { %5452 = vmatpush3.bf16.msra.mxu1 %v4111_v31 }
 0xb65   : > { %5465 = vmatprep.subr.bf16.mxu1 %v5701_v1 }
 0xb66   : > { %5460 = vmatpush3.bf16.msra.mxu0 %v4157_v30 }
 0xb67   : > { %5473 = vmatprep.subr.bf16.mxu0 %v5701_v1 }
 0xb71   : > { %v3998_v14 = vpop.xlane.xlu0 %3997 }
 0xb72   : > { %5611 = vrcp.f32 %v3998_v14 }
 0xb7b   : > { %v4001_v23 = vpop.xlane.xlu1 %4000 }
 0xb7c   : > { %v5612_v32 = vpop.eup %5611  ;;  %5613 = vrcp.f32 %v4001_v23 }
 0xb7d   : > { %v4008_v22 = vmul.f32 %v5612_v32, %v6510_v43 }
 0xb7f   : > { %v4012_v33 = vpack.c.bf16 %v4008_v22, %v4008_v22 }
 0xb81   : > { %5454 = vmatmul.mubr.msk.bf16.vlgmr.msra.gmra.mrb[36].mxu1 %vm3965_vm6, %v4012_v33 }
 0xb82   : > { %5469 = vmatprep.mubr.msk.bf16.mxu1 %vm5702_vm0, %v5701_v1  ;;  %5466 = vmatpush3.bf16.msra.mxu1 %v5573_v0 }
 0xb83   : > { %5467 = vmatprep.subr.bf16.mxu1 %v5701_v1 }
 0xb86   : > { %v5614_v13 = vpop.eup %5613  ;;  %5468 = vmatpush3.bf16.msra.mxu1 %v5574_v53 }
 0xb87   : > { %v4009_v38 = vmul.f32 %v5614_v13, %v6514_v16  ;;  %5481 = vmatprep.subr.bf16.mxu1 %v5701_v1 }
 0xb89   : > { %v4013_v56 = vpack.c.bf16 %v4009_v38, %v4009_v38 }
 0xb8b   : > { %5462 = vmatmul.mubr.msk.bf16.vlgmr.msra.gmra.mrb[40].mxu0 %vm3965_vm6, %v4013_v56  ;;  %v5222_v56 = vld [vmem:[%s6712_s16] ss:$0 sm:$0xff] }
 0xb8c   : > { %5477 = vmatprep.mubr.msk.bf16.mxu0 %vm5702_vm0, %v5701_v1 }
 0xc32   : > { %v4055_v36 = vpop.f32.mrb[32].mxu1 }
 0xc33   : > { %v5439_v39 = vpop.f32.mrb[33].mxu1 }
 0xc34   : > { %v4058_v40 = vpop.f32.mrb[34].mxu1  ;;  %v4101_v42 = vpop.f32.mrb[36].mxu0 }
 0xc35   : > { %v5440_v43 = vpop.f32.mrb[35].mxu1  ;;  %v5447_v20 = vpop.f32.mrb[37].mxu0 }
 0xc36   : > { %v4104_v12 = vpop.f32.mrb[38].mxu0 }
 0xc37   : > { %v5448_v29 = vpop.f32.mrb[39].mxu0 }
 0xc54   : > { %v4147_v18 = vpop.f32.mrb[36].mxu1 }
 0xc55   : > { %v4199_v37 = vcombine.low %v4055_v36, %v4147_v18  ;;  %v4200_v17 = vcombine.high %v4055_v36, %v4147_v18  ;;  %v5455_v21 = vpop.f32.mrb[37].mxu1 }
 0xc56   : > { %v4150_v46 = vpop.f32.mrb[38].mxu1 }
 0xc57   : > { %v5456_v16 = vpop.f32.mrb[39].mxu1  ;;  %v4207_v54 = vrot.slane %v4199_v37, %v5963_v24  ;;  %v4214_v55 = vrot.slane %v4200_v17, %v5963_v24  ;;  %v5575_v46 = vld [vmem:[%s6715_s19] sm:$0xff]  }
 0xc58   : > { %5474 = vmatpush3.bf16.msra.mxu0 %v5575_v46  ;;  %v5576_v16 = vld [vmem:[%s6715_s19 + $0x8] sm:$0xff]  }
 0xc59   : > { %5475 = vmatprep.subr.bf16.mxu0 %v5701_v1 }
 0xc5c   : > { %5476 = vmatpush3.bf16.msra.mxu0 %v5576_v16 }
 0xc5e   : > { %v4193_v47 = vpop.f32.mrb[40].mxu0 }
 0xc5f   : > { %v4215_v48 = vcombine.low %v4101_v42, %v4193_v47  ;;  %v4216_v49 = vcombine.high %v4101_v42, %v4193_v47  ;;  %v5463_v8 = vpop.f32.mrb[41].mxu0  ;;  %v5578_v47 = vld [vmem:[%s6717_s21 + $0x8] sm:$0xff]  }
 0xc60   : > { %v4196_v52 = vpop.f32.mrb[42].mxu0 }
 0xc61   : > { %v4223_v51 = vrot.slane %v4215_v48, %v5963_v24  ;;  %v4230_v45 = vrot.slane %v4216_v49, %v5963_v24  ;;  %v5464_v5 = vpop.f32.mrb[43].mxu0 }
 0xc63   : > { %v4231_v62 = vcombine.low %v4207_v54, %v4223_v51  ;;  %v4232_v10 = vcombine.high %v4207_v54, %v4223_v51  ;;  %v4247_v4 = vcombine.low %v4214_v55, %v4230_v45  ;;  %v4248_v11 = vcombine.high %v4214_v55, %v4230_v45  ;;  %v5226_v54 = vld [vmem:[%s6713_s17] ss:$0 sm:$0xff] }
 0xc64   : > { %v5227_v51 = vld [vmem:[%s6714_s18] ss:$0 sm:$0xff] }
 0xc65   : > { %v4239_v34 = vrot.slane %v4231_v62, %v5966_v28  ;;  %v4246_v2 = vrot.slane %v4232_v10, %v5966_v28  ;;  %v4255_v25 = vrot.slane %v4247_v4, %v5966_v28  ;;  %v4262_v27 = vrot.slane %v4248_v11, %v5966_v28  ;;  %v5579_v10 = vld [vmem:[%s6717_s21 + $0x10] sm:$0xff]   ;;  %v5580_v4 = vld [vmem:[%s6717_s21 + $0x18] sm:$0xff]   ;;  %v5228_v11 = vld [vmem:[%s6716_s20] ss:$0 sm:$0xff] }
 0xc67   : > { %v4267_v9 = vcombine.low %v4239_v34, %v4246_v2  ;;  %v5220_v58 = vcombine.high %v4239_v34, %v4246_v2  ;;  %v4283_v15 = vcombine.low %v4255_v25, %v4262_v27  ;;  %v5221_v50 = vcombine.high %v4255_v25, %v4262_v27 }
 0xc69   : > { %v4274_v57 = vrot.slane %v4267_v9, %v5963_v24  ;;  %v4282_v7 = vrot.slane %v5220_v58, %v5963_v24  ;;  %v4290_v61 = vrot.slane %v4283_v15, %v5963_v24  ;;  %v4298_v63 = vrot.slane %v5221_v50, %v5963_v24 }
 0xc6b   : > { %v4300_v59 = vcombine.high %v4274_v57, %v4282_v7  ;;  %v4316_v3 = vcombine.high %v4290_v61, %v4298_v63  ;;  %v4299_v6 = vcombine.low %v4274_v57, %v4282_v7  ;;  %v4315_v60 = vcombine.low %v4290_v61, %v4298_v63 }
 0xc6d   : > { %v4314_v35 = vrot.slane %v4300_v59, %v5966_v28  ;;  %v4330_v19 = vrot.slane %v4316_v3, %v5966_v28  ;;  %v4307_v26 = vrot.slane %v4299_v6, %v5966_v28  ;;  %v4323_v41 = vrot.slane %v4315_v60, %v5966_v28 }
 0xc6f   : > { %v4333_v31 = vcombine.low %v4314_v35, %v4330_v19  ;;  %v4332_v30 = vcombine.high %v4307_v26, %v4323_v41  ;;  %v4334_v14 = vcombine.high %v4314_v35, %v4330_v19  ;;  %v4331_v23 = vcombine.low %v4307_v26, %v4323_v41 }
 0xc71   : > { %4340 = vrot.lane.b32.xlu1 %v4333_v31, %s6794_s8  ;;  %4336 = vrot.lane.b32.xlu0 %v4332_v30, %s6795_s6  ;;  %v5238_v30 = vld [vmem:[%s6719_s23] ss:$0 sm:$0xff] }
 0xc75   : > { %4344 = vrot.lane.b32.xlu0 %v4334_v14, %s6796_s7  ;;  %s6644_s7 = scalar_lea.hbm %s6723_s27, %s5243_s12 }
 0xce3   : > { %v4337_v24 = vpop.permute.xlu0 %4336  ;;  %v4341_v32 = vpop.permute.xlu1 %4340 }
 0xce4   : > { %v4347_v22 = vsel %vm1976_vm2, %v4331_v23, %v4337_v24  ;;  %v5239_v23 = vld [vmem:[%s6720_s24] ss:$0 sm:$0xff] }
 0xce5   : > { %v4348_v13 = vsel %vm2547_vm4, %v4347_v22, %v4341_v32 }
 0xce7   : > { %v4345_v33 = vpop.permute.xlu0 %4344 }
 0xce8   : > { %v4349_v38 = vsel %vm2549_vm5, %v4348_v13, %v4345_v33 }
 0xce9   : > { %v4354_v28 = vpack.c.bf16 %v4349_v38, %v4349_v38 }
 0xceb   : > { %5470 = vmatmul.mubr.msk.bf16.vlgmr.msra.gmra.mrb[40].mxu1 %vm1358_vm1, %v4354_v28 }
 0xcec   : > { %5489 = vmatprep.mubr.msk.bf16.mxu1 %vm5702_vm0, %v5701_v1 }
 0xdbe   : > { %v4411_v36 = vpop.f32.mrb[40].mxu1 }
 0xdbf   : > { %v4412_v39 = vadd.f32 %v5222_v56, %v4411_v36  ;;  %v5471_v40 = vpop.f32.mrb[41].mxu1 }
 0xdc0   : > { %v4414_v42 = vpop.f32.mrb[42].mxu1 }
 0xdc1   : > { %v5472_v43 = vpop.f32.mrb[43].mxu1  ;;  %v4417_v20 = vadd.f32 %v4412_v39, %v6227_v44  ;;  %v5577_v44 = vld [vmem:[%s6717_s21] sm:$0xff]  }
 0xdc2   : > { %5482 = vmatpush3.bf16.msra.mxu1 %v5577_v44 }
 0xdc3   : > { %v4420_v12 = vsel %vm1358_vm1, %v4417_v20, 0.0  ;;  %5483 = vmatprep.subr.bf16.mxu1 %v5701_v1 }
 0xdc4   : > { %4421 = vadd.xlane.f32.xlu1 %v4420_v12 }
 0xdc6   : > { %5484 = vmatpush3.bf16.msra.mxu1 %v5578_v47 }
 0xdc7   : > { %5485 = vmatprep.subr.bf16.mxu1 %v5701_v1 }
 0xdca   : > { %5486 = vmatpush3.bf16.msra.mxu1 %v5579_v10 }
 0xdcb   : > { %5487 = vmatprep.subr.bf16.mxu1 %v5701_v1  ;;  %v5232_v1 = vld [vmem:[%s6718_s22] ss:$0 sm:$0xff] }
 0xdce   : > { %5488 = vmatpush3.bf16.msra.mxu1 %v5580_v4 }
 0xe51   : > { %v4422_v29 = vpop.xlane.xlu1 %4421 }
 0xe52   : > { %v4423_v18 = vmul.f32 0.03125, %v4422_v29 }
 0xe54   : > { %v4424_v37 = vsub.f32 %v4417_v20, %v4423_v18 }
 0xe56   : > { %v4425_v17 = vmul.f32 %v4424_v37, %v4424_v37 }
 0xe58   : > { %v4426_v21 = vsel %vm1358_vm1, %v4425_v17, 0.0 }
 0xe59   : > { %4427 = vadd.xlane.f32.xlu0 %v4426_v21 }
 0xee6   : > { %v4428_v48 = vpop.xlane.xlu0 %4427 }
 0xee7   : > { %v4429_v49 = vmul.f32 0.03125, %v4428_v48 }
 0xee9   : > { %v4430_v8 = vadd.f32 1e-05, %v4429_v49 }
 0xeeb   : > { %5615 = vrsqrt.f32 %v4430_v8 }
 0xef5   : > { %v5616_v52 = vpop.eup %5615 }
 0xef6   : > { %v4432_v55 = vmul.f32 %v5616_v52, %v4424_v37 }
 0xef8   : > { %v4439_v45 = vmul.f32 %v5226_v54, %v4432_v55 }
 0xefa   : > { %v4446_v5 = vadd.f32 %v5227_v51, %v4439_v45 }
 0xefc   : > { %v4451_v62 = vpack.c.bf16 %v4446_v5, %v4446_v5 }
 0xefe   : > { %5478 = vmatmul.mubr.msk.bf16.vlgmr.msra.gmra.mrb[44].mxu0 %vm1358_vm1, %v4451_v62 }
 0xfd1   : > { %v4508_v0 = vpop.f32.mrb[44].mxu0 }
 0xfd2   : > { %v4509_v34 = vadd.f32 %v5228_v11, %v4508_v0  ;;  %v5479_v2 = vpop.f32.mrb[45].mxu0 }
 0xfd3   : > { %v4511_v25 = vpop.f32.mrb[46].mxu0 }
 0xfd4   : > { %v4514_v27 = vmax.f32 %v4509_v34, 0.0  ;;  %v5480_v9 = vpop.f32.mrb[47].mxu0 }
 0xfd6   : > { %v4523_v58 = vpack.c.bf16 %v4514_v27, %v4514_v27 }
 0xfd8   : > { %5490 = vmatmul.mubr.msk.bf16.vlgmr.msra.gmra.mrb[44].mxu1 %vm4555_vm8, %v4523_v58 }
0x10ab   : > { %v4593_v15 = vpop.f32.mrb[44].mxu1 }
0x10ac   : > { %v4594_v50 = vadd.f32 %v5232_v1, %v4593_v15  ;;  %v5491_v53 = vpop.f32.mrb[45].mxu1 }
0x10ad   : > { %v4596_v57 = vpop.f32.mrb[46].mxu1 }
0x10ae   : > { %v5492_v7 = vpop.f32.mrb[47].mxu1  ;;  %v4599_v61 = vadd.f32 %v4594_v50, %v4446_v5 }
0x10b0   : > { %v4602_v63 = vsel %vm1358_vm1, %v4599_v61, 0.0 }
0x10b1   : > { %4603 = vadd.xlane.f32.xlu0 %v4602_v63 }
0x113e   : > { %v4604_v59 = vpop.xlane.xlu0 %4603 }
0x113f   : > { %v4605_v3 = vmul.f32 0.03125, %v4604_v59 }
0x1141   : > { %v4606_v6 = vsub.f32 %v4599_v61, %v4605_v3 }
0x1143   : > { %v4607_v60 = vmul.f32 %v4606_v6, %v4606_v6 }
0x1145   : > { %v4608_v35 = vsel %vm1358_vm1, %v4607_v60, 0.0 }
0x1146   : > { %4609 = vadd.xlane.f32.xlu1 %v4608_v35 }
0x11d3   : > { %v4610_v19 = vpop.xlane.xlu1 %4609 }
0x11d4   : > { %v4611_v26 = vmul.f32 0.03125, %v4610_v19 }
0x11d6   : > { %v4612_v41 = vadd.f32 1e-05, %v4611_v26 }
0x11d8   : > { %5617 = vrsqrt.f32 %v4612_v41 }
0x11e2   : > { %v5618_v31 = vpop.eup %5617 }
0x11e3   : > { %v4614_v14 = vmul.f32 %v5618_v31, %v4606_v6 }
0x11e5   : > { %v4621_v24 = vmul.f32 %v5238_v30, %v4614_v14 }
0x11e7   : > { %v4628_v32 = vadd.f32 %v5239_v23, %v4621_v24 }
0x11e9   : > { %v4634_v22 = vsel %vm1358_vm1, %v4628_v32, 0.0  ;;  %v4629_v33 = vpack.c.bf16 %v4628_v32, %v4628_v32 }
0x11ea   : > { %4635 = vadd.xlane.f32.xlu0 %v4634_v22 }
0x11eb   : > { %4631 = vst.msk [vmem:[%s1197_s10] sm:$0xf] %vm4630_vm9, %v4629_v33 }
0x1277   : > { %v4636_v13 = vpop.xlane.xlu0 %4635 }
0x1278   : > { %v4637_v38 = vmul.f32 0.03125, %v4636_v13 }
0x127a   : > { %v4638_v28 = vsub.f32 %v4628_v32, %v4637_v38 }
0x127c   : > { %v4639_v56 = vmul.f32 %v4638_v28, %v4638_v28 }
0x127e   : > { %v4640_v36 = vsel %vm1358_vm1, %v4639_v56, 0.0 }
0x127f   : > { %4641 = vadd.xlane.f32.xlu1 %v4640_v36 }
0x1280   : > { %5634 = shalt.err (!%p5631_p5)
}
0x1281   : > { %s5635_s30 = scalar_lea.hbm %s6644_s7, 64  ;;  %s5639_s12 = scalar_lea.hbm %s6723_s27, 128 }
0x1282   : > { %p5636_p6 = scmp.ne.s32.totalorder %s6644_s7, %s5635_s30  ;;  %p5640_p10 = scmp.lt.u32.totalorder %s6644_s7, %s6723_s27 }
0x1283   : > { %p5641_p11 = scmp.lt.u32.totalorder %s5639_s12, %s5635_s30  ;;  %p5643_p13 = scmp.lt.u32.totalorder %s5635_s30, %s6644_s7 }
0x1284   : > { %p5637_p7 = pnand %p5636_p6, %p5899_p4 }
0x1285   : > { %p5642_p12 = por %p5641_p11, %p5640_p10 }
0x1286   : > { %p5638_p9 = pneg %p5637_p7 }
0x1287   : > { %p5644_p0 = por %p5643_p13, %p5642_p12 }
0x1289   : > { %p5645_p1 = pnand %p5644_p0, %p5638_p9 }
0x128b   : > { %5648 = shalt.err (!%p5645_p1)
}
0x128c   : > { %5494 = dma.vmem_to_hbm [thread:$0]  (%p5899_p4), %s4688_s1, 64, %s6644_s7, %s4664_s0   ;;  %v5240_v20 = vld [vmem:[%s6721_s25] ss:$0 sm:$0xff] }
0x128d   : > { %v5241_v29 = vld [vmem:[%s6722_s26] ss:$0 sm:$0xff]  ;;  %s6797_s4 = sld [smem:[#allocation25_spill]] }
0x1293   : > { %s1324_s7 = scalar_lea.vmem %s6797_s4, %s5932_s29 }
0x130c   : > { %v4642_v39 = vpop.xlane.xlu1 %4641 }
0x130d   : > { %v4643_v40 = vmul.f32 0.03125, %v4642_v39 }
0x130f   : > { %v4644_v42 = vadd.f32 1e-05, %v4643_v40 }
0x1311   : > { %5619 = vrsqrt.f32 %v4644_v42 }
0x131b   : > { %v5620_v43 = vpop.eup %5619 }
0x131c   : > { %v4646_v12 = vmul.f32 %v5620_v43, %v4638_v28 }
0x131e   : > { %v4653_v18 = vmul.f32 %v5240_v20, %v4646_v12 }
0x1320   : > { %v4660_v37 = vadd.f32 %v5241_v29, %v4653_v18 }
0x1322   : > { %v4661_v17 = vpack.c.bf16 %v4660_v37, %v4660_v37 }
0x1324   : > { %4662 = vst.msk [vmem:[%s1324_s7] sm:$0xf] %vm4630_vm9, %v4661_v17 }
0x1325 PF: > { %s6798_s1 = sld [smem:[#allocation8_spill]]  ;;  %s6799_s0 = sld [smem:[#allocation5_spill]] }
0x132b   : > { %p5500_p4 = scmp.ge.s32.totalorder %s6798_s1, 2  ;;  %s4702_s12 = sand.u32 1, %s6799_s0  }
0x132c   : > { %s4703_s8 = scalar_lea.sflag [#allocation3], %s4702_s12 }
0x132d   : > { %p5497_p2 = pnand %p5500_p4, %p5906_p8 }
0x132f   : > { %5674 = dma.done.wait (!%p5497_p2), %s4703_s8, 64  }
0x1330   : > { %5676 = vsyncadd (!%p5497_p2), %s4703_s8, 4294967232  ;;  %s42_s6 = sadd.s32 1, %s6798_s1   ;;  %s6801_s11 = sld [smem:[#allocation6_spill]] }
0x1331   : > { %p39_p3 = scmp.ge.s32.totalorder %s42_s6, 4   ;;  %s6802_s9 = sld [smem:[#allocation11_spill]] }
0x1332   : > { %s6803_s30 = sld [smem:[#allocation7_spill]]  ;;  %s6804_s3 = sld [smem:[#allocation9_spill]] }
0x1333   : > { %s6805_s8 = smov %s5683_s5  ;;  %41 = sbr.rel (!%p39_p3) target bundleno = 19 (0x13), region = 253 }
0x1336   : > { %s6806_s5 = smov %s6801_s11 }
0x133a   :  { %4719 = vsyncpa [#allocation3], 1 }
0x133b   :  { %4721 = vsyncpa [#allocation3 + $0x1], 1 }

</bundles_post_ra>
